<compile_context>
chip_gen: v7x
topology: tpu7x:2x2x1
jax: 0.10.0
libtpu: 0.0.40
codegen_flags: <defaults>
</compile_context>

<pallas_src>
import functools

import numpy as np
import jax
import jax.numpy as jnp
from jax import lax
from jax.experimental import pallas as pl
from jax.experimental.pallas import tpu as pltpu


def make_freq_bands(n_freqs: int = 10):
    # Matches PositionalEncoding.__init__: 2 ** torch.linspace(1, N_freqs - 1, N_freqs)
    a, b = 1.0, float(n_freqs - 1)
    return tuple(float(2.0 ** e) for e in np.linspace(a, b, n_freqs))


_CHUNK = 512                 # in-kernel row chunk (multiple of 8/16; ~256 KiB intermediates)
_MAX_BLOCK_ROWS = 12288      # keeps 2x(in+out) VMEM buffers ~24 MiB (fits every generation)
_FALLBACK_ELEMS = 8192       # below this, a pallas_call is pure launch/DMA overhead
_VMEM_LIMIT = 32 * 1024 * 1024


def _pe_kernel(x_ref, w_ref, ph_ref, o_ref, *, n_chunks, d_in):
    # x_ref : (block_rows, D)     input coordinates for this row-block
    # w_ref : (D, P*D)            column map: frequency (or 1.0) on matching d, else 0
    # ph_ref: (1, P*D)            phase: 0 for identity/sin columns, pi/2 for cos columns
    # o_ref : (block_rows, P*D)   output, already in torch.cat([v, sin, cos, ...]) order
    w = w_ref[...]                                               # hoisted out of the loop
    ph = ph_ref[...]
    out_cols = w.shape[1]
    cols = lax.broadcasted_iota(jnp.int32, (_CHUNK, out_cols), 1)
    passthrough = cols < d_in                                    # identity columns (j < D)

    def chunk(c, carry):
        r0 = pl.multiple_of(c * _CHUNK, _CHUNK)
        x = x_ref[pl.ds(r0, _CHUNK), :].astype(jnp.float32)      # (CHUNK, D), f32 compute
        # theta[:, p*D + d] = f_p * x[:, d]   (identity columns: 1.0 * x, phase 0)
        theta = jnp.dot(x, w, preferred_element_type=jnp.float32) + ph
        # cos(f x) == sin(f x + pi/2): one transcendental pass handles sin AND cos cols.
        out = jnp.where(passthrough, theta, jnp.sin(theta))
        o_ref[pl.ds(r0, _CHUNK), :] = out.astype(o_ref.dtype)
        return carry

    lax.fori_loop(0, n_chunks, chunk, 0)


def _positional_encoding_xla(v, freqs):
    # Plain-XLA path for tiny inputs (kernel launch would dominate).
    vf = v.astype(jnp.float32)
    parts = [vf]
    for f in freqs:
        fv = jnp.float32(f) * vf
        parts.append(jnp.sin(fv))
        parts.append(jnp.cos(fv))
    return jnp.concatenate(parts, axis=-1).astype(v.dtype)


def positional_encoding(v: jax.Array, freq_bands) -> jax.Array:
    """phi(v) = cat([v] + [sin(f*v), cos(f*v) for f in freq_bands], axis=-1).

    v: (B, D). Returns (B, D * (1 + 2 * N_freqs)) in the torch.cat column order.
    """
    B, D = v.shape
    freqs = np.asarray(freq_bands, dtype=np.float64)
    n_freqs = int(freqs.shape[0])
    out_cols = (1 + 2 * n_freqs) * D

    if B * D < _FALLBACK_ELEMS:                      # small-input fallback (perf review)
        return _positional_encoding_xla(v, freqs)

    # Column map W (D, P*D) and phase row (1, P*D):  theta = v @ W + phase gives
    #   theta[:, d]             = v[:, d]                        (identity columns)
    #   theta[:, (2i+1)*D + d]  = f_i * v[:, d]                  (sin columns)
    #   theta[:, (2i+2)*D + d]  = f_i * v[:, d] + pi/2           (cos columns)
    w_np = np.zeros((D, out_cols), dtype=np.float32)
    ph_np = np.zeros((1, out_cols), dtype=np.float32)
    rng = np.arange(D)
    w_np[rng, rng] = 1.0
    for i, f in enumerate(freqs):
        s0 = (2 * i + 1) * D
        c0 = (2 * i + 2) * D
        w_np[rng, s0 + rng] = np.float32(f)
        w_np[rng, c0 + rng] = np.float32(f)
        ph_np[0, c0:c0 + D] = np.float32(np.pi / 2.0)
    w = jnp.asarray(w_np)
    ph = jnp.asarray(ph_np)

    # Row-block sizing: as large as the VMEM budget allows, blocks balanced so the
    # masked tail of the final block wastes < _CHUNK rows of compute.
    num_blocks = pl.cdiv(B, _MAX_BLOCK_ROWS)
    block_rows = pl.cdiv(pl.cdiv(B, num_blocks), _CHUNK) * _CHUNK
    n_chunks = block_rows // _CHUNK
    grid = (pl.cdiv(B, block_rows),)

    itemsize = jnp.dtype(v.dtype).itemsize
    cost = pl.CostEstimate(
        flops=2 * B * D * out_cols,                  # the small per-row matmul
        transcendentals=B * out_cols,                # one sin per output element
        bytes_accessed=B * D * itemsize + B * out_cols * itemsize,
    )

    kernel = functools.partial(_pe_kernel, n_chunks=n_chunks, d_in=D)
    return pl.pallas_call(
        kernel,
        out_shape=jax.ShapeDtypeStruct((B, out_cols), v.dtype),
        grid=grid,
        in_specs=[
            pl.BlockSpec((block_rows, D), lambda i: (i, 0)),
            pl.BlockSpec((D, out_cols), lambda i: (0, 0)),
            pl.BlockSpec((1, out_cols), lambda i: (0, 0)),
        ],
        out_specs=pl.BlockSpec((block_rows, out_cols), lambda i: (i, 0)),
        compiler_params=pltpu.CompilerParams(
            dimension_semantics=("parallel",),       # megacore-shardable on v7x
            vmem_limit_bytes=_VMEM_LIMIT,            # safe on v5e/v6e/v7x
        ),
        cost_estimate=cost,
    )(v, w, ph)


def positional_encoding_ref(v, freq_bands):
    fb = jnp.asarray(np.asarray(freq_bands), dtype=jnp.float32)
    parts = [v]
    for i in range(fb.shape[0]):
        fv = fb[i] * v
        parts.append(jnp.sin(fv))
        parts.append(jnp.cos(fv))
    return jnp.concatenate(parts, axis=-1)


if __name__ == "__main__":
    i_dim, n_freqs = 3, 10                                  # PositionalEncoding(i_dim=3, N_freqs=10)
    out_dim = i_dim * (1 + 2 * n_freqs)
    freq_bands = make_freq_bands(n_freqs)                   # deterministic buffer, as in __init__

    # Small demo input (takes the small-input XLA fallback path).
    v = jax.random.normal(jax.random.PRNGKey(0), (8, i_dim), dtype=jnp.float32)
    out = jax.block_until_ready(positional_encoding(v, freq_bands))
    exp = positional_encoding_ref(v, freq_bands)
    assert out.shape == (8, out_dim), out.shape
    assert jnp.allclose(out, exp, atol=1e-5, rtol=1e-5), "mismatch vs reference (small)"

    # Kernel path: single row-block with a masked ragged tail (3000 % 512 != 0).
    # Tolerance note: max angle ~2^9*|x| stresses f32 range reduction, and cos is
    # computed as sin(theta + pi/2); both contribute a few 1e-4 of deviation vs
    # XLA's sin/cos at the largest frequency band -- expected, not a bug.
    v2 = jax.random.normal(jax.random.PRNGKey(1), (3000, i_dim), dtype=jnp.float32)
    out2 = jax.block_until_ready(positional_encoding(v2, freq_bands))
    exp2 = positional_encoding_ref(v2, freq_bands)
    assert out2.shape == (3000, out_dim), out2.shape
    assert jnp.allclose(out2, exp2, atol=1e-3, rtol=1e-3), "mismatch vs reference (1 block)"

    # Kernel path: multi-block grid (2 row-blocks) + boundary masking on the last block.
    v3 = jax.random.normal(jax.random.PRNGKey(2), (20000, i_dim), dtype=jnp.float32)
    out3 = jax.block_until_ready(positional_encoding(v3, freq_bands))
    exp3 = positional_encoding_ref(v3, freq_bands)
    assert out3.shape == (20000, out_dim), out3.shape
    assert jnp.allclose(out3, exp3, atol=1e-3, rtol=1e-3), "mismatch vs reference (2 blocks)"

    print("KERNEL_OK")
</pallas_src>

<mosaic_0001>
module attributes {stable_mosaic.version = 11 : i64} {
  func.func @_pe_kernel(%arg0: i32, %arg1: memref<3072x3xf32, #tpu.memory_space<vmem>>, %arg2: memref<3x63xf32, #tpu.memory_space<vmem>>, %arg3: memref<1x63xf32, #tpu.memory_space<vmem>>, %arg4: memref<3072x63xf32, #tpu.memory_space<vmem>>) attributes {dimension_semantics = [#tpu.dimension_semantics<parallel>], iteration_bounds = array<i64: 1>, scalar_prefetch = 0 : i64, scratch_operands = 0 : i64, tpu.core_type = #tpu.core_type<tc>, window_params = [{transform_indices = @transform_0, window_bounds = array<i64: 3072, 3>}, {pipeline_mode = #tpu.pipeline_mode<synchronous>, transform_indices = @transform_1, window_bounds = array<i64: 3, 63>}, {pipeline_mode = #tpu.pipeline_mode<synchronous>, transform_indices = @transform_2, window_bounds = array<i64: 1, 63>}, {transform_indices = @transform_3, window_bounds = array<i64: 3072, 63>}]} {
    %c0 = arith.constant 0 : index
    %c0_0 = arith.constant 0 : index
    %0 = vector.load %arg2[%c0, %c0_0] : memref<3x63xf32, #tpu.memory_space<vmem>>, vector<3x63xf32>
    %c0_1 = arith.constant 0 : index
    %c0_2 = arith.constant 0 : index
    %1 = vector.load %arg3[%c0_1, %c0_2] : memref<1x63xf32, #tpu.memory_space<vmem>>, vector<1x63xf32>
    %2 = tpu.iota {dimensions = array<i32: 1>} : vector<512x63xi32>
    %c3_i32 = arith.constant 3 : i32
    %3 = vector.broadcast %c3_i32 : i32 to vector<512x63xi32>
    %4 = arith.cmpi slt, %2, %3 : vector<512x63xi32>
    %c0_i32 = arith.constant 0 : i32
    %c6_i32 = arith.constant 6 : i32
    %5 = arith.addi %c0_i32, %c6_i32 : i32
    %c1_i32 = arith.constant 1 : i32
    scf.for %arg5 = %c0_i32 to %5 step %c1_i32  : i32 {
      %c512_i32 = arith.constant 512 : i32
      %6 = arith.muli %arg5, %c512_i32 : i32
      %7 = tpu.assume_multiple %6, 512 : i32
      %8 = arith.index_cast %7 : i32 to index
      %c0_4 = arith.constant 0 : index
      %9 = vector.load %arg1[%8, %c0_4] : memref<3072x3xf32, #tpu.memory_space<vmem>>, vector<512x3xf32>
      %cst = arith.constant dense<0.000000e+00> : vector<512x63xf32>
      %10 = tpu.matmul %9, %0, %cst {dimension_numbers = #tpu.dot_dimension_numbers<[1], [0], [0], [1], [0, 0, 1, 1], [], []>} : vector<512x3xf32>, vector<3x63xf32>, vector<512x63xf32> -> vector<512x63xf32>
      %11 = vector.broadcast %1 : vector<1x63xf32> to vector<512x63xf32>
      %12 = arith.addf %10, %11 : vector<512x63xf32>
      %13 = math.sin %12 : vector<512x63xf32>
      %14 = arith.select %4, %12, %13 : vector<512x63xi1>, vector<512x63xf32>
      %15 = arith.index_cast %7 : i32 to index
      %c0_5 = arith.constant 0 : index
      %16 = vector.load %arg4[%15, %c0_5] : memref<3072x63xf32, #tpu.memory_space<vmem>>, vector<512x63xf32>
      tpu.vector_store %arg4[%15, %c0_5], %14 {strides = array<i32>} : memref<3072x63xf32, #tpu.memory_space<vmem>>, vector<512x63xf32>,
    }
    %c6_i32_3 = arith.constant 6 : i32
    return
  }
  func.func @transform_0(%arg0: i32) -> (i32, i32) {
    %c0_i32 = arith.constant 0 : i32
    %c0_i32_0 = arith.constant 0 : i32
    return %arg0, %c0_i32 : i32, i32
  }
  func.func @transform_1(%arg0: i32) -> (i32, i32) {
    %c0_i32 = arith.constant 0 : i32
    %c0_i32_0 = arith.constant 0 : i32
    %c0_i32_1 = arith.constant 0 : i32
    return %c0_i32, %c0_i32_0 : i32, i32
  }
  func.func @transform_2(%arg0: i32) -> (i32, i32) {
    %c0_i32 = arith.constant 0 : i32
    %c0_i32_0 = arith.constant 0 : i32
    %c0_i32_1 = arith.constant 0 : i32
    return %c0_i32, %c0_i32_0 : i32, i32
  }
  func.func @transform_3(%arg0: i32) -> (i32, i32) {
    %c0_i32 = arith.constant 0 : i32
    %c0_i32_0 = arith.constant 0 : i32
    return %arg0, %c0_i32 : i32, i32
  }
}

</mosaic_0001>

<bundles_post_ra>
// kernel: tpu_custom_call.1
= control target key start
LH: loop header
LB: loop body
LE: loop exit
PB: predicated region body
PF: predicated region fallthrough
CT: control target
= control target key end

     0   :  { %v16_v2 = vlaneseq  ;;  %s10071_s16 = smov 0   ;;  %s16784_s0 = inlined_call_operand.vmem [shape: f32[3000,3], index: 0, kind: input, shape index: {}]   ;;  %s16785_s1 = inlined_call_operand.vmem [shape: f32[3,63], index: 1, kind: input, shape index: {}]   ;;  %s16786_s2 = inlined_call_operand.vmem [shape: f32[1,63], index: 2, kind: input, shape index: {}]   ;;  %s16787_s3 = inlined_call_operand.vmem [shape: f32[3000,63], index: 3, kind: output, shape index: {}]  }
   0x1   :  { %v10061_v0 = vld [vmem:[%s16785_s1] sm:$0x7] }
   0x2   :  { %v10066_v1 = vld [vmem:[%s16786_s2] ss:$0 sm:$0xff]  ;;  %v10068_v3 = vand.u32 127, %v16_v2 }
   0x4   :  { %vm18_vm0 = vcmp.lt.s32.totalorder %v10068_v3, 3 }
   0x5 LB: > { %vm290_vm1 = vcmask 1042432   ;;  %s9010_s1 = sshll.u32 %s10030_s16, 9  ;;  %vm97_vm2 = vcmask 23552   ;;  %s24_s16 = sadd.s32 1, %s10030_s16   ;;  %s10030_s16 = sphi %s10071_s16, %s24_s16  }
   0x6   : > { %9398 = vmatprep.subr.msk.mxu0 %vm290_vm1, %v10061_v0  ;;  %9496 = vmatprep.subr.msk.mxu1 %vm290_vm1, %v10061_v0  ;;  %s10086_s18 = scalar_lea.vmem %s16784_s0, %s9010_s1  ;;  %s10548_s19 = scalar_lea.vmem [#allocation2], %s9010_s1 }
   0x7   : > { %9399 = vmatpush3.msk.msra.mxu0 %vm290_vm1, %v10061_v0  ;;  %9497 = vmatpush3.msk.msra.mxu1 %vm290_vm1, %v10061_v0  ;;  %v27_v4 = vld [vmem:[%s10086_s18] sm:$0xff]  ;;  %v28_v6 = vld [vmem:[%s10086_s18 + $0x8] sm:$0xff]  ;;  %v29_v8 = vld [vmem:[%s10086_s18 + $0x10] sm:$0xff]  ;;  %p21_p0 = scmp.ge.s32.totalorder %s24_s16, 6  }
   0x8   : > { %v59_v5 = vld [vmem:[%s10086_s18 + $0x100] sm:$0xff]  ;;  %9400 = vmatprep.mubr.msk.f32.mxu0 %vm97_vm2, %v27_v4  ;;  %v60_v7 = vld [vmem:[%s10086_s18 + $0x108] sm:$0xff]  ;;  %v61_v9 = vld [vmem:[%s10086_s18 + $0x110] sm:$0xff] }
   0x9   : > { %9448 = vmatprep.mubr.msk.f32.mxu1 %vm97_vm2, %v59_v5  ;;  %9401 = vmatmul.mubr.msk.f32.vlgmr.msra.gmra.mrb[0].mxu0 %vm97_vm2, %v28_v6  ;;  %v30_v10 = vld [vmem:[%s10086_s18 + $0x18] sm:$0xff]  ;;  %v31_v12 = vld [vmem:[%s10086_s18 + $0x20] sm:$0xff]  ;;  %v32_v14 = vld [vmem:[%s10086_s18 + $0x28] sm:$0xff] }
   0xa   : > { %9449 = vmatmul.mubr.msk.f32.vlgmr.msra.gmra.mrb[0].mxu1 %vm97_vm2, %v60_v7  ;;  %9403 = vmatprep.mubr.msk.f32.mxu0 %vm97_vm2, %v29_v8  ;;  %v62_v11 = vld [vmem:[%s10086_s18 + $0x118] sm:$0xff]  ;;  %v63_v13 = vld [vmem:[%s10086_s18 + $0x120] sm:$0xff]  ;;  %v64_v15 = vld [vmem:[%s10086_s18 + $0x128] sm:$0xff] }
   0xb   : > { %9451 = vmatprep.mubr.msk.f32.mxu1 %vm97_vm2, %v61_v9  ;;  %v33_v16 = vld [vmem:[%s10086_s18 + $0x30] sm:$0xff]  ;;  %v34_v18 = vld [vmem:[%s10086_s18 + $0x38] sm:$0xff]  ;;  %v35_v20 = vld [vmem:[%s10086_s18 + $0x40] sm:$0xff] }
   0xc   : > { %v65_v17 = vld [vmem:[%s10086_s18 + $0x130] sm:$0xff]  ;;  %v66_v19 = vld [vmem:[%s10086_s18 + $0x138] sm:$0xff]  ;;  %v67_v21 = vld [vmem:[%s10086_s18 + $0x140] sm:$0xff] }
   0xd   : > { %9404 = vmatmul.mubr.msk.f32.gmra.mrb[2].mxu0 %vm97_vm2, %v30_v10  ;;  %v36_v22 = vld [vmem:[%s10086_s18 + $0x48] sm:$0xff]  ;;  %v37_v24 = vld [vmem:[%s10086_s18 + $0x50] sm:$0xff]  ;;  %v38_v26 = vld [vmem:[%s10086_s18 + $0x58] sm:$0xff] }
   0xe   : > { %9452 = vmatmul.mubr.msk.f32.gmra.mrb[2].mxu1 %vm97_vm2, %v62_v11  ;;  %9406 = vmatprep.mubr.msk.f32.mxu0 %vm97_vm2, %v31_v12  ;;  %v68_v23 = vld [vmem:[%s10086_s18 + $0x148] sm:$0xff]  ;;  %v69_v25 = vld [vmem:[%s10086_s18 + $0x150] sm:$0xff]  ;;  %v70_v27 = vld [vmem:[%s10086_s18 + $0x158] sm:$0xff] }
   0xf   : > { %9454 = vmatprep.mubr.msk.f32.mxu1 %vm97_vm2, %v63_v13  ;;  %v39_v28 = vld [vmem:[%s10086_s18 + $0x60] sm:$0xff]  ;;  %v40_v30 = vld [vmem:[%s10086_s18 + $0x68] sm:$0xff]  ;;  %v41_v32 = vld [vmem:[%s10086_s18 + $0x70] sm:$0xff] }
  0x10   : > { %v71_v29 = vld [vmem:[%s10086_s18 + $0x160] sm:$0xff]  ;;  %v72_v31 = vld [vmem:[%s10086_s18 + $0x168] sm:$0xff]  ;;  %v73_v33 = vld [vmem:[%s10086_s18 + $0x170] sm:$0xff] }
  0x11   : > { %9407 = vmatmul.mubr.msk.f32.gmra.mrb[4].mxu0 %vm97_vm2, %v32_v14  ;;  %v42_v34 = vld [vmem:[%s10086_s18 + $0x78] sm:$0xff]  ;;  %v43_v36 = vld [vmem:[%s10086_s18 + $0x80] sm:$0xff]  ;;  %v44_v38 = vld [vmem:[%s10086_s18 + $0x88] sm:$0xff] }
  0x12   : > { %9455 = vmatmul.mubr.msk.f32.gmra.mrb[4].mxu1 %vm97_vm2, %v64_v15  ;;  %9409 = vmatprep.mubr.msk.f32.mxu0 %vm97_vm2, %v33_v16  ;;  %v74_v35 = vld [vmem:[%s10086_s18 + $0x178] sm:$0xff]  ;;  %v75_v37 = vld [vmem:[%s10086_s18 + $0x180] sm:$0xff]  ;;  %v76_v39 = vld [vmem:[%s10086_s18 + $0x188] sm:$0xff] }
  0x13   : > { %9457 = vmatprep.mubr.msk.f32.mxu1 %vm97_vm2, %v65_v17  ;;  %v45_v40 = vld [vmem:[%s10086_s18 + $0x90] sm:$0xff]  ;;  %v46_v42 = vld [vmem:[%s10086_s18 + $0x98] sm:$0xff]  ;;  %v47_v44 = vld [vmem:[%s10086_s18 + $0xa0] sm:$0xff] }
  0x14   : > { %v77_v41 = vld [vmem:[%s10086_s18 + $0x190] sm:$0xff]  ;;  %v78_v43 = vld [vmem:[%s10086_s18 + $0x198] sm:$0xff]  ;;  %v79_v45 = vld [vmem:[%s10086_s18 + $0x1a0] sm:$0xff] }
  0x15   : > { %9410 = vmatmul.mubr.msk.f32.gmra.mrb[6].mxu0 %vm97_vm2, %v34_v18  ;;  %v48_v46 = vld [vmem:[%s10086_s18 + $0xa8] sm:$0xff]  ;;  %v49_v48 = vld [vmem:[%s10086_s18 + $0xb0] sm:$0xff]  ;;  %v50_v50 = vld [vmem:[%s10086_s18 + $0xb8] sm:$0xff] }
  0x16   : > { %9458 = vmatmul.mubr.msk.f32.gmra.mrb[6].mxu1 %vm97_vm2, %v66_v19  ;;  %9412 = vmatprep.mubr.msk.f32.mxu0 %vm97_vm2, %v35_v20  ;;  %v80_v47 = vld [vmem:[%s10086_s18 + $0x1a8] sm:$0xff]  ;;  %v81_v49 = vld [vmem:[%s10086_s18 + $0x1b0] sm:$0xff]  ;;  %v82_v51 = vld [vmem:[%s10086_s18 + $0x1b8] sm:$0xff] }
  0x17   : > { %9460 = vmatprep.mubr.msk.f32.mxu1 %vm97_vm2, %v67_v21  ;;  %v51_v52 = vld [vmem:[%s10086_s18 + $0xc0] sm:$0xff]  ;;  %v52_v54 = vld [vmem:[%s10086_s18 + $0xc8] sm:$0xff]  ;;  %v53_v56 = vld [vmem:[%s10086_s18 + $0xd0] sm:$0xff] }
  0x18   : > { %v83_v53 = vld [vmem:[%s10086_s18 + $0x1c0] sm:$0xff]  ;;  %v84_v55 = vld [vmem:[%s10086_s18 + $0x1c8] sm:$0xff]  ;;  %v85_v57 = vld [vmem:[%s10086_s18 + $0x1d0] sm:$0xff] }
  0x19   : > { %9413 = vmatmul.mubr.msk.f32.gmra.mrb[8].mxu0 %vm97_vm2, %v36_v22  ;;  %v54_v58 = vld [vmem:[%s10086_s18 + $0xd8] sm:$0xff]  ;;  %v55_v60 = vld [vmem:[%s10086_s18 + $0xe0] sm:$0xff]  ;;  %v56_v62 = vld [vmem:[%s10086_s18 + $0xe8] sm:$0xff] }
  0x1a   : > { %9461 = vmatmul.mubr.msk.f32.gmra.mrb[8].mxu1 %vm97_vm2, %v68_v23  ;;  %9415 = vmatprep.mubr.msk.f32.mxu0 %vm97_vm2, %v37_v24  ;;  %v86_v59 = vld [vmem:[%s10086_s18 + $0x1d8] sm:$0xff]  ;;  %v87_v61 = vld [vmem:[%s10086_s18 + $0x1e0] sm:$0xff]  ;;  %v88_v63 = vld [vmem:[%s10086_s18 + $0x1e8] sm:$0xff] }
  0x1b   : > { %9463 = vmatprep.mubr.msk.f32.mxu1 %vm97_vm2, %v69_v25  ;;  %v57_v2 = vld [vmem:[%s10086_s18 + $0xf0] sm:$0xff]  ;;  %v58_v5 = vld [vmem:[%s10086_s18 + $0xf8] sm:$0xff] }
  0x1c   : > { %v89_v4 = vld [vmem:[%s10086_s18 + $0x1f0] sm:$0xff]  ;;  %v90_v6 = vld [vmem:[%s10086_s18 + $0x1f8] sm:$0xff] }
  0x1d   : > { %9416 = vmatmul.mubr.msk.f32.gmra.mrb[10].mxu0 %vm97_vm2, %v38_v26 }
  0x1e   : > { %9464 = vmatmul.mubr.msk.f32.gmra.mrb[10].mxu1 %vm97_vm2, %v70_v27  ;;  %9418 = vmatprep.mubr.msk.f32.mxu0 %vm97_vm2, %v39_v28 }
  0x1f   : > { %9466 = vmatprep.mubr.msk.f32.mxu1 %vm97_vm2, %v71_v29 }
  0x21   : > { %9419 = vmatmul.mubr.msk.f32.gmra.mrb[12].mxu0 %vm97_vm2, %v40_v30 }
  0x22   : > { %9467 = vmatmul.mubr.msk.f32.gmra.mrb[12].mxu1 %vm97_vm2, %v72_v31  ;;  %9421 = vmatprep.mubr.msk.f32.mxu0 %vm97_vm2, %v41_v32 }
  0x23   : > { %9469 = vmatprep.mubr.msk.f32.mxu1 %vm97_vm2, %v73_v33 }
  0x25   : > { %9422 = vmatmul.mubr.msk.f32.gmra.mrb[14].mxu0 %vm97_vm2, %v42_v34 }
  0x26   : > { %9470 = vmatmul.mubr.msk.f32.gmra.mrb[14].mxu1 %vm97_vm2, %v74_v35  ;;  %9424 = vmatprep.mubr.msk.f32.mxu0 %vm97_vm2, %v43_v36 }
  0x27   : > { %9472 = vmatprep.mubr.msk.f32.mxu1 %vm97_vm2, %v75_v37 }
  0x29   : > { %9425 = vmatmul.mubr.msk.f32.gmra.mrb[16].mxu0 %vm97_vm2, %v44_v38 }
  0x2a   : > { %9473 = vmatmul.mubr.msk.f32.gmra.mrb[16].mxu1 %vm97_vm2, %v76_v39  ;;  %9427 = vmatprep.mubr.msk.f32.mxu0 %vm97_vm2, %v45_v40 }
  0x2b   : > { %9475 = vmatprep.mubr.msk.f32.mxu1 %vm97_vm2, %v77_v41 }
  0x2d   : > { %9428 = vmatmul.mubr.msk.f32.gmra.mrb[18].mxu0 %vm97_vm2, %v46_v42 }
  0x2e   : > { %9476 = vmatmul.mubr.msk.f32.gmra.mrb[18].mxu1 %vm97_vm2, %v78_v43  ;;  %9430 = vmatprep.mubr.msk.f32.mxu0 %vm97_vm2, %v47_v44 }
  0x2f   : > { %9478 = vmatprep.mubr.msk.f32.mxu1 %vm97_vm2, %v79_v45 }
  0x31   : > { %9431 = vmatmul.mubr.msk.f32.gmra.mrb[20].mxu0 %vm97_vm2, %v48_v46 }
  0x32   : > { %9479 = vmatmul.mubr.msk.f32.gmra.mrb[20].mxu1 %vm97_vm2, %v80_v47  ;;  %9433 = vmatprep.mubr.msk.f32.mxu0 %vm97_vm2, %v49_v48  ;;  %v10032_v47 = vmov 683565275  }
  0x33   : > { %9481 = vmatprep.mubr.msk.f32.mxu1 %vm97_vm2, %v81_v49 }
  0x35   : > { %9434 = vmatmul.mubr.msk.f32.gmra.mrb[22].mxu0 %vm97_vm2, %v50_v50 }
  0x36   : > { %9482 = vmatmul.mubr.msk.f32.gmra.mrb[22].mxu1 %vm97_vm2, %v82_v51  ;;  %9436 = vmatprep.mubr.msk.f32.mxu0 %vm97_vm2, %v51_v52  ;;  %v10033_v51 = vmov 2475754826  }
  0x37   : > { %9484 = vmatprep.mubr.msk.f32.mxu1 %vm97_vm2, %v83_v53  ;;  %v10034_v53 = vmov 2131351028  }
  0x39   : > { %9437 = vmatmul.mubr.msk.f32.gmra.mrb[24].mxu0 %vm97_vm2, %v52_v54 }
  0x3a   : > { %9485 = vmatmul.mubr.msk.f32.gmra.mrb[24].mxu1 %vm97_vm2, %v84_v55  ;;  %9439 = vmatprep.mubr.msk.f32.mxu0 %vm97_vm2, %v53_v56  ;;  %v10035_v55 = vmov 2102212464  }
  0x3b   : > { %9487 = vmatprep.mubr.msk.f32.mxu1 %vm97_vm2, %v85_v57  ;;  %v10036_v57 = vmov 920167782  }
  0x3d   : > { %9440 = vmatmul.mubr.msk.f32.gmra.mrb[26].mxu0 %vm97_vm2, %v54_v58 }
  0x3e   : > { %9488 = vmatmul.mubr.msk.f32.gmra.mrb[26].mxu1 %vm97_vm2, %v86_v59  ;;  %9442 = vmatprep.mubr.msk.f32.mxu0 %vm97_vm2, %v55_v60 }
  0x3f   : > { %9490 = vmatprep.mubr.msk.f32.mxu1 %vm97_vm2, %v87_v61 }
  0x41   : > { %9443 = vmatmul.mubr.msk.f32.gmra.mrb[28].mxu0 %vm97_vm2, %v56_v62 }
  0x42   : > { %9491 = vmatmul.mubr.msk.f32.gmra.mrb[28].mxu1 %vm97_vm2, %v88_v63  ;;  %9445 = vmatprep.mubr.msk.f32.mxu0 %vm97_vm2, %v57_v2  ;;  %v10037_v2 = vmov 1326507024  }
  0x43   : > { %9493 = vmatprep.mubr.msk.f32.mxu1 %vm97_vm2, %v89_v4 }
  0x45   : > { %9446 = vmatmul.mubr.msk.f32.gmra.mrb[30].mxu0 %vm97_vm2, %v58_v5 }
  0x46   : > { %9494 = vmatmul.mubr.msk.f32.gmra.mrb[30].mxu1 %vm97_vm2, %v90_v6 }
  0xdc   : > { %v9402_v7 = vpop.f32.mrb[0].mxu0 }
  0xdd   : > { %v9450_v8 = vpop.f32.mrb[0].mxu1  ;;  %v10217_v9 = vadd.f32 %v9402_v7, %v10066_v1  ;;  %v360_v11 = vpop.f32.mrb[1].mxu0 }
  0xde   : > { %v10220_v10 = vadd.f32 %v9450_v8, %v10066_v1  ;;  %v520_v12 = vpop.f32.mrb[1].mxu1  ;;  %v10223_v13 = vadd.f32 %v10066_v1, %v360_v11 }
  0xdf   : > { %v783_v14 = vand.u32 2147483647, %v10217_v9  ;;  %v786_v15 = vand.u32 2139095040, %v10217_v9  ;;  %v10241_v31 = vadd.f32 %v10066_v1, %v520_v12  ;;  %vm785_vm1 = vcmp.lt.s32.totalorder %v10217_v9, 0 }
  0xe0   : > { %v4111_v16 = vand.u32 2147483647, %v10220_v10  ;;  %v4114_v17 = vand.u32 2139095040, %v10220_v10  ;;  %v10229_v18 = vpop.f32.mrb[2].mxu0  ;;  %v682_v24 = vand.u32 2139095040, %v10223_v13 }
  0xe1   : > { %v10231_v19 = vpop.f32.mrb[2].mxu1  ;;  %v787_v20 = vshrl.u32 %v786_v15, 23  ;;  %v790_v21 = vand.u32 8388607, %v783_v14  ;;  %v10238_v26 = vpop.f32.mrb[3].mxu0  ;;  %v4010_v45 = vand.u32 2139095040, %v10241_v31 }
  0xe2   : > { %v4115_v22 = vshrl.u32 %v4114_v17, 23  ;;  %v4118_v23 = vand.u32 8388607, %v4111_v16  ;;  %v683_v28 = vshrl.u32 %v682_v24, 23  ;;  %v679_v34 = vand.u32 2147483647, %v10223_v13 }
  0xe3   : > { %v9081_v25 = vadd.s32 4294967169, %v787_v20  ;;  %v791_v29 = vor.u32 8388608, %v790_v21  ;;  %v10244_v36 = vpop.f32.mrb[3].mxu1  ;;  %vm10344_vm2 = vcmp.le.f32.partialorder %v783_v14, 0.7853982 }
  0xe4   : > { %v9209_v27 = vadd.s32 4294967169, %v4115_v22  ;;  %v4119_v32 = vor.u32 8388608, %v4118_v23  ;;  %v9077_v35 = vadd.s32 4294967169, %v683_v28  ;;  %v10252_v43 = vand.u32 8388607, %v679_v34 }
  0xe5   : > { %v793_v30 = vadd.s32 1, %v9081_v25  ;;  %v10246_v40 = vshll.u32 %v791_v29, 8 }
  0xe6   : > { %v4121_v33 = vadd.s32 1, %v9209_v27  ;;  %v10248_v42 = vshll.u32 %v4119_v32, 8  ;;  %v10254_v44 = vadd.s32 1, %v9077_v35 }
  0xe7   : > { %vm794_vm3 = vcmp.gt.s32.totalorder %v793_v30, 0 }
  0xe8   : > { %v795_v37 = vsel %vm794_vm3, %v793_v30, 0  ;;  %vm4122_vm4 = vcmp.gt.s32.totalorder %v4121_v33, 0  ;;  %vm690_vm9 = vcmp.gt.s32.totalorder %v10254_v44, 0 }
  0xe9   : > { %v796_v38 = vshrl.u32 %v795_v37, 5  ;;  %v797_v39 = vand.u32 31, %v795_v37  ;;  %v4123_v41 = vsel %vm4122_vm4, %v4121_v33, 0 }
  0xea   : > { %v10258_v49 = vshrl.u32 %v4123_v41, 5  ;;  %v4125_v50 = vand.u32 31, %v4123_v41 }
  0xeb   : > { %v798_v46 = vsub.s32 32, %v797_v39  ;;  %v800_v48 = vshll.u32 %v10032_v47, %v797_v39  ;;  %v803_v52 = vshll.u32 %v10033_v51, %v797_v39  ;;  %v806_v54 = vshll.u32 %v10034_v53, %v797_v39 }
  0xec   : > { %v809_v56 = vshll.u32 %v10035_v55, %v797_v39  ;;  %v812_v58 = vshll.u32 %v10036_v57, %v797_v39  ;;  %vm815_vm5 = vcmp.lt.s32.totalorder %v796_v38, 1  ;;  %vm816_vm6 = vcmp.lt.s32.totalorder %v796_v38, 2 }
  0xed   : > { %v801_v59 = vshrl.u32 %v10033_v51, %v798_v46  ;;  %v804_v60 = vshrl.u32 %v10034_v53, %v798_v46  ;;  %v807_v61 = vshrl.u32 %v10035_v55, %v798_v46  ;;  %v799_v62 = vshrl.u32 %v10032_v47, %v798_v46 }
  0xee   : > { %v810_v63 = vshrl.u32 %v10036_v57, %v798_v46  ;;  %v813_v4 = vshrl.u32 %v10037_v2, %v798_v46  ;;  %v4126_v8 = vsub.s32 32, %v4125_v50  ;;  %vm817_vm7 = vcmp.lt.s32.totalorder %v796_v38, 3 }
  0xef   : > { %v802_v5 = vor.u32 %v801_v59, %v800_v48  ;;  %v805_v6 = vor.u32 %v804_v60, %v803_v52  ;;  %v808_v7 = vor.u32 %v807_v61, %v806_v54  ;;  %vm818_vm8 = vcmp.lt.s32.totalorder %v796_v38, 4 }
  0xf0   : > { %v811_v11 = vor.u32 %v810_v63, %v809_v56  ;;  %v814_v12 = vor.u32 %v813_v4, %v812_v58  ;;  %v4128_v25 = vshll.u32 %v10032_v47, %v4125_v50  ;;  %v4129_v29 = vshrl.u32 %v10033_v51, %v4126_v8 }
  0xf1   : > { %v819_v15 = vsel %vm815_vm5, %v799_v62, %v802_v5  ;;  %v820_v17 = vsel %vm818_vm8, %v808_v7, 2102212464  ;;  %v823_v20 = vsel %vm815_vm5, %v802_v5, %v805_v6  ;;  %v827_v21 = vsel %vm815_vm5, %v805_v6, %v808_v7 }
  0xf2   : > { %v821_v22 = vsel %vm817_vm7, %v805_v6, %v820_v17  ;;  %v824_v23 = vsel %vm818_vm8, %v811_v11, 920167782  ;;  %v828_v24 = vsel %vm818_vm8, %v814_v12, 1326507024  ;;  %v4131_v30 = vshll.u32 %v10033_v51, %v4125_v50 }
  0xf3   : > { %v825_v27 = vsel %vm817_vm7, %v808_v7, %v824_v23  ;;  %v829_v28 = vsel %vm817_vm7, %v811_v11, %v828_v24  ;;  %v822_v32 = vsel %vm816_vm6, %v819_v15, %v821_v22  ;;  %v4132_v37 = vshrl.u32 %v10034_v53, %v4126_v8 }
  0xf4   : > { %v826_v33 = vsel %vm816_vm6, %v823_v20, %v825_v27  ;;  %v830_v35 = vsel %vm816_vm6, %v827_v21, %v829_v28  ;;  %v4130_v52 = vor.u32 %v4129_v29, %v4128_v25  ;;  %v4134_v56 = vshll.u32 %v10034_v53, %v4125_v50 }
  0xf5   : > { %v10282_v39 = vmul.u32.u64.low %v10246_v40, %v830_v35  ;;  %v10283_v41 = vmul.u32.u64.high %v10246_v40, %v830_v35, %v10282_v39  ;;  %v10286_v46 = vmul.u32.u64.low %v10246_v40, %v826_v33  ;;  %v10287_v48 = vmul.u32.u64.high %v10246_v40, %v826_v33, %v10286_v46 }
  0xf6   : > { %v4133_v54 = vor.u32 %v4132_v37, %v4131_v30  ;;  %v4135_v58 = vshrl.u32 %v10035_v55, %v4126_v8  ;;  %v4127_v59 = vshrl.u32 %v10032_v47, %v4126_v8  ;;  %v4137_v38 = vshll.u32 %v10035_v55, %v4125_v50 }
  0xf7   : > { %v4138_v60 = vshrl.u32 %v10036_v57, %v4126_v8  ;;  %v4141_v61 = vshrl.u32 %v10037_v2, %v4126_v8  ;;  %v838_v62 = vmul.u32 %v10246_v40, %v822_v32  ;;  %v4140_v4 = vshll.u32 %v10036_v57, %v4125_v50 }
  0xf8   : > { %v4136_v63 = vor.u32 %v4135_v58, %v4134_v56  ;;  %vm4143_vm10 = vcmp.lt.s32.totalorder %v10258_v49, 1  ;;  %vm840_vm11 = vc.u32 %v10283_v41, %v10286_v46  ;;  %v841_v5 = vadd.s32 1, %v10287_v48 }
  0xf9   : > { %v4139_v6 = vor.u32 %v4138_v60, %v4137_v38  ;;  %vm4144_vm12 = vcmp.lt.s32.totalorder %v10258_v49, 2  ;;  %v4142_v7 = vor.u32 %v4141_v61, %v4140_v4  ;;  %vm4145_vm13 = vcmp.lt.s32.totalorder %v10258_v49, 3 }
  0xfa   : > { %vm4146_vm14 = vcmp.lt.s32.totalorder %v10258_v49, 4  ;;  %v4151_v8 = vsel %vm4143_vm10, %v4130_v52, %v4133_v54  ;;  %v842_v40 = vsel %vm840_vm11, %v841_v5, %v10287_v48  ;;  %v4155_v50 = vsel %vm4143_vm10, %v4133_v54, %v4136_v63 }
  0xfb   : > { %v4148_v11 = vsel %vm4146_vm14, %v4136_v63, 2102212464  ;;  %v4152_v12 = vsel %vm4146_vm14, %v4139_v6, 920167782  ;;  %v843_v15 = vadd.s32 %v842_v40, %v838_v62  ;;  %v4147_v17 = vsel %vm4143_vm10, %v4127_v59, %v4130_v52  ;;  %v10324_v52 = vpop.f32.mrb[4].mxu0 }
  0xfc   : > { %v4153_v20 = vsel %vm4145_vm13, %v4136_v63, %v4152_v12  ;;  %v4156_v21 = vsel %vm4146_vm14, %v4142_v7, 1326507024  ;;  %v4149_v22 = vsel %vm4145_vm13, %v4133_v54, %v4148_v11  ;;  %v691_v25 = vsel %vm690_vm9, %v10254_v44, 0 }
  0xfd   : > { %v4154_v23 = vsel %vm4144_vm12, %v4151_v8, %v4153_v20  ;;  %v4157_v24 = vsel %vm4145_vm13, %v4139_v6, %v4156_v21  ;;  %v844_v27 = vadd.s32 536870912, %v843_v15  ;;  %v4007_v35 = vand.u32 2147483647, %v10241_v31 }
  0xfe   : > { %v4158_v28 = vsel %vm4144_vm12, %v4155_v50, %v4157_v24  ;;  %v10312_v29 = vmul.u32.u64.low %v10248_v42, %v4154_v23  ;;  %v10313_v30 = vmul.u32.u64.high %v10248_v42, %v4154_v23, %v10312_v29  ;;  %v4150_v39 = vsel %vm4144_vm12, %v4147_v17, %v4149_v22 }
  0xff   : > { %v10317_v32 = vmul.u32.u64.low %v10248_v42, %v4158_v28  ;;  %v10318_v33 = vmul.u32.u64.high %v10248_v42, %v4158_v28, %v10317_v32  ;;  %v845_v37 = vshrl.u32 %v844_v27, 30  ;;  %v687_v44 = vor.u32 8388608, %v10252_v43 }
 0x100   : > { %v693_v48 = vand.u32 31, %v691_v25  ;;  %v4169_v56 = vadd.s32 1, %v10313_v30  ;;  %v4011_v59 = vshrl.u32 %v4010_v45, 23  ;;  %v4166_v38 = vmul.u32 %v10248_v42, %v4150_v39 }
 0x101   : > { %v846_v54 = vshll.u32 %v845_v37, 30  ;;  %vm4168_vm15 = vc.u32 %v10318_v33, %v10312_v29  ;;  %v10334_v49 = vand.u32 8388607, %v4007_v35  ;;  %v10340_v61 = vshll.u32 %v687_v44, 8 }
 0x102   : > { %v694_v58 = vsub.s32 32, %v693_v48  ;;  %v4170_v60 = vsel %vm4168_vm15, %v4169_v56, %v10313_v30  ;;  %v839_v42 = vadd.s32 %v10286_v46, %v10283_v41  ;;  %v10349_v63 = vshrl.u32 %v691_v25, 5 }
 0x103   : > { %v10337_v43 = vsub.s32 %v843_v15, %v846_v54  ;;  %v4171_v62 = vadd.s32 %v4170_v60, %v4166_v38  ;;  %v9205_v8 = vadd.s32 4294967169, %v4011_v59  ;;  %v869_v40 = vsub.s32 4, %v845_v37 }
 0x104   : > { %v697_v4 = vshrl.u32 %v10033_v51, %v694_v58  ;;  %v700_v6 = vshrl.u32 %v10034_v53, %v694_v58  ;;  %v703_v7 = vshrl.u32 %v10035_v55, %v694_v58  ;;  %v696_v14 = vshll.u32 %v10032_v47, %v693_v48 }
 0x105   : > { %v849_v5 = vsub.s32 0, %v10337_v43  ;;  %v4172_v11 = vadd.s32 536870912, %v4171_v62  ;;  %v4015_v12 = vor.u32 8388608, %v10334_v49  ;;  %v699_v46 = vshll.u32 %v10033_v51, %v693_v48 }
 0x106   : > { %v702_v50 = vshll.u32 %v10034_v53, %v693_v48  ;;  %v706_v15 = vshrl.u32 %v10036_v57, %v694_v58  ;;  %v698_v20 = vor.u32 %v697_v4, %v696_v14  ;;  %v705_v21 = vshll.u32 %v10035_v55, %v693_v48 }
 0x107   : > { %v9082_v41 = vmin.u32 %v849_v5, %v10337_v43  ;;  %v4173_v17 = vshrl.u32 %v4172_v11, 30  ;;  %v709_v22 = vshrl.u32 %v10037_v2, %v694_v58  ;;  %v701_v24 = vor.u32 %v700_v6, %v699_v46 }
 0x108   : > { %v704_v25 = vor.u32 %v703_v7, %v702_v50  ;;  %v708_v27 = vshll.u32 %v10036_v57, %v693_v48  ;;  %v870_v28 = vsel %vm785_vm1, %v869_v40, %v845_v37  ;;  %v707_v32 = vor.u32 %v706_v15, %v705_v21 }
 0x109   : > { %v851_v23 = vclz %v9082_v41  ;;  %v4174_v30 = vshll.u32 %v4173_v17, 30  ;;  %vm711_vm3 = vcmp.lt.s32.totalorder %v10349_v63, 1  ;;  %vm712_vm4 = vcmp.lt.s32.totalorder %v10349_v63, 2 }
 0x10a   : > { %v710_v44 = vor.u32 %v709_v22, %v708_v27  ;;  %vm714_vm5 = vcmp.lt.s32.totalorder %v10349_v63, 4  ;;  %vm4113_vm6 = vcmp.lt.s32.totalorder %v10220_v10, 0  ;;  %v695_v56 = vshrl.u32 %v10032_v47, %v694_v58 }
 0x10b   : > { %v9083_v39 = vadd.s32 4294967294, %v851_v23  ;;  %v10370_v54 = vsub.s32 %v4171_v62, %v4174_v30  ;;  %vm713_vm7 = vcmp.lt.s32.totalorder %v10349_v63, 3  ;;  %v720_v37 = vsel %vm714_vm5, %v707_v32, 920167782 }
 0x10c   : > { %v872_v48 = vsel %vm10344_vm2, 0, %v870_v28  ;;  %v719_v59 = vsel %vm711_vm3, %v698_v20, %v701_v24  ;;  %v721_v38 = vsel %vm713_vm7, %v704_v25, %v720_v37  ;;  %v4197_v4 = vsub.s32 4, %v4173_v17 }
 0x10d   : > { %vm9084_vm8 = vcmp.lt.s32.totalorder %v9083_v39, 0  ;;  %v4177_v62 = vsub.s32 0, %v10370_v54  ;;  %v723_v58 = vsel %vm711_vm3, %v701_v24, %v704_v25  ;;  %vm10387_vm9 = vcmp.le.f32.partialorder %v4111_v16, 0.7853982 }
 0x10e   : > { %v854_v60 = vsel %vm9084_vm8, 0, %v9083_v39  ;;  %v716_v40 = vsel %vm714_vm5, %v704_v25, 2102212464  ;;  %v724_v11 = vsel %vm714_vm5, %v710_v44, 1326507024  ;;  %v722_v46 = vsel %vm712_vm4, %v719_v59, %v721_v38 }
 0x10f   : > { %v855_v5 = vsub.s32 32, %v854_v60  ;;  %v859_v6 = vsub.s32 4294967266, %v854_v60  ;;  %v856_v14 = vshll.u32 %v10337_v43, %v854_v60  ;;  %v9210_v41 = vmin.u32 %v4177_v62, %v10370_v54  ;;  %v10424_v60 = vpop.f32.mrb[4].mxu1 }
 0x110   : > { %v725_v50 = vsel %vm713_vm7, %v707_v32, %v724_v11  ;;  %v4017_v22 = vadd.s32 1, %v9205_v8  ;;  %v876_v23 = vadd.s32 3, %v872_v48  ;;  %v715_v27 = vsel %vm711_vm3, %v695_v56, %v698_v20 }
 0x111   : > { %v857_v16 = vshrl.u32 %v839_v42, %v855_v5  ;;  %v860_v15 = vadd.s32 127, %v859_v6  ;;  %v726_v21 = vsel %vm712_vm4, %v723_v58, %v725_v50  ;;  %v4179_v25 = vclz %v9210_v41 }
 0x112   : > { %v717_v43 = vsel %vm713_vm7, %v701_v24, %v716_v40  ;;  %v10408_v39 = vmul.u32.u64.low %v10340_v61, %v726_v21  ;;  %v10409_v44 = vmul.u32.u64.high %v10340_v61, %v726_v21, %v10408_v39  ;;  %vm4018_vm10 = vcmp.gt.s32.totalorder %v4017_v22, 0 }
 0x113   : > { %v858_v28 = vor.u32 %v857_v16, %v856_v14  ;;  %v861_v30 = vshll.u32 %v860_v15, 23  ;;  %v9211_v42 = vadd.s32 4294967294, %v4179_v25  ;;  %v4167_v20 = vadd.s32 %v10312_v29, %v10318_v33 }
 0x114   : > { %v10412_v32 = vmul.u32.u64.low %v10340_v61, %v722_v46  ;;  %v10413_v37 = vmul.u32.u64.high %v10340_v61, %v722_v46, %v10412_v32  ;;  %v4198_v24 = vsel %vm4113_vm6, %v4197_v4, %v4173_v17  ;;  %v4019_v56 = vsel %vm4018_vm10, %v4017_v22, 0 }
 0x115   : > { %v862_v8 = vor.u32 4788187, %v861_v30  ;;  %v10420_v48 = vand.u32 3, %v876_v23  ;;  %vm9212_vm11 = vcmp.lt.s32.totalorder %v9211_v42, 0  ;;  %v718_v59 = vsel %vm712_vm4, %v715_v27, %v717_v43 }
 0x116   : > { %v4021_v38 = vand.u32 31, %v4019_v56  ;;  %v865_v58 = vcvt.s32.f32 %v858_v28  ;;  %v4182_v5 = vsel %vm9212_vm11, 0, %v9211_v42  ;;  %vm736_vm12 = vc.u32 %v10409_v44, %v10412_v32 }
 0x117   : > { %v863_v62 = vand.u32 2147483647, %v862_v8  ;;  %v4183_v29 = vsub.s32 32, %v4182_v5  ;;  %v4187_v33 = vsub.s32 4294967266, %v4182_v5  ;;  %v4200_v17 = vsel %vm10387_vm9, 0, %v4198_v24 }
 0x118   : > { %v737_v4 = vadd.s32 1, %v10413_v37  ;;  %v734_v63 = vmul.u32 %v10340_v61, %v718_v59  ;;  %v10432_v40 = vshrl.u32 %v4019_v56, 5  ;;  %v4022_v11 = vsub.s32 32, %v4021_v38 }
 0x119   : > { %v866_v6 = vmul.f32 %v865_v58, %v863_v62  ;;  %v4184_v14 = vshll.u32 %v10370_v54, %v4182_v5  ;;  %v4185_v41 = vshrl.u32 %v4167_v20, %v4183_v29  ;;  %v4188_v46 = vadd.s32 127, %v4187_v33 }
 0x11a   : > { %v738_v50 = vsel %vm736_vm12, %v737_v4, %v10413_v37  ;;  %v4024_v21 = vshll.u32 %v10032_v47, %v4021_v38  ;;  %v4025_v22 = vshrl.u32 %v10033_v51, %v4022_v11  ;;  %v4027_v27 = vshll.u32 %v10033_v51, %v4021_v38 }
 0x11b   : > { %v867_v16 = vxor.u32 2147483648, %v866_v6  ;;  %v739_v15 = vadd.s32 %v738_v50, %v734_v63  ;;  %v4186_v23 = vor.u32 %v4185_v41, %v4184_v14  ;;  %v4189_v25 = vshll.u32 %v4188_v46, 23 }
 0x11c   : > { %v4028_v61 = vshrl.u32 %v10034_v53, %v4022_v11  ;;  %v4030_v28 = vshll.u32 %v10034_v53, %v4021_v38  ;;  %v4031_v30 = vshrl.u32 %v10035_v55, %v4022_v11  ;;  %v4026_v37 = vor.u32 %v4025_v22, %v4024_v21 }
 0x11d   : > { %v868_v43 = vsel %vm785_vm1, %v867_v16, %v866_v6  ;;  %v740_v54 = vadd.s32 536870912, %v739_v15  ;;  %v4190_v42 = vor.u32 4788187, %v4189_v25  ;;  %v4033_v8 = vshll.u32 %v10035_v55, %v4021_v38 }
 0x11e   : > { %v871_v39 = vsel %vm10344_vm2, %v10217_v9, %v868_v43  ;;  %v4193_v20 = vcvt.s32.f32 %v4186_v23  ;;  %v4034_v56 = vshrl.u32 %v10036_v57, %v4022_v11  ;;  %v4029_v62 = vor.u32 %v4028_v61, %v4027_v27 }
 0x11f   : > { %9768 = vcosq.f32 %v871_v39  ;;  %v10448_v24 = vshrl.u32 %v740_v54, 30  ;;  %v4191_v59 = vand.u32 2147483647, %v4190_v42  ;;  %v4037_v58 = vshrl.u32 %v10037_v2, %v4022_v11 }
 0x120   : > { %9770 = vsinq.f32 %v871_v39  ;;  %v4035_v29 = vor.u32 %v4034_v56, %v4033_v8  ;;  %v4032_v33 = vor.u32 %v4031_v30, %v4030_v28  ;;  %v4036_v4 = vshll.u32 %v10036_v57, %v4021_v38 }
 0x121   : > { %v742_v5 = vshll.u32 %v10448_v24, 30  ;;  %v4194_v45 = vmul.f32 %v4193_v20, %v4191_v59  ;;  %vm882_vm13 = vcmp.eq.s32.totalorder %v10420_v48, 2  ;;  %v4204_v6 = vadd.s32 3, %v4200_v17 }
 0x122   : > { %vm4039_vm14 = vcmp.lt.s32.totalorder %v10432_v40, 1  ;;  %v10460_v14 = vshll.u32 %v4015_v12, 8  ;;  %vm879_vm15 = vcmp.eq.s32.totalorder %v10420_v48, 0  ;;  %v4038_v46 = vor.u32 %v4037_v58, %v4036_v4 }
 0x123   : > { %v10455_v63 = vsub.s32 %v739_v15, %v742_v5  ;;  %v4195_v41 = vxor.u32 2147483648, %v4194_v45  ;;  %vm4042_vm1 = vcmp.lt.s32.totalorder %v10432_v40, 4  ;;  %v4047_v38 = vsel %vm4039_vm14, %v4026_v37, %v4029_v62 }
 0x124   : > { %vm878_vm2 = vcmp.lt.s32.totalorder %v10420_v48, 2  ;;  %vm681_vm3 = vcmp.lt.s32.totalorder %v10223_v13, 0  ;;  %v4023_v50 = vshrl.u32 %v10032_v47, %v4022_v11  ;;  %vm4041_vm4 = vcmp.lt.s32.totalorder %v10432_v40, 3 }
 0x125   : > { %v745_v17 = vsub.s32 0, %v10455_v63  ;;  %v4048_v49 = vsel %vm4042_vm1, %v4035_v29, 920167782  ;;  %vm875_vm5 = vweird.f32 %v10217_v9  ;;  %vm7400_vm7 = vcmask 515072  }
 0x126   : > { %v4196_v12 = vsel %vm4113_vm6, %v4195_v41, %v4194_v45  ;;  %vm4040_vm8 = vcmp.lt.s32.totalorder %v10432_v40, 2  ;;  %v4044_v16 = vsel %vm4042_vm1, %v4032_v33, 2102212464  ;;  %v4049_v15 = vsel %vm4041_vm4, %v4032_v33, %v4048_v49 }
 0x127   : > { %v4199_v11 = vsel %vm10387_vm9, %v10220_v10, %v4196_v12  ;;  %v9078_v21 = vmin.u32 %v745_v17, %v10455_v63  ;;  %v4050_v22 = vsel %vm4040_vm8, %v4047_v38, %v4049_v15  ;;  %v4051_v23 = vsel %vm4039_vm14, %v4029_v62, %v4032_v33 }
 0x128   : > { %9772 = vcosq.f32 %v4199_v11  ;;  %v4052_v25 = vsel %vm4042_vm1, %v4038_v46, 1326507024  ;;  %v10492_v27 = vmul.u32.u64.low %v10460_v14, %v4050_v22  ;;  %v10493_v61 = vmul.u32.u64.high %v10460_v14, %v4050_v22, %v10492_v27 }
 0x129   : > { %v9769_v43 = vpop.eup %9768  ;;  %9774 = vsinq.f32 %v4199_v11  ;;  %vm10498_vm6 = vcmp.le.f32.partialorder %v679_v34, 0.7853982  ;;  %v747_v54 = vclz %v9078_v21  ;;  %v4043_v28 = vsel %vm4039_vm14, %v4023_v50, %v4026_v37 }
 0x12a   : > { %v4045_v30 = vsel %vm4041_vm4, %v4029_v62, %v4044_v16  ;;  %v9771_v39 = vpop.eup %9770  ;;  %v883_v42 = vxor.u32 2147483648, %v9769_v43  ;;  %v4205_v8 = vand.u32 3, %v4204_v6  ;;  %v765_v20 = vsub.s32 4, %v10448_v24 }
 0x12b   : > { %v4053_v56 = vsel %vm4041_vm4, %v4035_v29, %v4052_v25  ;;  %v880_v59 = vxor.u32 2147483648, %v9771_v39  ;;  %v9079_v34 = vadd.s32 4294967294, %v747_v54  ;;  %v10513_v5 = vadd.f32 %v10229_v18, %v10066_v1 }
 0x12c   : > { %v4054_v58 = vsel %vm4040_vm8, %v4051_v23, %v4053_v56  ;;  %v884_v37 = vsel %vm882_vm13, %v883_v42, %v9771_v39  ;;  %v4046_v62 = vsel %vm4040_vm8, %v4043_v28, %v4045_v30  ;;  %v735_v4 = vadd.s32 %v10412_v32, %v10409_v44  ;;  %v10537_v32 = vpop.f32.mrb[5].mxu0 }
 0x12d   : > { %v10520_v45 = vmul.u32.u64.low %v10460_v14, %v4054_v58  ;;  %v10521_v33 = vmul.u32.u64.high %v10460_v14, %v4054_v58, %v10520_v45  ;;  %v881_v29 = vsel %vm879_vm15, %v9769_v43, %v880_v59  ;;  %vm9080_vm9 = vcmp.lt.s32.totalorder %v9079_v34, 0 }
 0x12e   : > { %v4065_v18 = vadd.s32 1, %v10493_v61  ;;  %v885_v6 = vsel %vm878_vm2, %v881_v29, %v884_v37  ;;  %v750_v41 = vsel %vm9080_vm9, 0, %v9079_v34  ;;  %v766_v40 = vsel %vm681_vm3, %v765_v20, %v10448_v24 }
 0x12f   : > { %v994_v46 = vand.u32 2139095040, %v10513_v5  ;;  %v886_v38 = vsel %vm875_vm5, nan, %v885_v6  ;;  %v751_v17 = vsub.s32 32, %v750_v41  ;;  %v755_v50 = vsub.s32 4294967266, %v750_v41 }
 0x130   : > { %v4062_v44 = vmul.u32 %v10460_v14, %v4046_v62  ;;  %v7336_v48 = vsel %vm18_vm0, %v10217_v9, %v886_v38  ;;  %v752_v49 = vshll.u32 %v10455_v63, %v750_v41  ;;  %vm4064_vm10 = vc.u32 %v10521_v33, %v10492_v27 }
 0x131   : > { %v991_v24 = vand.u32 2147483647, %v10513_v5  ;;  %7402 = vst.msk [vmem:[%s10548_s19 + $0x8] sm:$0xff] %vm7400_vm7, %v7336_v48  ;;  %v753_v14 = vshrl.u32 %v735_v4, %v751_v17  ;;  %v756_v12 = vadd.s32 127, %v755_v50  ;;  %v4066_v16 = vsel %vm4064_vm10, %v4065_v18, %v10493_v61 }
 0x132   : > { %v995_v15 = vshrl.u32 %v994_v46, 23  ;;  %v9773_v11 = vpop.eup %9772  ;;  %vm4203_vm11 = vweird.f32 %v10220_v10  ;;  %vm4206_vm12 = vcmp.lt.s32.totalorder %v4205_v8, 2  ;;  %v768_v9 = vsel %vm10498_vm6, 0, %v766_v40 }
 0x133   : > { %v4067_v63 = vadd.s32 %v4066_v16, %v4062_v44  ;;  %v9775_v21 = vpop.eup %9774  ;;  %v4211_v22 = vxor.u32 2147483648, %v9773_v11  ;;  %v754_v23 = vor.u32 %v753_v14, %v752_v49  ;;  %v757_v25 = vshll.u32 %v756_v12, 23 }
 0x134   : > { %v9089_v43 = vadd.s32 4294967169, %v995_v15  ;;  %v4208_v54 = vxor.u32 2147483648, %v9775_v21  ;;  %vm4210_vm13 = vcmp.eq.s32.totalorder %v4205_v8, 2  ;;  %v998_v61 = vand.u32 8388607, %v991_v24 }
 0x135   : > { %v4068_v28 = vadd.s32 536870912, %v4067_v63  ;;  %vm4207_vm14 = vcmp.eq.s32.totalorder %v4205_v8, 0  ;;  %v4212_v30 = vsel %vm4210_vm13, %v4211_v22, %v9775_v21  ;;  %v758_v39 = vor.u32 4788187, %v757_v25 }
 0x136   : > { %v1001_v42 = vadd.s32 1, %v9089_v43  ;;  %v4209_v20 = vsel %vm4207_vm14, %v9773_v11, %v4208_v54  ;;  %v772_v56 = vadd.s32 3, %v768_v9  ;;  %v10562_v34 = vadd.f32 %v10231_v19, %v10066_v1 }
 0x137   : > { %v10558_v59 = vshrl.u32 %v4068_v28, 30  ;;  %v4213_v58 = vsel %vm4206_vm12, %v4209_v20, %v4212_v30  ;;  %v759_v37 = vand.u32 2147483647, %v758_v39  ;;  %v761_v62 = vcvt.s32.f32 %v754_v23 }
 0x138   : > { %vm1002_vm15 = vcmp.gt.s32.totalorder %v1001_v42, 0  ;;  %v4214_v45 = vsel %vm4203_vm11, nan, %v4213_v58  ;;  %v999_v4 = vor.u32 8388608, %v998_v61  ;;  %v10575_v46 = vand.u32 3, %v772_v56 }
 0x139   : > { %v4070_v29 = vshll.u32 %v10558_v59, 30  ;;  %v1003_v18 = vsel %vm1002_vm15, %v1001_v42, 0  ;;  %v7368_v6 = vsel %vm18_vm0, %v10220_v10, %v4214_v45  ;;  %v762_v41 = vmul.f32 %v761_v62, %v759_v37 }
 0x13a   : > { %v1005_v40 = vand.u32 31, %v1003_v18  ;;  %7434 = vst.msk [vmem:[%s10548_s19 + $0x108] sm:$0xff] %vm7400_vm7, %v7368_v6  ;;  %v4063_v17 = vadd.s32 %v10492_v27, %v10521_v33  ;;  %v10580_v44 = vshll.u32 %v999_v4, 8  ;;  %v4319_v48 = vand.u32 2147483647, %v10562_v34 }
 0x13b   : > { %v10573_v19 = vsub.s32 %v4067_v63, %v4070_v29  ;;  %v763_v8 = vxor.u32 2147483648, %v762_v41  ;;  %v4093_v49 = vsub.s32 4, %v10558_v59  ;;  %v10594_v11 = vshrl.u32 %v1003_v18, 5 }
 0x13c   : > { %v1006_v38 = vsub.s32 32, %v1005_v40  ;;  %v1008_v33 = vshll.u32 %v10032_v47, %v1005_v40  ;;  %v1011_v9 = vshll.u32 %v10033_v51, %v1005_v40  ;;  %v1014_v63 = vshll.u32 %v10034_v53, %v1005_v40 }
 0x13d   : > { %v4073_v50 = vsub.s32 0, %v10573_v19  ;;  %v764_v10 = vsel %vm681_vm3, %v763_v8, %v762_v41  ;;  %v4322_v23 = vand.u32 2139095040, %v10562_v34  ;;  %vm4009_vm1 = vcmp.lt.s32.totalorder %v10241_v31, 0 }
 0x13e   : > { %v1009_v14 = vshrl.u32 %v10033_v51, %v1006_v38  ;;  %v1012_v12 = vshrl.u32 %v10034_v53, %v1006_v38  ;;  %v767_v16 = vsel %vm10498_vm6, %v10223_v13, %v764_v10  ;;  %v1015_v15 = vshrl.u32 %v10035_v55, %v1006_v38 }
 0x13f   : > { %v9206_v27 = vmin.u32 %v4073_v50, %v10573_v19  ;;  %9776 = vcosq.f32 %v767_v16  ;;  %v1017_v43 = vshll.u32 %v10035_v55, %v1005_v40  ;;  %v1018_v54 = vshrl.u32 %v10036_v57, %v1006_v38 }
 0x140   : > { %9778 = vsinq.f32 %v767_v16  ;;  %v1010_v22 = vor.u32 %v1009_v14, %v1008_v33  ;;  %v1013_v7 = vor.u32 %v1012_v12, %v1011_v9  ;;  %v1016_v25 = vor.u32 %v1015_v15, %v1014_v63 }
 0x141   : > { %v4075_v21 = vclz %v9206_v27  ;;  %v1007_v61 = vshrl.u32 %v10032_v47, %v1006_v38  ;;  %v1020_v30 = vshll.u32 %v10036_v57, %v1005_v40  ;;  %v1021_v39 = vshrl.u32 %v10037_v2, %v1006_v38 }
 0x142   : > { %vm778_vm2 = vcmp.eq.s32.totalorder %v10575_v46, 2  ;;  %v1019_v42 = vor.u32 %v1018_v54, %v1017_v43  ;;  %vm1023_vm3 = vcmp.lt.s32.totalorder %v10594_v11, 1  ;;  %vm1024_vm4 = vcmp.lt.s32.totalorder %v10594_v11, 2  ;;  %v10654_v54 = vpop.f32.mrb[5].mxu1 }
 0x143   : > { %v9207_v28 = vadd.s32 4294967294, %v4075_v21  ;;  %vm1026_vm5 = vcmp.lt.s32.totalorder %v10594_v11, 4  ;;  %vm775_vm8 = vcmp.eq.s32.totalorder %v10575_v46, 0  ;;  %vm10612_vm6 = vcmp.le.f32.partialorder %v4007_v35, 0.7853982 }
 0x144   : > { %v1022_v56 = vor.u32 %v1021_v39, %v1020_v30  ;;  %vm1025_vm10 = vcmp.lt.s32.totalorder %v10594_v11, 3  ;;  %v1028_v58 = vsel %vm1026_vm5, %v1016_v25, 2102212464  ;;  %vm774_vm11 = vcmp.lt.s32.totalorder %v10575_v46, 2 }
 0x145   : > { %vm9208_vm9 = vcmp.lt.s32.totalorder %v9207_v28, 0  ;;  %v1027_v62 = vsel %vm1023_vm3, %v1007_v61, %v1010_v22  ;;  %v1031_v45 = vsel %vm1023_vm3, %v1010_v22, %v1013_v7  ;;  %v1032_v35 = vsel %vm1026_vm5, %v1019_v42, 920167782 }
 0x146   : > { %v4078_v37 = vsel %vm9208_vm9, 0, %v9207_v28  ;;  %vm771_vm12 = vweird.f32 %v10223_v13  ;;  %v1029_v18 = vsel %vm1025_vm10, %v1013_v7, %v1028_v58  ;;  %v1035_v6 = vsel %vm1023_vm3, %v1013_v7, %v1016_v25 }
 0x147   : > { %v4079_v29 = vsub.s32 32, %v4078_v37  ;;  %v4083_v4 = vsub.s32 4294967266, %v4078_v37  ;;  %v4080_v41 = vshll.u32 %v10573_v19, %v4078_v37  ;;  %v1033_v40 = vsel %vm1025_vm10, %v1016_v25, %v1032_v35 }
 0x148   : > { %v1036_v8 = vsel %vm1026_vm5, %v1022_v56, 1326507024  ;;  %v4323_v38 = vshrl.u32 %v4322_v23, 23  ;;  %v1034_v14 = vsel %vm1024_vm4, %v1031_v45, %v1033_v40  ;;  %v4094_v22 = vsel %vm4009_vm1, %v4093_v49, %v10558_v59 }
 0x149   : > { %v4081_v50 = vshrl.u32 %v4063_v17, %v4079_v29  ;;  %v4084_v10 = vadd.s32 127, %v4083_v4  ;;  %v1037_v12 = vsel %vm1025_vm10, %v1019_v42, %v1036_v8  ;;  %v9777_v16 = vpop.eup %9776  ;;  %v1030_v30 = vsel %vm1024_vm4, %v1027_v62, %v1029_v18 }
 0x14a   : > { %v1038_v27 = vsel %vm1024_vm4, %v1035_v6, %v1037_v12  ;;  %v10643_v19 = vmul.u32.u64.low %v10580_v44, %v1034_v14  ;;  %v10644_v33 = vmul.u32.u64.high %v10580_v44, %v1034_v14, %v10643_v19  ;;  %v9217_v15 = vadd.s32 4294967169, %v4323_v38  ;;  %v9779_v9 = vpop.eup %9778 }
 0x14b   : > { %v779_v63 = vxor.u32 2147483648, %v9777_v16  ;;  %v4082_v17 = vor.u32 %v4081_v50, %v4080_v41  ;;  %v4085_v21 = vshll.u32 %v4084_v10, 23  ;;  %v776_v23 = vxor.u32 2147483648, %v9779_v9 }
 0x14c   : > { %v10651_v7 = vmul.u32.u64.low %v10580_v44, %v1038_v27  ;;  %v10652_v25 = vmul.u32.u64.high %v10580_v44, %v1038_v27, %v10651_v7  ;;  %v4329_v43 = vadd.s32 1, %v9217_v15  ;;  %v4326_v39 = vand.u32 8388607, %v4319_v48 }
 0x14d   : > { %v780_v28 = vsel %vm778_vm2, %v779_v63, %v9779_v9  ;;  %v4086_v61 = vor.u32 4788187, %v4085_v21  ;;  %v777_v59 = vsel %vm775_vm8, %v9777_v16, %v776_v23  ;;  %v4096_v49 = vsel %vm10612_vm6, 0, %v4094_v22 }
 0x14e   : > { %v1049_v42 = vadd.s32 1, %v10644_v33  ;;  %vm4330_vm13 = vcmp.gt.s32.totalorder %v4329_v43, 0  ;;  %v781_v56 = vsel %vm774_vm11, %v777_v59, %v780_v28  ;;  %v4089_v37 = vcvt.s32.f32 %v4082_v17 }
 0x14f   : > { %v4087_v58 = vand.u32 2147483647, %v4086_v61  ;;  %v4331_v11 = vsel %vm4330_vm13, %v4329_v43, 0  ;;  %v782_v62 = vsel %vm771_vm12, nan, %v781_v56  ;;  %v1046_v45 = vmul.u32 %v10580_v44, %v1030_v30 }
 0x150   : > { %vm1048_vm14 = vc.u32 %v10652_v25, %v10643_v19  ;;  %v7335_v35 = vsel %vm18_vm0, %v10223_v13, %v782_v62  ;;  %v4333_v46 = vand.u32 31, %v4331_v11  ;;  %v4100_v18 = vadd.s32 3, %v4096_v49 }
 0x151   : > { %v4090_v29 = vmul.f32 %v4089_v37, %v4087_v58  ;;  %v1050_v4 = vsel %vm1048_vm14, %v1049_v42, %v10644_v33  ;;  %7401 = vst.msk [vmem:[%s10548_s19] sm:$0xff] %vm7400_vm7, %v7335_v35  ;;  %v4327_v41 = vor.u32 8388608, %v4326_v39  ;;  %v10680_v8 = vshrl.u32 %v4331_v11, 5 }
 0x152   : > { %v1051_v6 = vadd.s32 %v1050_v4, %v1046_v45  ;;  %v4334_v44 = vsub.s32 32, %v4333_v46  ;;  %v4336_v38 = vshll.u32 %v10032_v47, %v4333_v46  ;;  %v4339_v10 = vshll.u32 %v10033_v51, %v4333_v46 }
 0x153   : > { %v4091_v40 = vxor.u32 2147483648, %v4090_v29  ;;  %v4342_v13 = vshll.u32 %v10034_v53, %v4333_v46  ;;  %v4345_v14 = vshll.u32 %v10035_v55, %v4333_v46  ;;  %v4348_v33 = vshll.u32 %v10036_v57, %v4333_v46 }
 0x154   : > { %v1052_v50 = vadd.s32 536870912, %v1051_v6  ;;  %v4337_v16 = vshrl.u32 %v10033_v51, %v4334_v44  ;;  %v4340_v27 = vshrl.u32 %v10034_v53, %v4334_v44  ;;  %v4343_v63 = vshrl.u32 %v10035_v55, %v4334_v44 }
 0x155   : > { %v4092_v12 = vsel %vm4009_vm1, %v4091_v40, %v4090_v29  ;;  %v4346_v17 = vshrl.u32 %v10036_v57, %v4334_v44  ;;  %v4349_v23 = vshrl.u32 %v10037_v2, %v4334_v44  ;;  %vm993_vm15 = vcmp.lt.s32.totalorder %v10513_v5, 0 }
 0x156   : > { %v4095_v15 = vsel %vm10612_vm6, %v10241_v31, %v4092_v12  ;;  %v1053_v9 = vshrl.u32 %v1052_v50, 30  ;;  %v4338_v21 = vor.u32 %v4337_v16, %v4336_v38  ;;  %v4341_v22 = vor.u32 %v4340_v27, %v4339_v10 }
 0x157   : > { %9780 = vcosq.f32 %v4095_v15  ;;  %v4344_v43 = vor.u32 %v4343_v63, %v4342_v13  ;;  %v4347_v28 = vor.u32 %v4346_v17, %v4345_v14  ;;  %v4350_v61 = vor.u32 %v4349_v23, %v4348_v33  ;;  %v10748_v23 = vpop.f32.mrb[6].mxu0 }
 0x158   : > { %9782 = vsinq.f32 %v4095_v15  ;;  %v1054_v7 = vshll.u32 %v1053_v9, 30  ;;  %vm4351_vm1 = vcmp.lt.s32.totalorder %v10680_v8, 1  ;;  %v4101_v20 = vand.u32 3, %v4100_v18 }
 0x159   : > { %vm4354_vm2 = vcmp.lt.s32.totalorder %v10680_v8, 4  ;;  %v4359_v39 = vsel %vm4351_vm1, %v4338_v21, %v4341_v22  ;;  %vm10706_vm3 = vcmp.le.f32.partialorder %v991_v24, 0.7853982  ;;  %vm4353_vm4 = vcmp.lt.s32.totalorder %v10680_v8, 3 }
 0x15a   : > { %v10699_v30 = vsub.s32 %v1051_v6, %v1054_v7  ;;  %v4360_v49 = vsel %vm4354_vm2, %v4347_v28, 920167782  ;;  %v4367_v42 = vshll.u32 %v4327_v41, 8  ;;  %v10713_v56 = vadd.f32 %v10066_v1, %v10238_v26 }
 0x15b   : > { %vm4352_vm5 = vcmp.lt.s32.totalorder %v10680_v8, 2  ;;  %v4361_v37 = vsel %vm4353_vm4, %v4344_v43, %v4360_v49  ;;  %v4363_v24 = vsel %vm4351_vm1, %v4341_v22, %v4344_v43  ;;  %v1077_v11 = vsub.s32 4, %v1053_v9 }
 0x15c   : > { %v1057_v58 = vsub.s32 0, %v10699_v30  ;;  %v4356_v62 = vsel %vm4354_vm2, %v4344_v43, 2102212464  ;;  %v4362_v45 = vsel %vm4352_vm5, %v4359_v39, %v4361_v37  ;;  %v4364_v35 = vsel %vm4354_vm2, %v4350_v61, 1326507024 }
 0x15d   : > { %vm4099_vm8 = vweird.f32 %v10241_v31  ;;  %vm4102_vm6 = vcmp.lt.s32.totalorder %v4101_v20, 2  ;;  %v4335_v29 = vshrl.u32 %v10032_v47, %v4334_v44  ;;  %v4365_v4 = vsel %vm4353_vm4, %v4347_v28, %v4364_v35 }
 0x15e   : > { %v9090_v26 = vmin.u32 %v1057_v58, %v10699_v30  ;;  %v4366_v46 = vsel %vm4352_vm5, %v4363_v24, %v4365_v4  ;;  %v10730_v18 = vmul.u32.u64.low %v4367_v42, %v4362_v45  ;;  %v10731_v6 = vmul.u32.u64.high %v4367_v42, %v4362_v45, %v10730_v18 }
 0x15f   : > { %v890_v41 = vand.u32 2139095040, %v10713_v56  ;;  %v4355_v38 = vsel %vm4351_vm1, %v4335_v29, %v4338_v21  ;;  %v4357_v50 = vsel %vm4353_vm4, %v4341_v22, %v4356_v62  ;;  %v887_v44 = vand.u32 2147483647, %v10713_v56 }
 0x160   : > { %v1059_v40 = vclz %v9090_v26  ;;  %v1078_v13 = vsel %vm993_vm15, %v1077_v11, %v1053_v9  ;;  %v10742_v14 = vmul.u32.u64.low %v4367_v42, %v4366_v46  ;;  %v10743_v12 = vmul.u32.u64.high %v4367_v42, %v4366_v46, %v10742_v14 }
 0x161   : > { %v9781_v10 = vpop.eup %9780  ;;  %v891_v16 = vshrl.u32 %v890_v41, 23  ;;  %vm4103_vm9 = vcmp.eq.s32.totalorder %v4101_v20, 0  ;;  %vm4106_vm10 = vcmp.eq.s32.totalorder %v4101_v20, 2  ;;  %v4358_v17 = vsel %vm4352_vm5, %v4355_v38, %v4357_v50 }
 0x162   : > { %v9783_v27 = vpop.eup %9782  ;;  %v4107_v33 = vxor.u32 2147483648, %v9781_v10  ;;  %v9091_v15 = vadd.s32 4294967294, %v1059_v40  ;;  %v4377_v21 = vadd.s32 1, %v10731_v6  ;;  %v1047_v9 = vadd.s32 %v10643_v19, %v10652_v25 }
 0x163   : > { %v4104_v63 = vxor.u32 2147483648, %v9783_v27  ;;  %v9085_v22 = vadd.s32 4294967169, %v891_v16  ;;  %v1080_v43 = vsel %vm10706_vm3, 0, %v1078_v13  ;;  %vm4376_vm12 = vc.u32 %v10743_v12, %v10730_v18 }
 0x164   : > { %v4108_v7 = vsel %vm4106_vm10, %v4107_v33, %v9783_v27  ;;  %vm9092_vm11 = vcmp.lt.s32.totalorder %v9091_v15, 0  ;;  %v894_v8 = vand.u32 8388607, %v887_v44  ;;  %v4374_v37 = vmul.u32 %v4367_v42, %v4358_v17 }
 0x165   : > { %v4105_v28 = vsel %vm4103_vm9, %v9781_v10, %v4104_v63  ;;  %v1062_v61 = vsel %vm9092_vm11, 0, %v9091_v15  ;;  %v4378_v24 = vsel %vm4376_vm12, %v4377_v21, %v10731_v6  ;;  %v897_v11 = vadd.s32 1, %v9085_v22 }
 0x166   : > { %v4109_v39 = vsel %vm4102_vm6, %v4105_v28, %v4108_v7  ;;  %v1063_v49 = vsub.s32 32, %v1062_v61  ;;  %v1067_v58 = vsub.s32 4294967266, %v1062_v61  ;;  %v1064_v25 = vshll.u32 %v10699_v30, %v1062_v61 }
 0x167   : > { %v4110_v19 = vsel %vm4099_vm8, nan, %v4109_v39  ;;  %v4379_v26 = vadd.s32 %v4378_v24, %v4374_v37  ;;  %v1084_v20 = vadd.s32 3, %v1080_v43  ;;  %v895_v29 = vor.u32 8388608, %v894_v8 }
 0x168   : > { %v7367_v62 = vsel %vm18_vm0, %v10241_v31, %v4110_v19  ;;  %v1065_v45 = vshrl.u32 %v1047_v9, %v1063_v49  ;;  %v1068_v35 = vadd.s32 127, %v1067_v58  ;;  %vm898_vm13 = vcmp.gt.s32.totalorder %v897_v11, 0 }
 0x169   : > { %7433 = vst.msk [vmem:[%s10548_s19 + $0x100] sm:$0xff] %vm7400_vm7, %v7367_v62  ;;  %v10770_v42 = vadd.f32 %v10066_v1, %v10244_v36  ;;  %v4380_v46 = vadd.s32 536870912, %v4379_v26  ;;  %v899_v6 = vsel %vm898_vm13, %v897_v11, 0  ;;  %v10772_v31 = vand.u32 3, %v1084_v20 }
 0x16a   : > { %v1066_v30 = vor.u32 %v1065_v45, %v1064_v25  ;;  %v1069_v4 = vshll.u32 %v1068_v35, 23  ;;  %v901_v41 = vand.u32 31, %v899_v6  ;;  %vm4321_vm14 = vcmp.lt.s32.totalorder %v10562_v34, 0 }
 0x16b   : > { %v4381_v38 = vshrl.u32 %v4380_v46, 30  ;;  %v4215_v10 = vand.u32 2147483647, %v10770_v42  ;;  %v10776_v27 = vshll.u32 %v895_v29, 8  ;;  %v4218_v63 = vand.u32 2139095040, %v10770_v42 }
 0x16c   : > { %v1070_v40 = vor.u32 4788187, %v1069_v4  ;;  %v902_v50 = vsub.s32 32, %v901_v41  ;;  %v1073_v14 = vcvt.s32.f32 %v1066_v30  ;;  %v904_v22 = vshll.u32 %v10032_v47, %v901_v41 }
 0x16d   : > { %v4382_v16 = vshll.u32 %v4381_v38, 30  ;;  %v4405_v9 = vsub.s32 4, %v4381_v38  ;;  %v900_v43 = vshrl.u32 %v899_v6, 5  ;;  %v907_v28 = vshll.u32 %v10033_v51, %v901_v41 }
 0x16e   : > { %v1071_v13 = vand.u32 2147483647, %v1070_v40  ;;  %v905_v36 = vshrl.u32 %v10033_v51, %v902_v50  ;;  %v908_v33 = vshrl.u32 %v10034_v53, %v902_v50  ;;  %v911_v15 = vshrl.u32 %v10035_v55, %v902_v50 }
 0x16f   : > { %v10782_v21 = vsub.s32 %v4379_v26, %v4382_v16  ;;  %v914_v7 = vshrl.u32 %v10036_v57, %v902_v50  ;;  %v910_v61 = vshll.u32 %v10034_v53, %v901_v41  ;;  %v913_v58 = vshll.u32 %v10035_v55, %v901_v41 }
 0x170   : > { %v1074_v17 = vmul.f32 %v1073_v14, %v1071_v13  ;;  %v906_v49 = vor.u32 %v905_v36, %v904_v22  ;;  %v909_v37 = vor.u32 %v908_v33, %v907_v28  ;;  %v916_v25 = vshll.u32 %v10036_v57, %v901_v41 }
 0x171   : > { %v4385_v39 = vsub.s32 0, %v10782_v21  ;;  %v912_v19 = vor.u32 %v911_v15, %v910_v61  ;;  %v917_v24 = vshrl.u32 %v10037_v2, %v902_v50  ;;  %vm10796_vm1 = vcmp.le.f32.partialorder %v4319_v48, 0.7853982 }
 0x172   : > { %v1075_v8 = vxor.u32 2147483648, %v1074_v17  ;;  %v915_v35 = vor.u32 %v914_v7, %v913_v58  ;;  %v4219_v26 = vshrl.u32 %v4218_v63, 23  ;;  %v4406_v29 = vsel %vm4321_vm14, %v4405_v9, %v4381_v38  ;;  %v10814_v7 = vpop.f32.mrb[6].mxu1 }
 0x173   : > { %v9218_v45 = vmin.u32 %v4385_v39, %v10782_v21  ;;  %v903_v30 = vshrl.u32 %v10032_v47, %v902_v50  ;;  %v918_v4 = vor.u32 %v917_v24, %v916_v25  ;;  %vm922_vm2 = vcmp.lt.s32.totalorder %v900_v43, 4 }
 0x174   : > { %v1076_v11 = vsel %vm993_vm15, %v1075_v8, %v1074_v17  ;;  %vm919_vm15 = vcmp.lt.s32.totalorder %v900_v43, 1  ;;  %vm920_vm4 = vcmp.lt.s32.totalorder %v900_v43, 2  ;;  %v924_v48 = vsel %vm922_vm2, %v912_v19, 2102212464 }
 0x175   : > { %v1079_v20 = vsel %vm10706_vm3, %v10513_v5, %v1076_v11  ;;  %v4387_v46 = vclz %v9218_v45  ;;  %v927_v6 = vsel %vm919_vm15, %v906_v49, %v909_v37  ;;  %vm921_vm5 = vcmp.lt.s32.totalorder %v900_v43, 3 }
 0x176   : > { %9784 = vcosq.f32 %v1079_v20  ;;  %v928_v40 = vsel %vm922_vm2, %v915_v35, 920167782  ;;  %v931_v13 = vsel %vm919_vm15, %v909_v37, %v912_v19  ;;  %v923_v59 = vsel %vm919_vm15, %v903_v30, %v906_v49 }
 0x177   : > { %9786 = vsinq.f32 %v1079_v20  ;;  %v9219_v41 = vadd.s32 4294967294, %v4387_v46  ;;  %v929_v14 = vsel %vm921_vm5, %v912_v19, %v928_v40  ;;  %v932_v16 = vsel %vm922_vm2, %v918_v4, 1326507024 }
 0x178   : > { %v9213_v36 = vadd.s32 4294967169, %v4219_v26  ;;  %v925_v38 = vsel %vm921_vm5, %v909_v37, %v924_v48  ;;  %v930_v50 = vsel %vm920_vm4, %v927_v6, %v929_v14  ;;  %v933_v33 = vsel %vm921_vm5, %v915_v35, %v932_v16 }
 0x179   : > { %vm9220_vm3 = vcmp.lt.s32.totalorder %v9219_v41, 0  ;;  %v934_v63 = vsel %vm920_vm4, %v931_v13, %v933_v33  ;;  %v10810_v17 = vmul.u32.u64.low %v10776_v27, %v930_v50  ;;  %v10811_v22 = vmul.u32.u64.high %v10776_v27, %v930_v50, %v10810_v17 }
 0x17a   : > { %v4390_v15 = vsel %vm9220_vm3, 0, %v9219_v41  ;;  %v4375_v9 = vadd.s32 %v10730_v18, %v10743_v12  ;;  %v4225_v8 = vadd.s32 1, %v9213_v36  ;;  %vm1083_vm8 = vweird.f32 %v10513_v5 }
 0x17b   : > { %v4391_v28 = vsub.s32 32, %v4390_v15  ;;  %v4395_v61 = vsub.s32 4294967266, %v4390_v15  ;;  %v4408_v39 = vsel %vm10796_vm1, 0, %v4406_v29  ;;  %v926_v49 = vsel %vm920_vm4, %v923_v59, %v925_v38 }
 0x17c   : > { %v10823_v58 = vmul.u32.u64.low %v10776_v27, %v934_v63  ;;  %v10824_v37 = vmul.u32.u64.high %v10776_v27, %v934_v63, %v10823_v58  ;;  %v4392_v19 = vshll.u32 %v10782_v21, %v4390_v15  ;;  %vm4226_vm6 = vcmp.gt.s32.totalorder %v4225_v8, 0 }
 0x17d   : > { %v4393_v25 = vshrl.u32 %v4375_v9, %v4391_v28  ;;  %v4396_v24 = vadd.s32 127, %v4395_v61  ;;  %vm1086_vm9 = vcmp.lt.s32.totalorder %v10772_v31, 2  ;;  %v945_v18 = vadd.s32 1, %v10811_v22 }
 0x17e   : > { %v4222_v12 = vand.u32 8388607, %v4215_v10  ;;  %v4227_v11 = vsel %vm4226_vm6, %v4225_v8, 0  ;;  %v4412_v26 = vadd.s32 3, %v4408_v39  ;;  %vm1087_vm10 = vcmp.eq.s32.totalorder %v10772_v31, 0 }
 0x17f   : > { %v4394_v43 = vor.u32 %v4393_v25, %v4392_v19  ;;  %v4397_v35 = vshll.u32 %v4396_v24, 23  ;;  %v4229_v20 = vand.u32 31, %v4227_v11  ;;  %v942_v30 = vmul.u32 %v10776_v27, %v926_v49 }
 0x180   : > { %v9785_v45 = vpop.eup %9784  ;;  %vm944_vm11 = vc.u32 %v10824_v37, %v10810_v17  ;;  %vm1090_vm12 = vcmp.eq.s32.totalorder %v10772_v31, 2  ;;  %v4223_v40 = vor.u32 8388608, %v4222_v12  ;;  %v10837_v36 = vand.u32 3, %v4412_v26 }
 0x181   : > { %v9787_v29 = vpop.eup %9786  ;;  %v1091_v21 = vxor.u32 2147483648, %v9785_v45  ;;  %v4398_v46 = vor.u32 4788187, %v4397_v35  ;;  %v946_v48 = vsel %vm944_vm11, %v945_v18, %v10811_v22  ;;  %v4230_v13 = vsub.s32 32, %v4229_v20 }
 0x182   : > { %v1088_v4 = vxor.u32 2147483648, %v9787_v29  ;;  %v947_v41 = vadd.s32 %v946_v48, %v942_v30  ;;  %v4401_v16 = vcvt.s32.f32 %v4394_v43  ;;  %v10841_v50 = vshrl.u32 %v4227_v11, 5 }
 0x183   : > { %v1092_v6 = vsel %vm1090_vm12, %v1091_v21, %v9787_v29  ;;  %v4399_v14 = vand.u32 2147483647, %v4398_v46  ;;  %v4233_v33 = vshrl.u32 %v10033_v51, %v4230_v13  ;;  %vm889_vm13 = vcmp.lt.s32.totalorder %v10713_v56, 0 }
 0x184   : > { %v1089_v59 = vsel %vm1087_vm10, %v9785_v45, %v1088_v4  ;;  %v948_v38 = vadd.s32 536870912, %v947_v41  ;;  %v4236_v22 = vshrl.u32 %v10034_v53, %v4230_v13  ;;  %v4239_v9 = vshrl.u32 %v10035_v55, %v4230_v13 }
 0x185   : > { %v1093_v27 = vsel %vm1086_vm9, %v1089_v59, %v1092_v6  ;;  %v4402_v63 = vmul.f32 %v4401_v16, %v4399_v14  ;;  %v4232_v61 = vshll.u32 %v10032_v47, %v4229_v20  ;;  %v4235_v8 = vshll.u32 %v10033_v51, %v4229_v20 }
 0x186   : > { %v1094_v15 = vsel %vm1083_vm8, nan, %v1093_v27  ;;  %v949_v28 = vshrl.u32 %v948_v38, 30  ;;  %v4238_v49 = vshll.u32 %v10034_v53, %v4229_v20  ;;  %v4241_v58 = vshll.u32 %v10035_v55, %v4229_v20 }
 0x187   : > { %v7338_v31 = vsel %vm18_vm0, %v10513_v5, %v1094_v15  ;;  %v4403_v39 = vxor.u32 2147483648, %v4402_v63  ;;  %v4242_v19 = vshrl.u32 %v10036_v57, %v4230_v13  ;;  %v4234_v24 = vor.u32 %v4233_v33, %v4232_v61 }
 0x188   : > { %7404 = vst.msk [vmem:[%s10548_s19 + $0x18] sm:$0xff] %vm7400_vm7, %v7338_v31  ;;  %v950_v25 = vshll.u32 %v949_v28, 30  ;;  %v4237_v18 = vor.u32 %v4236_v22, %v4235_v8  ;;  %v4245_v12 = vshrl.u32 %v10037_v2, %v4230_v13  ;;  %v4240_v11 = vor.u32 %v4239_v9, %v4238_v49 }
 0x189   : > { %v4404_v5 = vsel %vm4321_vm14, %v4403_v39, %v4402_v63  ;;  %v4243_v45 = vor.u32 %v4242_v19, %v4241_v58  ;;  %v4244_v43 = vshll.u32 %v10036_v57, %v4229_v20  ;;  %v973_v29 = vsub.s32 4, %v949_v28 }
 0x18a   : > { %v4407_v35 = vsel %vm10796_vm1, %v10562_v34, %v4404_v5  ;;  %v10866_v26 = vsub.s32 %v947_v41, %v950_v25  ;;  %v10868_v21 = vshll.u32 %v4223_v40, 8  ;;  %v4231_v30 = vshrl.u32 %v10032_v47, %v4230_v13 }
 0x18b   : > { %9788 = vcosq.f32 %v4407_v35  ;;  %v4246_v4 = vor.u32 %v4245_v12, %v4244_v43  ;;  %v10873_v46 = vadd.f32 %v10324_v52, %v10066_v1  ;;  %vm4247_vm14 = vcmp.lt.s32.totalorder %v10841_v50, 1 }
 0x18c   : > { %9790 = vsinq.f32 %v4407_v35  ;;  %v953_v20 = vsub.s32 0, %v10866_v26  ;;  %vm4250_vm1 = vcmp.lt.s32.totalorder %v10841_v50, 4  ;;  %vm4249_vm15 = vcmp.lt.s32.totalorder %v10841_v50, 3 }
 0x18d   : > { %v4252_v62 = vsel %vm4250_vm1, %v4240_v11, 2102212464  ;;  %v4255_v48 = vsel %vm4247_vm14, %v4234_v24, %v4237_v18  ;;  %v4256_v6 = vsel %vm4250_vm1, %v4243_v45, 920167782  ;;  %v974_v52 = vsel %vm889_vm13, %v973_v29, %v949_v28 }
 0x18e   : > { %v9086_v41 = vmin.u32 %v953_v20, %v10866_v26  ;;  %vm4248_vm2 = vcmp.lt.s32.totalorder %v10841_v50, 2  ;;  %v4257_v40 = vsel %vm4249_vm15, %v4240_v11, %v4256_v6  ;;  %v4259_v59 = vsel %vm4247_vm14, %v4237_v18, %v4240_v11  ;;  %v10931_v20 = vpop.f32.mrb[7].mxu0 }
 0x18f   : > { %v4258_v13 = vsel %vm4248_vm2, %v4255_v48, %v4257_v40  ;;  %v4260_v14 = vsel %vm4250_vm1, %v4246_v4, 1326507024  ;;  %v1202_v16 = vand.u32 2139095040, %v10873_v46  ;;  %vm10894_vm4 = vcmp.le.f32.partialorder %v887_v44, 0.7853982 }
 0x190   : > { %v955_v38 = vclz %v9086_v41  ;;  %v4251_v33 = vsel %vm4247_vm14, %v4231_v30, %v4234_v24  ;;  %v4253_v15 = vsel %vm4249_vm15, %v4237_v18, %v4252_v62  ;;  %vm4414_vm5 = vcmp.lt.s32.totalorder %v10837_v36, 2 }
 0x191   : > { %v4261_v63 = vsel %vm4249_vm15, %v4243_v45, %v4260_v14  ;;  %v10906_v22 = vmul.u32.u64.low %v10868_v21, %v4258_v13  ;;  %v10907_v9 = vmul.u32.u64.high %v10868_v21, %v4258_v13, %v10906_v22  ;;  %vm4411_vm3 = vweird.f32 %v10562_v34 }
 0x192   : > { %v9087_v44 = vadd.s32 4294967294, %v955_v38  ;;  %v976_v31 = vsel %vm10894_vm4, 0, %v974_v52  ;;  %v4262_v28 = vsel %vm4248_vm2, %v4259_v59, %v4261_v63  ;;  %v1203_v61 = vshrl.u32 %v1202_v16, 23 }
 0x193   : > { %vm4415_vm8 = vcmp.eq.s32.totalorder %v10837_v36, 0  ;;  %v4254_v8 = vsel %vm4248_vm2, %v4251_v33, %v4253_v15  ;;  %v10919_v39 = vmul.u32.u64.low %v10868_v21, %v4262_v28  ;;  %v10920_v49 = vmul.u32.u64.high %v10868_v21, %v4262_v28, %v10919_v39 }
 0x194   : > { %vm4418_vm6 = vcmp.eq.s32.totalorder %v10837_v36, 2  ;;  %vm9088_vm9 = vcmp.lt.s32.totalorder %v9087_v44, 0  ;;  %v1199_v58 = vand.u32 2147483647, %v10873_v46  ;;  %v9097_v19 = vadd.s32 4294967169, %v1203_v61 }
 0x195   : > { %v9789_v25 = vpop.eup %9788  ;;  %v943_v24 = vadd.s32 %v10810_v17, %v10824_v37  ;;  %v958_v18 = vsel %vm9088_vm9, 0, %v9087_v44  ;;  %v980_v12 = vadd.s32 3, %v976_v31  ;;  %v4273_v5 = vadd.s32 1, %v10907_v9 }
 0x196   : > { %v9791_v50 = vpop.eup %9790  ;;  %v4419_v11 = vxor.u32 2147483648, %v9789_v25  ;;  %v959_v45 = vsub.s32 32, %v958_v18  ;;  %v963_v43 = vsub.s32 4294967266, %v958_v18  ;;  %v4270_v35 = vmul.u32 %v10868_v21, %v4254_v8 }
 0x197   : > { %v4416_v29 = vxor.u32 2147483648, %v9791_v50  ;;  %v960_v30 = vshll.u32 %v10866_v26, %v958_v18  ;;  %vm4272_vm10 = vc.u32 %v10920_v49, %v10906_v22  ;;  %v1209_v4 = vadd.s32 1, %v9097_v19 }
 0x198   : > { %v4420_v17 = vsel %vm4418_vm6, %v4419_v11, %v9791_v50  ;;  %v961_v37 = vshrl.u32 %v943_v24, %v959_v45  ;;  %v964_v62 = vadd.s32 127, %v963_v43  ;;  %v4274_v48 = vsel %vm4272_vm10, %v4273_v5, %v10907_v9 }
 0x199   : > { %v4417_v21 = vsel %vm4415_vm8, %v9789_v25, %v4416_v29  ;;  %v4275_v6 = vadd.s32 %v4274_v48, %v4270_v35  ;;  %v1206_v26 = vand.u32 8388607, %v1199_v58  ;;  %vm1210_vm11 = vcmp.gt.s32.totalorder %v1209_v4, 0 }
 0x19a   : > { %v4421_v41 = vsel %vm4414_vm5, %v4417_v21, %v4420_v17  ;;  %v962_v52 = vor.u32 %v961_v37, %v960_v30  ;;  %v965_v40 = vshll.u32 %v964_v62, 23  ;;  %v1211_v13 = vsel %vm1210_vm11, %v1209_v4, 0 }
 0x19b   : > { %v4422_v59 = vsel %vm4411_vm3, nan, %v4421_v41  ;;  %v4276_v14 = vadd.s32 536870912, %v4275_v6  ;;  %v1213_v16 = vand.u32 31, %v1211_v13  ;;  %v10946_v38 = vadd.f32 %v10424_v60, %v10066_v1 }
 0x19c   : > { %v7370_v33 = vsel %vm18_vm0, %v10562_v34, %v4422_v59  ;;  %v966_v15 = vor.u32 4788187, %v965_v40  ;;  %v969_v44 = vcvt.s32.f32 %v962_v52  ;;  %v10955_v31 = vand.u32 3, %v980_v12 }
 0x19d   : > { %7436 = vst.msk [vmem:[%s10548_s19 + $0x118] sm:$0xff] %vm7400_vm7, %v7370_v33  ;;  %v10953_v36 = vshrl.u32 %v4276_v14, 30  ;;  %v1214_v63 = vsub.s32 32, %v1213_v16  ;;  %v1207_v28 = vor.u32 8388608, %v1206_v26  ;;  %v1216_v60 = vshll.u32 %v10032_v47, %v1213_v16 }
 0x19e   : > { %v967_v9 = vand.u32 2147483647, %v966_v15  ;;  %v4530_v39 = vand.u32 2139095040, %v10946_v38  ;;  %v1219_v12 = vshll.u32 %v10033_v51, %v1213_v16  ;;  %v1222_v5 = vshll.u32 %v10034_v53, %v1213_v16 }
 0x19f   : > { %v4278_v61 = vshll.u32 %v10953_v36, 30  ;;  %v1217_v8 = vshrl.u32 %v10033_v51, %v1214_v63  ;;  %v1220_v19 = vshrl.u32 %v10034_v53, %v1214_v63  ;;  %v1223_v25 = vshrl.u32 %v10035_v55, %v1214_v63 }
 0x1a0   : > { %v970_v34 = vmul.f32 %v969_v44, %v967_v9  ;;  %v1226_v24 = vshrl.u32 %v10036_v57, %v1214_v63  ;;  %v1229_v50 = vshrl.u32 %v10037_v2, %v1214_v63  ;;  %v1212_v45 = vshrl.u32 %v1211_v13, 5 }
 0x1a1   : > { %v10964_v18 = vsub.s32 %v4275_v6, %v4278_v61  ;;  %v1225_v43 = vshll.u32 %v10035_v55, %v1213_v16  ;;  %v1228_v35 = vshll.u32 %v10036_v57, %v1213_v16  ;;  %v1218_v30 = vor.u32 %v1217_v8, %v1216_v60 }
 0x1a2   : > { %v971_v11 = vxor.u32 2147483648, %v970_v34  ;;  %v1221_v4 = vor.u32 %v1220_v19, %v1219_v12  ;;  %v1224_v17 = vor.u32 %v1223_v25, %v1222_v5  ;;  %v4271_v62 = vadd.s32 %v10906_v22, %v10920_v49 }
 0x1a3   : > { %v4281_v29 = vsub.s32 0, %v10964_v18  ;;  %v1227_v48 = vor.u32 %v1226_v24, %v1225_v43  ;;  %v1247_v21 = vshll.u32 %v1207_v28, 8  ;;  %v1230_v41 = vor.u32 %v1229_v50, %v1228_v35 }
 0x1a4   : > { %v972_v37 = vsel %vm889_vm13, %v971_v11, %v970_v34  ;;  %v4531_v52 = vshrl.u32 %v4530_v39, 23  ;;  %v1215_v40 = vshrl.u32 %v10032_v47, %v1214_v63  ;;  %vm1231_vm12 = vcmp.lt.s32.totalorder %v1212_v45, 1  ;;  %v10982_v63 = vpop.f32.mrb[7].mxu1 }
 0x1a5   : > { %v975_v6 = vsel %vm10894_vm4, %v10713_v56, %v972_v37  ;;  %v9214_v26 = vmin.u32 %v4281_v29, %v10964_v18  ;;  %vm1234_vm14 = vcmp.lt.s32.totalorder %v1212_v45, 4  ;;  %v1239_v14 = vsel %vm1231_vm12, %v1218_v30, %v1221_v4 }
 0x1a6   : > { %9792 = vcosq.f32 %v975_v6  ;;  %v1236_v59 = vsel %vm1234_vm14, %v1224_v17, 2102212464  ;;  %vm1232_vm13 = vcmp.lt.s32.totalorder %v1212_v45, 2  ;;  %vm1233_vm1 = vcmp.lt.s32.totalorder %v1212_v45, 3 }
 0x1a7   : > { %9794 = vsinq.f32 %v975_v6  ;;  %v4283_v13 = vclz %v9214_v26  ;;  %v1240_v22 = vsel %vm1234_vm14, %v1227_v48, 920167782  ;;  %v1243_v49 = vsel %vm1231_vm12, %v1221_v4, %v1224_v17 }
 0x1a8   : > { %v1235_v27 = vsel %vm1231_vm12, %v1215_v40, %v1218_v30  ;;  %v1241_v33 = vsel %vm1233_vm1, %v1224_v17, %v1240_v22  ;;  %v1244_v15 = vsel %vm1234_vm14, %v1230_v41, 1326507024  ;;  %v1237_v9 = vsel %vm1233_vm1, %v1221_v4, %v1236_v59 }
 0x1a9   : > { %v9215_v16 = vadd.s32 4294967294, %v4283_v13  ;;  %v1242_v44 = vsel %vm1232_vm13, %v1239_v14, %v1241_v33  ;;  %v1245_v28 = vsel %vm1233_vm1, %v1227_v48, %v1244_v15  ;;  %v9225_v61 = vadd.s32 4294967169, %v4531_v52 }
 0x1aa   : > { %v1246_v60 = vsel %vm1232_vm13, %v1243_v49, %v1245_v28  ;;  %v10985_v8 = vmul.u32.u64.low %v1247_v21, %v1242_v44  ;;  %v10986_v39 = vmul.u32.u64.high %v1247_v21, %v1242_v44, %v10985_v8  ;;  %v4301_v19 = vsub.s32 4, %v10953_v36 }
 0x1ab   : > { %vm9216_vm15 = vcmp.lt.s32.totalorder %v9215_v16, 0  ;;  %v10990_v25 = vmul.u32.u64.low %v1247_v21, %v1246_v60  ;;  %v10991_v24 = vmul.u32.u64.high %v1247_v21, %v1246_v60, %v10990_v25  ;;  %v1238_v50 = vsel %vm1232_vm13, %v1235_v27, %v1237_v9 }
 0x1ac   : > { %v4286_v34 = vsel %vm9216_vm15, 0, %v9215_v16  ;;  %v4537_v11 = vadd.s32 1, %v9225_v61  ;;  %vm983_vm2 = vcmp.eq.s32.totalorder %v10955_v31, 0  ;;  %vm10997_vm4 = vcmp.le.f32.partialorder %v4215_v10, 0.7853982 }
 0x1ad   : > { %v4287_v12 = vsub.s32 32, %v4286_v34  ;;  %v4291_v5 = vsub.s32 4294967266, %v4286_v34  ;;  %vm4217_vm5 = vcmp.lt.s32.totalorder %v10770_v42, 0  ;;  %v4288_v35 = vshll.u32 %v10964_v18, %v4286_v34 }
 0x1ae   : > { %v1257_v4 = vadd.s32 1, %v10986_v39  ;;  %vm4538_vm3 = vcmp.gt.s32.totalorder %v4537_v11, 0  ;;  %v4302_v17 = vsel %vm4217_vm5, %v4301_v19, %v10953_v36  ;;  %v1254_v37 = vmul.u32 %v1247_v21, %v1238_v50 }
 0x1af   : > { %v4289_v29 = vshrl.u32 %v4271_v62, %v4287_v12  ;;  %v4292_v30 = vadd.s32 127, %v4291_v5  ;;  %vm1256_vm8 = vc.u32 %v10991_v24, %v10985_v8  ;;  %v4539_v10 = vsel %vm4538_vm3, %v4537_v11, 0 }
 0x1b0   : > { %v9793_v45 = vpop.eup %9792  ;;  %v1258_v18 = vsel %vm1256_vm8, %v1257_v4, %v10986_v39  ;;  %vm986_vm6 = vcmp.eq.s32.totalorder %v10955_v31, 2  ;;  %v4541_v40 = vand.u32 31, %v4539_v10  ;;  %v4304_v36 = vsel %vm10997_vm4, 0, %v4302_v17 }
 0x1b1   : > { %v9795_v48 = vpop.eup %9794  ;;  %v987_v6 = vxor.u32 2147483648, %v9793_v45  ;;  %v4290_v26 = vor.u32 %v4289_v29, %v4288_v35  ;;  %v4293_v41 = vshll.u32 %v4292_v30, 23  ;;  %v1259_v52 = vadd.s32 %v1258_v18, %v1254_v37 }
 0x1b2   : > { %v984_v62 = vxor.u32 2147483648, %v9795_v48  ;;  %v4527_v21 = vand.u32 2147483647, %v10946_v38  ;;  %vm982_vm9 = vcmp.lt.s32.totalorder %v10955_v31, 2  ;;  %v4542_v49 = vsub.s32 32, %v4541_v40 }
 0x1b3   : > { %v988_v13 = vsel %vm986_vm6, %v987_v6, %v9795_v48  ;;  %v4294_v59 = vor.u32 4788187, %v4293_v41  ;;  %v1260_v22 = vadd.s32 536870912, %v1259_v52  ;;  %vm979_vm10 = vweird.f32 %v10713_v56 }
 0x1b4   : > { %v985_v14 = vsel %vm983_vm2, %v9793_v45, %v984_v62  ;;  %v4297_v33 = vcvt.s32.f32 %v4290_v26  ;;  %v4308_v9 = vadd.s32 3, %v4304_v36  ;;  %v4545_v28 = vshrl.u32 %v10033_v51, %v4542_v49 }
 0x1b5   : > { %v989_v16 = vsel %vm982_vm9, %v985_v14, %v988_v13  ;;  %v4295_v27 = vand.u32 2147483647, %v4294_v59  ;;  %v1261_v44 = vshrl.u32 %v1260_v22, 30  ;;  %v4534_v31 = vand.u32 8388607, %v4527_v21 }
 0x1b6   : > { %v990_v15 = vsel %vm979_vm10, nan, %v989_v16  ;;  %v4548_v39 = vshrl.u32 %v10034_v53, %v4542_v49  ;;  %v4540_v19 = vshrl.u32 %v4539_v10, 5  ;;  %v4544_v25 = vshll.u32 %v10032_v47, %v4541_v40 }
 0x1b7   : > { %v7337_v61 = vsel %vm18_vm0, %v10713_v56, %v990_v15  ;;  %v4298_v60 = vmul.f32 %v4297_v33, %v4295_v27  ;;  %v1262_v34 = vshll.u32 %v1261_v44, 30  ;;  %v4551_v12 = vshrl.u32 %v10035_v55, %v4542_v49 }
 0x1b8   : > { %7403 = vst.msk [vmem:[%s10548_s19 + $0x10] sm:$0xff] %vm7400_vm7, %v7337_v61  ;;  %v4547_v50 = vshll.u32 %v10033_v51, %v4541_v40  ;;  %v4553_v11 = vshll.u32 %v10035_v55, %v4541_v40  ;;  %v4554_v56 = vshrl.u32 %v10036_v57, %v4542_v49  ;;  %v4546_v29 = vor.u32 %v4545_v28, %v4544_v25 }
 0x1b9   : > { %v4299_v5 = vxor.u32 2147483648, %v4298_v60  ;;  %v11032_v35 = vsub.s32 %v1259_v52, %v1262_v34  ;;  %v4550_v30 = vshll.u32 %v10034_v53, %v4541_v40  ;;  %v4557_v4 = vshrl.u32 %v10037_v2, %v4542_v49 }
 0x1ba   : > { %vm1201_vm11 = vcmp.lt.s32.totalorder %v10873_v46, 0  ;;  %v4549_v17 = vor.u32 %v4548_v39, %v4547_v50  ;;  %v4555_v37 = vor.u32 %v4554_v56, %v4553_v11  ;;  %v4556_v10 = vshll.u32 %v10036_v57, %v4541_v40 }
 0x1bb   : > { %v4300_v45 = vsel %vm4217_vm5, %v4299_v5, %v4298_v60  ;;  %v11043_v6 = vand.u32 3, %v4308_v9  ;;  %v1265_v26 = vsub.s32 0, %v11032_v35  ;;  %v4552_v41 = vor.u32 %v4551_v12, %v4550_v30 }
 0x1bc   : > { %v4303_v48 = vsel %vm10997_vm4, %v10770_v42, %v4300_v45  ;;  %v4535_v18 = vor.u32 8388608, %v4534_v31  ;;  %v4558_v62 = vor.u32 %v4557_v4, %v4556_v10  ;;  %v11048_v52 = vadd.f32 %v10066_v1, %v10537_v32 }
 0x1bd   : > { %9796 = vcosq.f32 %v4303_v48  ;;  %vm11052_vm12 = vcmp.le.f32.partialorder %v1199_v58, 0.7853982  ;;  %v9098_v43 = vmin.u32 %v1265_v26, %v11032_v35  ;;  %vm4559_vm14 = vcmp.lt.s32.totalorder %v4540_v19, 1 }
 0x1be   : > { %9798 = vsinq.f32 %v4303_v48  ;;  %vm4562_vm13 = vcmp.lt.s32.totalorder %v4540_v19, 4  ;;  %v1285_v13 = vsub.s32 4, %v1261_v44  ;;  %v4543_v59 = vshrl.u32 %v10032_v47, %v4542_v49 }
 0x1bf   : > { %v4567_v36 = vsel %vm4559_vm14, %v4546_v29, %v4549_v17  ;;  %v4568_v14 = vsel %vm4562_vm13, %v4555_v37, 920167782  ;;  %v1267_v22 = vclz %v9098_v43  ;;  %vm4561_vm1 = vcmp.lt.s32.totalorder %v4540_v19, 3 }
 0x1c0   : > { %v4564_v32 = vsel %vm4562_vm13, %v4552_v41, 2102212464  ;;  %v4571_v16 = vsel %vm4559_vm14, %v4549_v17, %v4552_v41  ;;  %vm4560_vm15 = vcmp.lt.s32.totalorder %v4540_v19, 2  ;;  %v4569_v27 = vsel %vm4561_vm1, %v4552_v41, %v4568_v14 }
 0x1c1   : > { %v4572_v33 = vsel %vm4562_vm13, %v4558_v62, 1326507024  ;;  %v4575_v58 = vshll.u32 %v4535_v18, 8  ;;  %v9099_v15 = vadd.s32 4294967294, %v1267_v22  ;;  %v4563_v9 = vsel %vm4559_vm14, %v4543_v59, %v4546_v29 }
 0x1c2   : > { %v4570_v28 = vsel %vm4560_vm15, %v4567_v36, %v4569_v27  ;;  %v4573_v61 = vsel %vm4561_vm1, %v4555_v37, %v4572_v33  ;;  %vm4310_vm2 = vcmp.lt.s32.totalorder %v11043_v6, 2  ;;  %v4565_v60 = vsel %vm4561_vm1, %v4549_v17, %v4564_v32  ;;  %v11092_v32 = vpop.f32.mrb[8].mxu0 }
 0x1c3   : > { %v4574_v49 = vsel %vm4560_vm15, %v4571_v16, %v4573_v61  ;;  %v11061_v31 = vmul.u32.u64.low %v4575_v58, %v4570_v28  ;;  %v11062_v39 = vmul.u32.u64.high %v4575_v58, %v4570_v28, %v11061_v31  ;;  %vm9100_vm4 = vcmp.lt.s32.totalorder %v9099_v15, 0 }
 0x1c4   : > { %v1286_v34 = vsel %vm1201_vm11, %v1285_v13, %v1261_v44  ;;  %v11067_v25 = vmul.u32.u64.low %v4575_v58, %v4574_v49  ;;  %v11068_v12 = vmul.u32.u64.high %v4575_v58, %v4574_v49, %v11067_v25  ;;  %vm4311_vm5 = vcmp.eq.s32.totalorder %v11043_v6, 0 }
 0x1c5   : > { %vm4314_vm3 = vcmp.eq.s32.totalorder %v11043_v6, 2  ;;  %v1270_v5 = vsel %vm9100_vm4, 0, %v9099_v15  ;;  %v1098_v50 = vand.u32 2139095040, %v11048_v52  ;;  %v1255_v11 = vadd.s32 %v10985_v8, %v10991_v24 }
 0x1c6   : > { %v1271_v56 = vsub.s32 32, %v1270_v5  ;;  %v1275_v29 = vsub.s32 4294967266, %v1270_v5  ;;  %v4566_v30 = vsel %vm4560_vm15, %v4563_v9, %v4565_v60  ;;  %v1288_v44 = vsel %vm11052_vm12, 0, %v1286_v34 }
 0x1c7   : > { %v9797_v4 = vpop.eup %9796  ;;  %v4585_v45 = vadd.s32 1, %v11062_v39  ;;  %v1095_v17 = vand.u32 2147483647, %v11048_v52  ;;  %v1099_v37 = vshrl.u32 %v1098_v50, 23  ;;  %v1272_v26 = vshll.u32 %v11032_v35, %v1270_v5 }
 0x1c8   : > { %v9799_v10 = vpop.eup %9798  ;;  %v4315_v48 = vxor.u32 2147483648, %v9797_v4  ;;  %v1273_v41 = vshrl.u32 %v1255_v11, %v1271_v56  ;;  %v1276_v18 = vadd.s32 127, %v1275_v29  ;;  %v4582_v24 = vmul.u32 %v4575_v58, %v4566_v30 }
 0x1c9   : > { %v4312_v8 = vxor.u32 2147483648, %v9799_v10  ;;  %vm4584_vm8 = vc.u32 %v11068_v12, %v11061_v31  ;;  %v9093_v19 = vadd.s32 4294967169, %v1099_v37  ;;  %v11090_v22 = vadd.f32 %v10066_v1, %v10654_v54 }
 0x1ca   : > { %v4316_v62 = vsel %vm4314_vm3, %v4315_v48, %v9799_v10  ;;  %v1274_v43 = vor.u32 %v1273_v41, %v1272_v26  ;;  %v1277_v13 = vshll.u32 %v1276_v18, 23  ;;  %v4586_v59 = vsel %vm4584_vm8, %v4585_v45, %v11062_v39 }
 0x1cb   : > { %v4313_v36 = vsel %vm4311_vm5, %v9797_v4, %v4312_v8  ;;  %v4587_v14 = vadd.s32 %v4586_v59, %v4582_v24  ;;  %v1105_v35 = vadd.s32 1, %v9093_v19  ;;  %vm4307_vm6 = vweird.f32 %v10770_v42 }
 0x1cc   : > { %v4317_v16 = vsel %vm4310_vm2, %v4313_v36, %v4316_v62  ;;  %v1278_v27 = vor.u32 4788187, %v1277_v13  ;;  %v1292_v33 = vadd.s32 3, %v1288_v44  ;;  %v1102_v9 = vand.u32 8388607, %v1095_v17 }
 0x1cd   : > { %v4318_v58 = vsel %vm4307_vm6, nan, %v4317_v16  ;;  %v4588_v15 = vadd.s32 536870912, %v4587_v14  ;;  %vm1106_vm9 = vcmp.gt.s32.totalorder %v1105_v35, 0  ;;  %v1281_v61 = vcvt.s32.f32 %v1274_v43 }
 0x1ce   : > { %v7369_v54 = vsel %vm18_vm0, %v10770_v42, %v4318_v58  ;;  %v1279_v28 = vand.u32 2147483647, %v1278_v27  ;;  %v1107_v60 = vsel %vm1106_vm9, %v1105_v35, 0  ;;  %v4426_v39 = vand.u32 2139095040, %v11090_v22 }
 0x1cf   : > { %7435 = vst.msk [vmem:[%s10548_s19 + $0x110] sm:$0xff] %vm7400_vm7, %v7369_v54  ;;  %v11104_v49 = vshrl.u32 %v4588_v15, 30  ;;  %v1109_v6 = vand.u32 31, %v1107_v60  ;;  %v11108_v11 = vand.u32 3, %v1292_v33  ;;  %v1103_v56 = vor.u32 8388608, %v1102_v9 }
 0x1d0   : > { %v1282_v34 = vmul.f32 %v1281_v61, %v1279_v28  ;;  %v4423_v42 = vand.u32 2147483647, %v11090_v22  ;;  %v1108_v30 = vshrl.u32 %v1107_v60, 5  ;;  %v4427_v44 = vshrl.u32 %v4426_v39, 23 }
 0x1d1   : > { %v4590_v25 = vshll.u32 %v11104_v49, 30  ;;  %v1110_v5 = vsub.s32 32, %v1109_v6  ;;  %v1112_v37 = vshll.u32 %v10032_v47, %v1109_v6  ;;  %v1115_v18 = vshll.u32 %v10033_v51, %v1109_v6 }
 0x1d2   : > { %v1283_v50 = vxor.u32 2147483648, %v1282_v34  ;;  %v1118_v8 = vshll.u32 %v10034_v53, %v1109_v6  ;;  %v1121_v19 = vshll.u32 %v10035_v55, %v1109_v6  ;;  %v1124_v40 = vshll.u32 %v10036_v57, %v1109_v6 }
 0x1d3   : > { %v11111_v29 = vsub.s32 %v4587_v14, %v4590_v25  ;;  %v1113_v4 = vshrl.u32 %v10033_v51, %v1110_v5  ;;  %v1116_v10 = vshrl.u32 %v10034_v53, %v1110_v5  ;;  %v1119_v48 = vshrl.u32 %v10035_v55, %v1110_v5 }
 0x1d4   : > { %v1284_v45 = vsel %vm1201_vm11, %v1283_v50, %v1282_v34  ;;  %v1122_v62 = vshrl.u32 %v10036_v57, %v1110_v5  ;;  %v1125_v14 = vshrl.u32 %v10037_v2, %v1110_v5  ;;  %v11130_v35 = vshll.u32 %v1103_v56, 8  ;;  %v11137_v34 = vpop.f32.mrb[8].mxu1 }
 0x1d5   : > { %v1287_v26 = vsel %vm11052_vm12, %v10873_v46, %v1284_v45  ;;  %v4593_v41 = vsub.s32 0, %v11111_v29  ;;  %v1114_v24 = vor.u32 %v1113_v4, %v1112_v37  ;;  %v1117_v13 = vor.u32 %v1116_v10, %v1115_v18 }
 0x1d6   : > { %9800 = vcosq.f32 %v1287_v26  ;;  %v1120_v59 = vor.u32 %v1119_v48, %v1118_v8  ;;  %v1123_v36 = vor.u32 %v1122_v62, %v1121_v19  ;;  %v1111_v27 = vshrl.u32 %v10032_v47, %v1110_v5 }
 0x1d7   : > { %9802 = vsinq.f32 %v1287_v26  ;;  %v9226_v43 = vmin.u32 %v4593_v41, %v11111_v29  ;;  %vm1127_vm10 = vcmp.lt.s32.totalorder %v1108_v30, 1  ;;  %v9221_v33 = vadd.s32 4294967169, %v4427_v44 }
 0x1d8   : > { %vm1298_vm11 = vcmp.eq.s32.totalorder %v11108_v11, 2  ;;  %v1126_v58 = vor.u32 %v1125_v14, %v1124_v40  ;;  %vm1128_vm12 = vcmp.lt.s32.totalorder %v1108_v30, 2  ;;  %vm1129_vm14 = vcmp.lt.s32.totalorder %v1108_v30, 3 }
 0x1d9   : > { %v4595_v16 = vclz %v9226_v43  ;;  %vm1130_vm13 = vcmp.lt.s32.totalorder %v1108_v30, 4  ;;  %vm1295_vm1 = vcmp.eq.s32.totalorder %v11108_v11, 0  ;;  %v1135_v54 = vsel %vm1127_vm10, %v1114_v24, %v1117_v13 }
 0x1da   : > { %v1132_v9 = vsel %vm1130_vm13, %v1120_v59, 2102212464  ;;  %v1136_v28 = vsel %vm1130_vm13, %v1123_v36, 920167782  ;;  %vm4529_vm15 = vcmp.lt.s32.totalorder %v10946_v38, 0  ;;  %v1131_v61 = vsel %vm1127_vm10, %v1111_v27, %v1114_v24 }
 0x1db   : > { %v9227_v15 = vadd.s32 4294967294, %v4595_v16  ;;  %v1137_v60 = vsel %vm1129_vm14, %v1120_v59, %v1136_v28  ;;  %v1139_v6 = vsel %vm1127_vm10, %v1117_v13, %v1120_v59  ;;  %v1140_v39 = vsel %vm1130_vm13, %v1126_v58, 1326507024 }
 0x1dc   : > { %vm1291_vm2 = vweird.f32 %v10873_v46  ;;  %v1133_v25 = vsel %vm1129_vm14, %v1117_v13, %v1132_v9  ;;  %v1138_v5 = vsel %vm1128_vm12, %v1135_v54, %v1137_v60  ;;  %v1141_v50 = vsel %vm1129_vm14, %v1123_v36, %v1140_v39 }
 0x1dd   : > { %vm9228_vm4 = vcmp.lt.s32.totalorder %v9227_v15, 0  ;;  %v1142_v4 = vsel %vm1128_vm12, %v1139_v6, %v1141_v50  ;;  %v11145_v44 = vmul.u32.u64.low %v11130_v35, %v1138_v5  ;;  %v11146_v45 = vmul.u32.u64.high %v11130_v35, %v1138_v5, %v11145_v44 }
 0x1de   : > { %v4598_v56 = vsel %vm9228_vm4, 0, %v9227_v15  ;;  %v4583_v37 = vadd.s32 %v11061_v31, %v11068_v12  ;;  %v4613_v26 = vsub.s32 4, %v11104_v49  ;;  %v1134_v18 = vsel %vm1128_vm12, %v1131_v61, %v1133_v25 }
 0x1df   : > { %v4599_v10 = vsub.s32 32, %v4598_v56  ;;  %v4603_v48 = vsub.s32 4294967266, %v4598_v56  ;;  %v11154_v8 = vmul.u32.u64.low %v11130_v35, %v1142_v4  ;;  %v11155_v24 = vmul.u32.u64.high %v11130_v35, %v1142_v4, %v11154_v8 }
 0x1e0   : > { %v9801_v41 = vpop.eup %9800  ;;  %v4433_v19 = vadd.s32 1, %v9221_v33  ;;  %v4600_v13 = vshll.u32 %v11111_v29, %v4598_v56  ;;  %v1153_v31 = vadd.s32 1, %v11146_v45  ;;  %v11161_v12 = vand.u32 8388607, %v4423_v42 }
 0x1e1   : > { %v9803_v62 = vpop.eup %9802  ;;  %v1299_v43 = vxor.u32 2147483648, %v9801_v41  ;;  %v4601_v59 = vshrl.u32 %v4583_v37, %v4599_v10  ;;  %v4604_v36 = vadd.s32 127, %v4603_v48  ;;  %vm1294_vm3 = vcmp.lt.s32.totalorder %v11108_v11, 2 }
 0x1e2   : > { %v1296_v40 = vxor.u32 2147483648, %v9803_v62  ;;  %vm4434_vm5 = vcmp.gt.s32.totalorder %v4433_v19, 0  ;;  %v1150_v33 = vmul.u32 %v11130_v35, %v1134_v18  ;;  %vm1152_vm8 = vc.u32 %v11155_v24, %v11145_v44 }
 0x1e3   : > { %v1300_v30 = vsel %vm1298_vm11, %v1299_v43, %v9803_v62  ;;  %v4602_v14 = vor.u32 %v4601_v59, %v4600_v13  ;;  %v4605_v16 = vshll.u32 %v4604_v36, 23  ;;  %v4435_v27 = vsel %vm4434_vm5, %v4433_v19, 0 }
 0x1e4   : > { %v1297_v29 = vsel %vm1295_vm1, %v9801_v41, %v1296_v40  ;;  %v4614_v9 = vsel %vm4529_vm15, %v4613_v26, %v11104_v49  ;;  %v1154_v54 = vsel %vm1152_vm8, %v1153_v31, %v11146_v45  ;;  %vm11179_vm6 = vcmp.le.f32.partialorder %v4527_v21, 0.7853982 }
 0x1e5   : > { %v1301_v58 = vsel %vm1294_vm3, %v1297_v29, %v1300_v30  ;;  %v4606_v15 = vor.u32 4788187, %v4605_v16  ;;  %v1155_v35 = vadd.s32 %v1154_v54, %v1150_v33  ;;  %v4437_v61 = vand.u32 31, %v4435_v27 }
 0x1e6   : > { %v1302_v28 = vsel %vm1291_vm2, nan, %v1301_v58  ;;  %v4609_v39 = vcvt.s32.f32 %v4602_v14  ;;  %v4431_v49 = vor.u32 8388608, %v11161_v12  ;;  %v4616_v25 = vsel %vm11179_vm6, 0, %v4614_v9 }
 0x1e7   : > { %v7340_v60 = vsel %vm18_vm0, %v10873_v46, %v1302_v28  ;;  %v4607_v6 = vand.u32 2147483647, %v4606_v15  ;;  %v1156_v5 = vadd.s32 536870912, %v1155_v35  ;;  %v4436_v21 = vshrl.u32 %v4435_v27, 5 }
 0x1e8   : > { %7406 = vst.msk [vmem:[%s10548_s19 + $0x28] sm:$0xff] %vm7400_vm7, %v7340_v60  ;;  %v4438_v50 = vsub.s32 32, %v4437_v61  ;;  %v4440_v4 = vshll.u32 %v10032_v47, %v4437_v61  ;;  %v4443_v45 = vshll.u32 %v10033_v51, %v4437_v61  ;;  %v4446_v37 = vshll.u32 %v10034_v53, %v4437_v61 }
 0x1e9   : > { %v4610_v56 = vmul.f32 %v4609_v39, %v4607_v6  ;;  %v1157_v46 = vshrl.u32 %v1156_v5, 30  ;;  %v4449_v26 = vshll.u32 %v10035_v55, %v4437_v61  ;;  %v4452_v13 = vshll.u32 %v10036_v57, %v4437_v61 }
 0x1ea   : > { %v4441_v10 = vshrl.u32 %v10033_v51, %v4438_v50  ;;  %v4444_v48 = vshrl.u32 %v10034_v53, %v4438_v50  ;;  %v4447_v18 = vshrl.u32 %v10035_v55, %v4438_v50  ;;  %v4450_v8 = vshrl.u32 %v10036_v57, %v4438_v50 }
 0x1eb   : > { %v4611_v41 = vxor.u32 2147483648, %v4610_v56  ;;  %v4453_v19 = vshrl.u32 %v10037_v2, %v4438_v50  ;;  %v1158_v62 = vshll.u32 %v1157_v46, 30  ;;  %v11203_v59 = vadd.f32 %v10748_v23, %v10066_v1 }
 0x1ec   : > { %v4442_v43 = vor.u32 %v4441_v10, %v4440_v4  ;;  %v4445_v40 = vor.u32 %v4444_v48, %v4443_v45  ;;  %v4448_v31 = vor.u32 %v4447_v18, %v4446_v37  ;;  %v4451_v12 = vor.u32 %v4450_v8, %v4449_v26 }
 0x1ed   : > { %v4612_v36 = vsel %vm4529_vm15, %v4611_v41, %v4610_v56  ;;  %v4620_v14 = vadd.s32 3, %v4616_v25  ;;  %v11210_v16 = vsub.s32 %v1155_v35, %v1158_v62  ;;  %v4454_v27 = vor.u32 %v4453_v19, %v4452_v13 }
 0x1ee   : > { %v4615_v30 = vsel %vm11179_vm6, %v10946_v38, %v4612_v36  ;;  %vm4455_vm9 = vcmp.lt.s32.totalorder %v4436_v21, 1  ;;  %vm4456_vm10 = vcmp.lt.s32.totalorder %v4436_v21, 2  ;;  %vm4457_vm11 = vcmp.lt.s32.totalorder %v4436_v21, 3 }
 0x1ef   : > { %9804 = vcosq.f32 %v4615_v30  ;;  %vm11214_vm12 = vcmp.le.f32.partialorder %v1095_v17, 0.7853982  ;;  %v1161_v29 = vsub.s32 0, %v11210_v16  ;;  %v4439_v33 = vshrl.u32 %v10032_v47, %v4438_v50 }
 0x1f0   : > { %9806 = vsinq.f32 %v4615_v30  ;;  %vm4458_vm14 = vcmp.lt.s32.totalorder %v4436_v21, 4  ;;  %v1181_v58 = vsub.s32 4, %v1157_v46  ;;  %v4463_v9 = vsel %vm4455_vm9, %v4442_v43, %v4445_v40 }
 0x1f1   : > { %v4460_v15 = vsel %vm4458_vm14, %v4448_v31, 2102212464  ;;  %v4464_v54 = vsel %vm4458_vm14, %v4451_v12, 920167782  ;;  %v9094_v28 = vmin.u32 %v1161_v29, %v11210_v16  ;;  %v4467_v35 = vsel %vm4455_vm9, %v4445_v40, %v4448_v31 }
 0x1f2   : > { %v4465_v11 = vsel %vm4457_vm11, %v4448_v31, %v4464_v54  ;;  %v4468_v17 = vsel %vm4458_vm14, %v4454_v27, 1326507024  ;;  %v4621_v61 = vand.u32 3, %v4620_v14  ;;  %v4471_v39 = vshll.u32 %v4431_v49, 8 }
 0x1f3   : > { %v4466_v60 = vsel %vm4456_vm10, %v4463_v9, %v4465_v11  ;;  %v4469_v6 = vsel %vm4457_vm11, %v4451_v12, %v4468_v17  ;;  %vm1097_vm13 = vcmp.lt.s32.totalorder %v11048_v52, 0  ;;  %v1163_v25 = vclz %v9094_v28 }
 0x1f4   : > { %v4459_v5 = vsel %vm4455_vm9, %v4439_v33, %v4442_v43  ;;  %v4461_v50 = vsel %vm4457_vm11, %v4445_v40, %v4460_v15  ;;  %v4470_v56 = vsel %vm4456_vm10, %v4467_v35, %v4469_v6  ;;  %v1410_v37 = vand.u32 2139095040, %v11203_v59  ;;  %v11253_v15 = vpop.f32.mrb[9].mxu0 }
 0x1f5   : > { %v11230_v4 = vmul.u32.u64.low %v4471_v39, %v4466_v60  ;;  %v11231_v45 = vmul.u32.u64.high %v4471_v39, %v4466_v60, %v11230_v4  ;;  %vm4619_vm1 = vweird.f32 %v10946_v38  ;;  %v9095_v10 = vadd.s32 4294967294, %v1163_v25 }
 0x1f6   : > { %v1182_v49 = vsel %vm1097_vm13, %v1181_v58, %v1157_v46  ;;  %v11238_v48 = vmul.u32.u64.low %v4471_v39, %v4470_v56  ;;  %v11239_v26 = vmul.u32.u64.high %v4471_v39, %v4470_v56, %v11238_v48  ;;  %vm4622_vm15 = vcmp.lt.s32.totalorder %v4621_v61, 2 }
 0x1f7   : > { %vm4623_vm2 = vcmp.eq.s32.totalorder %v4621_v61, 0  ;;  %v4462_v41 = vsel %vm4456_vm10, %v4459_v5, %v4461_v50  ;;  %v1411_v18 = vshrl.u32 %v1410_v37, 23  ;;  %vm4626_vm4 = vcmp.eq.s32.totalorder %v4621_v61, 2 }
 0x1f8   : > { %v1151_v8 = vadd.s32 %v11145_v44, %v11155_v24  ;;  %vm9096_vm5 = vcmp.lt.s32.totalorder %v9095_v10, 0  ;;  %v1407_v19 = vand.u32 2147483647, %v11203_v59  ;;  %v1184_v46 = vsel %vm11214_vm12, 0, %v1182_v49 }
 0x1f9   : > { %v9805_v62 = vpop.eup %9804  ;;  %v1166_v43 = vsel %vm9096_vm5, 0, %v9095_v10  ;;  %v4481_v13 = vadd.s32 1, %v11231_v45  ;;  %v9105_v36 = vadd.s32 4294967169, %v1411_v18  ;;  %v4478_v30 = vmul.u32 %v4471_v39, %v4462_v41 }
 0x1fa   : > { %v9807_v40 = vpop.eup %9806  ;;  %v4627_v31 = vxor.u32 2147483648, %v9805_v62  ;;  %v1167_v21 = vsub.s32 32, %v1166_v43  ;;  %v1171_v12 = vsub.s32 4294967266, %v1166_v43  ;;  %v1168_v27 = vshll.u32 %v11210_v16, %v1166_v43 }
 0x1fb   : > { %v4624_v14 = vxor.u32 2147483648, %v9807_v40  ;;  %vm4480_vm3 = vc.u32 %v11239_v26, %v11230_v4  ;;  %v1417_v44 = vadd.s32 1, %v9105_v36  ;;  %v1188_v54 = vadd.s32 3, %v1184_v46 }
 0x1fc   : > { %v4628_v24 = vsel %vm4626_vm4, %v4627_v31, %v9807_v40  ;;  %v1169_v29 = vshrl.u32 %v1151_v8, %v1167_v21  ;;  %v1172_v33 = vadd.s32 127, %v1171_v12  ;;  %v4482_v58 = vsel %vm4480_vm3, %v4481_v13, %v11231_v45 }
 0x1fd   : > { %v4625_v9 = vsel %vm4623_vm2, %v9805_v62, %v4624_v14  ;;  %v4483_v28 = vadd.s32 %v4482_v58, %v4478_v30  ;;  %vm1418_vm8 = vcmp.gt.s32.totalorder %v1417_v44, 0  ;;  %v1414_v39 = vand.u32 8388607, %v1407_v19 }
 0x1fe   : > { %v4629_v16 = vsel %vm4622_vm15, %v4625_v9, %v4628_v24  ;;  %v1170_v11 = vor.u32 %v1169_v29, %v1168_v27  ;;  %v1173_v35 = vshll.u32 %v1172_v33, 23  ;;  %v1419_v17 = vsel %vm1418_vm8, %v1417_v44, 0 }
 0x1ff   : > { %v4630_v60 = vsel %vm4619_vm1, nan, %v4629_v16  ;;  %v4484_v6 = vadd.s32 536870912, %v4483_v28  ;;  %v1421_v25 = vand.u32 31, %v1419_v17  ;;  %v11266_v10 = vand.u32 3, %v1188_v54 }
 0x200   : > { %v7372_v5 = vsel %vm18_vm0, %v10946_v38, %v4630_v60  ;;  %v1174_v50 = vor.u32 4788187, %v1173_v35  ;;  %v1177_v37 = vcvt.s32.f32 %v1170_v11  ;;  %v11270_v49 = vadd.f32 %v10814_v7, %v10066_v1 }
 0x201   : > { %7438 = vst.msk [vmem:[%s10548_s19 + $0x128] sm:$0xff] %vm7400_vm7, %v7372_v5  ;;  %v4485_v61 = vshrl.u32 %v4484_v6, 30  ;;  %v1422_v56 = vsub.s32 32, %v1421_v25  ;;  %vm4425_vm6 = vcmp.lt.s32.totalorder %v11090_v22, 0  ;;  %v1415_v41 = vor.u32 8388608, %v1414_v39 }
 0x202   : > { %v1175_v45 = vand.u32 2147483647, %v1174_v50  ;;  %v1424_v18 = vshll.u32 %v10032_v47, %v1421_v25  ;;  %v1427_v7 = vshll.u32 %v10033_v51, %v1421_v25  ;;  %v1430_v36 = vshll.u32 %v10034_v53, %v1421_v25 }
 0x203   : > { %v4486_v48 = vshll.u32 %v4485_v61, 30  ;;  %v1425_v38 = vshrl.u32 %v10033_v51, %v1422_v56  ;;  %v1428_v62 = vshrl.u32 %v10034_v53, %v1422_v56  ;;  %v1431_v43 = vshrl.u32 %v10035_v55, %v1422_v56 }
 0x204   : > { %v1178_v8 = vmul.f32 %v1177_v37, %v1175_v45  ;;  %v1434_v46 = vshrl.u32 %v10036_v57, %v1422_v56  ;;  %v1437_v40 = vshrl.u32 %v10037_v2, %v1422_v56  ;;  %v1420_v21 = vshrl.u32 %v1419_v17, 5 }
 0x205   : > { %v11278_v13 = vsub.s32 %v4483_v28, %v4486_v48  ;;  %v1433_v12 = vshll.u32 %v10035_v55, %v1421_v25  ;;  %v1436_v30 = vshll.u32 %v10036_v57, %v1421_v25  ;;  %v1426_v27 = vor.u32 %v1425_v38, %v1424_v18  ;;  %v11303_v18 = vpop.f32.mrb[9].mxu1 }
 0x206   : > { %v1179_v31 = vxor.u32 2147483648, %v1178_v8  ;;  %v1429_v44 = vor.u32 %v1428_v62, %v1427_v7  ;;  %v1432_v24 = vor.u32 %v1431_v43, %v1430_v36  ;;  %v4509_v33 = vsub.s32 4, %v4485_v61 }
 0x207   : > { %v4489_v14 = vsub.s32 0, %v11278_v13  ;;  %v1435_v58 = vor.u32 %v1434_v46, %v1433_v12  ;;  %v4735_v9 = vand.u32 2147483647, %v11270_v49  ;;  %vm11294_vm9 = vcmp.le.f32.partialorder %v4423_v42, 0.7853982 }
 0x208   : > { %v1180_v29 = vsel %vm1097_vm13, %v1179_v31, %v1178_v8  ;;  %v1438_v11 = vor.u32 %v1437_v40, %v1436_v30  ;;  %v1455_v35 = vshll.u32 %v1415_v41, 8  ;;  %v1423_v17 = vshrl.u32 %v10032_v47, %v1422_v56 }
 0x209   : > { %v1183_v54 = vsel %vm11214_vm12, %v11048_v52, %v1180_v29  ;;  %v9222_v16 = vmin.u32 %v4489_v14, %v11278_v13  ;;  %vm1439_vm10 = vcmp.lt.s32.totalorder %v1420_v21, 1  ;;  %vm1442_vm11 = vcmp.lt.s32.totalorder %v1420_v21, 4 }
 0x20a   : > { %9808 = vcosq.f32 %v1183_v54  ;;  %v1444_v6 = vsel %vm1442_vm11, %v1432_v24, 2102212464  ;;  %v1447_v23 = vsel %vm1439_vm10, %v1426_v27, %v1429_v44  ;;  %v4510_v39 = vsel %vm4425_vm6, %v4509_v33, %v4485_v61 }
 0x20b   : > { %9810 = vsinq.f32 %v1183_v54  ;;  %v4491_v60 = vclz %v9222_v16  ;;  %vm1441_vm12 = vcmp.lt.s32.totalorder %v1420_v21, 3  ;;  %v1448_v42 = vsel %vm1442_vm11, %v1435_v58, 920167782 }
 0x20c   : > { %v1451_v25 = vsel %vm1439_vm10, %v1429_v44, %v1432_v24  ;;  %vm1440_vm14 = vcmp.lt.s32.totalorder %v1420_v21, 2  ;;  %v1449_v50 = vsel %vm1441_vm12, %v1432_v24, %v1448_v42  ;;  %v1452_v45 = vsel %vm1442_vm11, %v1438_v11, 1326507024 }
 0x20d   : > { %v9223_v5 = vadd.s32 4294967294, %v4491_v60  ;;  %v1443_v37 = vsel %vm1439_vm10, %v1423_v17, %v1426_v27  ;;  %v1445_v48 = vsel %vm1441_vm12, %v1429_v44, %v1444_v6  ;;  %v1450_v56 = vsel %vm1440_vm14, %v1447_v23, %v1449_v50 }
 0x20e   : > { %v1453_v41 = vsel %vm1441_vm12, %v1435_v58, %v1452_v45  ;;  %v11306_v8 = vmul.u32.u64.low %v1455_v35, %v1450_v56  ;;  %v11307_v62 = vmul.u32.u64.high %v1455_v35, %v1450_v56, %v11306_v8  ;;  %v4738_v7 = vand.u32 2139095040, %v11270_v49 }
 0x20f   : > { %vm9224_vm13 = vcmp.lt.s32.totalorder %v9223_v5, 0  ;;  %v1454_v38 = vsel %vm1440_vm14, %v1451_v25, %v1453_v41  ;;  %vm1187_vm1 = vweird.f32 %v11048_v52  ;;  %v4479_v36 = vadd.s32 %v11230_v4, %v11239_v26 }
 0x210   : > { %v4494_v61 = vsel %vm9224_vm13, 0, %v9223_v5  ;;  %v11310_v43 = vmul.u32.u64.low %v1455_v35, %v1454_v38  ;;  %v11311_v46 = vmul.u32.u64.high %v1455_v35, %v1454_v38, %v11310_v43  ;;  %v1446_v12 = vsel %vm1440_vm14, %v1443_v37, %v1445_v48 }
 0x211   : > { %v4495_v40 = vsub.s32 32, %v4494_v61  ;;  %v4499_v31 = vsub.s32 4294967266, %v4494_v61  ;;  %vm1190_vm15 = vcmp.lt.s32.totalorder %v11266_v10, 2  ;;  %vm1194_vm2 = vcmp.eq.s32.totalorder %v11266_v10, 2 }
 0x212   : > { %v4512_v30 = vsel %vm11294_vm9, 0, %v4510_v39  ;;  %v4739_v14 = vshrl.u32 %v4738_v7, 23  ;;  %v4496_v27 = vshll.u32 %v11278_v13, %v4494_v61  ;;  %v1465_v29 = vadd.s32 1, %v11307_v62 }
 0x213   : > { %v4497_v44 = vshrl.u32 %v4479_v36, %v4495_v40  ;;  %v4500_v24 = vadd.s32 127, %v4499_v31  ;;  %v1462_v4 = vmul.u32 %v1455_v35, %v1446_v12  ;;  %vm1464_vm4 = vc.u32 %v11311_v46, %v11306_v8 }
 0x214   : > { %v9809_v33 = vpop.eup %9808  ;;  %v9233_v26 = vadd.s32 4294967169, %v4739_v14  ;;  %v4742_v21 = vand.u32 8388607, %v4735_v9  ;;  %v1466_v17 = vsel %vm1464_vm4, %v1465_v29, %v11307_v62  ;;  %v11331_v23 = vadd.f32 %v10066_v1, %v10931_v20 }
 0x215   : > { %v9811_v58 = vpop.eup %9810  ;;  %v1195_v54 = vxor.u32 2147483648, %v9809_v33  ;;  %v4498_v16 = vor.u32 %v4497_v44, %v4496_v27  ;;  %v4501_v11 = vshll.u32 %v4500_v24, 23  ;;  %v1467_v60 = vadd.s32 %v1466_v17, %v1462_v4 }
 0x216   : > { %v1192_v13 = vxor.u32 2147483648, %v9811_v58  ;;  %v4745_v6 = vadd.s32 1, %v9233_v26  ;;  %vm1191_vm5 = vcmp.eq.s32.totalorder %v11266_v10, 0  ;;  %v4516_v42 = vadd.s32 3, %v4512_v30 }
 0x217   : > { %v1196_v35 = vsel %vm1194_vm2, %v1195_v54, %v9811_v58  ;;  %v4502_v39 = vor.u32 4788187, %v4501_v11  ;;  %v1468_v5 = vadd.s32 536870912, %v1467_v60  ;;  %v4743_v50 = vor.u32 8388608, %v4742_v21 }
 0x218   : > { %v1193_v25 = vsel %vm1191_vm5, %v9809_v33, %v1192_v13  ;;  %vm4746_vm3 = vcmp.gt.s32.totalorder %v4745_v6, 0  ;;  %v4505_v48 = vcvt.s32.f32 %v4498_v16  ;;  %v1306_v62 = vand.u32 2139095040, %v11331_v23 }
 0x219   : > { %v1197_v45 = vsel %vm1190_vm15, %v1193_v25, %v1196_v35  ;;  %v4503_v37 = vand.u32 2147483647, %v4502_v39  ;;  %v4747_v56 = vsel %vm4746_vm3, %v4745_v6, 0  ;;  %v11340_v41 = vshrl.u32 %v1468_v5, 30 }
 0x21a   : > { %v1198_v20 = vsel %vm1187_vm1, nan, %v1197_v45  ;;  %v4749_v38 = vand.u32 31, %v4747_v56  ;;  %v11349_v40 = vand.u32 3, %v4516_v42  ;;  %v11351_v31 = vshll.u32 %v4743_v50, 8 }
 0x21b   : > { %v7339_v61 = vsel %vm18_vm0, %v11048_v52, %v1198_v20  ;;  %v4506_v43 = vmul.f32 %v4505_v48, %v4503_v37  ;;  %v1470_v10 = vshll.u32 %v11340_v41, 30  ;;  %v1303_v12 = vand.u32 2147483647, %v11331_v23 }
 0x21c   : > { %7405 = vst.msk [vmem:[%s10548_s19 + $0x20] sm:$0xff] %vm7400_vm7, %v7339_v61  ;;  %v4750_v7 = vsub.s32 32, %v4749_v38  ;;  %v4748_v14 = vshrl.u32 %v4747_v56, 5  ;;  %v1307_v44 = vshrl.u32 %v1306_v62, 23  ;;  %v4752_v24 = vshll.u32 %v10032_v47, %v4749_v38 }
 0x21d   : > { %v4507_v36 = vxor.u32 2147483648, %v4506_v43  ;;  %v11354_v30 = vsub.s32 %v1467_v60, %v1470_v10  ;;  %v4755_v21 = vshll.u32 %v10033_v51, %v4749_v38  ;;  %v4758_v58 = vshll.u32 %v10034_v53, %v4749_v38 }
 0x21e   : > { %v4753_v27 = vshrl.u32 %v10033_v51, %v4750_v7  ;;  %v4756_v29 = vshrl.u32 %v10034_v53, %v4750_v7  ;;  %v4759_v33 = vshrl.u32 %v10035_v55, %v4750_v7  ;;  %v4761_v16 = vshll.u32 %v10035_v55, %v4749_v38 }
 0x21f   : > { %v4508_v52 = vsel %vm4425_vm6, %v4507_v36, %v4506_v43  ;;  %v1473_v26 = vsub.s32 0, %v11354_v30  ;;  %v4762_v11 = vshrl.u32 %v10036_v57, %v4750_v7  ;;  %v4764_v28 = vshll.u32 %v10036_v57, %v4749_v38 }
 0x220   : > { %v4511_v4 = vsel %vm11294_vm9, %v11090_v22, %v4508_v52  ;;  %v4754_v54 = vor.u32 %v4753_v27, %v4752_v24  ;;  %v4757_v13 = vor.u32 %v4756_v29, %v4755_v21  ;;  %v4760_v60 = vor.u32 %v4759_v33, %v4758_v58 }
 0x221   : > { %9812 = vcosq.f32 %v4511_v4  ;;  %v9106_v17 = vmin.u32 %v1473_v26, %v11354_v30  ;;  %v4763_v6 = vor.u32 %v4762_v11, %v4761_v16  ;;  %v4765_v35 = vshrl.u32 %v10037_v2, %v4750_v7 }
 0x222   : > { %9814 = vsinq.f32 %v4511_v4  ;;  %v9101_v39 = vadd.s32 4294967169, %v1307_v44  ;;  %vm1409_vm8 = vcmp.lt.s32.totalorder %v11203_v59, 0  ;;  %v1493_v25 = vsub.s32 4, %v11340_v41 }
 0x223   : > { %v1475_v42 = vclz %v9106_v17  ;;  %v4751_v5 = vshrl.u32 %v10032_v47, %v4750_v7  ;;  %vm4767_vm6 = vcmp.lt.s32.totalorder %v4748_v14, 1  ;;  %vm4522_vm9 = vcmp.eq.s32.totalorder %v11349_v40, 2 }
 0x224   : > { %v4766_v50 = vor.u32 %v4765_v35, %v4764_v28  ;;  %vm4768_vm10 = vcmp.lt.s32.totalorder %v4748_v14, 2  ;;  %vm4769_vm11 = vcmp.lt.s32.totalorder %v4748_v14, 3  ;;  %vm4770_vm12 = vcmp.lt.s32.totalorder %v4748_v14, 4 }
 0x225   : > { %vm4519_vm14 = vcmp.eq.s32.totalorder %v11349_v40, 0  ;;  %v9107_v45 = vadd.s32 4294967294, %v1475_v42  ;;  %v4772_v37 = vsel %vm4770_vm12, %v4760_v60, 2102212464  ;;  %v4775_v48 = vsel %vm4767_vm6, %v4754_v54, %v4757_v13 }
 0x226   : > { %v4776_v56 = vsel %vm4770_vm12, %v4763_v6, 920167782  ;;  %vm11380_vm13 = vcmp.le.f32.partialorder %v1407_v19, 0.7853982  ;;  %v4771_v38 = vsel %vm4767_vm6, %v4751_v5, %v4754_v54  ;;  %v4779_v61 = vsel %vm4767_vm6, %v4757_v13, %v4760_v60 }
 0x227   : > { %v4777_v62 = vsel %vm4769_vm11, %v4760_v60, %v4776_v56  ;;  %v4780_v43 = vsel %vm4770_vm12, %v4766_v50, 1326507024  ;;  %vm4515_vm1 = vweird.f32 %v11090_v22  ;;  %vm9108_vm15 = vcmp.lt.s32.totalorder %v9107_v45, 0 }
 0x228   : > { %v4773_v10 = vsel %vm4769_vm11, %v4757_v13, %v4772_v37  ;;  %v4778_v7 = vsel %vm4768_vm10, %v4775_v48, %v4777_v62  ;;  %v4781_v36 = vsel %vm4769_vm11, %v4763_v6, %v4780_v43  ;;  %v1478_v27 = vsel %vm9108_vm15, 0, %v9107_v45  ;;  %v11422_v37 = vpop.f32.mrb[10].mxu0 }
 0x229   : > { %v4782_v19 = vsel %vm4768_vm10, %v4779_v61, %v4781_v36  ;;  %v11391_v44 = vmul.u32.u64.low %v11351_v31, %v4778_v7  ;;  %v11392_v52 = vmul.u32.u64.high %v11351_v31, %v4778_v7, %v11391_v44  ;;  %v1463_v24 = vadd.s32 %v11306_v8, %v11311_v46 }
 0x22a   : > { %v1479_v29 = vsub.s32 32, %v1478_v27  ;;  %v1483_v33 = vsub.s32 4294967266, %v1478_v27  ;;  %v11399_v4 = vand.u32 8388607, %v1303_v12  ;;  %v4774_v21 = vsel %vm4768_vm10, %v4771_v38, %v4773_v10 }
 0x22b   : > { %v9813_v26 = vpop.eup %9812  ;;  %v11403_v58 = vmul.u32.u64.low %v11351_v31, %v4782_v19  ;;  %v11404_v54 = vmul.u32.u64.high %v11351_v31, %v4782_v19, %v11403_v58  ;;  %v1313_v16 = vadd.s32 1, %v9101_v39  ;;  %v1480_v13 = vshll.u32 %v11354_v30, %v1478_v27 }
 0x22c   : > { %v9815_v11 = vpop.eup %9814  ;;  %v4523_v17 = vxor.u32 2147483648, %v9813_v26  ;;  %v1481_v60 = vshrl.u32 %v1463_v24, %v1479_v29  ;;  %v1484_v8 = vadd.s32 127, %v1483_v33  ;;  %v1494_v6 = vsel %vm1409_vm8, %v1493_v25, %v11340_v41 }
 0x22d   : > { %v4520_v46 = vxor.u32 2147483648, %v9815_v11  ;;  %v4793_v28 = vadd.s32 1, %v11392_v52  ;;  %vm1314_vm2 = vcmp.gt.s32.totalorder %v1313_v16, 0  ;;  %vm4518_vm4 = vcmp.lt.s32.totalorder %v11349_v40, 2 }
 0x22e   : > { %v4524_v14 = vsel %vm4522_vm9, %v4523_v17, %v9815_v11  ;;  %v1482_v35 = vor.u32 %v1481_v60, %v1480_v13  ;;  %v1485_v42 = vshll.u32 %v1484_v8, 23  ;;  %v1315_v39 = vsel %vm1314_vm2, %v1313_v16, 0 }
 0x22f   : > { %v4521_v30 = vsel %vm4519_vm14, %v9813_v26, %v4520_v46  ;;  %v4790_v5 = vmul.u32 %v11351_v31, %v4774_v21  ;;  %vm4792_vm5 = vc.u32 %v11404_v54, %v11391_v44  ;;  %v1496_v50 = vsel %vm11380_vm13, 0, %v1494_v6 }
 0x230   : > { %v4525_v41 = vsel %vm4518_vm4, %v4521_v30, %v4524_v14  ;;  %v1486_v25 = vor.u32 4788187, %v1485_v42  ;;  %v4794_v45 = vsel %vm4792_vm5, %v4793_v28, %v11392_v52  ;;  %v1317_v56 = vand.u32 31, %v1315_v39 }
 0x231   : > { %v4526_v48 = vsel %vm4515_vm1, nan, %v4525_v41  ;;  %v4795_v40 = vadd.s32 %v4794_v45, %v4790_v5  ;;  %v11428_v31 = vadd.f32 %v10066_v1, %v10982_v63  ;;  %v1489_v61 = vcvt.s32.f32 %v1482_v35 }
 0x232   : > { %v7371_v38 = vsel %vm18_vm0, %v11090_v22, %v4526_v48  ;;  %v1487_v62 = vand.u32 2147483647, %v1486_v25  ;;  %v1311_v43 = vor.u32 8388608, %v11399_v4  ;;  %v1500_v10 = vadd.s32 3, %v1496_v50 }
 0x233   : > { %7437 = vst.msk [vmem:[%s10548_s19 + $0x120] sm:$0xff] %vm7400_vm7, %v7371_v38  ;;  %v4796_v7 = vadd.s32 536870912, %v4795_v40  ;;  %v1316_v36 = vshrl.u32 %v1315_v39, 5  ;;  %v1318_v27 = vsub.s32 32, %v1317_v56  ;;  %v1320_v52 = vshll.u32 %v10032_v47, %v1317_v56 }
 0x234   : > { %v1490_v19 = vmul.f32 %v1489_v61, %v1487_v62  ;;  %v1323_v63 = vshll.u32 %v10033_v51, %v1317_v56  ;;  %v1326_v24 = vshll.u32 %v10034_v53, %v1317_v56  ;;  %v1329_v4 = vshll.u32 %v10035_v55, %v1317_v56 }
 0x235   : > { %v4797_v29 = vshrl.u32 %v4796_v7, 30  ;;  %v1321_v22 = vshrl.u32 %v10033_v51, %v1318_v27  ;;  %v1324_v33 = vshrl.u32 %v10034_v53, %v1318_v27  ;;  %vm4737_vm3 = vcmp.lt.s32.totalorder %v11270_v49, 0 }
 0x236   : > { %v1491_v26 = vxor.u32 2147483648, %v1490_v19  ;;  %v1327_v21 = vshrl.u32 %v10035_v55, %v1318_v27  ;;  %v1330_v58 = vshrl.u32 %v10036_v57, %v1318_v27  ;;  %v1333_v16 = vshrl.u32 %v10037_v2, %v1318_v27 }
 0x237   : > { %v4798_v11 = vshll.u32 %v4797_v29, 30  ;;  %v1322_v17 = vor.u32 %v1321_v22, %v1320_v52  ;;  %v1332_v13 = vshll.u32 %v10036_v57, %v1317_v56  ;;  %vm1335_vm6 = vcmp.lt.s32.totalorder %v1316_v36, 1 }
 0x238   : > { %v1492_v60 = vsel %vm1409_vm8, %v1491_v26, %v1490_v19  ;;  %v1325_v8 = vor.u32 %v1324_v33, %v1323_v63  ;;  %v1328_v46 = vor.u32 %v1327_v21, %v1326_v24  ;;  %v1331_v6 = vor.u32 %v1330_v58, %v1329_v4 }
 0x239   : > { %v1495_v28 = vsel %vm11380_vm13, %v11203_v59, %v1492_v60  ;;  %v11452_v14 = vsub.s32 %v4795_v40, %v4798_v11  ;;  %v1334_v35 = vor.u32 %v1333_v16, %v1332_v13  ;;  %vm1338_vm9 = vcmp.lt.s32.totalorder %v1316_v36, 4  ;;  %v11488_v16 = vpop.f32.mrb[10].mxu1 }
 0x23a   : > { %9816 = vcosq.f32 %v1495_v28  ;;  %v1319_v42 = vshrl.u32 %v10032_v47, %v1318_v27  ;;  %vm1336_vm10 = vcmp.lt.s32.totalorder %v1316_v36, 2  ;;  %v1340_v39 = vsel %vm1338_vm9, %v1328_v46, 2102212464 }
 0x23b   : > { %9818 = vsinq.f32 %v1495_v28  ;;  %v4801_v30 = vsub.s32 0, %v11452_v14  ;;  %v4821_v5 = vsub.s32 4, %v4797_v29  ;;  %vm1337_vm8 = vcmp.lt.s32.totalorder %v1316_v36, 3 }
 0x23c   : > { %v1339_v41 = vsel %vm1335_vm6, %v1319_v42, %v1322_v17  ;;  %v1341_v25 = vsel %vm1337_vm8, %v1325_v8, %v1340_v39  ;;  %v1343_v20 = vsel %vm1335_vm6, %v1322_v17, %v1325_v8  ;;  %v1344_v50 = vsel %vm1338_vm9, %v1331_v6, 920167782 }
 0x23d   : > { %v9234_v45 = vmin.u32 %v4801_v30, %v11452_v14  ;;  %v1345_v48 = vsel %vm1337_vm8, %v1328_v46, %v1344_v50  ;;  %v1347_v40 = vsel %vm1335_vm6, %v1325_v8, %v1328_v46  ;;  %v1348_v56 = vsel %vm1338_vm9, %v1334_v35, 1326507024 }
 0x23e   : > { %v1501_v38 = vand.u32 3, %v1500_v10  ;;  %v1346_v62 = vsel %vm1336_vm10, %v1343_v20, %v1345_v48  ;;  %v1349_v61 = vsel %vm1337_vm8, %v1331_v6, %v1348_v56  ;;  %v1351_v7 = vshll.u32 %v1311_v43, 8 }
 0x23f   : > { %v4803_v27 = vclz %v9234_v45  ;;  %v4822_v19 = vsel %vm4737_vm3, %v4821_v5, %v4797_v29  ;;  %v4631_v52 = vand.u32 2147483647, %v11428_v31  ;;  %v1342_v63 = vsel %vm1336_vm10, %v1339_v41, %v1341_v25 }
 0x240   : > { %v1350_v24 = vsel %vm1336_vm10, %v1347_v40, %v1349_v61  ;;  %v11469_v22 = vmul.u32.u64.low %v1351_v7, %v1346_v62  ;;  %v11470_v33 = vmul.u32.u64.high %v1351_v7, %v1346_v62, %v11469_v22  ;;  %v4634_v21 = vand.u32 2139095040, %v11428_v31 }
 0x241   : > { %v9235_v4 = vadd.s32 4294967294, %v4803_v27  ;;  %v11472_v26 = vmul.u32.u64.low %v1351_v7, %v1350_v24  ;;  %v11473_v10 = vmul.u32.u64.high %v1351_v7, %v1350_v24, %v11472_v26  ;;  %vm1503_vm11 = vcmp.eq.s32.totalorder %v1501_v38, 0 }
 0x242   : > { %vm11478_vm12 = vcmp.le.f32.partialorder %v4735_v9, 0.7853982  ;;  %v11484_v36 = vadd.f32 %v11092_v32, %v10066_v1  ;;  %vm1506_vm14 = vcmp.eq.s32.totalorder %v1501_v38, 2  ;;  %v4791_v29 = vadd.s32 %v11391_v44, %v11404_v54 }
 0x243   : > { %vm9236_vm13 = vcmp.lt.s32.totalorder %v9235_v4, 0  ;;  %v4635_v58 = vshrl.u32 %v4634_v21, 23  ;;  %v4824_v9 = vsel %vm11478_vm12, 0, %v4822_v19  ;;  %v1358_v13 = vmul.u32 %v1351_v7, %v1342_v63 }
 0x244   : > { %v9817_v11 = vpop.eup %9816  ;;  %v4806_v17 = vsel %vm9236_vm13, 0, %v9235_v4  ;;  %v1361_v60 = vadd.s32 1, %v11470_v33  ;;  %v4638_v28 = vand.u32 8388607, %v4631_v52  ;;  %vm1360_vm1 = vc.u32 %v11473_v10, %v11469_v22 }
 0x245   : > { %v9819_v8 = vpop.eup %9818  ;;  %v1507_v46 = vxor.u32 2147483648, %v9817_v11  ;;  %v4807_v32 = vsub.s32 32, %v4806_v17  ;;  %v4811_v6 = vsub.s32 4294967266, %v4806_v17  ;;  %v4808_v54 = vshll.u32 %v11452_v14, %v4806_v17 }
 0x246   : > { %v1504_v44 = vxor.u32 2147483648, %v9819_v8  ;;  %v9229_v35 = vadd.s32 4294967169, %v4635_v58  ;;  %v1362_v5 = vsel %vm1360_vm1, %v1361_v60, %v11470_v33  ;;  %vm1502_vm15 = vcmp.lt.s32.totalorder %v1501_v38, 2 }
 0x247   : > { %v1508_v42 = vsel %vm1506_vm14, %v1507_v46, %v9819_v8  ;;  %v4809_v39 = vshrl.u32 %v4791_v29, %v4807_v32  ;;  %v4812_v30 = vadd.s32 127, %v4811_v6  ;;  %v1363_v25 = vadd.s32 %v1362_v5, %v1358_v13 }
 0x248   : > { %v1505_v41 = vsel %vm1503_vm11, %v9817_v11, %v1504_v44  ;;  %v4641_v20 = vadd.s32 1, %v9229_v35  ;;  %vm1499_vm2 = vweird.f32 %v11203_v59  ;;  %v4828_v40 = vadd.s32 3, %v4824_v9 }
 0x249   : > { %v1509_v50 = vsel %vm1502_vm15, %v1505_v41, %v1508_v42  ;;  %v4810_v45 = vor.u32 %v4809_v39, %v4808_v54  ;;  %v4813_v14 = vshll.u32 %v4812_v30, 23  ;;  %v1364_v56 = vadd.s32 536870912, %v1363_v25 }
 0x24a   : > { %v1510_v48 = vsel %vm1499_vm2, nan, %v1509_v50  ;;  %vm4642_vm4 = vcmp.gt.s32.totalorder %v4641_v20, 0  ;;  %v4639_v7 = vor.u32 8388608, %v4638_v28  ;;  %v1618_v63 = vand.u32 2139095040, %v11484_v36 }
 0x24b   : > { %v7342_v62 = vsel %vm18_vm0, %v11203_v59, %v1510_v48  ;;  %v4814_v61 = vor.u32 4788187, %v4813_v14  ;;  %v4643_v38 = vsel %vm4642_vm4, %v4641_v20, 0  ;;  %v1365_v27 = vshrl.u32 %v1364_v56, 30 }
 0x24c   : > { %7408 = vst.msk [vmem:[%s10548_s19 + $0x38] sm:$0xff] %vm7400_vm7, %v7342_v62  ;;  %v4645_v19 = vand.u32 31, %v4643_v38  ;;  %v4817_v33 = vcvt.s32.f32 %v4810_v45  ;;  %vm1305_vm5 = vcmp.lt.s32.totalorder %v11331_v23, 0  ;;  %v11508_v4 = vand.u32 3, %v4828_v40 }
 0x24d   : > { %v4815_v24 = vand.u32 2147483647, %v4814_v61  ;;  %vm11512_vm6 = vcmp.le.f32.partialorder %v1303_v12, 0.7853982  ;;  %v1366_v59 = vshll.u32 %v1365_v27, 30  ;;  %v1359_v11 = vadd.s32 %v11469_v22, %v11473_v10 }
 0x24e   : > { %v4646_v21 = vsub.s32 32, %v4645_v19  ;;  %v1615_v29 = vand.u32 2147483647, %v11484_v36  ;;  %v1389_v17 = vsub.s32 4, %v1365_v27  ;;  %v11518_v9 = vshll.u32 %v4639_v7, 8 }
 0x24f   : > { %v4818_v58 = vmul.f32 %v4817_v33, %v4815_v24  ;;  %v11520_v13 = vsub.s32 %v1363_v25, %v1366_v59  ;;  %v11522_v60 = vshrl.u32 %v4643_v38, 5  ;;  %v1619_v12 = vshrl.u32 %v1618_v63, 23 }
 0x250   : > { %v4649_v8 = vshrl.u32 %v10033_v51, %v4646_v21  ;;  %v4648_v32 = vshll.u32 %v10032_v47, %v4645_v19  ;;  %v4652_v6 = vshrl.u32 %v10034_v53, %v4646_v21  ;;  %v4655_v28 = vshrl.u32 %v10035_v55, %v4646_v21 }
 0x251   : > { %v4819_v46 = vxor.u32 2147483648, %v4818_v58  ;;  %v1369_v44 = vsub.s32 0, %v11520_v13  ;;  %v4651_v22 = vshll.u32 %v10033_v51, %v4645_v19  ;;  %v4654_v10 = vshll.u32 %v10034_v53, %v4645_v19 }
 0x252   : > { %v4658_v54 = vshrl.u32 %v10036_v57, %v4646_v21  ;;  %v1390_v42 = vsel %vm1305_vm5, %v1389_v17, %v1365_v27  ;;  %v4650_v39 = vor.u32 %v4649_v8, %v4648_v32  ;;  %v4657_v30 = vshll.u32 %v10035_v55, %v4645_v19 }
 0x253   : > { %v4820_v35 = vsel %vm4737_vm3, %v4819_v46, %v4818_v58  ;;  %v9102_v41 = vmin.u32 %v1369_v44, %v11520_v13  ;;  %v4653_v25 = vor.u32 %v4652_v6, %v4651_v22  ;;  %v4656_v20 = vor.u32 %v4655_v28, %v4654_v10  ;;  %v11573_v28 = vpop.f32.mrb[11].mxu0 }
 0x254   : > { %v4823_v5 = vsel %vm11478_vm12, %v11270_v49, %v4820_v35  ;;  %v4659_v50 = vor.u32 %v4658_v54, %v4657_v30  ;;  %v4660_v45 = vshll.u32 %v10036_v57, %v4645_v19  ;;  %v4661_v14 = vshrl.u32 %v10037_v2, %v4646_v21 }
 0x255   : > { %9820 = vcosq.f32 %v4823_v5  ;;  %v1371_v48 = vclz %v9102_v41  ;;  %v9113_v40 = vadd.s32 4294967169, %v1619_v12  ;;  %v11545_v56 = vand.u32 8388607, %v1615_v29 }
 0x256   : > { %9822 = vsinq.f32 %v4823_v5  ;;  %v1392_v43 = vsel %vm11512_vm6, 0, %v1390_v42  ;;  %v4647_v62 = vshrl.u32 %v10032_v47, %v4646_v21  ;;  %v4662_v61 = vor.u32 %v4661_v14, %v4660_v45 }
 0x257   : > { %vm4663_vm3 = vcmp.lt.s32.totalorder %v11522_v60, 1  ;;  %v9103_v7 = vadd.s32 4294967294, %v1371_v48  ;;  %vm4665_vm9 = vcmp.lt.s32.totalorder %v11522_v60, 3  ;;  %vm4666_vm10 = vcmp.lt.s32.totalorder %v11522_v60, 4 }
 0x258   : > { %v4671_v38 = vsel %vm4663_vm3, %v4650_v39, %v4653_v25  ;;  %v4668_v27 = vsel %vm4666_vm10, %v4656_v20, 2102212464  ;;  %v4672_v19 = vsel %vm4666_vm10, %v4659_v50, 920167782  ;;  %v4675_v63 = vsel %vm4663_vm3, %v4653_v25, %v4656_v20 }
 0x259   : > { %v4676_v24 = vsel %vm4666_vm10, %v4662_v61, 1326507024  ;;  %vm4831_vm8 = vcmp.eq.s32.totalorder %v11508_v4, 0  ;;  %vm9104_vm11 = vcmp.lt.s32.totalorder %v9103_v7, 0  ;;  %vm4664_vm12 = vcmp.lt.s32.totalorder %v11522_v60, 2 }
 0x25a   : > { %v4673_v33 = vsel %vm4665_vm9, %v4656_v20, %v4672_v19  ;;  %v4677_v59 = vsel %vm4665_vm9, %v4659_v50, %v4676_v24  ;;  %vm4830_vm14 = vcmp.lt.s32.totalorder %v11508_v4, 2  ;;  %v1374_v21 = vsel %vm9104_vm11, 0, %v9103_v7 }
 0x25b   : > { %v4667_v58 = vsel %vm4663_vm3, %v4647_v62, %v4650_v39  ;;  %v4674_v17 = vsel %vm4664_vm12, %v4671_v38, %v4673_v33  ;;  %v4678_v8 = vsel %vm4664_vm12, %v4675_v63, %v4677_v59  ;;  %vm4827_vm13 = vweird.f32 %v11270_v49 }
 0x25c   : > { %v1375_v12 = vsub.s32 32, %v1374_v21  ;;  %v1379_v46 = vsub.s32 4294967266, %v1374_v21  ;;  %v4669_v32 = vsel %vm4665_vm9, %v4653_v25, %v4668_v27  ;;  %v1625_v6 = vadd.s32 1, %v9113_v40 }
 0x25d   : > { %v11576_v44 = vmul.u32.u64.low %v11518_v9, %v4678_v8  ;;  %v11577_v22 = vmul.u32.u64.high %v11518_v9, %v4678_v8, %v11576_v44  ;;  %v11580_v10 = vmul.u32.u64.low %v11518_v9, %v4674_v17  ;;  %v11581_v54 = vmul.u32.u64.high %v11518_v9, %v4674_v17, %v11580_v10 }
 0x25e   : > { %v1376_v35 = vshll.u32 %v11520_v13, %v1374_v21  ;;  %v1377_v42 = vshrl.u32 %v1359_v11, %v1375_v12  ;;  %v1380_v39 = vadd.s32 127, %v1379_v46  ;;  %vm1626_vm1 = vcmp.gt.s32.totalorder %v1625_v6, 0 }
 0x25f   : > { %v9821_v30 = vpop.eup %9820  ;;  %vm4834_vm15 = vcmp.eq.s32.totalorder %v11508_v4, 2  ;;  %v1396_v5 = vadd.s32 3, %v1392_v43  ;;  %v4670_v41 = vsel %vm4664_vm12, %v4667_v58, %v4669_v32  ;;  %v1627_v25 = vsel %vm1626_vm1, %v1625_v6, 0 }
 0x260   : > { %v9823_v20 = vpop.eup %9822  ;;  %v4835_v50 = vxor.u32 2147483648, %v9821_v30  ;;  %v1378_v45 = vor.u32 %v1377_v42, %v1376_v35  ;;  %v1381_v14 = vshll.u32 %v1380_v39, 23  ;;  %v1623_v48 = vor.u32 8388608, %v11545_v56 }
 0x261   : > { %v4832_v40 = vxor.u32 2147483648, %v9823_v20  ;;  %vm4688_vm2 = vc.u32 %v11577_v22, %v11580_v10  ;;  %v4689_v11 = vadd.s32 1, %v11581_v54  ;;  %v11594_v13 = vadd.f32 %v11137_v34, %v10066_v1 }
 0x262   : > { %v4836_v43 = vsel %vm4834_vm15, %v4835_v50, %v9823_v20  ;;  %v1382_v60 = vor.u32 4788187, %v1381_v14  ;;  %v4686_v62 = vmul.u32 %v11518_v9, %v4670_v41  ;;  %v1629_v61 = vand.u32 31, %v1627_v25 }
 0x263   : > { %v4833_v7 = vsel %vm4831_vm8, %v9821_v30, %v4832_v40  ;;  %v1385_v56 = vcvt.s32.f32 %v1378_v45  ;;  %v11599_v38 = vand.u32 3, %v1396_v5  ;;  %v4690_v27 = vsel %vm4688_vm2, %v4689_v11, %v11581_v54 }
 0x264   : > { %v4837_v19 = vsel %vm4830_vm14, %v4833_v7, %v4836_v43  ;;  %v1383_v63 = vand.u32 2147483647, %v1382_v60  ;;  %v4691_v34 = vadd.s32 %v4690_v27, %v4686_v62  ;;  %v1630_v24 = vsub.s32 32, %v1629_v61 }
 0x265   : > { %v4838_v33 = vsel %vm4827_vm13, nan, %v4837_v19  ;;  %v1628_v9 = vshrl.u32 %v1627_v25, 5  ;;  %v1632_v59 = vshll.u32 %v10032_v47, %v1629_v61  ;;  %v1635_v21 = vshll.u32 %v10033_v51, %v1629_v61 }
 0x266   : > { %v7374_v58 = vsel %vm18_vm0, %v11270_v49, %v4838_v33  ;;  %v1386_v17 = vmul.f32 %v1385_v56, %v1383_v63  ;;  %v4692_v8 = vadd.s32 536870912, %v4691_v34  ;;  %v1638_v4 = vshll.u32 %v10034_v53, %v1629_v61 }
 0x267   : > { %7440 = vst.msk [vmem:[%s10548_s19 + $0x138] sm:$0xff] %vm7400_vm7, %v7374_v58  ;;  %v1633_v12 = vshrl.u32 %v10033_v51, %v1630_v24  ;;  %v1636_v46 = vshrl.u32 %v10034_v53, %v1630_v24  ;;  %v1639_v32 = vshrl.u32 %v10035_v55, %v1630_v24  ;;  %v1641_v6 = vshll.u32 %v10035_v55, %v1629_v61 }
 0x268   : > { %v1387_v44 = vxor.u32 2147483648, %v1386_v17  ;;  %v4693_v54 = vshrl.u32 %v4692_v8, 30  ;;  %v1642_v35 = vshrl.u32 %v10036_v57, %v1630_v24  ;;  %v1644_v49 = vshll.u32 %v10036_v57, %v1629_v61 }
 0x269   : > { %v1634_v42 = vor.u32 %v1633_v12, %v1632_v59  ;;  %v1637_v39 = vor.u32 %v1636_v46, %v1635_v21  ;;  %v1640_v30 = vor.u32 %v1639_v32, %v1638_v4  ;;  %v1645_v5 = vshrl.u32 %v10037_v2, %v1630_v24 }
 0x26a   : > { %v1388_v41 = vsel %vm1305_vm5, %v1387_v44, %v1386_v17  ;;  %v4694_v25 = vshll.u32 %v4693_v54, 30  ;;  %v1643_v20 = vor.u32 %v1642_v35, %v1641_v6  ;;  %v11623_v50 = vshll.u32 %v1623_v48, 8  ;;  %v11656_v35 = vpop.f32.mrb[11].mxu1 }
 0x26b   : > { %v1391_v45 = vsel %vm11512_vm6, %v11331_v23, %v1388_v41  ;;  %v1646_v14 = vor.u32 %v1645_v5, %v1644_v49  ;;  %vm1647_vm4 = vcmp.lt.s32.totalorder %v1628_v9, 1  ;;  %v4946_v40 = vand.u32 2139095040, %v11594_v13 }
 0x26c   : > { %9824 = vcosq.f32 %v1391_v45  ;;  %v11629_v11 = vsub.s32 %v4691_v34, %v4694_v25  ;;  %vm1648_vm3 = vcmp.lt.s32.totalorder %v1628_v9, 2  ;;  %vm1650_vm9 = vcmp.lt.s32.totalorder %v1628_v9, 4 }
 0x26d   : > { %9826 = vsinq.f32 %v1391_v45  ;;  %v1631_v43 = vshrl.u32 %v10032_v47, %v1630_v24  ;;  %v1652_v60 = vsel %vm1650_vm9, %v1640_v30, 2102212464  ;;  %v1655_v48 = vsel %vm1647_vm4, %v1634_v42, %v1637_v39 }
 0x26e   : > { %v4697_v62 = vsub.s32 0, %v11629_v11  ;;  %v4717_v61 = vsub.s32 4, %v4693_v54  ;;  %vm1649_vm5 = vcmp.lt.s32.totalorder %v1628_v9, 3  ;;  %v1656_v26 = vsel %vm1650_vm9, %v1643_v20, 920167782 }
 0x26f   : > { %v1651_v7 = vsel %vm1647_vm4, %v1631_v43, %v1634_v42  ;;  %v1657_v56 = vsel %vm1649_vm5, %v1640_v30, %v1656_v26  ;;  %v1659_v27 = vsel %vm1647_vm4, %v1637_v39, %v1640_v30  ;;  %v1660_v19 = vsel %vm1650_vm9, %v1646_v14, 1326507024 }
 0x270   : > { %v9230_v63 = vmin.u32 %v4697_v62, %v11629_v11  ;;  %v1653_v34 = vsel %vm1649_vm5, %v1637_v39, %v1652_v60  ;;  %v1658_v33 = vsel %vm1648_vm3, %v1655_v48, %v1657_v56  ;;  %v1661_v24 = vsel %vm1649_vm5, %v1643_v20, %v1660_v19 }
 0x271   : > { %vm4633_vm6 = vcmp.lt.s32.totalorder %v11428_v31, 0  ;;  %v1662_v59 = vsel %vm1648_vm3, %v1659_v27, %v1661_v24  ;;  %v11641_v21 = vmul.u32.u64.low %v11623_v50, %v1658_v33  ;;  %v11642_v58 = vmul.u32.u64.high %v11623_v50, %v1658_v33, %v11641_v21 }
 0x272   : > { %v4699_v17 = vclz %v9230_v63  ;;  %v4718_v8 = vsel %vm4633_vm6, %v4717_v61, %v4693_v54  ;;  %v4943_v4 = vand.u32 2147483647, %v11594_v13  ;;  %v11649_v12 = vadd.f32 %v10066_v1, %v11253_v15 }
 0x273   : > { %v1654_v46 = vsel %vm1648_vm3, %v1651_v7, %v1653_v34  ;;  %v11653_v32 = vmul.u32.u64.low %v11623_v50, %v1662_v59  ;;  %v11654_v6 = vmul.u32.u64.high %v11623_v50, %v1662_v59, %v11653_v32  ;;  %v4947_v44 = vshrl.u32 %v4946_v40, 23 }
 0x274   : > { %vm1398_vm10 = vcmp.lt.s32.totalorder %v11599_v38, 2  ;;  %vm1399_vm8 = vcmp.eq.s32.totalorder %v11599_v38, 0  ;;  %vm11662_vm11 = vcmp.le.f32.partialorder %v4631_v52, 0.7853982  ;;  %v9231_v15 = vadd.s32 4294967294, %v4699_v17 }
 0x275   : > { %vm1402_vm12 = vcmp.eq.s32.totalorder %v11599_v38, 2  ;;  %v4687_v9 = vadd.s32 %v11580_v10, %v11577_v22  ;;  %v1673_v49 = vadd.s32 1, %v11642_v58  ;;  %v9241_v42 = vadd.s32 4294967169, %v4947_v44 }
 0x276   : > { %v9825_v39 = vpop.eup %9824  ;;  %vm9232_vm14 = vcmp.lt.s32.totalorder %v9231_v15, 0  ;;  %v4720_v30 = vsel %vm11662_vm11, 0, %v4718_v8  ;;  %v1670_v5 = vmul.u32 %v11623_v50, %v1654_v46  ;;  %v4950_v52 = vand.u32 8388607, %v4943_v4 }
 0x277   : > { %v9827_v41 = vpop.eup %9826  ;;  %v1403_v25 = vxor.u32 2147483648, %v9825_v39  ;;  %v4702_v20 = vsel %vm9232_vm14, 0, %v9231_v15  ;;  %vm1672_vm13 = vc.u32 %v11654_v6, %v11641_v21  ;;  %v1511_v22 = vand.u32 2147483647, %v11649_v12 }
 0x278   : > { %v1400_v10 = vxor.u32 2147483648, %v9827_v41  ;;  %v4703_v45 = vsub.s32 32, %v4702_v20  ;;  %v4707_v14 = vsub.s32 4294967266, %v4702_v20  ;;  %v1514_v40 = vand.u32 2139095040, %v11649_v12 }
 0x279   : > { %v1404_v43 = vsel %vm1402_vm12, %v1403_v25, %v9827_v41  ;;  %v4704_v50 = vshll.u32 %v11629_v11, %v4702_v20  ;;  %v1674_v60 = vsel %vm1672_vm13, %v1673_v49, %v11642_v58  ;;  %v4953_v48 = vadd.s32 1, %v9241_v42 }
 0x27a   : > { %v1401_v62 = vsel %vm1399_vm8, %v9825_v39, %v1400_v10  ;;  %v4705_v61 = vshrl.u32 %v4687_v9, %v4703_v45  ;;  %v4708_v26 = vadd.s32 127, %v4707_v14  ;;  %v1675_v7 = vadd.s32 %v1674_v60, %v1670_v5 }
 0x27b   : > { %vm1395_vm1 = vweird.f32 %v11331_v23  ;;  %v1405_v56 = vsel %vm1398_vm10, %v1401_v62, %v1404_v43  ;;  %vm4954_vm15 = vcmp.gt.s32.totalorder %v4953_v48, 0  ;;  %v4724_v33 = vadd.s32 3, %v4720_v30 }
 0x27c   : > { %v1406_v27 = vsel %vm1395_vm1, nan, %v1405_v56  ;;  %v4706_v19 = vor.u32 %v4705_v61, %v4704_v50  ;;  %v4709_v63 = vshll.u32 %v4708_v26, 23  ;;  %v1676_v11 = vadd.s32 536870912, %v1675_v7 }
 0x27d   : > { %v7341_v34 = vsel %vm18_vm0, %v11331_v23, %v1406_v27  ;;  %v4951_v24 = vor.u32 8388608, %v4950_v52  ;;  %v4955_v59 = vsel %vm4954_vm15, %v4953_v48, 0  ;;  %v1515_v8 = vshrl.u32 %v1514_v40, 23 }
 0x27e   : > { %7407 = vst.msk [vmem:[%s10548_s19 + $0x30] sm:$0xff] %vm7400_vm7, %v7341_v34  ;;  %v4710_v58 = vor.u32 4788187, %v4709_v63  ;;  %v1677_v17 = vshrl.u32 %v1676_v11, 30  ;;  %v11694_v38 = vand.u32 8388607, %v1511_v22  ;;  %v4713_v44 = vcvt.s32.f32 %v4706_v19 }
 0x27f   : > { %v4957_v46 = vand.u32 31, %v4955_v59  ;;  %v11696_v9 = vand.u32 3, %v4724_v33  ;;  %v11699_v23 = vadd.s32 %v11641_v21, %v11654_v6  ;;  %v11701_v42 = vshll.u32 %v4951_v24, 8 }
 0x280   : > { %v4711_v32 = vand.u32 2147483647, %v4710_v58  ;;  %v1678_v15 = vshll.u32 %v1677_v17, 30  ;;  %v9109_v5 = vadd.s32 4294967169, %v1515_v8  ;;  %v1519_v52 = vor.u32 8388608, %v11694_v38 }
 0x281   : > { %v4958_v49 = vsub.s32 32, %v4957_v46  ;;  %v4956_v41 = vshrl.u32 %v4955_v59, 5  ;;  %v4960_v25 = vshll.u32 %v10032_v47, %v4957_v46  ;;  %vm1617_vm2 = vcmp.lt.s32.totalorder %v11484_v36, 0 }
 0x282   : > { %v4714_v39 = vmul.f32 %v4713_v44, %v4711_v32  ;;  %v11703_v30 = vsub.s32 %v1675_v7, %v1678_v15  ;;  %v4963_v6 = vshll.u32 %v10033_v51, %v4957_v46  ;;  %v4966_v43 = vshll.u32 %v10034_v53, %v4957_v46 }
 0x283   : > { %v4961_v20 = vshrl.u32 %v10033_v51, %v4958_v49  ;;  %v4964_v10 = vshrl.u32 %v10034_v53, %v4958_v49  ;;  %v4967_v14 = vshrl.u32 %v10035_v55, %v4958_v49  ;;  %v4969_v50 = vshll.u32 %v10035_v55, %v4957_v46 }
 0x284   : > { %v4715_v45 = vxor.u32 2147483648, %v4714_v39  ;;  %v1681_v21 = vsub.s32 0, %v11703_v30  ;;  %v4970_v60 = vshrl.u32 %v10036_v57, %v4958_v49  ;;  %v4972_v26 = vshll.u32 %v10036_v57, %v4957_v46 }
 0x285   : > { %v4962_v40 = vor.u32 %v4961_v20, %v4960_v25  ;;  %v4965_v61 = vor.u32 %v4964_v10, %v4963_v6  ;;  %v4968_v56 = vor.u32 %v4967_v14, %v4966_v43  ;;  %v4973_v19 = vshrl.u32 %v10037_v2, %v4958_v49 }
 0x286   : > { %v4716_v48 = vsel %vm4633_vm6, %v4715_v45, %v4714_v39  ;;  %v9114_v62 = vmin.u32 %v1681_v21, %v11703_v30  ;;  %v4971_v27 = vor.u32 %v4970_v60, %v4969_v50  ;;  %v1701_v11 = vsub.s32 4, %v1677_v17 }
 0x287   : > { %v4719_v7 = vsel %vm11662_vm11, %v11428_v31, %v4716_v48  ;;  %v1521_v34 = vadd.s32 1, %v9109_v5  ;;  %vm11726_vm4 = vcmp.le.f32.partialorder %v1615_v29, 0.7853982  ;;  %v4959_v24 = vshrl.u32 %v10032_v47, %v4958_v49 }
 0x288   : > { %9828 = vcosq.f32 %v4719_v7  ;;  %v1683_v63 = vclz %v9114_v62  ;;  %v4974_v59 = vor.u32 %v4973_v19, %v4972_v26  ;;  %vm4975_vm3 = vcmp.lt.s32.totalorder %v4956_v41, 1  ;;  %v11761_v26 = vpop.f32.mrb[12].mxu0 }
 0x289   : > { %9830 = vsinq.f32 %v4719_v7  ;;  %vm4977_vm9 = vcmp.lt.s32.totalorder %v4956_v41, 3  ;;  %vm4978_vm5 = vcmp.lt.s32.totalorder %v4956_v41, 4  ;;  %v4983_v58 = vsel %vm4975_vm3, %v4962_v40, %v4965_v61 }
 0x28a   : > { %v9115_v54 = vadd.s32 4294967294, %v1683_v63  ;;  %v4980_v8 = vsel %vm4978_vm5, %v4968_v56, 2102212464  ;;  %v4984_v46 = vsel %vm4978_vm5, %v4971_v27, 920167782  ;;  %v4987_v32 = vsel %vm4975_vm3, %v4965_v61, %v4968_v56 }
 0x28b   : > { %v4988_v44 = vsel %vm4978_vm5, %v4974_v59, 1326507024  ;;  %vm4976_vm10 = vcmp.lt.s32.totalorder %v4956_v41, 2  ;;  %v4985_v29 = vsel %vm4977_vm9, %v4968_v56, %v4984_v46  ;;  %vm4727_vm8 = vcmp.eq.s32.totalorder %v11696_v9, 0 }
 0x28c   : > { %vm9116_vm6 = vcmp.lt.s32.totalorder %v9115_v54, 0  ;;  %v4989_v15 = vsel %vm4977_vm9, %v4971_v27, %v4988_v44  ;;  %v1702_v39 = vsel %vm1617_vm2, %v1701_v11, %v1677_v17  ;;  %v4986_v5 = vsel %vm4976_vm10, %v4983_v58, %v4985_v29 }
 0x28d   : > { %v1686_v49 = vsel %vm9116_vm6, 0, %v9115_v54  ;;  %v4990_v25 = vsel %vm4976_vm10, %v4987_v32, %v4989_v15  ;;  %vm4726_vm11 = vcmp.lt.s32.totalorder %v11696_v9, 2  ;;  %v4979_v45 = vsel %vm4975_vm3, %v4959_v24, %v4962_v40 }
 0x28e   : > { %v1687_v20 = vsub.s32 32, %v1686_v49  ;;  %v1691_v10 = vsub.s32 4294967266, %v1686_v49  ;;  %v4981_v21 = vsel %vm4977_vm9, %v4965_v61, %v4980_v8  ;;  %vm4723_vm12 = vweird.f32 %v11428_v31 }
 0x28f   : > { %v11745_v6 = vmul.u32.u64.low %v11701_v42, %v4990_v25  ;;  %v11746_v14 = vmul.u32.u64.high %v11701_v42, %v4990_v25, %v11745_v6  ;;  %v11749_v17 = vmul.u32.u64.low %v11701_v42, %v4986_v5  ;;  %v11750_v43 = vmul.u32.u64.high %v11701_v42, %v4986_v5, %v11749_v17 }
 0x290   : > { %v1688_v50 = vshll.u32 %v11703_v30, %v1686_v49  ;;  %v1689_v60 = vshrl.u32 %v11699_v23, %v1687_v20  ;;  %v1692_v48 = vadd.s32 127, %v1691_v10  ;;  %vm1522_vm14 = vcmp.gt.s32.totalorder %v1521_v34, 0 }
 0x291   : > { %vm4730_vm13 = vcmp.eq.s32.totalorder %v11696_v9, 2  ;;  %v4982_v40 = vsel %vm4976_vm10, %v4979_v45, %v4981_v21  ;;  %v1523_v62 = vsel %vm1522_vm14, %v1521_v34, 0  ;;  %v11759_v61 = vshll.u32 %v1519_v52, 8 }
 0x292   : > { %v9829_v7 = vpop.eup %9828  ;;  %v1690_v56 = vor.u32 %v1689_v60, %v1688_v50  ;;  %v1693_v27 = vshll.u32 %v1692_v48, 23  ;;  %v1704_v30 = vsel %vm11726_vm4, 0, %v1702_v39  ;;  %v1525_v23 = vand.u32 31, %v1523_v62 }
 0x293   : > { %v9831_v19 = vpop.eup %9830  ;;  %v4731_v63 = vxor.u32 2147483648, %v9829_v7  ;;  %vm5000_vm1 = vc.u32 %v11746_v14, %v11749_v17  ;;  %v5001_v41 = vadd.s32 1, %v11750_v43  ;;  %v11770_v38 = vadd.f32 %v10066_v1, %v11303_v18 }
 0x294   : > { %v4728_v52 = vxor.u32 2147483648, %v9831_v19  ;;  %v1694_v11 = vor.u32 4788187, %v1693_v27  ;;  %v4998_v34 = vmul.u32 %v11701_v42, %v4982_v40  ;;  %v1526_v24 = vsub.s32 32, %v1525_v23 }
 0x295   : > { %v4732_v59 = vsel %vm4730_vm13, %v4731_v63, %v9831_v19  ;;  %v1708_v54 = vadd.s32 3, %v1704_v30  ;;  %v5002_v58 = vsel %vm5000_vm1, %v5001_v41, %v11750_v43  ;;  %v11776_v8 = vshrl.u32 %v1523_v62, 5 }
 0x296   : > { %v4729_v46 = vsel %vm4727_vm8, %v9829_v7, %v4728_v52  ;;  %v1695_v32 = vand.u32 2147483647, %v1694_v11  ;;  %v1697_v18 = vcvt.s32.f32 %v1690_v56  ;;  %v5003_v44 = vadd.s32 %v5002_v58, %v4998_v34 }
 0x297   : > { %v4733_v29 = vsel %vm4726_vm11, %v4729_v46, %v4732_v59  ;;  %v1528_v42 = vshll.u32 %v10032_v47, %v1525_v23  ;;  %v1529_v15 = vshrl.u32 %v10033_v51, %v1526_v24  ;;  %v1532_v49 = vshrl.u32 %v10034_v53, %v1526_v24 }
 0x298   : > { %v4734_v39 = vsel %vm4723_vm12, nan, %v4733_v29  ;;  %v1698_v5 = vmul.f32 %v1697_v18, %v1695_v32  ;;  %v5004_v25 = vadd.s32 536870912, %v5003_v44  ;;  %v1535_v20 = vshrl.u32 %v10035_v55, %v1526_v24 }
 0x299   : > { %v7373_v10 = vsel %vm18_vm0, %v11428_v31, %v4734_v39  ;;  %v1530_v45 = vor.u32 %v1529_v15, %v1528_v42  ;;  %v1531_v9 = vshll.u32 %v10033_v51, %v1525_v23  ;;  %v1534_v21 = vshll.u32 %v10034_v53, %v1525_v23 }
 0x29a   : > { %7439 = vst.msk [vmem:[%s10548_s19 + $0x130] sm:$0xff] %vm7400_vm7, %v7373_v10  ;;  %v1699_v6 = vxor.u32 2147483648, %v1698_v5  ;;  %v5005_v43 = vshrl.u32 %v5004_v25, 30  ;;  %v1537_v50 = vshll.u32 %v10035_v55, %v1525_v23  ;;  %v1538_v60 = vshrl.u32 %v10036_v57, %v1526_v24  ;;  %v11828_v10 = vpop.f32.mrb[12].mxu1 }
 0x29b   : > { %v1533_v48 = vor.u32 %v1532_v49, %v1531_v9  ;;  %v1536_v40 = vor.u32 %v1535_v20, %v1534_v21  ;;  %v1540_v62 = vshll.u32 %v10036_v57, %v1525_v23  ;;  %v1541_v7 = vshrl.u32 %v10037_v2, %v1526_v24 }
 0x29c   : > { %v1700_v31 = vsel %vm1617_vm2, %v1699_v6, %v1698_v5  ;;  %v11801_v56 = vand.u32 3, %v1708_v54  ;;  %v5006_v27 = vshll.u32 %v5005_v43, 30  ;;  %v1539_v30 = vor.u32 %v1538_v60, %v1537_v50 }
 0x29d   : > { %v1703_v19 = vsel %vm11726_vm4, %v11484_v36, %v1700_v31  ;;  %v1527_v63 = vshrl.u32 %v10032_v47, %v1526_v24  ;;  %v1542_v41 = vor.u32 %v1541_v7, %v1540_v62  ;;  %v4842_v52 = vand.u32 2139095040, %v11770_v38 }
 0x29e   : > { %9832 = vcosq.f32 %v1703_v19  ;;  %v11808_v23 = vsub.s32 %v5003_v44, %v5006_v27  ;;  %vm1543_vm15 = vcmp.lt.s32.totalorder %v11776_v8, 1  ;;  %vm1546_vm2 = vcmp.lt.s32.totalorder %v11776_v8, 4 }
 0x29f   : > { %9834 = vsinq.f32 %v1703_v19  ;;  %vm1544_vm3 = vcmp.lt.s32.totalorder %v11776_v8, 2  ;;  %v1548_v11 = vsel %vm1546_vm2, %v1536_v40, 2102212464  ;;  %v1551_v34 = vsel %vm1543_vm15, %v1530_v45, %v1533_v48 }
 0x2a0   : > { %v5009_v33 = vsub.s32 0, %v11808_v23  ;;  %v5029_v59 = vsub.s32 4, %v5005_v43  ;;  %vm1545_vm4 = vcmp.lt.s32.totalorder %v11776_v8, 3  ;;  %v1552_v24 = vsel %vm1546_vm2, %v1539_v30, 920167782 }
 0x2a1   : > { %v1547_v54 = vsel %vm1543_vm15, %v1527_v63, %v1530_v45  ;;  %v1553_v58 = vsel %vm1545_vm4, %v1536_v40, %v1552_v24  ;;  %v1555_v46 = vsel %vm1543_vm15, %v1533_v48, %v1536_v40  ;;  %v1556_v32 = vsel %vm1546_vm2, %v1542_v41, 1326507024 }
 0x2a2   : > { %v9242_v18 = vmin.u32 %v5009_v33, %v11808_v23  ;;  %v1549_v44 = vsel %vm1545_vm4, %v1533_v48, %v1548_v11  ;;  %v1554_v29 = vsel %vm1544_vm3, %v1551_v34, %v1553_v58  ;;  %v1557_v42 = vsel %vm1545_vm4, %v1539_v30, %v1556_v32 }
 0x2a3   : > { %vm4945_vm9 = vcmp.lt.s32.totalorder %v11594_v13, 0  ;;  %v1558_v15 = vsel %vm1544_vm3, %v1555_v46, %v1557_v42  ;;  %v11822_v49 = vmul.u32.u64.low %v11759_v61, %v1554_v29  ;;  %v11823_v39 = vmul.u32.u64.high %v11759_v61, %v1554_v29, %v11822_v49 }
 0x2a4   : > { %v5011_v5 = vclz %v9242_v18  ;;  %v5030_v25 = vsel %vm4945_vm9, %v5029_v59, %v5005_v43  ;;  %v4839_v20 = vand.u32 2147483647, %v11770_v38  ;;  %v1550_v45 = vsel %vm1544_vm3, %v1547_v54, %v1549_v44 }
 0x2a5   : > { %v11833_v9 = vmul.u32.u64.low %v11759_v61, %v1558_v15  ;;  %v11834_v21 = vmul.u32.u64.high %v11759_v61, %v1558_v15, %v11833_v9  ;;  %v4843_v6 = vshrl.u32 %v4842_v52, 23  ;;  %vm1710_vm5 = vcmp.lt.s32.totalorder %v11801_v56, 2 }
 0x2a6   : > { %vm11839_vm6 = vcmp.le.f32.partialorder %v4943_v4, 0.7853982  ;;  %v9243_v43 = vadd.s32 4294967294, %v5011_v5  ;;  %vm1711_vm10 = vcmp.eq.s32.totalorder %v11801_v56, 0  ;;  %vm1714_vm8 = vcmp.eq.s32.totalorder %v11801_v56, 2 }
 0x2a7   : > { %v1569_v8 = vadd.s32 1, %v11823_v39  ;;  %v9237_v60 = vadd.s32 4294967169, %v4843_v6  ;;  %v4999_v40 = vadd.s32 %v11749_v17, %v11746_v14  ;;  %v5032_v62 = vsel %vm11839_vm6, 0, %v5030_v25 }
 0x2a8   : > { %v9833_v48 = vpop.eup %9832  ;;  %vm9244_vm11 = vcmp.lt.s32.totalorder %v9243_v43, 0  ;;  %v1566_v4 = vmul.u32 %v11759_v61, %v1550_v45  ;;  %vm1568_vm12 = vc.u32 %v11834_v21, %v11822_v49  ;;  %v4846_v30 = vand.u32 8388607, %v4839_v20 }
 0x2a9   : > { %v9835_v7 = vpop.eup %9834  ;;  %v1715_v31 = vxor.u32 2147483648, %v9833_v48  ;;  %v5014_v27 = vsel %vm9244_vm11, 0, %v9243_v43  ;;  %v11856_v14 = vadd.f32 %v11422_v37, %v10066_v1  ;;  %v1570_v52 = vsel %vm1568_vm12, %v1569_v8, %v11823_v39 }
 0x2aa   : > { %v1712_v19 = vxor.u32 2147483648, %v9835_v7  ;;  %v5015_v63 = vsub.s32 32, %v5014_v27  ;;  %v5019_v41 = vsub.s32 4294967266, %v5014_v27  ;;  %v5016_v61 = vshll.u32 %v11808_v23, %v5014_v27 }
 0x2ab   : > { %v1716_v17 = vsel %vm1714_vm8, %v1715_v31, %v9835_v7  ;;  %v4849_v11 = vadd.s32 1, %v9237_v60  ;;  %v1571_v24 = vadd.s32 %v1570_v52, %v1566_v4  ;;  %vm1707_vm14 = vweird.f32 %v11484_v36 }
 0x2ac   : > { %v1713_v34 = vsel %vm1711_vm10, %v9833_v48, %v1712_v19  ;;  %v5017_v33 = vshrl.u32 %v4999_v40, %v5015_v63  ;;  %v5020_v59 = vadd.s32 127, %v5019_v41  ;;  %v5036_v18 = vadd.s32 3, %v5032_v62 }
 0x2ad   : > { %v1717_v37 = vsel %vm1710_vm5, %v1713_v34, %v1716_v17  ;;  %vm4850_vm13 = vcmp.gt.s32.totalorder %v4849_v11, 0  ;;  %v1572_v23 = vadd.s32 536870912, %v1571_v24  ;;  %v4847_v15 = vor.u32 8388608, %v4846_v30 }
 0x2ae   : > { %v1718_v54 = vsel %vm1707_vm14, nan, %v1717_v37  ;;  %v5018_v58 = vor.u32 %v5017_v33, %v5016_v61  ;;  %v5021_v46 = vshll.u32 %v5020_v59, 23  ;;  %v4851_v44 = vsel %vm4850_vm13, %v4849_v11, 0 }
 0x2af   : > { %v7344_v32 = vsel %vm18_vm0, %v11484_v36, %v1718_v54  ;;  %v1573_v42 = vshrl.u32 %v1572_v23, 30  ;;  %v1826_v39 = vand.u32 2139095040, %v11856_v14  ;;  %v4853_v56 = vand.u32 31, %v4851_v44 }
 0x2b0   : > { %7410 = vst.msk [vmem:[%s10548_s19 + $0x48] sm:$0xff] %vm7400_vm7, %v7344_v32  ;;  %v5022_v29 = vor.u32 4788187, %v5021_v46  ;;  %v5025_v25 = vcvt.s32.f32 %v5018_v58  ;;  %v11873_v9 = vand.u32 3, %v5036_v18  ;;  %v1567_v6 = vadd.s32 %v11822_v49, %v11834_v21 }
 0x2b1   : > { %v1574_v45 = vshll.u32 %v1573_v42, 30  ;;  %v4854_v43 = vsub.s32 32, %v4853_v56  ;;  %v1823_v36 = vand.u32 2147483647, %v11856_v14  ;;  %v11879_v48 = vshll.u32 %v4847_v15, 8 }
 0x2b2   : > { %v5023_v5 = vand.u32 2147483647, %v5022_v29  ;;  %v1827_v40 = vshrl.u32 %v1826_v39, 23  ;;  %v11881_v62 = vshrl.u32 %v4851_v44, 5  ;;  %v4856_v4 = vshll.u32 %v10032_v47, %v4853_v56 }
 0x2b3   : > { %v11877_v60 = vsub.s32 %v1571_v24, %v1574_v45  ;;  %v4857_v7 = vshrl.u32 %v10033_v51, %v4854_v43  ;;  %v4860_v31 = vshrl.u32 %v10034_v53, %v4854_v43  ;;  %vm1513_vm1 = vcmp.lt.s32.totalorder %v11649_v12, 0 }
 0x2b4   : > { %v5026_v8 = vmul.f32 %v5025_v25, %v5023_v5  ;;  %v4859_v21 = vshll.u32 %v10033_v51, %v4853_v56  ;;  %v4863_v30 = vshrl.u32 %v10035_v55, %v4854_v43  ;;  %v4862_v63 = vshll.u32 %v10034_v53, %v4853_v56 }
 0x2b5   : > { %v1577_v49 = vsub.s32 0, %v11877_v60  ;;  %v4858_v19 = vor.u32 %v4857_v7, %v4856_v4  ;;  %v4865_v41 = vshll.u32 %v10035_v55, %v4853_v56  ;;  %v4866_v17 = vshrl.u32 %v10036_v57, %v4854_v43 }
 0x2b6   : > { %v5027_v27 = vxor.u32 2147483648, %v5026_v8  ;;  %v4861_v11 = vor.u32 %v4860_v31, %v4859_v21  ;;  %v4868_v34 = vshll.u32 %v10036_v57, %v4853_v56  ;;  %v4864_v59 = vor.u32 %v4863_v30, %v4862_v63 }
 0x2b7   : > { %v9110_v52 = vmin.u32 %v1577_v49, %v11877_v60  ;;  %v4867_v24 = vor.u32 %v4866_v17, %v4865_v41  ;;  %v4869_v37 = vshrl.u32 %v10037_v2, %v4854_v43  ;;  %v1597_v58 = vsub.s32 4, %v1573_v42 }
 0x2b8   : > { %v5028_v61 = vsel %vm4945_vm9, %v5027_v27, %v5026_v8  ;;  %v9121_v46 = vadd.s32 4294967169, %v1827_v40  ;;  %v4855_v23 = vshrl.u32 %v10032_v47, %v4854_v43  ;;  %vm4871_vm15 = vcmp.lt.s32.totalorder %v11881_v62, 1  ;;  %v11930_v27 = vpop.f32.mrb[13].mxu0 }
 0x2b9   : > { %v5031_v33 = vsel %vm11839_vm6, %v11594_v13, %v5028_v61  ;;  %v1579_v54 = vclz %v9110_v52  ;;  %v4870_v32 = vor.u32 %v4869_v37, %v4868_v34  ;;  %vm11905_vm2 = vcmp.le.f32.partialorder %v1511_v22, 0.7853982 }
 0x2ba   : > { %9836 = vcosq.f32 %v5031_v33  ;;  %vm4873_vm3 = vcmp.lt.s32.totalorder %v11881_v62, 3  ;;  %vm4874_vm4 = vcmp.lt.s32.totalorder %v11881_v62, 4  ;;  %v4879_v44 = vsel %vm4871_vm15, %v4858_v19, %v4861_v11 }
 0x2bb   : > { %9838 = vsinq.f32 %v5031_v33  ;;  %v9111_v50 = vadd.s32 4294967294, %v1579_v54  ;;  %v4876_v29 = vsel %vm4874_vm4, %v4864_v59, 2102212464  ;;  %v4880_v15 = vsel %vm4874_vm4, %v4867_v24, 920167782 }
 0x2bc   : > { %v4883_v39 = vsel %vm4871_vm15, %v4861_v11, %v4864_v59  ;;  %v4884_v56 = vsel %vm4874_vm4, %v4870_v32, 1326507024  ;;  %vm4872_vm5 = vcmp.lt.s32.totalorder %v11881_v62, 2  ;;  %v4881_v22 = vsel %vm4873_vm3, %v4864_v59, %v4880_v15 }
 0x2bd   : > { %vm9112_vm9 = vcmp.lt.s32.totalorder %v9111_v50, 0  ;;  %v4885_v5 = vsel %vm4873_vm3, %v4867_v24, %v4884_v56  ;;  %v1598_v45 = vsel %vm1513_vm1, %v1597_v58, %v1573_v42  ;;  %v4882_v43 = vsel %vm4872_vm5, %v4879_v44, %v4881_v22 }
 0x2be   : > { %v1582_v25 = vsel %vm9112_vm9, 0, %v9111_v50  ;;  %v4886_v8 = vsel %vm4872_vm5, %v4883_v39, %v4885_v5  ;;  %v4875_v7 = vsel %vm4871_vm15, %v4855_v23, %v4858_v19  ;;  %v4877_v31 = vsel %vm4873_vm3, %v4861_v11, %v4876_v29 }
 0x2bf   : > { %v1583_v40 = vsub.s32 32, %v1582_v25  ;;  %v1587_v4 = vsub.s32 4294967266, %v1582_v25  ;;  %vm5035_vm6 = vweird.f32 %v11594_v13  ;;  %v1584_v63 = vshll.u32 %v11877_v60, %v1582_v25 }
 0x2c0   : > { %v11934_v42 = vmul.u32.u64.low %v11879_v48, %v4886_v8  ;;  %v11935_v49 = vmul.u32.u64.high %v11879_v48, %v4886_v8, %v11934_v42  ;;  %v11938_v21 = vmul.u32.u64.low %v11879_v48, %v4882_v43  ;;  %v11939_v30 = vmul.u32.u64.high %v11879_v48, %v4882_v43, %v11938_v21 }
 0x2c1   : > { %v1585_v41 = vshrl.u32 %v1567_v6, %v1583_v40  ;;  %v1588_v19 = vadd.s32 127, %v1587_v4  ;;  %v1833_v17 = vadd.s32 1, %v9121_v46  ;;  %vm5038_vm10 = vcmp.lt.s32.totalorder %v11873_v9, 2 }
 0x2c2   : > { %vm5039_vm8 = vcmp.eq.s32.totalorder %v11873_v9, 0  ;;  %vm5042_vm11 = vcmp.eq.s32.totalorder %v11873_v9, 2  ;;  %v4878_v61 = vsel %vm4872_vm5, %v4875_v7, %v4877_v31  ;;  %v1830_v33 = vand.u32 8388607, %v1823_v36 }
 0x2c3   : > { %v1586_v11 = vor.u32 %v1585_v41, %v1584_v63  ;;  %v1589_v34 = vshll.u32 %v1588_v19, 23  ;;  %vm1834_vm12 = vcmp.gt.s32.totalorder %v1833_v17, 0  ;;  %v1600_v59 = vsel %vm11905_vm2, 0, %v1598_v45 }
 0x2c4   : > { %v9837_v52 = vpop.eup %9836  ;;  %vm4896_vm14 = vc.u32 %v11935_v49, %v11938_v21  ;;  %v4897_v24 = vadd.s32 1, %v11939_v30  ;;  %v4894_v54 = vmul.u32 %v11879_v48, %v4878_v61  ;;  %v1835_v58 = vsel %vm1834_vm12, %v1833_v17, 0 }
 0x2c5   : > { %v9839_v60 = vpop.eup %9838  ;;  %v5043_v6 = vxor.u32 2147483648, %v9837_v52  ;;  %v1590_v62 = vor.u32 4788187, %v1589_v34  ;;  %v1837_v32 = vand.u32 31, %v1835_v58  ;;  %v11961_v50 = vadd.f32 %v11488_v16, %v10066_v1 }
 0x2c6   : > { %v5040_v37 = vxor.u32 2147483648, %v9839_v60  ;;  %v4898_v23 = vsel %vm4896_vm14, %v4897_v24, %v11939_v30  ;;  %v1593_v15 = vcvt.s32.f32 %v1586_v11  ;;  %v1604_v56 = vadd.s32 3, %v1600_v59 }
 0x2c7   : > { %v5044_v46 = vsel %vm5042_vm11, %v5043_v6, %v9839_v60  ;;  %v1591_v29 = vand.u32 2147483647, %v1590_v62  ;;  %v4899_v39 = vadd.s32 %v4898_v23, %v4894_v54  ;;  %v1831_v22 = vor.u32 8388608, %v1830_v33 }
 0x2c8   : > { %v5041_v44 = vsel %vm5039_vm8, %v9837_v52, %v5040_v37  ;;  %v1838_v5 = vsub.s32 32, %v1837_v32  ;;  %v1836_v16 = vshrl.u32 %v1835_v58, 5  ;;  %v1840_v40 = vshll.u32 %v10032_v47, %v1837_v32 }
 0x2c9   : > { %v5045_v48 = vsel %vm5038_vm10, %v5041_v44, %v5044_v46  ;;  %v1594_v45 = vmul.f32 %v1593_v15, %v1591_v29  ;;  %v4900_v43 = vadd.s32 536870912, %v4899_v39  ;;  %v1843_v42 = vshll.u32 %v10033_v51, %v1837_v32 }
 0x2ca   : > { %v5046_v25 = vsel %vm5035_vm6, nan, %v5045_v48  ;;  %v1841_v4 = vshrl.u32 %v10033_v51, %v1838_v5  ;;  %v1844_v9 = vshrl.u32 %v10034_v53, %v1838_v5  ;;  %v1847_v30 = vshrl.u32 %v10035_v55, %v1838_v5 }
 0x2cb   : > { %v7376_v8 = vsel %vm18_vm0, %v11594_v13, %v5046_v25  ;;  %v1595_v7 = vxor.u32 2147483648, %v1594_v45  ;;  %v11977_v31 = vshrl.u32 %v4900_v43, 30  ;;  %v1846_v41 = vshll.u32 %v10034_v53, %v1837_v32 }
 0x2cc   : > { %7442 = vst.msk [vmem:[%s10548_s19 + $0x148] sm:$0xff] %vm7400_vm7, %v7376_v8  ;;  %v1842_v63 = vor.u32 %v1841_v4, %v1840_v40  ;;  %v1849_v13 = vshll.u32 %v10035_v55, %v1837_v32  ;;  %v1850_v19 = vshrl.u32 %v10036_v57, %v1838_v5  ;;  %v1845_v52 = vor.u32 %v1844_v9, %v1843_v42  ;;  %v12016_v4 = vpop.f32.mrb[13].mxu1 }
 0x2cd   : > { %v1596_v17 = vsel %vm1513_vm1, %v1595_v7, %v1594_v45  ;;  %v4902_v61 = vshll.u32 %v11977_v31, 30  ;;  %v1852_v11 = vshll.u32 %v10036_v57, %v1837_v32  ;;  %v1848_v33 = vor.u32 %v1847_v30, %v1846_v41 }
 0x2ce   : > { %v1599_v34 = vsel %vm11905_vm2, %v11649_v12, %v1596_v17  ;;  %v1851_v60 = vor.u32 %v1850_v19, %v1849_v13  ;;  %v1853_v6 = vshrl.u32 %v10037_v2, %v1838_v5  ;;  %v11996_v24 = vadd.f32 %v10066_v1, %v11573_v28 }
 0x2cf   : > { %9840 = vcosq.f32 %v1599_v34  ;;  %v11992_v59 = vsub.s32 %v4899_v39, %v4902_v61  ;;  %v1605_v37 = vand.u32 3, %v1604_v56  ;;  %v5154_v54 = vand.u32 2139095040, %v11961_v50 }
 0x2d0   : > { %9842 = vsinq.f32 %v1599_v34  ;;  %v1854_v62 = vor.u32 %v1853_v6, %v1852_v11  ;;  %vm4841_vm13 = vcmp.lt.s32.totalorder %v11770_v38, 0  ;;  %vm1855_vm1 = vcmp.lt.s32.totalorder %v1836_v16, 1 }
 0x2d1   : > { %v4905_v18 = vsub.s32 0, %v11992_v59  ;;  %vm1858_vm15 = vcmp.lt.s32.totalorder %v1836_v16, 4  ;;  %v1871_v58 = vshll.u32 %v1831_v22, 8  ;;  %vm1857_vm2 = vcmp.lt.s32.totalorder %v1836_v16, 3 }
 0x2d2   : > { %v1860_v46 = vsel %vm1858_vm15, %v1848_v33, 2102212464  ;;  %v1863_v23 = vsel %vm1855_vm1, %v1842_v63, %v1845_v52  ;;  %v1864_v32 = vsel %vm1858_vm15, %v1851_v60, 920167782  ;;  %v1839_v44 = vshrl.u32 %v10032_v47, %v1838_v5 }
 0x2d3   : > { %v9238_v28 = vmin.u32 %v4905_v18, %v11992_v59  ;;  %vm1856_vm3 = vcmp.lt.s32.totalorder %v1836_v16, 2  ;;  %v1865_v29 = vsel %vm1857_vm2, %v1848_v33, %v1864_v32  ;;  %v1867_v39 = vsel %vm1855_vm1, %v1845_v52, %v1848_v33 }
 0x2d4   : > { %v1866_v15 = vsel %vm1856_vm3, %v1863_v23, %v1865_v29  ;;  %v1868_v48 = vsel %vm1858_vm15, %v1854_v62, 1326507024  ;;  %v5155_v56 = vshrl.u32 %v5154_v54, 23  ;;  %vm1606_vm4 = vcmp.lt.s32.totalorder %v1605_v37, 2 }
 0x2d5   : > { %v4907_v22 = vclz %v9238_v28  ;;  %v1859_v25 = vsel %vm1855_vm1, %v1839_v44, %v1842_v63  ;;  %v1861_v45 = vsel %vm1857_vm2, %v1845_v52, %v1860_v46  ;;  %vm1603_vm9 = vweird.f32 %v11649_v12 }
 0x2d6   : > { %v4925_v43 = vsub.s32 4, %v11977_v31  ;;  %v1869_v5 = vsel %vm1857_vm2, %v1851_v60, %v1868_v48  ;;  %v12012_v8 = vmul.u32.u64.low %v1871_v58, %v1866_v15  ;;  %v12013_v40 = vmul.u32.u64.high %v1871_v58, %v1866_v15, %v12012_v8 }
 0x2d7   : > { %vm1607_vm5 = vcmp.eq.s32.totalorder %v1605_v37, 0  ;;  %v9239_v9 = vadd.s32 4294967294, %v4907_v22  ;;  %v1870_v7 = vsel %vm1856_vm3, %v1867_v39, %v1869_v5  ;;  %v9249_v42 = vadd.s32 4294967169, %v5155_v56 }
 0x2d8   : > { %vm1610_vm6 = vcmp.eq.s32.totalorder %v1605_v37, 2  ;;  %v1862_v30 = vsel %vm1856_vm3, %v1859_v25, %v1861_v45  ;;  %v12020_v63 = vmul.u32.u64.low %v1871_v58, %v1870_v7  ;;  %v12021_v41 = vmul.u32.u64.high %v1871_v58, %v1870_v7, %v12020_v63 }
 0x2d9   : > { %v9841_v13 = vpop.eup %9840  ;;  %v4895_v19 = vadd.s32 %v11938_v21, %v11935_v49  ;;  %vm9240_vm10 = vcmp.lt.s32.totalorder %v9239_v9, 0  ;;  %v5151_v17 = vand.u32 2147483647, %v11961_v50  ;;  %v5161_v61 = vadd.s32 1, %v9249_v42 }
 0x2da   : > { %v9843_v52 = vpop.eup %9842  ;;  %v1611_v11 = vxor.u32 2147483648, %v9841_v13  ;;  %v4910_v34 = vsel %vm9240_vm10, 0, %v9239_v9  ;;  %v4926_v33 = vsel %vm4841_vm13, %v4925_v43, %v11977_v31  ;;  %v1881_v16 = vadd.s32 1, %v12013_v40 }
 0x2db   : > { %v1608_v60 = vxor.u32 2147483648, %v9843_v52  ;;  %v4911_v6 = vsub.s32 32, %v4910_v34  ;;  %v4915_v62 = vsub.s32 4294967266, %v4910_v34  ;;  %v1878_v54 = vmul.u32 %v1871_v58, %v1862_v30 }
 0x2dc   : > { %v1612_v18 = vsel %vm1610_vm6, %v1611_v11, %v9843_v52  ;;  %v4912_v49 = vshll.u32 %v11992_v59, %v4910_v34  ;;  %vm1880_vm8 = vc.u32 %v12021_v41, %v12012_v8  ;;  %vm5162_vm11 = vcmp.gt.s32.totalorder %v5161_v61, 0 }
 0x2dd   : > { %v1609_v21 = vsel %vm1607_vm5, %v9841_v13, %v1608_v60  ;;  %v4913_v46 = vshrl.u32 %v4895_v19, %v4911_v6  ;;  %v4916_v23 = vadd.s32 127, %v4915_v62  ;;  %v1882_v31 = vsel %vm1880_vm8, %v1881_v16, %v12013_v40 }
 0x2de   : > { %v1613_v32 = vsel %vm1606_vm4, %v1609_v21, %v1612_v18  ;;  %v1883_v28 = vadd.s32 %v1882_v31, %v1878_v54  ;;  %v5158_v58 = vand.u32 8388607, %v5151_v17  ;;  %v5163_v44 = vsel %vm5162_vm11, %v5161_v61, 0 }
 0x2df   : > { %v1614_v59 = vsel %vm1603_vm9, nan, %v1613_v32  ;;  %v4914_v29 = vor.u32 %v4913_v46, %v4912_v49  ;;  %v4917_v15 = vshll.u32 %v4916_v23, 23  ;;  %vm12046_vm12 = vcmp.le.f32.partialorder %v4839_v20, 0.7853982 }
 0x2e0   : > { %v7343_v39 = vsel %vm18_vm0, %v11649_v12, %v1614_v59  ;;  %v1884_v37 = vadd.s32 536870912, %v1883_v28  ;;  %v5165_v56 = vand.u32 31, %v5163_v44  ;;  %v4928_v25 = vsel %vm12046_vm12, 0, %v4926_v33 }
 0x2e1   : > { %7409 = vst.msk [vmem:[%s10548_s19 + $0x40] sm:$0xff] %vm7400_vm7, %v7343_v39  ;;  %v4918_v22 = vor.u32 4788187, %v4917_v15  ;;  %v1719_v45 = vand.u32 2147483647, %v11996_v24  ;;  %v12057_v43 = vadd.f32 %v10066_v1, %v11656_v35  ;;  %v5159_v20 = vor.u32 8388608, %v5158_v58 }
 0x2e2   : > { %v12059_v12 = vshrl.u32 %v1884_v37, 30  ;;  %v5166_v5 = vsub.s32 32, %v5165_v56  ;;  %v1722_v40 = vand.u32 2139095040, %v11996_v24  ;;  %v4921_v7 = vcvt.s32.f32 %v4914_v29 }
 0x2e3   : > { %v4919_v9 = vand.u32 2147483647, %v4918_v22  ;;  %v12062_v42 = vshrl.u32 %v5163_v44, 5  ;;  %v5168_v30 = vshll.u32 %v10032_v47, %v5165_v56  ;;  %v5171_v19 = vshll.u32 %v10033_v51, %v5165_v56 }
 0x2e4   : > { %v1886_v63 = vshll.u32 %v12059_v12, 30  ;;  %v5169_v13 = vshrl.u32 %v10033_v51, %v5166_v5  ;;  %v5174_v35 = vshll.u32 %v10034_v53, %v5165_v56  ;;  %v5172_v52 = vshrl.u32 %v10034_v53, %v5166_v5 }
 0x2e5   : > { %v4922_v61 = vmul.f32 %v4921_v7, %v4919_v9  ;;  %v5175_v11 = vshrl.u32 %v10035_v55, %v5166_v5  ;;  %v5178_v34 = vshrl.u32 %v10036_v57, %v5166_v5  ;;  %v4932_v33 = vadd.s32 3, %v4928_v25 }
 0x2e6   : > { %v12072_v16 = vsub.s32 %v1883_v28, %v1886_v63  ;;  %v5177_v60 = vshll.u32 %v10035_v55, %v5165_v56  ;;  %v5181_v6 = vshrl.u32 %v10037_v2, %v5166_v5  ;;  %v5170_v54 = vor.u32 %v5169_v13, %v5168_v30 }
 0x2e7   : > { %v4923_v62 = vxor.u32 2147483648, %v4922_v61  ;;  %v5173_v18 = vor.u32 %v5172_v52, %v5171_v19  ;;  %v5176_v49 = vor.u32 %v5175_v11, %v5174_v35  ;;  %v5180_v23 = vshll.u32 %v10036_v57, %v5165_v56 }
 0x2e8   : > { %v1889_v21 = vsub.s32 0, %v12072_v16  ;;  %v5179_v46 = vor.u32 %v5178_v34, %v5177_v60  ;;  %v12078_v31 = vshll.u32 %v5159_v20, 8  ;;  %vm1825_vm14 = vcmp.lt.s32.totalorder %v11856_v14, 0 }
 0x2e9   : > { %v4924_v32 = vsel %vm4841_vm13, %v4923_v62, %v4922_v61  ;;  %v5167_v28 = vshrl.u32 %v10032_v47, %v5166_v5  ;;  %vm5183_vm1 = vcmp.lt.s32.totalorder %v12062_v42, 1  ;;  %v1723_v58 = vshrl.u32 %v1722_v40, 23 }
 0x2ea   : > { %v4927_v44 = vsel %vm12046_vm12, %v11770_v38, %v4924_v32  ;;  %v9122_v59 = vmin.u32 %v1889_v21, %v12072_v16  ;;  %v5182_v29 = vor.u32 %v5181_v6, %v5180_v23  ;;  %vm5186_vm15 = vcmp.lt.s32.totalorder %v12062_v42, 4 }
 0x2eb   : > { %9844 = vcosq.f32 %v4927_v44  ;;  %v5188_v15 = vsel %vm5186_vm15, %v5176_v49, 2102212464  ;;  %v5191_v39 = vsel %vm5183_vm1, %v5170_v54, %v5173_v18  ;;  %v5192_v37 = vsel %vm5186_vm15, %v5179_v46, 920167782 }
 0x2ec   : > { %9846 = vsinq.f32 %v4927_v44  ;;  %v1891_v56 = vclz %v9122_v59  ;;  %vm5184_vm13 = vcmp.lt.s32.totalorder %v12062_v42, 2  ;;  %vm5185_vm2 = vcmp.lt.s32.totalorder %v12062_v42, 3 }
 0x2ed   : > { %v1909_v48 = vsub.s32 4, %v12059_v12  ;;  %v5187_v22 = vsel %vm5183_vm1, %v5167_v28, %v5170_v54  ;;  %v5193_v25 = vsel %vm5185_vm2, %v5176_v49, %v5192_v37  ;;  %v5195_v20 = vsel %vm5183_vm1, %v5173_v18, %v5176_v49 }
 0x2ee   : > { %v9123_v5 = vadd.s32 4294967294, %v1891_v56  ;;  %v5189_v40 = vsel %vm5185_vm2, %v5173_v18, %v5188_v15  ;;  %v5194_v9 = vsel %vm5184_vm13, %v5191_v39, %v5193_v25  ;;  %v5196_v7 = vsel %vm5186_vm15, %v5182_v29, 1326507024 }
 0x2ef   : > { %v5197_v30 = vsel %vm5185_vm2, %v5179_v46, %v5196_v7  ;;  %v12108_v63 = vmul.u32.u64.low %v12078_v31, %v5194_v9  ;;  %v12109_v13 = vmul.u32.u64.high %v12078_v31, %v5194_v9, %v12108_v63  ;;  %v9117_v19 = vadd.s32 4294967169, %v1723_v58 }
 0x2f0   : > { %vm12114_vm3 = vcmp.le.f32.partialorder %v1823_v36, 0.7853982  ;;  %v1879_v61 = vadd.s32 %v12012_v8, %v12021_v41  ;;  %vm9124_vm4 = vcmp.lt.s32.totalorder %v9123_v5, 0  ;;  %v5198_v52 = vsel %vm5184_vm13, %v5195_v20, %v5197_v30 }
 0x2f1   : > { %v1894_v11 = vsel %vm9124_vm4, 0, %v9123_v5  ;;  %v12123_v34 = vmul.u32.u64.low %v12078_v31, %v5198_v52  ;;  %v12124_v60 = vmul.u32.u64.high %v12078_v31, %v5198_v52, %v12123_v34  ;;  %v1729_v6 = vadd.s32 1, %v9117_v19 }
 0x2f2   : > { %vm4931_vm9 = vweird.f32 %v11770_v38  ;;  %v1895_v62 = vsub.s32 32, %v1894_v11  ;;  %v1899_v36 = vsub.s32 4294967266, %v1894_v11  ;;  %v1910_v54 = vsel %vm1825_vm14, %v1909_v48, %v12059_v12 }
 0x2f3   : > { %v5190_v8 = vsel %vm5184_vm13, %v5187_v22, %v5189_v40  ;;  %v4933_v41 = vand.u32 3, %v4932_v33  ;;  %v5209_v18 = vadd.s32 1, %v12109_v13  ;;  %v1726_v49 = vand.u32 8388607, %v1719_v45 }
 0x2f4   : > { %vm1730_vm5 = vcmp.gt.s32.totalorder %v1729_v6, 0  ;;  %v1896_v21 = vshll.u32 %v12072_v16, %v1894_v11  ;;  %v1897_v46 = vshrl.u32 %v1879_v61, %v1895_v62  ;;  %v1900_v23 = vadd.s32 127, %v1899_v36  ;;  %v12142_v16 = vpop.f32.mrb[14].mxu0 }
 0x2f5   : > { %v1731_v32 = vsel %vm1730_vm5, %v1729_v6, 0  ;;  %v9845_v28 = vpop.eup %9844  ;;  %v1912_v58 = vsel %vm12114_vm3, 0, %v1910_v54  ;;  %v5206_v12 = vmul.u32 %v12078_v31, %v5190_v8  ;;  %vm5208_vm6 = vc.u32 %v12124_v60, %v12108_v63 }
 0x2f6   : > { %v1733_v42 = vand.u32 31, %v1731_v32  ;;  %v9847_v33 = vpop.eup %9846  ;;  %v4939_v44 = vxor.u32 2147483648, %v9845_v28  ;;  %v1898_v59 = vor.u32 %v1897_v46, %v1896_v21  ;;  %v1901_v29 = vshll.u32 %v1900_v23, 23 }
 0x2f7   : > { %v5210_v15 = vsel %vm5208_vm6, %v5209_v18, %v12109_v13  ;;  %v4936_v39 = vxor.u32 2147483648, %v9847_v33  ;;  %vm4938_vm10 = vcmp.eq.s32.totalorder %v4933_v41, 2  ;;  %vm4934_vm8 = vcmp.lt.s32.totalorder %v4933_v41, 2 }
 0x2f8   : > { %v5211_v37 = vadd.s32 %v5210_v15, %v5206_v12  ;;  %v1734_v56 = vsub.s32 32, %v1733_v42  ;;  %vm4935_vm11 = vcmp.eq.s32.totalorder %v4933_v41, 0  ;;  %v4940_v48 = vsel %vm4938_vm10, %v4939_v44, %v9847_v33 }
 0x2f9   : > { %v1902_v31 = vor.u32 4788187, %v1901_v29  ;;  %v4937_v22 = vsel %vm4935_vm11, %v9845_v28, %v4936_v39  ;;  %v1916_v25 = vadd.s32 3, %v1912_v58  ;;  %v1727_v5 = vor.u32 8388608, %v1726_v49 }
 0x2fa   : > { %v5212_v20 = vadd.s32 536870912, %v5211_v37  ;;  %v4941_v40 = vsel %vm4934_vm8, %v4937_v22, %v4940_v48  ;;  %v1905_v7 = vcvt.s32.f32 %v1898_v59  ;;  %v1732_v30 = vshrl.u32 %v1731_v32, 5 }
 0x2fb   : > { %v1903_v9 = vand.u32 2147483647, %v1902_v31  ;;  %v4942_v13 = vsel %vm4931_vm9, nan, %v4941_v40  ;;  %v1737_v61 = vshrl.u32 %v10033_v51, %v1734_v56  ;;  %v1743_v52 = vshrl.u32 %v10035_v55, %v1734_v56 }
 0x2fc   : > { %v12146_v19 = vshrl.u32 %v5212_v20, 30  ;;  %v7375_v11 = vsel %vm18_vm0, %v11770_v38, %v4942_v13  ;;  %v1736_v6 = vshll.u32 %v10032_v47, %v1733_v42  ;;  %v1740_v62 = vshrl.u32 %v10034_v53, %v1734_v56 }
 0x2fd   : > { %v1906_v34 = vmul.f32 %v1905_v7, %v1903_v9  ;;  %7441 = vst.msk [vmem:[%s10548_s19 + $0x140] sm:$0xff] %vm7400_vm7, %v7375_v11  ;;  %v1739_v54 = vshll.u32 %v10033_v51, %v1733_v42  ;;  %v1742_v8 = vshll.u32 %v10034_v53, %v1733_v42  ;;  %v1746_v41 = vshrl.u32 %v10036_v57, %v1734_v56 }
 0x2fe   : > { %v5214_v36 = vshll.u32 %v12146_v19, 30  ;;  %v1745_v49 = vshll.u32 %v10035_v55, %v1733_v42  ;;  %v1748_v38 = vshll.u32 %v10036_v57, %v1733_v42  ;;  %v1749_v21 = vshrl.u32 %v10037_v2, %v1734_v56 }
 0x2ff   : > { %v1907_v18 = vxor.u32 2147483648, %v1906_v34  ;;  %v1738_v23 = vor.u32 %v1737_v61, %v1736_v6  ;;  %v1744_v32 = vor.u32 %v1743_v52, %v1742_v8  ;;  %v1741_v58 = vor.u32 %v1740_v62, %v1739_v54 }
 0x300   : > { %v12164_v46 = vsub.s32 %v5211_v37, %v5214_v36  ;;  %v1747_v12 = vor.u32 %v1746_v41, %v1745_v49  ;;  %v1750_v33 = vor.u32 %v1749_v21, %v1748_v38  ;;  %v12171_v59 = vand.u32 3, %v1916_v25 }
 0x301   : > { %v1908_v28 = vsel %vm1825_vm14, %v1907_v18, %v1906_v34  ;;  %v1767_v29 = vshll.u32 %v1727_v5, 8  ;;  %v1735_v15 = vshrl.u32 %v10032_v47, %v1734_v56  ;;  %vm1754_vm12 = vcmp.lt.s32.totalorder %v1732_v30, 4  ;;  %v12180_v34 = vpop.f32.mrb[14].mxu1 }
 0x302   : > { %v1911_v44 = vsel %vm12114_vm3, %v11856_v14, %v1908_v28  ;;  %v5217_v42 = vsub.s32 0, %v12164_v46  ;;  %v5050_v39 = vand.u32 2139095040, %v12057_v43  ;;  %vm1751_vm14 = vcmp.lt.s32.totalorder %v1732_v30, 1 }
 0x303   : > { %9848 = vcosq.f32 %v1911_v44  ;;  %v1756_v48 = vsel %vm1754_vm12, %v1744_v32, 2102212464  ;;  %v1759_v31 = vsel %vm1751_vm14, %v1738_v23, %v1741_v58  ;;  %v1760_v22 = vsel %vm1754_vm12, %v1747_v12, 920167782 }
 0x304   : > { %9850 = vsinq.f32 %v1911_v44  ;;  %v9250_v37 = vmin.u32 %v5217_v42, %v12164_v46  ;;  %v1763_v35 = vsel %vm1751_vm14, %v1741_v58, %v1744_v32  ;;  %v1764_v20 = vsel %vm1754_vm12, %v1750_v33, 1326507024 }
 0x305   : > { %v5237_v40 = vsub.s32 4, %v12146_v19  ;;  %vm1752_vm1 = vcmp.lt.s32.totalorder %v1732_v30, 2  ;;  %vm1753_vm15 = vcmp.lt.s32.totalorder %v1732_v30, 3  ;;  %v1755_v5 = vsel %vm1751_vm14, %v1735_v15, %v1738_v23 }
 0x306   : > { %v5219_v25 = vclz %v9250_v37  ;;  %v1757_v9 = vsel %vm1753_vm15, %v1741_v58, %v1756_v48  ;;  %v1761_v56 = vsel %vm1753_vm15, %v1744_v32, %v1760_v22  ;;  %v1765_v7 = vsel %vm1753_vm15, %v1747_v12, %v1764_v20 }
 0x307   : > { %v1762_v61 = vsel %vm1752_vm1, %v1759_v31, %v1761_v56  ;;  %v1766_v52 = vsel %vm1752_vm1, %v1763_v35, %v1765_v7  ;;  %v5051_v11 = vshrl.u32 %v5050_v39, 23  ;;  %vm1915_vm13 = vweird.f32 %v11856_v14 }
 0x308   : > { %v9251_v13 = vadd.s32 4294967294, %v5219_v25  ;;  %v12182_v6 = vmul.u32.u64.low %v1767_v29, %v1766_v52  ;;  %v12183_v62 = vmul.u32.u64.high %v1767_v29, %v1766_v52, %v12182_v6  ;;  %vm5153_vm2 = vcmp.lt.s32.totalorder %v11961_v50, 0 }
 0x309   : > { %v12185_v36 = vmul.u32.u64.low %v1767_v29, %v1762_v61  ;;  %v12186_v54 = vmul.u32.u64.high %v1767_v29, %v1762_v61, %v12185_v36  ;;  %v1758_v8 = vsel %vm1752_vm1, %v1755_v5, %v1757_v9  ;;  %v9245_v41 = vadd.s32 4294967169, %v5051_v11 }
 0x30a   : > { %vm9252_vm3 = vcmp.lt.s32.totalorder %v9251_v13, 0  ;;  %vm1919_vm4 = vcmp.eq.s32.totalorder %v12171_v59, 0  ;;  %vm12195_vm9 = vcmp.le.f32.partialorder %v5151_v17, 0.7853982  ;;  %v5047_v38 = vand.u32 2147483647, %v12057_v43 }
 0x30b   : > { %v5222_v49 = vsel %vm9252_vm3, 0, %v9251_v13  ;;  %v5207_v21 = vadd.s32 %v12108_v63, %v12124_v60  ;;  %v5238_v30 = vsel %vm5153_vm2, %v5237_v40, %v12146_v19  ;;  %v1774_v58 = vmul.u32 %v1767_v29, %v1758_v8 }
 0x30c   : > { %v5223_v23 = vsub.s32 32, %v5222_v49  ;;  %v5227_v32 = vsub.s32 4294967266, %v5222_v49  ;;  %vm1776_vm5 = vc.u32 %v12183_v62, %v12185_v36  ;;  %v1777_v17 = vadd.s32 1, %v12186_v54 }
 0x30d   : > { %v9849_v28 = vpop.eup %9848  ;;  %v5057_v12 = vadd.s32 1, %v9245_v41  ;;  %v5224_v42 = vshll.u32 %v12164_v46, %v5222_v49  ;;  %vm1922_vm6 = vcmp.eq.s32.totalorder %v12171_v59, 2  ;;  %vm1918_vm8 = vcmp.lt.s32.totalorder %v12171_v59, 2 }
 0x30e   : > { %v9851_v33 = vpop.eup %9850  ;;  %v1923_v44 = vxor.u32 2147483648, %v9849_v28  ;;  %v5225_v15 = vshrl.u32 %v5207_v21, %v5223_v23  ;;  %v5228_v63 = vadd.s32 127, %v5227_v32  ;;  %v1778_v39 = vsel %vm1776_vm5, %v1777_v17, %v12186_v54 }
 0x30f   : > { %v1920_v60 = vxor.u32 2147483648, %v9851_v33  ;;  %vm5058_vm10 = vcmp.gt.s32.totalorder %v5057_v12, 0  ;;  %v1779_v48 = vadd.s32 %v1778_v39, %v1774_v58  ;;  %v5240_v46 = vsel %vm12195_vm9, 0, %v5238_v30 }
 0x310   : > { %v1924_v19 = vsel %vm1922_vm6, %v1923_v44, %v9851_v33  ;;  %v5226_v29 = vor.u32 %v5225_v15, %v5224_v42  ;;  %v5229_v37 = vshll.u32 %v5228_v63, 23  ;;  %v5059_v22 = vsel %vm5058_vm10, %v5057_v12, 0 }
 0x311   : > { %v1921_v31 = vsel %vm1919_vm4, %v9849_v28, %v1920_v60  ;;  %v1780_v25 = vadd.s32 536870912, %v1779_v48  ;;  %v5054_v40 = vand.u32 8388607, %v5047_v38  ;;  %v5061_v9 = vand.u32 31, %v5059_v22 }
 0x312   : > { %v1925_v35 = vsel %vm1918_vm8, %v1921_v31, %v1924_v19  ;;  %v5230_v20 = vor.u32 4788187, %v5229_v37  ;;  %v5233_v7 = vcvt.s32.f32 %v5226_v29  ;;  %v5244_v61 = vadd.s32 3, %v5240_v46 }
 0x313   : > { %v1926_v5 = vsel %vm1915_vm13, nan, %v1925_v35  ;;  %v12223_v13 = vshrl.u32 %v1780_v25, 30  ;;  %v5062_v52 = vsub.s32 32, %v5061_v9  ;;  %v12229_v11 = vadd.f32 %v11761_v26, %v10066_v1 }
 0x314   : > { %v7346_v56 = vsel %vm18_vm0, %v11856_v14, %v1926_v5  ;;  %v5231_v59 = vand.u32 2147483647, %v5230_v20  ;;  %v5055_v8 = vor.u32 8388608, %v5054_v40  ;;  %v5064_v41 = vshll.u32 %v10032_v47, %v5061_v9 }
 0x315   : > { %7412 = vst.msk [vmem:[%s10548_s19 + $0x58] sm:$0xff] %vm7400_vm7, %v7346_v56  ;;  %v1782_v54 = vshll.u32 %v12223_v13, 30  ;;  %v5065_v14 = vshrl.u32 %v10033_v51, %v5062_v52  ;;  %v5067_v49 = vshll.u32 %v10033_v51, %v5061_v9  ;;  %v5068_v21 = vshrl.u32 %v10034_v53, %v5062_v52 }
 0x316   : > { %v5234_v6 = vmul.f32 %v5233_v7, %v5231_v59  ;;  %v5071_v23 = vshrl.u32 %v10035_v55, %v5062_v52  ;;  %v5070_v26 = vshll.u32 %v10034_v53, %v5061_v9  ;;  %v5074_v28 = vshrl.u32 %v10036_v57, %v5062_v52 }
 0x317   : > { %v12237_v30 = vsub.s32 %v1779_v48, %v1782_v54  ;;  %v12241_v58 = vand.u32 3, %v5244_v61  ;;  %v5060_v17 = vshrl.u32 %v5059_v22, 5  ;;  %v5066_v12 = vor.u32 %v5065_v14, %v5064_v41 }
 0x318   : > { %v5235_v32 = vxor.u32 2147483648, %v5234_v6  ;;  %v5073_v33 = vshll.u32 %v10035_v55, %v5061_v9  ;;  %v5069_v15 = vor.u32 %v5068_v21, %v5067_v49  ;;  %v5072_v63 = vor.u32 %v5071_v23, %v5070_v26 }
 0x319   : > { %v1785_v42 = vsub.s32 0, %v12237_v30  ;;  %vm1721_vm11 = vcmp.lt.s32.totalorder %v11996_v24, 0  ;;  %v5076_v19 = vshll.u32 %v10036_v57, %v5061_v9  ;;  %v5077_v29 = vshrl.u32 %v10037_v2, %v5062_v52 }
 0x31a   : > { %v5236_v44 = vsel %vm5153_vm2, %v5235_v32, %v5234_v6  ;;  %v5075_v39 = vor.u32 %v5074_v28, %v5073_v33  ;;  %v12254_v48 = vshll.u32 %v5055_v8, 8  ;;  %v2034_v31 = vand.u32 2139095040, %v12229_v11  ;;  %v12279_v33 = vpop.f32.mrb[15].mxu0 }
 0x31b   : > { %v5239_v60 = vsel %vm12195_vm9, %v11961_v50, %v5236_v44  ;;  %v9118_v37 = vmin.u32 %v1785_v42, %v12237_v30  ;;  %v1805_v46 = vsub.s32 4, %v12223_v13  ;;  %v5063_v18 = vshrl.u32 %v10032_v47, %v5062_v52 }
 0x31c   : > { %9852 = vcosq.f32 %v5239_v60  ;;  %v5078_v22 = vor.u32 %v5077_v29, %v5076_v19  ;;  %vm5079_vm12 = vcmp.lt.s32.totalorder %v5060_v17, 1  ;;  %vm5080_vm14 = vcmp.lt.s32.totalorder %v5060_v17, 2 }
 0x31d   : > { %9854 = vsinq.f32 %v5239_v60  ;;  %v1787_v35 = vclz %v9118_v37  ;;  %vm5082_vm1 = vcmp.lt.s32.totalorder %v5060_v17, 4  ;;  %vm5081_vm15 = vcmp.lt.s32.totalorder %v5060_v17, 3 }
 0x31e   : > { %v5084_v20 = vsel %vm5082_vm1, %v5072_v63, 2102212464  ;;  %v5087_v25 = vsel %vm5079_vm12, %v5066_v12, %v5069_v15  ;;  %v5088_v40 = vsel %vm5082_vm1, %v5075_v39, 920167782  ;;  %vm12261_vm13 = vcmp.le.f32.partialorder %v1719_v45, 0.7853982 }
 0x31f   : > { %v9119_v9 = vadd.s32 4294967294, %v1787_v35  ;;  %v5083_v56 = vsel %vm5079_vm12, %v5063_v18, %v5066_v12  ;;  %v5089_v59 = vsel %vm5081_vm15, %v5072_v63, %v5088_v40  ;;  %v5091_v7 = vsel %vm5079_vm12, %v5069_v15, %v5072_v63 }
 0x320   : > { %vm5247_vm2 = vcmp.eq.s32.totalorder %v12241_v58, 0  ;;  %v5085_v61 = vsel %vm5081_vm15, %v5069_v15, %v5084_v20  ;;  %v5090_v52 = vsel %vm5080_vm14, %v5087_v25, %v5089_v59  ;;  %v5092_v6 = vsel %vm5082_vm1, %v5078_v22, 1326507024 }
 0x321   : > { %v2035_v54 = vshrl.u32 %v2034_v31, 23  ;;  %vm9120_vm3 = vcmp.lt.s32.totalorder %v9119_v9, 0  ;;  %v5093_v8 = vsel %vm5081_vm15, %v5075_v39, %v5092_v6  ;;  %v2031_v21 = vand.u32 2147483647, %v12229_v11 }
 0x322   : > { %v12268_v41 = vmul.u32.u64.low %v12254_v48, %v5090_v52  ;;  %v12269_v14 = vmul.u32.u64.high %v12254_v48, %v5090_v52, %v12268_v41  ;;  %v1790_v45 = vsel %vm9120_vm3, 0, %v9119_v9  ;;  %v5094_v49 = vsel %vm5080_vm14, %v5091_v7, %v5093_v8 }
 0x323   : > { %v9129_v23 = vadd.s32 4294967169, %v2035_v54  ;;  %v1775_v32 = vadd.s32 %v12185_v36, %v12183_v62  ;;  %v1791_v26 = vsub.s32 32, %v1790_v45  ;;  %v1795_v28 = vsub.s32 4294967266, %v1790_v45 }
 0x324   : > { %v1806_v12 = vsel %vm1721_vm11, %v1805_v46, %v12223_v13  ;;  %v5086_v44 = vsel %vm5080_vm14, %v5083_v56, %v5085_v61  ;;  %v12283_v42 = vmul.u32.u64.low %v12254_v48, %v5094_v49  ;;  %v12284_v15 = vmul.u32.u64.high %v12254_v48, %v5094_v49, %v12283_v42 }
 0x325   : > { %v2041_v63 = vadd.s32 1, %v9129_v23  ;;  %v1792_v39 = vshll.u32 %v12237_v30, %v1790_v45  ;;  %v1793_v19 = vshrl.u32 %v1775_v32, %v1791_v26  ;;  %v1796_v62 = vadd.s32 127, %v1795_v28 }
 0x326   : > { %v9853_v60 = vpop.eup %9852  ;;  %v5105_v36 = vadd.s32 1, %v12269_v14  ;;  %vm5250_vm4 = vcmp.eq.s32.totalorder %v12241_v58, 2  ;;  %v2038_v17 = vand.u32 8388607, %v2031_v21  ;;  %v1808_v30 = vsel %vm12261_vm13, 0, %v1806_v12 }
 0x327   : > { %v9855_v29 = vpop.eup %9854  ;;  %v5251_v13 = vxor.u32 2147483648, %v9853_v60  ;;  %vm2042_vm9 = vcmp.gt.s32.totalorder %v2041_v63, 0  ;;  %v1794_v31 = vor.u32 %v1793_v19, %v1792_v39  ;;  %v1797_v46 = vshll.u32 %v1796_v62, 23 }
 0x328   : > { %v5248_v37 = vxor.u32 2147483648, %v9855_v29  ;;  %v2043_v18 = vsel %vm2042_vm9, %v2041_v63, 0  ;;  %v5102_v35 = vmul.u32 %v12254_v48, %v5086_v44  ;;  %vm5104_vm5 = vc.u32 %v12284_v15, %v12268_v41 }
 0x329   : > { %v5252_v22 = vsel %vm5250_vm4, %v5251_v13, %v9855_v29  ;;  %vm5246_vm6 = vcmp.lt.s32.totalorder %v12241_v58, 2  ;;  %v1798_v25 = vor.u32 4788187, %v1797_v46  ;;  %v5106_v40 = vsel %vm5104_vm5, %v5105_v36, %v12269_v14 }
 0x32a   : > { %v5249_v20 = vsel %vm5247_vm2, %v9853_v60, %v5248_v37  ;;  %vm5243_vm10 = vweird.f32 %v11961_v50  ;;  %v5107_v56 = vadd.s32 %v5106_v40, %v5102_v35  ;;  %v2045_v59 = vand.u32 31, %v2043_v18 }
 0x32b   : > { %v5253_v9 = vsel %vm5246_vm6, %v5249_v20, %v5252_v22  ;;  %v1799_v61 = vand.u32 2147483647, %v1798_v25  ;;  %v1801_v48 = vcvt.s32.f32 %v1794_v31  ;;  %v1812_v52 = vadd.s32 3, %v1808_v30 }
 0x32c   : > { %v5254_v7 = vsel %vm5243_vm10, nan, %v5253_v9  ;;  %v5108_v54 = vadd.s32 536870912, %v5107_v56  ;;  %v2039_v58 = vor.u32 8388608, %v2038_v17  ;;  %v2046_v8 = vsub.s32 32, %v2045_v59 }
 0x32d   : > { %v7378_v6 = vsel %vm18_vm0, %v11961_v50, %v5254_v7  ;;  %v1802_v45 = vmul.f32 %v1801_v48, %v1799_v61  ;;  %v2044_v14 = vshrl.u32 %v2043_v18, 5  ;;  %v2048_v49 = vshll.u32 %v10032_v47, %v2045_v59 }
 0x32e   : > { %7444 = vst.msk [vmem:[%s10548_s19 + $0x158] sm:$0xff] %vm7400_vm7, %v7378_v6  ;;  %v2051_v23 = vshll.u32 %v10033_v51, %v2045_v59  ;;  %vm5049_vm8 = vcmp.lt.s32.totalorder %v12057_v43, 0  ;;  %v5109_v32 = vshrl.u32 %v5108_v54, 30  ;;  %v2049_v26 = vshrl.u32 %v10033_v51, %v2046_v8 }
 0x32f   : > { %v2052_v28 = vshrl.u32 %v10034_v53, %v2046_v8  ;;  %v2054_v50 = vshll.u32 %v10034_v53, %v2045_v59  ;;  %v1803_v12 = vxor.u32 2147483648, %v1802_v45  ;;  %v2055_v44 = vshrl.u32 %v10035_v55, %v2046_v8 }
 0x330   : > { %v2057_v42 = vshll.u32 %v10035_v55, %v2045_v59  ;;  %v2058_v63 = vshrl.u32 %v10036_v57, %v2046_v8  ;;  %v5110_v60 = vshll.u32 %v5109_v32, 30  ;;  %v2050_v39 = vor.u32 %v2049_v26, %v2048_v49 }
 0x331   : > { %v2053_v19 = vor.u32 %v2052_v28, %v2051_v23  ;;  %v2060_v62 = vshll.u32 %v10036_v57, %v2045_v59  ;;  %v1804_v36 = vsel %vm1721_vm11, %v1803_v12, %v1802_v45  ;;  %v2056_v29 = vor.u32 %v2055_v44, %v2054_v50 }
 0x332   : > { %v2059_v13 = vor.u32 %v2058_v63, %v2057_v42  ;;  %v2061_v17 = vshrl.u32 %v10037_v2, %v2046_v8  ;;  %v1807_v37 = vsel %vm12261_vm13, %v11996_v24, %v1804_v36  ;;  %v12322_v31 = vand.u32 3, %v1812_v52 }
 0x333   : > { %v12324_v46 = vsub.s32 %v5107_v56, %v5110_v60  ;;  %v12328_v18 = vadd.f32 %v11828_v10, %v10066_v1  ;;  %9856 = vcosq.f32 %v1807_v37  ;;  %v5133_v22 = vsub.s32 4, %v5109_v32 }
 0x334   : > { %v2062_v30 = vor.u32 %v2061_v17, %v2060_v62  ;;  %v2079_v35 = vshll.u32 %v2039_v58, 8  ;;  %9858 = vsinq.f32 %v1807_v37  ;;  %vm2063_vm11 = vcmp.lt.s32.totalorder %v2044_v14, 1 }
 0x335   : > { %v5113_v20 = vsub.s32 0, %v12324_v46  ;;  %vm2066_vm12 = vcmp.lt.s32.totalorder %v2044_v14, 4  ;;  %vm2065_vm14 = vcmp.lt.s32.totalorder %v2044_v14, 3  ;;  %v2071_v25 = vsel %vm2063_vm11, %v2050_v39, %v2053_v19 }
 0x336   : > { %v2068_v5 = vsel %vm2066_vm12, %v2056_v29, 2102212464  ;;  %v2072_v40 = vsel %vm2066_vm12, %v2059_v13, 920167782  ;;  %v2047_v56 = vshrl.u32 %v10032_v47, %v2046_v8  ;;  %vm2064_vm1 = vcmp.lt.s32.totalorder %v2044_v14, 2 }
 0x337   : > { %v9246_v9 = vmin.u32 %v5113_v20, %v12324_v46  ;;  %v2073_v10 = vsel %vm2065_vm14, %v2056_v29, %v2072_v40  ;;  %v5134_v59 = vsel %vm5049_vm8, %v5133_v22, %v5109_v32  ;;  %v2075_v61 = vsel %vm2063_vm11, %v2053_v19, %v2056_v29  ;;  %v12368_v22 = vpop.f32.mrb[15].mxu1 }
 0x338   : > { %v2074_v7 = vsel %vm2064_vm1, %v2071_v25, %v2073_v10  ;;  %v2076_v48 = vsel %vm2066_vm12, %v2062_v30, 1326507024  ;;  %vm12341_vm15 = vcmp.le.f32.partialorder %v5047_v38, 0.7853982  ;;  %v2067_v54 = vsel %vm2063_vm11, %v2047_v56, %v2050_v39 }
 0x339   : > { %v5115_v6 = vclz %v9246_v9  ;;  %v2069_v58 = vsel %vm2065_vm14, %v2053_v19, %v2068_v5  ;;  %vm1814_vm13 = vcmp.lt.s32.totalorder %v12322_v31, 2  ;;  %v2077_v8 = vsel %vm2065_vm14, %v2059_v13, %v2076_v48 }
 0x33a   : > { %v12349_v45 = vmul.u32.u64.low %v2079_v35, %v2074_v7  ;;  %v12350_v49 = vmul.u32.u64.high %v2079_v35, %v2074_v7, %v12349_v45  ;;  %v5362_v23 = vand.u32 2139095040, %v12328_v18  ;;  %vm1811_vm2 = vweird.f32 %v11996_v24 }
 0x33b   : > { %vm1815_vm3 = vcmp.eq.s32.totalorder %v12322_v31, 0  ;;  %v9247_v38 = vadd.s32 4294967294, %v5115_v6  ;;  %v5136_v32 = vsel %vm12341_vm15, 0, %v5134_v59  ;;  %v2078_v26 = vsel %vm2064_vm1, %v2075_v61, %v2077_v8 }
 0x33c   : > { %v2070_v28 = vsel %vm2064_vm1, %v2067_v54, %v2069_v58  ;;  %v12360_v50 = vmul.u32.u64.low %v2079_v35, %v2078_v26  ;;  %v12361_v12 = vmul.u32.u64.high %v2079_v35, %v2078_v26, %v12360_v50  ;;  %v5363_v44 = vshrl.u32 %v5362_v23, 23 }
 0x33d   : > { %vm1818_vm4 = vcmp.eq.s32.totalorder %v12322_v31, 2  ;;  %v5103_v42 = vadd.s32 %v12268_v41, %v12284_v15  ;;  %vm9248_vm9 = vcmp.lt.s32.totalorder %v9247_v38, 0  ;;  %v5359_v63 = vand.u32 2147483647, %v12328_v18  ;;  %v9857_v60 = vpop.eup %9856 }
 0x33e   : > { %v5118_v39 = vsel %vm9248_vm9, 0, %v9247_v38  ;;  %v5140_v19 = vadd.s32 3, %v5136_v32  ;;  %v2089_v62 = vadd.s32 1, %v12350_v49  ;;  %v9257_v36 = vadd.s32 4294967169, %v5363_v44  ;;  %v9859_v14 = vpop.eup %9858 }
 0x33f   : > { %v1819_v29 = vxor.u32 2147483648, %v9857_v60  ;;  %v5119_v13 = vsub.s32 32, %v5118_v39  ;;  %v5123_v17 = vsub.s32 4294967266, %v5118_v39  ;;  %v2086_v37 = vmul.u32 %v2079_v35, %v2070_v28 }
 0x340   : > { %v1816_v30 = vxor.u32 2147483648, %v9859_v14  ;;  %v5120_v20 = vshll.u32 %v12324_v46, %v5118_v39  ;;  %vm2088_vm5 = vc.u32 %v12361_v12, %v12349_v45  ;;  %v5369_v41 = vadd.s32 1, %v9257_v36 }
 0x341   : > { %v1820_v15 = vsel %vm1818_vm4, %v1819_v29, %v9859_v14  ;;  %v5121_v5 = vshrl.u32 %v5103_v42, %v5119_v13  ;;  %v5124_v25 = vadd.s32 127, %v5123_v17  ;;  %v2090_v40 = vsel %vm2088_vm5, %v2089_v62, %v12350_v49 }
 0x342   : > { %v1817_v35 = vsel %vm1815_vm3, %v9857_v60, %v1816_v30  ;;  %v2091_v9 = vadd.s32 %v2090_v40, %v2086_v37  ;;  %v5366_v56 = vand.u32 8388607, %v5359_v63  ;;  %vm5370_vm6 = vcmp.gt.s32.totalorder %v5369_v41, 0 }
 0x343   : > { %v1821_v46 = vsel %vm1814_vm13, %v1817_v35, %v1820_v15  ;;  %v5122_v10 = vor.u32 %v5121_v5, %v5120_v20  ;;  %v5125_v59 = vshll.u32 %v5124_v25, 23  ;;  %v5371_v7 = vsel %vm5370_vm6, %v5369_v41, 0 }
 0x344   : > { %v1822_v61 = vsel %vm1811_vm2, nan, %v1821_v46  ;;  %v2092_v48 = vadd.s32 536870912, %v2091_v9  ;;  %v5373_v6 = vand.u32 31, %v5371_v7  ;;  %v12386_v54 = vadd.f32 %v10066_v1, %v11930_v27 }
 0x345   : > { %v7345_v58 = vsel %vm18_vm0, %v11996_v24, %v1822_v61  ;;  %v5126_v8 = vor.u32 4788187, %v5125_v59  ;;  %v5129_v38 = vcvt.s32.f32 %v5122_v10  ;;  %v12395_v32 = vand.u32 3, %v5140_v19 }
 0x346   : > { %7411 = vst.msk [vmem:[%s10548_s19 + $0x50] sm:$0xff] %vm7400_vm7, %v7345_v58  ;;  %v12393_v31 = vshrl.u32 %v2092_v48, 30  ;;  %v5374_v49 = vsub.s32 32, %v5373_v6  ;;  %v5367_v26 = vor.u32 8388608, %v5366_v56  ;;  %v5376_v27 = vshll.u32 %v10032_v47, %v5373_v6 }
 0x347   : > { %v5127_v23 = vand.u32 2147483647, %v5126_v8  ;;  %v1930_v44 = vand.u32 2139095040, %v12386_v54  ;;  %v5379_v19 = vshll.u32 %v10033_v51, %v5373_v6  ;;  %v5382_v36 = vshll.u32 %v10034_v53, %v5373_v6 }
 0x348   : > { %v2094_v28 = vshll.u32 %v12393_v31, 30  ;;  %v5377_v50 = vshrl.u32 %v10033_v51, %v5374_v49  ;;  %v5380_v42 = vshrl.u32 %v10034_v53, %v5374_v49  ;;  %v5383_v60 = vshrl.u32 %v10035_v55, %v5374_v49 }
 0x349   : > { %v5130_v24 = vmul.f32 %v5129_v38, %v5127_v23  ;;  %v5386_v39 = vshrl.u32 %v10036_v57, %v5374_v49  ;;  %v5389_v14 = vshrl.u32 %v10037_v2, %v5374_v49  ;;  %v5372_v13 = vshrl.u32 %v5371_v7, 5 }
 0x34a   : > { %v12404_v62 = vsub.s32 %v2091_v9, %v2094_v28  ;;  %v5385_v17 = vshll.u32 %v10035_v55, %v5373_v6  ;;  %v5388_v37 = vshll.u32 %v10036_v57, %v5373_v6  ;;  %v5378_v20 = vor.u32 %v5377_v50, %v5376_v27 }
 0x34b   : > { %v5131_v29 = vxor.u32 2147483648, %v5130_v24  ;;  %v5381_v41 = vor.u32 %v5380_v42, %v5379_v19  ;;  %v5384_v15 = vor.u32 %v5383_v60, %v5382_v36  ;;  %v2087_v25 = vadd.s32 %v12349_v45, %v12361_v12 }
 0x34c   : > { %v2097_v30 = vsub.s32 0, %v12404_v62  ;;  %v5387_v40 = vor.u32 %v5386_v39, %v5385_v17  ;;  %v5407_v35 = vshll.u32 %v5367_v26, 8  ;;  %v5390_v46 = vor.u32 %v5389_v14, %v5388_v37 }
 0x34d   : > { %v5132_v5 = vsel %vm5049_vm8, %v5131_v29, %v5130_v24  ;;  %v1931_v10 = vshrl.u32 %v1930_v44, 23  ;;  %v5375_v59 = vshrl.u32 %v10032_v47, %v5374_v49  ;;  %vm5391_vm10 = vcmp.lt.s32.totalorder %v5372_v13, 1  ;;  %v12432_v29 = vpop.f32.mrb[16].mxu0 }
 0x34e   : > { %v5135_v9 = vsel %vm12341_vm15, %v12057_v43, %v5132_v5  ;;  %v9130_v56 = vmin.u32 %v2097_v30, %v12404_v62  ;;  %vm5394_vm11 = vcmp.lt.s32.totalorder %v5372_v13, 4  ;;  %v5399_v48 = vsel %vm5391_vm10, %v5378_v20, %v5381_v41 }
 0x34f   : > { %9860 = vcosq.f32 %v5135_v9  ;;  %v5396_v61 = vsel %vm5394_vm11, %v5384_v15, 2102212464  ;;  %vm5392_vm8 = vcmp.lt.s32.totalorder %v5372_v13, 2  ;;  %vm5393_vm12 = vcmp.lt.s32.totalorder %v5372_v13, 3 }
 0x350   : > { %9862 = vsinq.f32 %v5135_v9  ;;  %v2099_v7 = vclz %v9130_v56  ;;  %v5400_v45 = vsel %vm5394_vm11, %v5387_v40, 920167782  ;;  %v5403_v12 = vsel %vm5391_vm10, %v5381_v41, %v5384_v15 }
 0x351   : > { %v5395_v52 = vsel %vm5391_vm10, %v5375_v59, %v5378_v20  ;;  %v5401_v58 = vsel %vm5393_vm12, %v5384_v15, %v5400_v45  ;;  %v5404_v8 = vsel %vm5394_vm11, %v5390_v46, 1326507024  ;;  %v5397_v23 = vsel %vm5393_vm12, %v5381_v41, %v5396_v61 }
 0x352   : > { %v9131_v6 = vadd.s32 4294967294, %v2099_v7  ;;  %v5402_v38 = vsel %vm5392_vm8, %v5399_v48, %v5401_v58  ;;  %v5405_v26 = vsel %vm5393_vm12, %v5387_v40, %v5404_v8  ;;  %v9125_v28 = vadd.s32 4294967169, %v1931_v10 }
 0x353   : > { %v5406_v49 = vsel %vm5392_vm8, %v5403_v12, %v5405_v26  ;;  %v12423_v27 = vmul.u32.u64.low %v5407_v35, %v5402_v38  ;;  %v12424_v50 = vmul.u32.u64.high %v5407_v35, %v5402_v38, %v12423_v27  ;;  %v2117_v24 = vsub.s32 4, %v12393_v31 }
 0x354   : > { %vm9132_vm14 = vcmp.lt.s32.totalorder %v9131_v6, 0  ;;  %v12428_v42 = vmul.u32.u64.low %v5407_v35, %v5406_v49  ;;  %v12429_v60 = vmul.u32.u64.high %v5407_v35, %v5406_v49, %v12428_v42  ;;  %v5398_v36 = vsel %vm5392_vm8, %v5395_v52, %v5397_v23 }
 0x355   : > { %v2102_v44 = vsel %vm9132_vm14, 0, %v9131_v6  ;;  %v1937_v14 = vadd.s32 1, %v9125_v28  ;;  %vm5143_vm1 = vcmp.eq.s32.totalorder %v12395_v32, 0  ;;  %vm12437_vm15 = vcmp.le.f32.partialorder %v2031_v21, 0.7853982 }
 0x356   : > { %v2103_v39 = vsub.s32 32, %v2102_v44  ;;  %v2107_v19 = vsub.s32 4294967266, %v2102_v44  ;;  %vm2033_vm13 = vcmp.lt.s32.totalorder %v12229_v11, 0  ;;  %v2104_v37 = vshll.u32 %v12404_v62, %v2102_v44 }
 0x357   : > { %v5417_v13 = vadd.s32 1, %v12424_v50  ;;  %vm1938_vm2 = vcmp.gt.s32.totalorder %v1937_v14, 0  ;;  %v2118_v15 = vsel %vm2033_vm13, %v2117_v24, %v12393_v31  ;;  %v5414_v5 = vmul.u32 %v5407_v35, %v5398_v36 }
 0x358   : > { %v2105_v30 = vshrl.u32 %v2087_v25, %v2103_v39  ;;  %v2108_v20 = vadd.s32 127, %v2107_v19  ;;  %vm5416_vm3 = vc.u32 %v12429_v60, %v12423_v27  ;;  %v1939_v21 = vsel %vm1938_vm2, %v1937_v14, 0 }
 0x359   : > { %v9861_v41 = vpop.eup %9860  ;;  %v5418_v62 = vsel %vm5416_vm3, %v5417_v13, %v12424_v50  ;;  %vm5146_vm4 = vcmp.eq.s32.totalorder %v12395_v32, 2  ;;  %v1941_v59 = vand.u32 31, %v1939_v21  ;;  %v2120_v31 = vsel %vm12437_vm15, 0, %v2118_v15 }
 0x35a   : > { %v9863_v40 = vpop.eup %9862  ;;  %v5147_v9 = vxor.u32 2147483648, %v9861_v41  ;;  %v2106_v56 = vor.u32 %v2105_v30, %v2104_v37  ;;  %v2109_v46 = vshll.u32 %v2108_v20, 23  ;;  %v5419_v10 = vadd.s32 %v5418_v62, %v5414_v5 }
 0x35b   : > { %v5144_v25 = vxor.u32 2147483648, %v9863_v40  ;;  %v1927_v35 = vand.u32 2147483647, %v12386_v54  ;;  %vm5142_vm9 = vcmp.lt.s32.totalorder %v12395_v32, 2  ;;  %v1942_v12 = vsub.s32 32, %v1941_v59 }
 0x35c   : > { %v5148_v7 = vsel %vm5146_vm4, %v5147_v9, %v9863_v40  ;;  %v2110_v61 = vor.u32 4788187, %v2109_v46  ;;  %v5420_v45 = vadd.s32 536870912, %v5419_v10  ;;  %vm5139_vm5 = vweird.f32 %v12057_v43 }
 0x35d   : > { %v5145_v48 = vsel %vm5143_vm1, %v9861_v41, %v5144_v25  ;;  %v2113_v58 = vcvt.s32.f32 %v2106_v56  ;;  %v2124_v23 = vadd.s32 3, %v2120_v31  ;;  %v1945_v26 = vshrl.u32 %v10033_v51, %v1942_v12 }
 0x35e   : > { %v5149_v6 = vsel %vm5142_vm9, %v5145_v48, %v5148_v7  ;;  %v2111_v52 = vand.u32 2147483647, %v2110_v61  ;;  %v5421_v38 = vshrl.u32 %v5420_v45, 30  ;;  %v1934_v32 = vand.u32 8388607, %v1927_v35 }
 0x35f   : > { %v5150_v8 = vsel %vm5139_vm5, nan, %v5149_v6  ;;  %v1948_v50 = vshrl.u32 %v10034_v53, %v1942_v12  ;;  %v1940_v24 = vshrl.u32 %v1939_v21, 5  ;;  %v1944_v42 = vshll.u32 %v10032_v47, %v1941_v59 }
 0x360   : > { %v7377_v28 = vsel %vm18_vm0, %v12057_v43, %v5150_v8  ;;  %v2114_v49 = vmul.f32 %v2113_v58, %v2111_v52  ;;  %v5422_v44 = vshll.u32 %v5421_v38, 30  ;;  %v1951_v39 = vshrl.u32 %v10035_v55, %v1942_v12 }
 0x361   : > { %7443 = vst.msk [vmem:[%s10548_s19 + $0x150] sm:$0xff] %vm7400_vm7, %v7377_v28  ;;  %v1947_v36 = vshll.u32 %v10033_v51, %v1941_v59  ;;  %v1953_v14 = vshll.u32 %v10035_v55, %v1941_v59  ;;  %v1954_v43 = vshrl.u32 %v10036_v57, %v1942_v12  ;;  %v1946_v30 = vor.u32 %v1945_v26, %v1944_v42 }
 0x362   : > { %v2115_v19 = vxor.u32 2147483648, %v2114_v49  ;;  %v12472_v37 = vsub.s32 %v5419_v10, %v5422_v44  ;;  %v1950_v20 = vshll.u32 %v10034_v53, %v1941_v59  ;;  %v1957_v13 = vshrl.u32 %v10037_v2, %v1942_v12 }
 0x363   : > { %vm5361_vm6 = vcmp.lt.s32.totalorder %v12328_v18, 0  ;;  %v1949_v15 = vor.u32 %v1948_v50, %v1947_v36  ;;  %v1955_v5 = vor.u32 %v1954_v43, %v1953_v14  ;;  %v1956_v21 = vshll.u32 %v10036_v57, %v1941_v59 }
 0x364   : > { %v2116_v41 = vsel %vm2033_vm13, %v2115_v19, %v2114_v49  ;;  %v12483_v9 = vand.u32 3, %v2124_v23  ;;  %v5425_v56 = vsub.s32 0, %v12472_v37  ;;  %v1952_v46 = vor.u32 %v1951_v39, %v1950_v20 }
 0x365   : > { %v2119_v40 = vsel %vm12437_vm15, %v12229_v11, %v2116_v41  ;;  %v1935_v62 = vor.u32 8388608, %v1934_v32  ;;  %v1958_v25 = vor.u32 %v1957_v13, %v1956_v21  ;;  %v12488_v10 = vadd.f32 %v10066_v1, %v12016_v4 }
 0x366   : > { %9864 = vcosq.f32 %v2119_v40  ;;  %vm12492_vm10 = vcmp.le.f32.partialorder %v5359_v63, 0.7853982  ;;  %v9258_v17 = vmin.u32 %v5425_v56, %v12472_v37  ;;  %vm1959_vm11 = vcmp.lt.s32.totalorder %v1940_v24, 1 }
 0x367   : > { %9866 = vsinq.f32 %v2119_v40  ;;  %vm1962_vm8 = vcmp.lt.s32.totalorder %v1940_v24, 4  ;;  %v5445_v7 = vsub.s32 4, %v5421_v38  ;;  %v1943_v61 = vshrl.u32 %v10032_v47, %v1942_v12 }
 0x368   : > { %v1967_v31 = vsel %vm1959_vm11, %v1946_v30, %v1949_v15  ;;  %v1968_v48 = vsel %vm1962_vm8, %v1955_v5, 920167782  ;;  %v5427_v45 = vclz %v9258_v17  ;;  %vm1961_vm12 = vcmp.lt.s32.totalorder %v1940_v24, 3 }
 0x369   : > { %v1964_v4 = vsel %vm1962_vm8, %v1952_v46, 2102212464  ;;  %v1971_v6 = vsel %vm1959_vm11, %v1949_v15, %v1952_v46  ;;  %vm1960_vm14 = vcmp.lt.s32.totalorder %v1940_v24, 2  ;;  %v1969_v52 = vsel %vm1961_vm12, %v1952_v46, %v1968_v48 }
 0x36a   : > { %v1972_v58 = vsel %vm1962_vm8, %v1958_v25, 1326507024  ;;  %v1975_v63 = vshll.u32 %v1935_v62, 8  ;;  %v9259_v8 = vadd.s32 4294967294, %v5427_v45  ;;  %v1963_v23 = vsel %vm1959_vm11, %v1943_v61, %v1946_v30 }
 0x36b   : > { %v1970_v26 = vsel %vm1960_vm14, %v1967_v31, %v1969_v52  ;;  %v1973_v28 = vsel %vm1961_vm12, %v1955_v5, %v1972_v58  ;;  %vm2126_vm1 = vcmp.lt.s32.totalorder %v12483_v9, 2  ;;  %v1965_v49 = vsel %vm1961_vm12, %v1949_v15, %v1964_v4 }
 0x36c   : > { %v1974_v12 = vsel %vm1960_vm14, %v1971_v6, %v1973_v28  ;;  %v12501_v32 = vmul.u32.u64.low %v1975_v63, %v1970_v26  ;;  %v12502_v50 = vmul.u32.u64.high %v1975_v63, %v1970_v26, %v12501_v32  ;;  %vm9260_vm15 = vcmp.lt.s32.totalorder %v9259_v8, 0 }
 0x36d   : > { %v5446_v44 = vsel %vm5361_vm6, %v5445_v7, %v5421_v38  ;;  %v12507_v42 = vmul.u32.u64.low %v1975_v63, %v1974_v12  ;;  %v12508_v39 = vmul.u32.u64.high %v1975_v63, %v1974_v12, %v12507_v42  ;;  %vm2127_vm13 = vcmp.eq.s32.totalorder %v12483_v9, 0 }
 0x36e   : > { %vm2130_vm2 = vcmp.eq.s32.totalorder %v12483_v9, 2  ;;  %v5430_v19 = vsel %vm9260_vm15, 0, %v9259_v8  ;;  %v5258_v36 = vand.u32 2139095040, %v12488_v10  ;;  %v5415_v14 = vadd.s32 %v12423_v27, %v12429_v60  ;;  %v12521_v27 = vpop.f32.mrb[16].mxu1 }
 0x36f   : > { %v5431_v43 = vsub.s32 32, %v5430_v19  ;;  %v5435_v30 = vsub.s32 4294967266, %v5430_v19  ;;  %v1966_v20 = vsel %vm1960_vm14, %v1963_v23, %v1965_v49  ;;  %v5448_v38 = vsel %vm12492_vm10, 0, %v5446_v44 }
 0x370   : > { %v9865_v13 = vpop.eup %9864  ;;  %v1985_v41 = vadd.s32 1, %v12502_v50  ;;  %v5255_v15 = vand.u32 2147483647, %v12488_v10  ;;  %v5259_v5 = vshrl.u32 %v5258_v36, 23  ;;  %v5432_v56 = vshll.u32 %v12472_v37, %v5430_v19 }
 0x371   : > { %v9867_v21 = vpop.eup %9866  ;;  %v2131_v40 = vxor.u32 2147483648, %v9865_v13  ;;  %v5433_v46 = vshrl.u32 %v5415_v14, %v5431_v43  ;;  %v5436_v62 = vadd.s32 127, %v5435_v30  ;;  %v1982_v24 = vmul.u32 %v1975_v63, %v1966_v20 }
 0x372   : > { %v2128_v60 = vxor.u32 2147483648, %v9867_v21  ;;  %vm1984_vm3 = vc.u32 %v12508_v39, %v12501_v32  ;;  %v9253_v25 = vadd.s32 4294967169, %v5259_v5  ;;  %v12532_v4 = vadd.f32 %v12142_v16, %v10066_v1 }
 0x373   : > { %v2132_v17 = vsel %vm2130_vm2, %v2131_v40, %v9867_v21  ;;  %v5434_v7 = vor.u32 %v5433_v46, %v5432_v56  ;;  %v5437_v61 = vshll.u32 %v5436_v62, 23  ;;  %v1986_v31 = vsel %vm1984_vm3, %v1985_v41, %v12502_v50 }
 0x374   : > { %v2129_v37 = vsel %vm2127_vm13, %v9865_v13, %v2128_v60  ;;  %v1987_v48 = vadd.s32 %v1986_v31, %v1982_v24  ;;  %v5265_v45 = vadd.s32 1, %v9253_v25  ;;  %vm2123_vm4 = vweird.f32 %v12229_v11 }
 0x375   : > { %v2133_v6 = vsel %vm2126_vm1, %v2129_v37, %v2132_v17  ;;  %v5438_v52 = vor.u32 4788187, %v5437_v61  ;;  %v5452_v58 = vadd.s32 3, %v5448_v38  ;;  %v5262_v23 = vand.u32 8388607, %v5255_v15 }
 0x376   : > { %v2134_v63 = vsel %vm2123_vm4, nan, %v2133_v6  ;;  %v1988_v8 = vadd.s32 536870912, %v1987_v48  ;;  %vm5266_vm9 = vcmp.gt.s32.totalorder %v5265_v45, 0  ;;  %v5441_v16 = vcvt.s32.f32 %v5434_v7 }
 0x377   : > { %v7348_v26 = vsel %vm18_vm0, %v12229_v11, %v2134_v63  ;;  %v5439_v28 = vand.u32 2147483647, %v5438_v52  ;;  %v5267_v49 = vsel %vm5266_vm9, %v5265_v45, 0  ;;  %v2242_v50 = vand.u32 2139095040, %v12532_v4 }
 0x378   : > { %7414 = vst.msk [vmem:[%s10548_s19 + $0x68] sm:$0xff] %vm7400_vm7, %v7348_v26  ;;  %v12544_v12 = vshrl.u32 %v1988_v8, 30  ;;  %v5269_v9 = vand.u32 31, %v5267_v49  ;;  %v12548_v14 = vand.u32 3, %v5452_v58  ;;  %v5263_v43 = vor.u32 8388608, %v5262_v23 }
 0x379   : > { %v5442_v44 = vmul.f32 %v5441_v16, %v5439_v28  ;;  %v2239_v11 = vand.u32 2147483647, %v12532_v4  ;;  %v5268_v20 = vshrl.u32 %v5267_v49, 5  ;;  %v2243_v38 = vshrl.u32 %v2242_v50, 23 }
 0x37a   : > { %v1990_v42 = vshll.u32 %v12544_v12, 30  ;;  %v5270_v19 = vsub.s32 32, %v5269_v9  ;;  %v5272_v5 = vshll.u32 %v10032_v47, %v5269_v9  ;;  %v5275_v62 = vshll.u32 %v10033_v51, %v5269_v9 }
 0x37b   : > { %v5443_v36 = vxor.u32 2147483648, %v5442_v44  ;;  %v5278_v60 = vshll.u32 %v10034_v53, %v5269_v9  ;;  %v5281_v25 = vshll.u32 %v10035_v55, %v5269_v9  ;;  %v5284_v59 = vshll.u32 %v10036_v57, %v5269_v9 }
 0x37c   : > { %v12551_v30 = vsub.s32 %v1987_v48, %v1990_v42  ;;  %v5273_v13 = vshrl.u32 %v10033_v51, %v5270_v19  ;;  %v5276_v21 = vshrl.u32 %v10034_v53, %v5270_v19  ;;  %v5279_v40 = vshrl.u32 %v10035_v55, %v5270_v19 }
 0x37d   : > { %v5444_v41 = vsel %vm5361_vm6, %v5443_v36, %v5442_v44  ;;  %v5282_v17 = vshrl.u32 %v10036_v57, %v5270_v19  ;;  %v5285_v48 = vshrl.u32 %v10037_v2, %v5270_v19  ;;  %v12570_v45 = vshll.u32 %v5263_v43, 8  ;;  %v12581_v36 = vpop.f32.mrb[17].mxu0 }
 0x37e   : > { %v5447_v56 = vsel %vm12492_vm10, %v12328_v18, %v5444_v41  ;;  %v1993_v46 = vsub.s32 0, %v12551_v30  ;;  %v5274_v24 = vor.u32 %v5273_v13, %v5272_v5  ;;  %v5277_v61 = vor.u32 %v5276_v21, %v5275_v62 }
 0x37f   : > { %9868 = vcosq.f32 %v5447_v56  ;;  %v5280_v31 = vor.u32 %v5279_v40, %v5278_v60  ;;  %v5283_v37 = vor.u32 %v5282_v17, %v5281_v25  ;;  %v5271_v52 = vshrl.u32 %v10032_v47, %v5270_v19 }
 0x380   : > { %9870 = vsinq.f32 %v5447_v56  ;;  %v9126_v7 = vmin.u32 %v1993_v46, %v12551_v30  ;;  %vm5287_vm5 = vcmp.lt.s32.totalorder %v5268_v20, 1  ;;  %v9137_v58 = vadd.s32 4294967169, %v2243_v38 }
 0x381   : > { %vm5458_vm6 = vcmp.eq.s32.totalorder %v12548_v14, 2  ;;  %v5286_v63 = vor.u32 %v5285_v48, %v5284_v59  ;;  %vm5288_vm10 = vcmp.lt.s32.totalorder %v5268_v20, 2  ;;  %vm5289_vm11 = vcmp.lt.s32.totalorder %v5268_v20, 3 }
 0x382   : > { %v1995_v6 = vclz %v9126_v7  ;;  %vm5290_vm8 = vcmp.lt.s32.totalorder %v5268_v20, 4  ;;  %vm5455_vm12 = vcmp.eq.s32.totalorder %v12548_v14, 0  ;;  %v5295_v26 = vsel %vm5287_vm5, %v5274_v24, %v5277_v61 }
 0x383   : > { %v5292_v23 = vsel %vm5290_vm8, %v5280_v31, 2102212464  ;;  %v5296_v28 = vsel %vm5290_vm8, %v5283_v37, 920167782  ;;  %vm1929_vm14 = vcmp.lt.s32.totalorder %v12386_v54, 0  ;;  %v5291_v16 = vsel %vm5287_vm5, %v5271_v52, %v5274_v24 }
 0x384   : > { %v9127_v8 = vadd.s32 4294967294, %v1995_v6  ;;  %v5297_v49 = vsel %vm5289_vm11, %v5280_v31, %v5296_v28  ;;  %v5299_v9 = vsel %vm5287_vm5, %v5277_v61, %v5280_v31  ;;  %v5300_v50 = vsel %vm5290_vm8, %v5286_v63, 1326507024 }
 0x385   : > { %vm5451_vm1 = vweird.f32 %v12328_v18  ;;  %v5293_v44 = vsel %vm5289_vm11, %v5277_v61, %v5292_v23  ;;  %v5298_v42 = vsel %vm5288_vm10, %v5295_v26, %v5297_v49  ;;  %v5301_v19 = vsel %vm5289_vm11, %v5283_v37, %v5300_v50 }
 0x386   : > { %vm9128_vm15 = vcmp.lt.s32.totalorder %v9127_v8, 0  ;;  %v5302_v13 = vsel %vm5288_vm10, %v5299_v9, %v5301_v19  ;;  %v12585_v38 = vmul.u32.u64.low %v12570_v45, %v5298_v42  ;;  %v12586_v41 = vmul.u32.u64.high %v12570_v45, %v5298_v42, %v12585_v38 }
 0x387   : > { %v1998_v43 = vsel %vm9128_vm15, 0, %v9127_v8  ;;  %v1983_v5 = vadd.s32 %v12501_v32, %v12508_v39  ;;  %v2013_v56 = vsub.s32 4, %v12544_v12  ;;  %v5294_v62 = vsel %vm5288_vm10, %v5291_v16, %v5293_v44 }
 0x388   : > { %v1999_v21 = vsub.s32 32, %v1998_v43  ;;  %v2003_v40 = vsub.s32 4294967266, %v1998_v43  ;;  %v12594_v60 = vmul.u32.u64.low %v12570_v45, %v5302_v13  ;;  %v12595_v24 = vmul.u32.u64.high %v12570_v45, %v5302_v13, %v12594_v60 }
 0x389   : > { %v9869_v46 = vpop.eup %9868  ;;  %v2249_v25 = vadd.s32 1, %v9137_v58  ;;  %v2000_v61 = vshll.u32 %v12551_v30, %v1998_v43  ;;  %v5313_v32 = vadd.s32 1, %v12586_v41  ;;  %v12601_v39 = vand.u32 8388607, %v2239_v11 }
 0x38a   : > { %v9871_v17 = vpop.eup %9870  ;;  %v5459_v7 = vxor.u32 2147483648, %v9869_v46  ;;  %v2001_v31 = vshrl.u32 %v1983_v5, %v1999_v21  ;;  %v2004_v37 = vadd.s32 127, %v2003_v40  ;;  %vm5454_vm2 = vcmp.lt.s32.totalorder %v12548_v14, 2 }
 0x38b   : > { %v5456_v59 = vxor.u32 2147483648, %v9871_v17  ;;  %vm2250_vm13 = vcmp.gt.s32.totalorder %v2249_v25, 0  ;;  %v5310_v58 = vmul.u32 %v12570_v45, %v5294_v62  ;;  %vm5312_vm3 = vc.u32 %v12595_v24, %v12585_v38 }
 0x38c   : > { %v5460_v20 = vsel %vm5458_vm6, %v5459_v7, %v9871_v17  ;;  %v2002_v48 = vor.u32 %v2001_v31, %v2000_v61  ;;  %v2005_v6 = vshll.u32 %v2004_v37, 23  ;;  %v2251_v52 = vsel %vm2250_vm13, %v2249_v25, 0 }
 0x38d   : > { %v5457_v30 = vsel %vm5455_vm12, %v9869_v46, %v5456_v59  ;;  %v2014_v23 = vsel %vm1929_vm14, %v2013_v56, %v12544_v12  ;;  %v5314_v26 = vsel %vm5312_vm3, %v5313_v32, %v12586_v41  ;;  %vm12619_vm4 = vcmp.le.f32.partialorder %v1927_v35, 0.7853982 }
 0x38e   : > { %v5461_v63 = vsel %vm5454_vm2, %v5457_v30, %v5460_v20  ;;  %v2006_v8 = vor.u32 4788187, %v2005_v6  ;;  %v5315_v45 = vadd.s32 %v5314_v26, %v5310_v58  ;;  %v2253_v16 = vand.u32 31, %v2251_v52 }
 0x38f   : > { %v5462_v28 = vsel %vm5451_vm1, nan, %v5461_v63  ;;  %v2009_v50 = vcvt.s32.f32 %v2002_v48  ;;  %v2247_v12 = vor.u32 8388608, %v12601_v39  ;;  %v2016_v44 = vsel %vm12619_vm4, 0, %v2014_v23 }
 0x390   : > { %v7380_v49 = vsel %vm18_vm0, %v12328_v18, %v5462_v28  ;;  %v2007_v9 = vand.u32 2147483647, %v2006_v8  ;;  %v5316_v42 = vadd.s32 536870912, %v5315_v45  ;;  %v2252_v35 = vshrl.u32 %v2251_v52, 5 }
 0x391   : > { %7446 = vst.msk [vmem:[%s10548_s19 + $0x168] sm:$0xff] %vm7400_vm7, %v7380_v49  ;;  %v2254_v19 = vsub.s32 32, %v2253_v16  ;;  %v2256_v13 = vshll.u32 %v10032_v47, %v2253_v16  ;;  %v2259_v41 = vshll.u32 %v10033_v51, %v2253_v16  ;;  %v2262_v5 = vshll.u32 %v10034_v53, %v2253_v16 }
 0x392   : > { %v2010_v43 = vmul.f32 %v2009_v50, %v2007_v9  ;;  %v5317_v18 = vshrl.u32 %v5316_v42, 30  ;;  %v2265_v56 = vshll.u32 %v10035_v55, %v2253_v16  ;;  %v2268_v61 = vshll.u32 %v10036_v57, %v2253_v16 }
 0x393   : > { %v2257_v21 = vshrl.u32 %v10033_v51, %v2254_v19  ;;  %v2260_v40 = vshrl.u32 %v10034_v53, %v2254_v19  ;;  %v2263_v62 = vshrl.u32 %v10035_v55, %v2254_v19  ;;  %v2266_v60 = vshrl.u32 %v10036_v57, %v2254_v19 }
 0x394   : > { %v2011_v46 = vxor.u32 2147483648, %v2010_v43  ;;  %v2269_v25 = vshrl.u32 %v10037_v2, %v2254_v19  ;;  %v5318_v17 = vshll.u32 %v5317_v18, 30  ;;  %v12643_v31 = vadd.f32 %v12180_v34, %v10066_v1 }
 0x395   : > { %v2258_v7 = vor.u32 %v2257_v21, %v2256_v13  ;;  %v2261_v59 = vor.u32 %v2260_v40, %v2259_v41  ;;  %v2264_v32 = vor.u32 %v2263_v62, %v2262_v5  ;;  %v2267_v39 = vor.u32 %v2266_v60, %v2265_v56 }
 0x396   : > { %v2012_v37 = vsel %vm1929_vm14, %v2011_v46, %v2010_v43  ;;  %v2020_v48 = vadd.s32 3, %v2016_v44  ;;  %v12650_v6 = vsub.s32 %v5315_v45, %v5318_v17  ;;  %v2270_v52 = vor.u32 %v2269_v25, %v2268_v61 }
 0x397   : > { %v2015_v20 = vsel %vm12619_vm4, %v12386_v54, %v2012_v37  ;;  %vm2271_vm9 = vcmp.lt.s32.totalorder %v2252_v35, 1  ;;  %vm2272_vm5 = vcmp.lt.s32.totalorder %v2252_v35, 2  ;;  %vm2273_vm6 = vcmp.lt.s32.totalorder %v2252_v35, 3 }
 0x398   : > { %9872 = vcosq.f32 %v2015_v20  ;;  %vm12654_vm10 = vcmp.le.f32.partialorder %v5255_v15, 0.7853982  ;;  %v5321_v30 = vsub.s32 0, %v12650_v6  ;;  %v2255_v58 = vshrl.u32 %v10032_v47, %v2254_v19 }
 0x399   : > { %9874 = vsinq.f32 %v2015_v20  ;;  %vm2274_vm11 = vcmp.lt.s32.totalorder %v2252_v35, 4  ;;  %v5341_v63 = vsub.s32 4, %v5317_v18  ;;  %v2279_v23 = vsel %vm2271_vm9, %v2258_v7, %v2261_v59 }
 0x39a   : > { %v2276_v8 = vsel %vm2274_vm11, %v2264_v32, 2102212464  ;;  %v2280_v26 = vsel %vm2274_vm11, %v2267_v39, 920167782  ;;  %v9254_v28 = vmin.u32 %v5321_v30, %v12650_v6  ;;  %v2283_v45 = vsel %vm2271_vm9, %v2261_v59, %v2264_v32 }
 0x39b   : > { %v2281_v14 = vsel %vm2273_vm6, %v2264_v32, %v2280_v26  ;;  %v2284_v15 = vsel %vm2274_vm11, %v2270_v52, 1326507024  ;;  %v2021_v16 = vand.u32 3, %v2020_v48  ;;  %v2287_v50 = vshll.u32 %v2247_v12, 8 }
 0x39c   : > { %v2282_v49 = vsel %vm2272_vm5, %v2279_v23, %v2281_v14  ;;  %v2285_v9 = vsel %vm2273_vm6, %v2267_v39, %v2284_v15  ;;  %vm5257_vm8 = vcmp.lt.s32.totalorder %v12488_v10, 0  ;;  %v5323_v44 = vclz %v9254_v28 }
 0x39d   : > { %v2275_v42 = vsel %vm2271_vm9, %v2255_v58, %v2258_v7  ;;  %v2277_v19 = vsel %vm2273_vm6, %v2261_v59, %v2276_v8  ;;  %v2286_v43 = vsel %vm2272_vm5, %v2283_v45, %v2285_v9  ;;  %v5570_v5 = vand.u32 2139095040, %v12643_v31 }
 0x39e   : > { %v12670_v13 = vmul.u32.u64.low %v2287_v50, %v2282_v49  ;;  %v12671_v41 = vmul.u32.u64.high %v2287_v50, %v2282_v49, %v12670_v13  ;;  %vm2019_vm12 = vweird.f32 %v12386_v54  ;;  %v9255_v21 = vadd.s32 4294967294, %v5323_v44 }
 0x39f   : > { %v5342_v12 = vsel %vm5257_vm8, %v5341_v63, %v5317_v18  ;;  %v12678_v40 = vmul.u32.u64.low %v2287_v50, %v2286_v43  ;;  %v12679_v56 = vmul.u32.u64.high %v2287_v50, %v2286_v43, %v12678_v40  ;;  %vm2022_vm14 = vcmp.lt.s32.totalorder %v2021_v16, 2 }
 0x3a0   : > { %vm2023_vm1 = vcmp.eq.s32.totalorder %v2021_v16, 0  ;;  %v2278_v46 = vsel %vm2272_vm5, %v2275_v42, %v2277_v19  ;;  %v5571_v62 = vshrl.u32 %v5570_v5, 23  ;;  %vm2026_vm15 = vcmp.eq.s32.totalorder %v2021_v16, 2 }
 0x3a1   : > { %v5311_v60 = vadd.s32 %v12585_v38, %v12595_v24  ;;  %vm9256_vm13 = vcmp.lt.s32.totalorder %v9255_v21, 0  ;;  %v5567_v25 = vand.u32 2147483647, %v12643_v31  ;;  %v5344_v18 = vsel %vm12654_vm10, 0, %v5342_v12  ;;  %v12691_v24 = vpop.f32.mrb[17].mxu1 }
 0x3a2   : > { %v9873_v17 = vpop.eup %9872  ;;  %v5326_v7 = vsel %vm9256_vm13, 0, %v9255_v21  ;;  %v2297_v61 = vadd.s32 1, %v12671_v41  ;;  %v9265_v37 = vadd.s32 4294967169, %v5571_v62  ;;  %v2294_v20 = vmul.u32 %v2287_v50, %v2278_v46 }
 0x3a3   : > { %v9875_v59 = vpop.eup %9874  ;;  %v2027_v32 = vxor.u32 2147483648, %v9873_v17  ;;  %v5327_v35 = vsub.s32 32, %v5326_v7  ;;  %v5331_v39 = vsub.s32 4294967266, %v5326_v7  ;;  %v5328_v52 = vshll.u32 %v12650_v6, %v5326_v7 }
 0x3a4   : > { %v2024_v48 = vxor.u32 2147483648, %v9875_v59  ;;  %vm2296_vm2 = vc.u32 %v12679_v56, %v12670_v13  ;;  %v5577_v38 = vadd.s32 1, %v9265_v37  ;;  %v5348_v26 = vadd.s32 3, %v5344_v18 }
 0x3a5   : > { %v2028_v30 = vsel %vm2026_vm15, %v2027_v32, %v9875_v59  ;;  %v5329_v58 = vshrl.u32 %v5311_v60, %v5327_v35  ;;  %v5332_v63 = vadd.s32 127, %v5331_v39  ;;  %v2298_v8 = vsel %vm2296_vm2, %v2297_v61, %v12671_v41 }
 0x3a6   : > { %v2025_v23 = vsel %vm2023_vm1, %v9873_v17, %v2024_v48  ;;  %v2299_v28 = vadd.s32 %v2298_v8, %v2294_v20  ;;  %vm5578_vm3 = vcmp.gt.s32.totalorder %v5577_v38, 0  ;;  %v5574_v50 = vand.u32 8388607, %v5567_v25 }
 0x3a7   : > { %v2029_v6 = vsel %vm2022_vm14, %v2025_v23, %v2028_v30  ;;  %v5330_v14 = vor.u32 %v5329_v58, %v5328_v52  ;;  %v5333_v45 = vshll.u32 %v5332_v63, 23  ;;  %v5579_v15 = vsel %vm5578_vm3, %v5577_v38, 0 }
 0x3a8   : > { %v2030_v49 = vsel %vm2019_vm12, nan, %v2029_v6  ;;  %v2300_v9 = vadd.s32 536870912, %v2299_v28  ;;  %v5581_v44 = vand.u32 31, %v5579_v15  ;;  %v12706_v21 = vand.u32 3, %v5348_v26 }
 0x3a9   : > { %v7347_v42 = vsel %vm18_vm0, %v12386_v54, %v2030_v49  ;;  %v5334_v19 = vor.u32 4788187, %v5333_v45  ;;  %v5337_v5 = vcvt.s32.f32 %v5330_v14  ;;  %v12710_v12 = vadd.f32 %v10066_v1, %v12279_v33 }
 0x3aa   : > { %7413 = vst.msk [vmem:[%s10548_s19 + $0x60] sm:$0xff] %vm7400_vm7, %v7347_v42  ;;  %v2301_v16 = vshrl.u32 %v2300_v9, 30  ;;  %v5582_v43 = vsub.s32 32, %v5581_v44  ;;  %vm2241_vm4 = vcmp.lt.s32.totalorder %v12532_v4, 0  ;;  %v5575_v46 = vor.u32 8388608, %v5574_v50 }
 0x3ab   : > { %v5335_v41 = vand.u32 2147483647, %v5334_v19  ;;  %v5584_v62 = vshll.u32 %v10032_v47, %v5581_v44  ;;  %v5587_v33 = vshll.u32 %v10033_v51, %v5581_v44  ;;  %v5590_v37 = vshll.u32 %v10034_v53, %v5581_v44 }
 0x3ac   : > { %v2302_v40 = vshll.u32 %v2301_v16, 30  ;;  %v5585_v54 = vshrl.u32 %v10033_v51, %v5582_v43  ;;  %v5588_v17 = vshrl.u32 %v10034_v53, %v5582_v43  ;;  %v5591_v7 = vshrl.u32 %v10035_v55, %v5582_v43 }
 0x3ad   : > { %v5338_v60 = vmul.f32 %v5337_v5, %v5335_v41  ;;  %v5594_v18 = vshrl.u32 %v10036_v57, %v5582_v43  ;;  %v5597_v59 = vshrl.u32 %v10037_v2, %v5582_v43  ;;  %v5580_v35 = vshrl.u32 %v5579_v15, 5 }
 0x3ae   : > { %v12718_v61 = vsub.s32 %v2299_v28, %v2302_v40  ;;  %v5593_v39 = vshll.u32 %v10035_v55, %v5581_v44  ;;  %v5596_v20 = vshll.u32 %v10036_v57, %v5581_v44  ;;  %v5586_v52 = vor.u32 %v5585_v54, %v5584_v62 }
 0x3af   : > { %v5339_v32 = vxor.u32 2147483648, %v5338_v60  ;;  %v5589_v38 = vor.u32 %v5588_v17, %v5587_v33  ;;  %v5592_v30 = vor.u32 %v5591_v7, %v5590_v37  ;;  %v2325_v63 = vsub.s32 4, %v2301_v16 }
 0x3b0   : > { %v2305_v48 = vsub.s32 0, %v12718_v61  ;;  %v5595_v8 = vor.u32 %v5594_v18, %v5593_v39  ;;  %v2135_v23 = vand.u32 2147483647, %v12710_v12  ;;  %vm12734_vm9 = vcmp.le.f32.partialorder %v2239_v11, 0.7853982  ;;  %v12756_v39 = vpop.f32.mrb[18].mxu0 }
 0x3b1   : > { %v5340_v58 = vsel %vm5257_vm8, %v5339_v32, %v5338_v60  ;;  %v5598_v14 = vor.u32 %v5597_v59, %v5596_v20  ;;  %v5615_v45 = vshll.u32 %v5575_v46, 8  ;;  %v5583_v15 = vshrl.u32 %v10032_v47, %v5582_v43 }
 0x3b2   : > { %v5343_v26 = vsel %vm12654_vm10, %v12488_v10, %v5340_v58  ;;  %v9138_v6 = vmin.u32 %v2305_v48, %v12718_v61  ;;  %vm5599_vm5 = vcmp.lt.s32.totalorder %v5580_v35, 1  ;;  %vm5602_vm6 = vcmp.lt.s32.totalorder %v5580_v35, 4 }
 0x3b3   : > { %9876 = vcosq.f32 %v5343_v26  ;;  %v5604_v9 = vsel %vm5602_vm6, %v5592_v30, 2102212464  ;;  %v5607_v34 = vsel %vm5599_vm5, %v5586_v52, %v5589_v38  ;;  %v2326_v50 = vsel %vm2241_vm4, %v2325_v63, %v2301_v16 }
 0x3b4   : > { %9878 = vsinq.f32 %v5343_v26  ;;  %v2307_v49 = vclz %v9138_v6  ;;  %vm5601_vm10 = vcmp.lt.s32.totalorder %v5580_v35, 3  ;;  %v5608_v11 = vsel %vm5602_vm6, %v5595_v8, 920167782 }
 0x3b5   : > { %v5611_v44 = vsel %vm5599_vm5, %v5589_v38, %v5592_v30  ;;  %vm5600_vm11 = vcmp.lt.s32.totalorder %v5580_v35, 2  ;;  %v5609_v19 = vsel %vm5601_vm10, %v5592_v30, %v5608_v11  ;;  %v5612_v41 = vsel %vm5602_vm6, %v5598_v14, 1326507024 }
 0x3b6   : > { %v9139_v42 = vadd.s32 4294967294, %v2307_v49  ;;  %v5603_v5 = vsel %vm5599_vm5, %v5583_v15, %v5586_v52  ;;  %v5605_v40 = vsel %vm5601_vm10, %v5589_v38, %v5604_v9  ;;  %v5610_v43 = vsel %vm5600_vm11, %v5607_v34, %v5609_v19 }
 0x3b7   : > { %v5613_v46 = vsel %vm5601_vm10, %v5595_v8, %v5612_v41  ;;  %v12744_v54 = vmul.u32.u64.low %v5615_v45, %v5610_v43  ;;  %v12745_v60 = vmul.u32.u64.high %v5615_v45, %v5610_v43, %v12744_v54  ;;  %v2138_v18 = vand.u32 2139095040, %v12710_v12 }
 0x3b8   : > { %vm9140_vm8 = vcmp.lt.s32.totalorder %v9139_v42, 0  ;;  %v5614_v62 = vsel %vm5600_vm11, %v5611_v44, %v5613_v46  ;;  %vm5347_vm12 = vweird.f32 %v12488_v10  ;;  %v2295_v33 = vadd.s32 %v12670_v13, %v12679_v56 }
 0x3b9   : > { %v2310_v16 = vsel %vm9140_vm8, 0, %v9139_v42  ;;  %v12748_v17 = vmul.u32.u64.low %v5615_v45, %v5614_v62  ;;  %v12749_v7 = vmul.u32.u64.high %v5615_v45, %v5614_v62, %v12748_v17  ;;  %v5606_v32 = vsel %vm5600_vm11, %v5603_v5, %v5605_v40 }
 0x3ba   : > { %v2311_v37 = vsub.s32 32, %v2310_v16  ;;  %v2315_v59 = vsub.s32 4294967266, %v2310_v16  ;;  %vm5350_vm14 = vcmp.lt.s32.totalorder %v12706_v21, 2  ;;  %vm5354_vm1 = vcmp.eq.s32.totalorder %v12706_v21, 2 }
 0x3bb   : > { %v2328_v20 = vsel %vm12734_vm9, 0, %v2326_v50  ;;  %v2139_v48 = vshrl.u32 %v2138_v18, 23  ;;  %v2312_v52 = vshll.u32 %v12718_v61, %v2310_v16  ;;  %v5625_v13 = vadd.s32 1, %v12745_v60 }
 0x3bc   : > { %v2313_v38 = vshrl.u32 %v2295_v33, %v2311_v37  ;;  %v2316_v30 = vadd.s32 127, %v2315_v59  ;;  %v5622_v58 = vmul.u32 %v5615_v45, %v5606_v32  ;;  %vm5624_vm15 = vc.u32 %v12749_v7, %v12744_v54 }
 0x3bd   : > { %v9877_v56 = vpop.eup %9876  ;;  %v9133_v35 = vadd.s32 4294967169, %v2139_v48  ;;  %v2142_v63 = vand.u32 8388607, %v2135_v23  ;;  %v5626_v15 = vsel %vm5624_vm15, %v5625_v13, %v12745_v60  ;;  %v12771_v34 = vadd.f32 %v10066_v1, %v12368_v22 }
 0x3be   : > { %v9879_v8 = vpop.eup %9878  ;;  %v5355_v26 = vxor.u32 2147483648, %v9877_v56  ;;  %v2314_v6 = vor.u32 %v2313_v38, %v2312_v52  ;;  %v2317_v14 = vshll.u32 %v2316_v30, 23  ;;  %v5627_v49 = vadd.s32 %v5626_v15, %v5622_v58 }
 0x3bf   : > { %v5352_v61 = vxor.u32 2147483648, %v9879_v8  ;;  %v2145_v9 = vadd.s32 1, %v9133_v35  ;;  %vm5351_vm13 = vcmp.eq.s32.totalorder %v12706_v21, 0  ;;  %v2332_v11 = vadd.s32 3, %v2328_v20 }
 0x3c0   : > { %v5356_v45 = vsel %vm5354_vm1, %v5355_v26, %v9879_v8  ;;  %v2318_v50 = vor.u32 4788187, %v2317_v14  ;;  %v5628_v42 = vadd.s32 536870912, %v5627_v49  ;;  %v2143_v19 = vor.u32 8388608, %v2142_v63 }
 0x3c1   : > { %v5353_v44 = vsel %vm5351_vm13, %v9877_v56, %v5352_v61  ;;  %vm2146_vm2 = vcmp.gt.s32.totalorder %v2145_v9, 0  ;;  %v2321_v40 = vcvt.s32.f32 %v2314_v6  ;;  %v5466_v60 = vand.u32 2139095040, %v12771_v34 }
 0x3c2   : > { %v5357_v41 = vsel %vm5350_vm14, %v5353_v44, %v5356_v45  ;;  %v2319_v5 = vand.u32 2147483647, %v2318_v50  ;;  %v2147_v43 = vsel %vm2146_vm2, %v2145_v9, 0  ;;  %v12780_v46 = vshrl.u32 %v5628_v42, 30 }
 0x3c3   : > { %v5358_v22 = vsel %vm5347_vm12, nan, %v5357_v41  ;;  %v2149_v62 = vand.u32 31, %v2147_v43  ;;  %v12789_v37 = vand.u32 3, %v2332_v11  ;;  %v12791_v59 = vshll.u32 %v2143_v19, 8 }
 0x3c4   : > { %v7379_v16 = vsel %vm18_vm0, %v12488_v10, %v5358_v22  ;;  %v2322_v17 = vmul.f32 %v2321_v40, %v2319_v5  ;;  %v5630_v21 = vshll.u32 %v12780_v46, 30  ;;  %v5463_v32 = vand.u32 2147483647, %v12771_v34 }
 0x3c5   : > { %7445 = vst.msk [vmem:[%s10548_s19 + $0x160] sm:$0xff] %vm7400_vm7, %v7379_v16  ;;  %v2150_v18 = vsub.s32 32, %v2149_v62  ;;  %v2148_v48 = vshrl.u32 %v2147_v43, 5  ;;  %v5467_v38 = vshrl.u32 %v5466_v60, 23  ;;  %v2152_v30 = vshll.u32 %v10032_v47, %v2149_v62 }
 0x3c6   : > { %v2323_v33 = vxor.u32 2147483648, %v2322_v17  ;;  %v12794_v20 = vsub.s32 %v5627_v49, %v5630_v21  ;;  %v2155_v63 = vshll.u32 %v10033_v51, %v2149_v62  ;;  %v2158_v8 = vshll.u32 %v10034_v53, %v2149_v62 }
 0x3c7   : > { %v2153_v52 = vshrl.u32 %v10033_v51, %v2150_v18  ;;  %v2156_v13 = vshrl.u32 %v10034_v53, %v2150_v18  ;;  %v2159_v56 = vshrl.u32 %v10035_v55, %v2150_v18  ;;  %v2161_v6 = vshll.u32 %v10035_v55, %v2149_v62 }
 0x3c8   : > { %v2324_v10 = vsel %vm2241_vm4, %v2323_v33, %v2322_v17  ;;  %v5633_v35 = vsub.s32 0, %v12794_v20  ;;  %v2162_v14 = vshrl.u32 %v10036_v57, %v2150_v18  ;;  %v2164_v28 = vshll.u32 %v10036_v57, %v2149_v62 }
 0x3c9   : > { %v2327_v58 = vsel %vm12734_vm9, %v12532_v4, %v2324_v10  ;;  %v2154_v26 = vor.u32 %v2153_v52, %v2152_v30  ;;  %v2157_v61 = vor.u32 %v2156_v13, %v2155_v63  ;;  %v2160_v49 = vor.u32 %v2159_v56, %v2158_v8 }
 0x3ca   : > { %9880 = vcosq.f32 %v2327_v58  ;;  %v9266_v15 = vmin.u32 %v5633_v35, %v12794_v20  ;;  %v2163_v9 = vor.u32 %v2162_v14, %v2161_v6  ;;  %v2165_v45 = vshrl.u32 %v10037_v2, %v2150_v18 }
 0x3cb   : > { %9882 = vsinq.f32 %v2327_v58  ;;  %v9261_v50 = vadd.s32 4294967169, %v5467_v38  ;;  %vm5569_vm3 = vcmp.lt.s32.totalorder %v12643_v31, 0  ;;  %v5653_v44 = vsub.s32 4, %v12780_v46 }
 0x3cc   : > { %v5635_v11 = vclz %v9266_v15  ;;  %v2151_v42 = vshrl.u32 %v10032_v47, %v2150_v18  ;;  %vm2167_vm4 = vcmp.lt.s32.totalorder %v2148_v48, 1  ;;  %vm2338_vm9 = vcmp.eq.s32.totalorder %v12789_v37, 2 }
 0x3cd   : > { %v2166_v19 = vor.u32 %v2165_v45, %v2164_v28  ;;  %vm2168_vm5 = vcmp.lt.s32.totalorder %v2148_v48, 2  ;;  %vm2169_vm6 = vcmp.lt.s32.totalorder %v2148_v48, 3  ;;  %vm2170_vm10 = vcmp.lt.s32.totalorder %v2148_v48, 4  ;;  %v12851_v48 = vpop.f32.mrb[18].mxu1 }
 0x3ce   : > { %vm2335_vm11 = vcmp.eq.s32.totalorder %v12789_v37, 0  ;;  %v9267_v41 = vadd.s32 4294967294, %v5635_v11  ;;  %v2172_v5 = vsel %vm2170_vm10, %v2160_v49, 2102212464  ;;  %v2175_v40 = vsel %vm2167_vm4, %v2154_v26, %v2157_v61 }
 0x3cf   : > { %v2176_v43 = vsel %vm2170_vm10, %v2163_v9, 920167782  ;;  %vm12820_vm8 = vcmp.le.f32.partialorder %v5567_v25, 0.7853982  ;;  %v2171_v62 = vsel %vm2167_vm4, %v2151_v42, %v2154_v26  ;;  %v2179_v16 = vsel %vm2167_vm4, %v2157_v61, %v2160_v49 }
 0x3d0   : > { %v2177_v60 = vsel %vm2169_vm6, %v2160_v49, %v2176_v43  ;;  %v2180_v17 = vsel %vm2170_vm10, %v2166_v19, 1326507024  ;;  %vm2331_vm12 = vweird.f32 %v12532_v4  ;;  %vm9268_vm14 = vcmp.lt.s32.totalorder %v9267_v41, 0 }
 0x3d1   : > { %v2173_v21 = vsel %vm2169_vm6, %v2157_v61, %v2172_v5  ;;  %v2178_v18 = vsel %vm2168_vm5, %v2175_v40, %v2177_v60  ;;  %v2181_v33 = vsel %vm2169_vm6, %v2163_v9, %v2180_v17  ;;  %v5638_v52 = vsel %vm9268_vm14, 0, %v9267_v41 }
 0x3d2   : > { %v2182_v25 = vsel %vm2168_vm5, %v2179_v16, %v2181_v33  ;;  %v12831_v38 = vmul.u32.u64.low %v12791_v59, %v2178_v18  ;;  %v12832_v10 = vmul.u32.u64.high %v12791_v59, %v2178_v18, %v12831_v38  ;;  %v5623_v30 = vadd.s32 %v12744_v54, %v12749_v7 }
 0x3d3   : > { %v5639_v13 = vsub.s32 32, %v5638_v52  ;;  %v5643_v56 = vsub.s32 4294967266, %v5638_v52  ;;  %v12839_v58 = vand.u32 8388607, %v5463_v32  ;;  %v2174_v63 = vsel %vm2168_vm5, %v2171_v62, %v2173_v21 }
 0x3d4   : > { %v9881_v35 = vpop.eup %9880  ;;  %v12843_v8 = vmul.u32.u64.low %v12791_v59, %v2182_v25  ;;  %v12844_v26 = vmul.u32.u64.high %v12791_v59, %v2182_v25, %v12843_v8  ;;  %v5473_v6 = vadd.s32 1, %v9261_v50  ;;  %v5640_v61 = vshll.u32 %v12794_v20, %v5638_v52 }
 0x3d5   : > { %v9883_v14 = vpop.eup %9882  ;;  %v2339_v15 = vxor.u32 2147483648, %v9881_v35  ;;  %v5641_v49 = vshrl.u32 %v5623_v30, %v5639_v13  ;;  %v5644_v54 = vadd.s32 127, %v5643_v56  ;;  %v5654_v9 = vsel %vm5569_vm3, %v5653_v44, %v12780_v46 }
 0x3d6   : > { %v2336_v7 = vxor.u32 2147483648, %v9883_v14  ;;  %v2193_v28 = vadd.s32 1, %v12832_v10  ;;  %vm5474_vm1 = vcmp.gt.s32.totalorder %v5473_v6, 0  ;;  %vm2334_vm15 = vcmp.lt.s32.totalorder %v12789_v37, 2 }
 0x3d7   : > { %v2340_v45 = vsel %vm2338_vm9, %v2339_v15, %v9883_v14  ;;  %v5642_v50 = vor.u32 %v5641_v49, %v5640_v61  ;;  %v5645_v11 = vshll.u32 %v5644_v54, 23  ;;  %v5475_v42 = vsel %vm5474_vm1, %v5473_v6, 0 }
 0x3d8   : > { %v2337_v20 = vsel %vm2335_vm11, %v9881_v35, %v2336_v7  ;;  %v2190_v19 = vmul.u32 %v12791_v59, %v2174_v63  ;;  %vm2192_vm13 = vc.u32 %v12844_v26, %v12831_v38  ;;  %v5656_v41 = vsel %vm12820_vm8, 0, %v5654_v9 }
 0x3d9   : > { %v2341_v46 = vsel %vm2334_vm15, %v2337_v20, %v2340_v45  ;;  %v5646_v44 = vor.u32 4788187, %v5645_v11  ;;  %v2194_v5 = vsel %vm2192_vm13, %v2193_v28, %v12832_v10  ;;  %v5477_v62 = vand.u32 31, %v5475_v42 }
 0x3da   : > { %v2342_v40 = vsel %vm2331_vm12, nan, %v2341_v46  ;;  %v2195_v43 = vadd.s32 %v2194_v5, %v2190_v19  ;;  %v12868_v37 = vadd.f32 %v12432_v29, %v10066_v1  ;;  %v5649_v16 = vcvt.s32.f32 %v5642_v50 }
 0x3db   : > { %v7350_v59 = vsel %vm18_vm0, %v12532_v4, %v2342_v40  ;;  %v5647_v60 = vand.u32 2147483647, %v5646_v44  ;;  %v5471_v17 = vor.u32 8388608, %v12839_v58  ;;  %v5660_v21 = vadd.s32 3, %v5656_v41 }
 0x3dc   : > { %7416 = vst.msk [vmem:[%s10548_s19 + $0x78] sm:$0xff] %vm7400_vm7, %v7350_v59  ;;  %v2196_v18 = vadd.s32 536870912, %v2195_v43  ;;  %v5476_v33 = vshrl.u32 %v5475_v42, 5  ;;  %v5478_v52 = vsub.s32 32, %v5477_v62  ;;  %v5480_v10 = vshll.u32 %v10032_v47, %v5477_v62 }
 0x3dd   : > { %v5650_v25 = vmul.f32 %v5649_v16, %v5647_v60  ;;  %v5483_v29 = vshll.u32 %v10033_v51, %v5477_v62  ;;  %v5486_v30 = vshll.u32 %v10034_v53, %v5477_v62  ;;  %v5489_v58 = vshll.u32 %v10035_v55, %v5477_v62 }
 0x3de   : > { %v2197_v13 = vshrl.u32 %v2196_v18, 30  ;;  %v5481_v4 = vshrl.u32 %v10033_v51, %v5478_v52  ;;  %v5484_v56 = vshrl.u32 %v10034_v53, %v5478_v52  ;;  %vm2137_vm2 = vcmp.lt.s32.totalorder %v12710_v12, 0 }
 0x3df   : > { %v5651_v35 = vxor.u32 2147483648, %v5650_v25  ;;  %v5487_v63 = vshrl.u32 %v10035_v55, %v5478_v52  ;;  %v5490_v8 = vshrl.u32 %v10036_v57, %v5478_v52  ;;  %v5493_v6 = vshrl.u32 %v10037_v2, %v5478_v52 }
 0x3e0   : > { %v2198_v14 = vshll.u32 %v2197_v13, 30  ;;  %v5482_v15 = vor.u32 %v5481_v4, %v5480_v10  ;;  %v5492_v61 = vshll.u32 %v10036_v57, %v5477_v62  ;;  %vm5495_vm4 = vcmp.lt.s32.totalorder %v5476_v33, 1 }
 0x3e1   : > { %v5652_v49 = vsel %vm5569_vm3, %v5651_v35, %v5650_v25  ;;  %v5485_v54 = vor.u32 %v5484_v56, %v5483_v29  ;;  %v5488_v7 = vor.u32 %v5487_v63, %v5486_v30  ;;  %v5491_v9 = vor.u32 %v5490_v8, %v5489_v58 }
 0x3e2   : > { %v5655_v28 = vsel %vm12820_vm8, %v12643_v31, %v5652_v49  ;;  %v12892_v45 = vsub.s32 %v2195_v43, %v2198_v14  ;;  %v5494_v50 = vor.u32 %v5493_v6, %v5492_v61  ;;  %vm5498_vm9 = vcmp.lt.s32.totalorder %v5476_v33, 4  ;;  %v12931_v49 = vpop.f32.mrb[19].mxu0 }
 0x3e3   : > { %9884 = vcosq.f32 %v5655_v28  ;;  %v5479_v11 = vshrl.u32 %v10032_v47, %v5478_v52  ;;  %vm5496_vm5 = vcmp.lt.s32.totalorder %v5476_v33, 2  ;;  %v5500_v42 = vsel %vm5498_vm9, %v5488_v7, 2102212464 }
 0x3e4   : > { %9886 = vsinq.f32 %v5655_v28  ;;  %v2201_v20 = vsub.s32 0, %v12892_v45  ;;  %v2221_v19 = vsub.s32 4, %v2197_v13  ;;  %vm5497_vm3 = vcmp.lt.s32.totalorder %v5476_v33, 3 }
 0x3e5   : > { %v5499_v46 = vsel %vm5495_vm4, %v5479_v11, %v5482_v15  ;;  %v5501_v44 = vsel %vm5497_vm3, %v5485_v54, %v5500_v42  ;;  %v5503_v22 = vsel %vm5495_vm4, %v5482_v15, %v5485_v54  ;;  %v5504_v41 = vsel %vm5498_vm9, %v5491_v9, 920167782 }
 0x3e6   : > { %v9134_v5 = vmin.u32 %v2201_v20, %v12892_v45  ;;  %v5505_v40 = vsel %vm5497_vm3, %v5488_v7, %v5504_v41  ;;  %v5507_v43 = vsel %vm5495_vm4, %v5485_v54, %v5488_v7  ;;  %v5508_v62 = vsel %vm5498_vm9, %v5494_v50, 1326507024 }
 0x3e7   : > { %v5661_v59 = vand.u32 3, %v5660_v21  ;;  %v5506_v60 = vsel %vm5496_vm5, %v5503_v22, %v5505_v40  ;;  %v5509_v16 = vsel %vm5497_vm3, %v5491_v9, %v5508_v62  ;;  %v5511_v18 = vshll.u32 %v5471_v17, 8 }
 0x3e8   : > { %v2203_v52 = vclz %v9134_v5  ;;  %v2222_v25 = vsel %vm2137_vm2, %v2221_v19, %v2197_v13  ;;  %v2447_v10 = vand.u32 2147483647, %v12868_v37  ;;  %v5502_v29 = vsel %vm5496_vm5, %v5499_v46, %v5501_v44 }
 0x3e9   : > { %v5510_v30 = vsel %vm5496_vm5, %v5507_v43, %v5509_v16  ;;  %v12909_v4 = vmul.u32.u64.low %v5511_v18, %v5506_v60  ;;  %v12910_v56 = vmul.u32.u64.high %v5511_v18, %v5506_v60, %v12909_v4  ;;  %v2450_v63 = vand.u32 2139095040, %v12868_v37 }
 0x3ea   : > { %v9135_v58 = vadd.s32 4294967294, %v2203_v52  ;;  %v12912_v35 = vmul.u32.u64.low %v5511_v18, %v5510_v30  ;;  %v12913_v21 = vmul.u32.u64.high %v5511_v18, %v5510_v30, %v12912_v35  ;;  %vm5663_vm6 = vcmp.eq.s32.totalorder %v5661_v59, 0 }
 0x3eb   : > { %vm12918_vm10 = vcmp.le.f32.partialorder %v2135_v23, 0.7853982  ;;  %v12924_v33 = vadd.f32 %v12521_v27, %v10066_v1  ;;  %vm5666_vm11 = vcmp.eq.s32.totalorder %v5661_v59, 2  ;;  %v2191_v13 = vadd.s32 %v12831_v38, %v12844_v26 }
 0x3ec   : > { %vm9136_vm8 = vcmp.lt.s32.totalorder %v9135_v58, 0  ;;  %v2451_v8 = vshrl.u32 %v2450_v63, 23  ;;  %v2224_v15 = vsel %vm12918_vm10, 0, %v2222_v25  ;;  %v5518_v61 = vmul.u32 %v5511_v18, %v5502_v29 }
 0x3ed   : > { %v9885_v6 = vpop.eup %9884  ;;  %v2206_v14 = vsel %vm9136_vm8, 0, %v9135_v58  ;;  %v5521_v23 = vadd.s32 1, %v12910_v56  ;;  %v2454_v28 = vand.u32 8388607, %v2447_v10  ;;  %vm5520_vm12 = vc.u32 %v12913_v21, %v12909_v4 }
 0x3ee   : > { %v9887_v54 = vpop.eup %9886  ;;  %v5667_v7 = vxor.u32 2147483648, %v9885_v6  ;;  %v2207_v27 = vsub.s32 32, %v2206_v14  ;;  %v2211_v9 = vsub.s32 4294967266, %v2206_v14  ;;  %v2208_v26 = vshll.u32 %v12892_v45, %v2206_v14 }
 0x3ef   : > { %v5664_v38 = vxor.u32 2147483648, %v9887_v54  ;;  %v9145_v50 = vadd.s32 4294967169, %v2451_v8  ;;  %v5522_v19 = vsel %vm5520_vm12, %v5521_v23, %v12910_v56  ;;  %vm5662_vm14 = vcmp.lt.s32.totalorder %v5661_v59, 2 }
 0x3f0   : > { %v5668_v11 = vsel %vm5666_vm11, %v5667_v7, %v9887_v54  ;;  %v2209_v42 = vshrl.u32 %v2191_v13, %v2207_v27  ;;  %v2212_v20 = vadd.s32 127, %v2211_v9  ;;  %v5523_v44 = vadd.s32 %v5522_v19, %v5518_v61 }
 0x3f1   : > { %v5665_v46 = vsel %vm5663_vm6, %v9885_v6, %v5664_v38  ;;  %v2457_v22 = vadd.s32 1, %v9145_v50  ;;  %vm5659_vm1 = vweird.f32 %v12643_v31  ;;  %v2228_v43 = vadd.s32 3, %v2224_v15 }
 0x3f2   : > { %v5669_v41 = vsel %vm5662_vm14, %v5665_v46, %v5668_v11  ;;  %v2210_v5 = vor.u32 %v2209_v42, %v2208_v26  ;;  %v2213_v45 = vshll.u32 %v2212_v20, 23  ;;  %v5524_v62 = vadd.s32 536870912, %v5523_v44 }
 0x3f3   : > { %v5670_v40 = vsel %vm5659_vm1, nan, %v5669_v41  ;;  %vm2458_vm15 = vcmp.gt.s32.totalorder %v2457_v22, 0  ;;  %v2455_v18 = vor.u32 8388608, %v2454_v28  ;;  %v5778_v29 = vand.u32 2139095040, %v12924_v33 }
 0x3f4   : > { %v7382_v60 = vsel %vm18_vm0, %v12643_v31, %v5670_v40  ;;  %v2214_v16 = vor.u32 4788187, %v2213_v45  ;;  %v2459_v59 = vsel %vm2458_vm15, %v2457_v22, 0  ;;  %v5525_v52 = vshrl.u32 %v5524_v62, 30 }
 0x3f5   : > { %7448 = vst.msk [vmem:[%s10548_s19 + $0x178] sm:$0xff] %vm7400_vm7, %v7382_v60  ;;  %v2461_v25 = vand.u32 31, %v2459_v59  ;;  %v2217_v56 = vcvt.s32.f32 %v2210_v5  ;;  %vm5465_vm13 = vcmp.lt.s32.totalorder %v12771_v34, 0  ;;  %v12948_v58 = vand.u32 3, %v2228_v43 }
 0x3f6   : > { %v2215_v30 = vand.u32 2147483647, %v2214_v16  ;;  %vm12952_vm4 = vcmp.le.f32.partialorder %v5463_v32, 0.7853982  ;;  %v5526_v31 = vshll.u32 %v5525_v52, 30  ;;  %v5519_v6 = vadd.s32 %v12909_v4, %v12913_v21 }
 0x3f7   : > { %v2462_v63 = vsub.s32 32, %v2461_v25  ;;  %v5775_v13 = vand.u32 2147483647, %v12924_v33  ;;  %v5549_v14 = vsub.s32 4, %v5525_v52  ;;  %v12958_v15 = vshll.u32 %v2455_v18, 8 }
 0x3f8   : > { %v2218_v8 = vmul.f32 %v2217_v56, %v2215_v30  ;;  %v12960_v61 = vsub.s32 %v5523_v44, %v5526_v31  ;;  %v12962_v23 = vshrl.u32 %v2459_v59, 5  ;;  %v5779_v32 = vshrl.u32 %v5778_v29, 23 }
 0x3f9   : > { %v2465_v54 = vshrl.u32 %v10033_v51, %v2462_v63  ;;  %v2464_v27 = vshll.u32 %v10032_v47, %v2461_v25  ;;  %v2468_v9 = vshrl.u32 %v10034_v53, %v2462_v63  ;;  %v2471_v28 = vshrl.u32 %v10035_v55, %v2462_v63 }
 0x3fa   : > { %v2219_v7 = vxor.u32 2147483648, %v2218_v8  ;;  %v5529_v38 = vsub.s32 0, %v12960_v61  ;;  %v2467_v4 = vshll.u32 %v10033_v51, %v2461_v25  ;;  %v2470_v21 = vshll.u32 %v10034_v53, %v2461_v25 }
 0x3fb   : > { %v2474_v26 = vshrl.u32 %v10036_v57, %v2462_v63  ;;  %v5550_v11 = vsel %vm5465_vm13, %v5549_v14, %v5525_v52  ;;  %v2466_v42 = vor.u32 %v2465_v54, %v2464_v27  ;;  %v2473_v20 = vshll.u32 %v10035_v55, %v2461_v25 }
 0x3fc   : > { %v2220_v50 = vsel %vm2137_vm2, %v2219_v7, %v2218_v8  ;;  %v9262_v46 = vmin.u32 %v5529_v38, %v12960_v61  ;;  %v2469_v44 = vor.u32 %v2468_v9, %v2467_v4  ;;  %v2472_v22 = vor.u32 %v2471_v28, %v2470_v21 }
 0x3fd   : > { %v2223_v19 = vsel %vm12918_vm10, %v12710_v12, %v2220_v50  ;;  %v2475_v41 = vor.u32 %v2474_v26, %v2473_v20  ;;  %v2476_v5 = vshll.u32 %v10036_v57, %v2461_v25  ;;  %v2477_v45 = vshrl.u32 %v10037_v2, %v2462_v63 }
 0x3fe   : > { %9888 = vcosq.f32 %v2223_v19  ;;  %v5531_v40 = vclz %v9262_v46  ;;  %v9273_v43 = vadd.s32 4294967169, %v5779_v32  ;;  %v12985_v62 = vand.u32 8388607, %v5775_v13  ;;  %v13010_v32 = vpop.f32.mrb[19].mxu1 }
 0x3ff   : > { %9890 = vsinq.f32 %v2223_v19  ;;  %v5552_v17 = vsel %vm12952_vm4, 0, %v5550_v11  ;;  %v2463_v60 = vshrl.u32 %v10032_v47, %v2462_v63  ;;  %v2478_v16 = vor.u32 %v2477_v45, %v2476_v5 }
 0x400   : > { %vm2479_vm2 = vcmp.lt.s32.totalorder %v12962_v23, 1  ;;  %v9263_v18 = vadd.s32 4294967294, %v5531_v40  ;;  %vm2481_vm9 = vcmp.lt.s32.totalorder %v12962_v23, 3  ;;  %vm2482_vm5 = vcmp.lt.s32.totalorder %v12962_v23, 4 }
 0x401   : > { %v2487_v59 = vsel %vm2479_vm2, %v2466_v42, %v2469_v44  ;;  %v2484_v52 = vsel %vm2482_vm5, %v2472_v22, 2102212464  ;;  %v2488_v25 = vsel %vm2482_vm5, %v2475_v41, 920167782  ;;  %v2491_v29 = vsel %vm2479_vm2, %v2469_v44, %v2472_v22 }
 0x402   : > { %v2492_v30 = vsel %vm2482_vm5, %v2478_v16, 1326507024  ;;  %vm2231_vm3 = vcmp.eq.s32.totalorder %v12948_v58, 0  ;;  %vm9264_vm6 = vcmp.lt.s32.totalorder %v9263_v18, 0  ;;  %vm2480_vm10 = vcmp.lt.s32.totalorder %v12962_v23, 2 }
 0x403   : > { %v2489_v56 = vsel %vm2481_vm9, %v2472_v22, %v2488_v25  ;;  %v2493_v31 = vsel %vm2481_vm9, %v2475_v41, %v2492_v30  ;;  %vm2230_vm11 = vcmp.lt.s32.totalorder %v12948_v58, 2  ;;  %v5534_v63 = vsel %vm9264_vm6, 0, %v9263_v18 }
 0x404   : > { %v2483_v8 = vsel %vm2479_vm2, %v2463_v60, %v2466_v42  ;;  %v2490_v14 = vsel %vm2480_vm10, %v2487_v59, %v2489_v56  ;;  %v2494_v54 = vsel %vm2480_vm10, %v2491_v29, %v2493_v31  ;;  %vm2227_vm8 = vweird.f32 %v12710_v12 }
 0x405   : > { %v5535_v7 = vsub.s32 32, %v5534_v63  ;;  %v5539_v27 = vsub.s32 4294967266, %v5534_v63  ;;  %v2485_v9 = vsel %vm2481_vm9, %v2469_v44, %v2484_v52  ;;  %v5785_v28 = vadd.s32 1, %v9273_v43 }
 0x406   : > { %v13016_v38 = vmul.u32.u64.low %v12958_v15, %v2494_v54  ;;  %v13017_v4 = vmul.u32.u64.high %v12958_v15, %v2494_v54, %v13016_v38  ;;  %v13020_v21 = vmul.u32.u64.low %v12958_v15, %v2490_v14  ;;  %v13021_v26 = vmul.u32.u64.high %v12958_v15, %v2490_v14, %v13020_v21 }
 0x407   : > { %v5536_v50 = vshll.u32 %v12960_v61, %v5534_v63  ;;  %v5537_v11 = vshrl.u32 %v5519_v6, %v5535_v7  ;;  %v5540_v42 = vadd.s32 127, %v5539_v27  ;;  %vm5786_vm12 = vcmp.gt.s32.totalorder %v5785_v28, 0 }
 0x408   : > { %v9889_v20 = vpop.eup %9888  ;;  %vm2234_vm14 = vcmp.eq.s32.totalorder %v12948_v58, 2  ;;  %v5556_v19 = vadd.s32 3, %v5552_v17  ;;  %v2486_v46 = vsel %vm2480_vm10, %v2483_v8, %v2485_v9  ;;  %v5787_v44 = vsel %vm5786_vm12, %v5785_v28, 0 }
 0x409   : > { %v9891_v22 = vpop.eup %9890  ;;  %v2235_v41 = vxor.u32 2147483648, %v9889_v20  ;;  %v5538_v5 = vor.u32 %v5537_v11, %v5536_v50  ;;  %v5541_v45 = vshll.u32 %v5540_v42, 23  ;;  %v5783_v40 = vor.u32 8388608, %v12985_v62 }
 0x40a   : > { %v2232_v43 = vxor.u32 2147483648, %v9891_v22  ;;  %vm2504_vm1 = vc.u32 %v13017_v4, %v13020_v21  ;;  %v2505_v6 = vadd.s32 1, %v13021_v26  ;;  %v13034_v61 = vadd.f32 %v10066_v1, %v12581_v36 }
 0x40b   : > { %v2236_v17 = vsel %vm2234_vm14, %v2235_v41, %v9891_v22  ;;  %v5542_v23 = vor.u32 4788187, %v5541_v45  ;;  %v2502_v60 = vmul.u32 %v12958_v15, %v2486_v46  ;;  %v5789_v16 = vand.u32 31, %v5787_v44 }
 0x40c   : > { %v2233_v18 = vsel %vm2231_vm3, %v9889_v20, %v2232_v43  ;;  %v5545_v62 = vcvt.s32.f32 %v5538_v5  ;;  %v13039_v59 = vand.u32 3, %v5556_v19  ;;  %v2506_v52 = vsel %vm2504_vm1, %v2505_v6, %v13021_v26 }
 0x40d   : > { %v2237_v25 = vsel %vm2230_vm11, %v2233_v18, %v2236_v17  ;;  %v5543_v29 = vand.u32 2147483647, %v5542_v23  ;;  %v2507_v36 = vadd.s32 %v2506_v52, %v2502_v60  ;;  %v5790_v30 = vsub.s32 32, %v5789_v16 }
 0x40e   : > { %v2238_v56 = vsel %vm2227_vm8, nan, %v2237_v25  ;;  %v5788_v15 = vshrl.u32 %v5787_v44, 5  ;;  %v5792_v31 = vshll.u32 %v10032_v47, %v5789_v16  ;;  %v5795_v63 = vshll.u32 %v10033_v51, %v5789_v16 }
 0x40f   : > { %v7349_v8 = vsel %vm18_vm0, %v12710_v12, %v2238_v56  ;;  %v5546_v14 = vmul.f32 %v5545_v62, %v5543_v29  ;;  %v2508_v54 = vadd.s32 536870912, %v2507_v36  ;;  %v5798_v58 = vshll.u32 %v10034_v53, %v5789_v16 }
 0x410   : > { %7415 = vst.msk [vmem:[%s10548_s19 + $0x70] sm:$0xff] %vm7400_vm7, %v7349_v8  ;;  %v5793_v7 = vshrl.u32 %v10033_v51, %v5790_v30  ;;  %v5796_v27 = vshrl.u32 %v10034_v53, %v5790_v30  ;;  %v5799_v9 = vshrl.u32 %v10035_v55, %v5790_v30  ;;  %v5801_v28 = vshll.u32 %v10035_v55, %v5789_v16 }
 0x411   : > { %v5547_v38 = vxor.u32 2147483648, %v5546_v14  ;;  %v2509_v26 = vshrl.u32 %v2508_v54, 30  ;;  %v5802_v50 = vshrl.u32 %v10036_v57, %v5790_v30  ;;  %v5804_v12 = vshll.u32 %v10036_v57, %v5789_v16 }
 0x412   : > { %v5794_v11 = vor.u32 %v5793_v7, %v5792_v31  ;;  %v5797_v42 = vor.u32 %v5796_v27, %v5795_v63  ;;  %v5800_v20 = vor.u32 %v5799_v9, %v5798_v58  ;;  %v5805_v19 = vshrl.u32 %v10037_v2, %v5790_v30 }
 0x413   : > { %v5548_v46 = vsel %vm5465_vm13, %v5547_v38, %v5546_v14  ;;  %v2510_v44 = vshll.u32 %v2509_v26, 30  ;;  %v5803_v22 = vor.u32 %v5802_v50, %v5801_v28  ;;  %v13063_v41 = vshll.u32 %v5783_v40, 8 }
 0x414   : > { %v5551_v5 = vsel %vm12952_vm4, %v12771_v34, %v5548_v46  ;;  %v5806_v45 = vor.u32 %v5805_v19, %v5804_v12  ;;  %vm5807_vm15 = vcmp.lt.s32.totalorder %v5788_v15, 1  ;;  %v2346_v43 = vand.u32 2139095040, %v13034_v61 }
 0x415   : > { %9892 = vcosq.f32 %v5551_v5  ;;  %v13069_v6 = vsub.s32 %v2507_v36, %v2510_v44  ;;  %vm5808_vm2 = vcmp.lt.s32.totalorder %v5788_v15, 2  ;;  %vm5810_vm9 = vcmp.lt.s32.totalorder %v5788_v15, 4 }
 0x416   : > { %9894 = vsinq.f32 %v5551_v5  ;;  %v5791_v17 = vshrl.u32 %v10032_v47, %v5790_v30  ;;  %v5812_v23 = vsel %vm5810_vm9, %v5800_v20, 2102212464  ;;  %v5815_v40 = vsel %vm5807_vm15, %v5794_v11, %v5797_v42 }
 0x417   : > { %v2513_v60 = vsub.s32 0, %v13069_v6  ;;  %v2533_v16 = vsub.s32 4, %v2509_v26  ;;  %vm5809_vm13 = vcmp.lt.s32.totalorder %v5788_v15, 3  ;;  %v5816_v35 = vsel %vm5810_vm9, %v5803_v22, 920167782 }
 0x418   : > { %v5811_v18 = vsel %vm5807_vm15, %v5791_v17, %v5794_v11  ;;  %v5817_v62 = vsel %vm5809_vm13, %v5800_v20, %v5816_v35  ;;  %v5819_v52 = vsel %vm5807_vm15, %v5797_v42, %v5800_v20  ;;  %v5820_v25 = vsel %vm5810_vm9, %v5806_v45, 1326507024 }
 0x419   : > { %v9146_v29 = vmin.u32 %v2513_v60, %v13069_v6  ;;  %v5813_v36 = vsel %vm5809_vm13, %v5797_v42, %v5812_v23  ;;  %v5818_v56 = vsel %vm5808_vm2, %v5815_v40, %v5817_v62  ;;  %v5821_v30 = vsel %vm5809_vm13, %v5803_v22, %v5820_v25 }
 0x41a   : > { %vm2449_vm4 = vcmp.lt.s32.totalorder %v12868_v37, 0  ;;  %v5822_v31 = vsel %vm5808_vm2, %v5819_v52, %v5821_v30  ;;  %v13081_v63 = vmul.u32.u64.low %v13063_v41, %v5818_v56  ;;  %v13082_v8 = vmul.u32.u64.high %v13063_v41, %v5818_v56, %v13081_v63 }
 0x41b   : > { %v2515_v14 = vclz %v9146_v29  ;;  %v2534_v54 = vsel %vm2449_vm4, %v2533_v16, %v2509_v26  ;;  %v2343_v58 = vand.u32 2147483647, %v13034_v61  ;;  %v13089_v7 = vadd.f32 %v10066_v1, %v12691_v24 }
 0x41c   : > { %v5814_v27 = vsel %vm5808_vm2, %v5811_v18, %v5813_v36  ;;  %v13093_v9 = vmul.u32.u64.low %v13063_v41, %v5822_v31  ;;  %v13094_v28 = vmul.u32.u64.high %v13063_v41, %v5822_v31, %v13093_v9  ;;  %v2347_v38 = vshrl.u32 %v2346_v43, 23 }
 0x41d   : > { %vm5558_vm5 = vcmp.lt.s32.totalorder %v13039_v59, 2  ;;  %vm5559_vm3 = vcmp.eq.s32.totalorder %v13039_v59, 0  ;;  %vm13100_vm6 = vcmp.le.f32.partialorder %v2447_v10, 0.7853982  ;;  %v9147_v50 = vadd.s32 4294967294, %v2515_v14 }
 0x41e   : > { %vm5562_vm10 = vcmp.eq.s32.totalorder %v13039_v59, 2  ;;  %v2503_v24 = vadd.s32 %v13020_v21, %v13017_v4  ;;  %v5833_v15 = vadd.s32 1, %v13082_v8  ;;  %v9141_v12 = vadd.s32 4294967169, %v2347_v38  ;;  %v13115_v21 = vpop.f32.mrb[20].mxu0 }
 0x41f   : > { %v9893_v11 = vpop.eup %9892  ;;  %vm9148_vm11 = vcmp.lt.s32.totalorder %v9147_v50, 0  ;;  %v2536_v42 = vsel %vm13100_vm6, 0, %v2534_v54  ;;  %v5830_v20 = vmul.u32 %v13063_v41, %v5814_v27  ;;  %v2350_v10 = vand.u32 8388607, %v2343_v58 }
 0x420   : > { %v9895_v19 = vpop.eup %9894  ;;  %v5563_v46 = vxor.u32 2147483648, %v9893_v11  ;;  %v2518_v44 = vsel %vm9148_vm11, 0, %v9147_v50  ;;  %vm5832_vm8 = vc.u32 %v13094_v28, %v13081_v63  ;;  %v5671_v4 = vand.u32 2147483647, %v13089_v7 }
 0x421   : > { %v5560_v22 = vxor.u32 2147483648, %v9895_v19  ;;  %v2519_v5 = vsub.s32 32, %v2518_v44  ;;  %v2523_v45 = vsub.s32 4294967266, %v2518_v44  ;;  %v5674_v43 = vand.u32 2139095040, %v13089_v7 }
 0x422   : > { %v5564_v41 = vsel %vm5562_vm10, %v5563_v46, %v9895_v19  ;;  %v2520_v17 = vshll.u32 %v13069_v6, %v2518_v44  ;;  %v5834_v23 = vsel %vm5832_vm8, %v5833_v15, %v13082_v8  ;;  %v2353_v40 = vadd.s32 1, %v9141_v12 }
 0x423   : > { %v5561_v60 = vsel %vm5559_vm3, %v9893_v11, %v5560_v22  ;;  %v2521_v16 = vshrl.u32 %v2503_v24, %v2519_v5  ;;  %v2524_v35 = vadd.s32 127, %v2523_v45  ;;  %v5835_v18 = vadd.s32 %v5834_v23, %v5830_v20 }
 0x424   : > { %vm5555_vm12 = vweird.f32 %v12771_v34  ;;  %v5565_v62 = vsel %vm5558_vm5, %v5561_v60, %v5564_v41  ;;  %vm2354_vm14 = vcmp.gt.s32.totalorder %v2353_v40, 0  ;;  %v2540_v56 = vadd.s32 3, %v2536_v42 }
 0x425   : > { %v5566_v52 = vsel %vm5555_vm12, nan, %v5565_v62  ;;  %v2522_v25 = vor.u32 %v2521_v16, %v2520_v17  ;;  %v2525_v29 = vshll.u32 %v2524_v35, 23  ;;  %v5836_v6 = vadd.s32 536870912, %v5835_v18 }
 0x426   : > { %v7381_v36 = vsel %vm18_vm0, %v12771_v34, %v5566_v52  ;;  %v2351_v30 = vor.u32 8388608, %v2350_v10  ;;  %v2355_v31 = vsel %vm2354_vm14, %v2353_v40, 0  ;;  %v5675_v54 = vshrl.u32 %v5674_v43, 23 }
 0x427   : > { %7447 = vst.msk [vmem:[%s10548_s19 + $0x170] sm:$0xff] %vm7400_vm7, %v7381_v36  ;;  %v2526_v8 = vor.u32 4788187, %v2525_v29  ;;  %v5837_v14 = vshrl.u32 %v5836_v6, 30  ;;  %v13134_v59 = vand.u32 8388607, %v5671_v4  ;;  %v2529_v38 = vcvt.s32.f32 %v2522_v25 }
 0x428   : > { %v2357_v27 = vand.u32 31, %v2355_v31  ;;  %v13136_v24 = vand.u32 3, %v2540_v56  ;;  %v13139_v34 = vadd.s32 %v13081_v63, %v13094_v28  ;;  %v13141_v12 = vshll.u32 %v2351_v30, 8 }
 0x429   : > { %v2527_v9 = vand.u32 2147483647, %v2526_v8  ;;  %v5838_v50 = vshll.u32 %v5837_v14, 30  ;;  %v9269_v20 = vadd.s32 4294967169, %v5675_v54  ;;  %v5679_v10 = vor.u32 8388608, %v13134_v59 }
 0x42a   : > { %v2358_v15 = vsub.s32 32, %v2357_v27  ;;  %v13146_v19 = vshrl.u32 %v2355_v31, 5  ;;  %v2360_v46 = vshll.u32 %v10032_v47, %v2357_v27  ;;  %vm5777_vm1 = vcmp.lt.s32.totalorder %v12924_v33, 0 }
 0x42b   : > { %v2530_v11 = vmul.f32 %v2529_v38, %v2527_v9  ;;  %v13143_v42 = vsub.s32 %v5835_v18, %v5838_v50  ;;  %v2363_v28 = vshll.u32 %v10033_v51, %v2357_v27  ;;  %v2366_v41 = vshll.u32 %v10034_v53, %v2357_v27 }
 0x42c   : > { %v2361_v44 = vshrl.u32 %v10033_v51, %v2358_v15  ;;  %v2364_v22 = vshrl.u32 %v10034_v53, %v2358_v15  ;;  %v2367_v45 = vshrl.u32 %v10035_v55, %v2358_v15  ;;  %v2369_v17 = vshll.u32 %v10035_v55, %v2357_v27 }
 0x42d   : > { %v2531_v5 = vxor.u32 2147483648, %v2530_v11  ;;  %v5841_v63 = vsub.s32 0, %v13143_v42  ;;  %v2370_v23 = vshrl.u32 %v10036_v57, %v2358_v15  ;;  %v2372_v35 = vshll.u32 %v10036_v57, %v2357_v27 }
 0x42e   : > { %v2362_v43 = vor.u32 %v2361_v44, %v2360_v46  ;;  %v2365_v16 = vor.u32 %v2364_v22, %v2363_v28  ;;  %v2368_v62 = vor.u32 %v2367_v45, %v2366_v41  ;;  %v2373_v25 = vshrl.u32 %v10037_v2, %v2358_v15  ;;  %v13197_v28 = vpop.f32.mrb[20].mxu1 }
 0x42f   : > { %v2532_v40 = vsel %vm2449_vm4, %v2531_v5, %v2530_v11  ;;  %v9274_v60 = vmin.u32 %v5841_v63, %v13143_v42  ;;  %v2371_v52 = vor.u32 %v2370_v23, %v2369_v17  ;;  %v5861_v6 = vsub.s32 4, %v5837_v14 }
 0x430   : > { %v2535_v18 = vsel %vm13100_vm6, %v12868_v37, %v2532_v40  ;;  %v5681_v36 = vadd.s32 1, %v9269_v20  ;;  %vm13168_vm15 = vcmp.le.f32.partialorder %v5775_v13, 0.7853982  ;;  %v2359_v30 = vshrl.u32 %v10032_v47, %v2358_v15 }
 0x431   : > { %9896 = vcosq.f32 %v2535_v18  ;;  %v5843_v29 = vclz %v9274_v60  ;;  %v2374_v31 = vor.u32 %v2373_v25, %v2372_v35  ;;  %vm2375_vm2 = vcmp.lt.s32.totalorder %v13146_v19, 1 }
 0x432   : > { %9898 = vsinq.f32 %v2535_v18  ;;  %vm2377_vm9 = vcmp.lt.s32.totalorder %v13146_v19, 3  ;;  %vm2378_vm13 = vcmp.lt.s32.totalorder %v13146_v19, 4  ;;  %v2383_v8 = vsel %vm2375_vm2, %v2362_v43, %v2365_v16 }
 0x433   : > { %v9275_v26 = vadd.s32 4294967294, %v5843_v29  ;;  %v2380_v54 = vsel %vm2378_vm13, %v2368_v62, 2102212464  ;;  %v2384_v27 = vsel %vm2378_vm13, %v2371_v52, 920167782  ;;  %v2387_v13 = vsel %vm2375_vm2, %v2365_v16, %v2368_v62 }
 0x434   : > { %v2388_v9 = vsel %vm2378_vm13, %v2374_v31, 1326507024  ;;  %vm2376_vm5 = vcmp.lt.s32.totalorder %v13146_v19, 2  ;;  %v2385_v38 = vsel %vm2377_vm9, %v2368_v62, %v2384_v27  ;;  %vm2543_vm3 = vcmp.eq.s32.totalorder %v13136_v24, 0 }
 0x435   : > { %vm9276_vm4 = vcmp.lt.s32.totalorder %v9275_v26, 0  ;;  %v2389_v50 = vsel %vm2377_vm9, %v2371_v52, %v2388_v9  ;;  %v5862_v11 = vsel %vm5777_vm1, %v5861_v6, %v5837_v14  ;;  %v2386_v20 = vsel %vm2376_vm5, %v2383_v8, %v2385_v38 }
 0x436   : > { %v5846_v15 = vsel %vm9276_vm4, 0, %v9275_v26  ;;  %v2390_v46 = vsel %vm2376_vm5, %v2387_v13, %v2389_v50  ;;  %vm2542_vm6 = vcmp.lt.s32.totalorder %v13136_v24, 2  ;;  %v2379_v5 = vsel %vm2375_vm2, %v2359_v30, %v2362_v43 }
 0x437   : > { %v5847_v44 = vsub.s32 32, %v5846_v15  ;;  %v5851_v22 = vsub.s32 4294967266, %v5846_v15  ;;  %v2381_v63 = vsel %vm2377_vm9, %v2365_v16, %v2380_v54  ;;  %vm2539_vm10 = vweird.f32 %v12868_v37 }
 0x438   : > { %v13201_v14 = vmul.u32.u64.low %v13141_v12, %v2390_v46  ;;  %v13202_v45 = vmul.u32.u64.high %v13141_v12, %v2390_v46, %v13201_v14  ;;  %v13205_v41 = vmul.u32.u64.low %v13141_v12, %v2386_v20  ;;  %v13206_v17 = vmul.u32.u64.high %v13141_v12, %v2386_v20, %v13205_v41 }
 0x439   : > { %v5848_v23 = vshll.u32 %v13143_v42, %v5846_v15  ;;  %v5849_v43 = vshrl.u32 %v13139_v34, %v5847_v44  ;;  %v5852_v40 = vadd.s32 127, %v5851_v22  ;;  %vm5682_vm11 = vcmp.gt.s32.totalorder %v5681_v36, 0 }
 0x43a   : > { %vm2546_vm8 = vcmp.eq.s32.totalorder %v13136_v24, 2  ;;  %v2382_v60 = vsel %vm2376_vm5, %v2379_v5, %v2381_v63  ;;  %v5683_v16 = vsel %vm5682_vm11, %v5681_v36, 0  ;;  %v13216_v35 = vshll.u32 %v5679_v10, 8 }
 0x43b   : > { %v9897_v18 = vpop.eup %9896  ;;  %v5850_v62 = vor.u32 %v5849_v43, %v5848_v23  ;;  %v5853_v52 = vshll.u32 %v5852_v40, 23  ;;  %v5864_v42 = vsel %vm13168_vm15, 0, %v5862_v11  ;;  %v5685_v25 = vand.u32 31, %v5683_v16 }
 0x43c   : > { %v9899_v34 = vpop.eup %9898  ;;  %v2547_v29 = vxor.u32 2147483648, %v9897_v18  ;;  %vm2400_vm12 = vc.u32 %v13202_v45, %v13205_v41  ;;  %v2401_v19 = vadd.s32 1, %v13206_v17  ;;  %v13225_v6 = vadd.f32 %v12756_v39, %v10066_v1 }
 0x43d   : > { %v2544_v59 = vxor.u32 2147483648, %v9899_v34  ;;  %v5854_v10 = vor.u32 4788187, %v5853_v52  ;;  %v2398_v36 = vmul.u32 %v13141_v12, %v2382_v60  ;;  %v5686_v30 = vsub.s32 32, %v5685_v25 }
 0x43e   : > { %v2548_v31 = vsel %vm2546_vm8, %v2547_v29, %v9899_v34  ;;  %v5868_v26 = vadd.s32 3, %v5864_v42  ;;  %v2402_v8 = vsel %vm2400_vm12, %v2401_v19, %v13206_v17  ;;  %v5684_v54 = vshrl.u32 %v5683_v16, 5 }
 0x43f   : > { %v2545_v27 = vsel %vm2543_vm3, %v9897_v18, %v2544_v59  ;;  %v5855_v13 = vand.u32 2147483647, %v5854_v10  ;;  %v5857_v9 = vcvt.s32.f32 %v5850_v62  ;;  %v2403_v39 = vadd.s32 %v2402_v8, %v2398_v36 }
 0x440   : > { %v2549_v38 = vsel %vm2542_vm6, %v2545_v27, %v2548_v31  ;;  %v5688_v12 = vshll.u32 %v10032_v47, %v5685_v25  ;;  %v5689_v50 = vshrl.u32 %v10033_v51, %v5686_v30  ;;  %v5692_v15 = vshrl.u32 %v10034_v53, %v5686_v30 }
 0x441   : > { %v2550_v11 = vsel %vm2539_vm10, nan, %v2549_v38  ;;  %v5858_v20 = vmul.f32 %v5857_v9, %v5855_v13  ;;  %v2404_v46 = vadd.s32 536870912, %v2403_v39  ;;  %v5695_v44 = vshrl.u32 %v10035_v55, %v5686_v30 }
 0x442   : > { %v7352_v22 = vsel %vm18_vm0, %v12868_v37, %v2550_v11  ;;  %v5690_v5 = vor.u32 %v5689_v50, %v5688_v12  ;;  %v5691_v24 = vshll.u32 %v10033_v51, %v5685_v25  ;;  %v5694_v63 = vshll.u32 %v10034_v53, %v5685_v25 }
 0x443   : > { %7418 = vst.msk [vmem:[%s10548_s19 + $0x88] sm:$0xff] %vm7400_vm7, %v7352_v22  ;;  %v5859_v14 = vxor.u32 2147483648, %v5858_v20  ;;  %v2405_v17 = vshrl.u32 %v2404_v46, 30  ;;  %v5697_v23 = vshll.u32 %v10035_v55, %v5685_v25  ;;  %v5698_v43 = vshrl.u32 %v10036_v57, %v5686_v30 }
 0x444   : > { %v5693_v40 = vor.u32 %v5692_v15, %v5691_v24  ;;  %v5696_v60 = vor.u32 %v5695_v44, %v5694_v63  ;;  %v5700_v16 = vshll.u32 %v10036_v57, %v5685_v25  ;;  %v5701_v18 = vshrl.u32 %v10037_v2, %v5686_v30 }
 0x445   : > { %v5860_v37 = vsel %vm5777_vm1, %v5859_v14, %v5858_v20  ;;  %v13254_v62 = vand.u32 3, %v5868_v26  ;;  %v2406_v52 = vshll.u32 %v2405_v17, 30  ;;  %v5699_v42 = vor.u32 %v5698_v43, %v5697_v23  ;;  %v13280_v14 = vpop.f32.mrb[21].mxu0 }
 0x446   : > { %v5863_v34 = vsel %vm13168_vm15, %v12924_v33, %v5860_v37  ;;  %v5687_v29 = vshrl.u32 %v10032_v47, %v5686_v30  ;;  %v5702_v19 = vor.u32 %v5701_v18, %v5700_v16  ;;  %v2658_v59 = vand.u32 2139095040, %v13225_v6 }
 0x447   : > { %9900 = vcosq.f32 %v5863_v34  ;;  %v13261_v25 = vsub.s32 %v2403_v39, %v2406_v52  ;;  %vm5703_vm14 = vcmp.lt.s32.totalorder %v5684_v54, 1  ;;  %vm5706_vm2 = vcmp.lt.s32.totalorder %v5684_v54, 4 }
 0x448   : > { %9902 = vsinq.f32 %v5863_v34  ;;  %vm5704_vm1 = vcmp.lt.s32.totalorder %v5684_v54, 2  ;;  %v5708_v10 = vsel %vm5706_vm2, %v5696_v60, 2102212464  ;;  %v5711_v36 = vsel %vm5703_vm14, %v5690_v5, %v5693_v40 }
 0x449   : > { %v2409_v31 = vsub.s32 0, %v13261_v25  ;;  %v2429_v26 = vsub.s32 4, %v2405_v17  ;;  %vm5705_vm9 = vcmp.lt.s32.totalorder %v5684_v54, 3  ;;  %v5712_v56 = vsel %vm5706_vm2, %v5699_v42, 920167782 }
 0x44a   : > { %v5707_v8 = vsel %vm5703_vm14, %v5687_v29, %v5690_v5  ;;  %v5713_v27 = vsel %vm5705_vm9, %v5696_v60, %v5712_v56  ;;  %v5715_v30 = vsel %vm5703_vm14, %v5693_v40, %v5696_v60  ;;  %v5716_v13 = vsel %vm5706_vm2, %v5702_v19, 1326507024 }
 0x44b   : > { %v9142_v9 = vmin.u32 %v2409_v31, %v13261_v25  ;;  %v5709_v38 = vsel %vm5705_vm9, %v5693_v40, %v5708_v10  ;;  %v5714_v39 = vsel %vm5704_vm1, %v5711_v36, %v5713_v27  ;;  %v5717_v12 = vsel %vm5705_vm9, %v5699_v42, %v5716_v13 }
 0x44c   : > { %vm2345_vm15 = vcmp.lt.s32.totalorder %v13034_v61, 0  ;;  %v5718_v50 = vsel %vm5704_vm1, %v5715_v30, %v5717_v12  ;;  %v13269_v15 = vmul.u32.u64.low %v13216_v35, %v5714_v39  ;;  %v13270_v11 = vmul.u32.u64.high %v13216_v35, %v5714_v39, %v13269_v15 }
 0x44d   : > { %v2411_v20 = vclz %v9142_v9  ;;  %v2430_v46 = vsel %vm2345_vm15, %v2429_v26, %v2405_v17  ;;  %v2655_v44 = vand.u32 2147483647, %v13225_v6  ;;  %v5710_v22 = vsel %vm5704_vm1, %v5707_v8, %v5709_v38 }
 0x44e   : > { %v13277_v5 = vmul.u32.u64.low %v13216_v35, %v5718_v50  ;;  %v13278_v24 = vmul.u32.u64.high %v13216_v35, %v5718_v50, %v13277_v5  ;;  %v2659_v63 = vshrl.u32 %v2658_v59, 23  ;;  %vm5870_vm13 = vcmp.lt.s32.totalorder %v13254_v62, 2 }
 0x44f   : > { %vm13285_vm4 = vcmp.le.f32.partialorder %v2343_v58, 0.7853982  ;;  %v9143_v17 = vadd.s32 4294967294, %v2411_v20  ;;  %vm5871_vm5 = vcmp.eq.s32.totalorder %v13254_v62, 0  ;;  %vm5874_vm3 = vcmp.eq.s32.totalorder %v13254_v62, 2 }
 0x450   : > { %v5729_v54 = vadd.s32 1, %v13270_v11  ;;  %v9153_v43 = vadd.s32 4294967169, %v2659_v63  ;;  %v2399_v60 = vadd.s32 %v13205_v41, %v13202_v45  ;;  %v2432_v16 = vsel %vm13285_vm4, 0, %v2430_v46 }
 0x451   : > { %v9901_v40 = vpop.eup %9900  ;;  %vm9144_vm6 = vcmp.lt.s32.totalorder %v9143_v17, 0  ;;  %v5726_v58 = vmul.u32 %v13216_v35, %v5710_v22  ;;  %vm5728_vm10 = vc.u32 %v13278_v24, %v13269_v15  ;;  %v2662_v42 = vand.u32 8388607, %v2655_v44 }
 0x452   : > { %v9903_v18 = vpop.eup %9902  ;;  %v5875_v37 = vxor.u32 2147483648, %v9901_v40  ;;  %v2414_v52 = vsel %vm9144_vm6, 0, %v9143_v17  ;;  %v13302_v45 = vadd.f32 %v12851_v48, %v10066_v1  ;;  %v5730_v59 = vsel %vm5728_vm10, %v5729_v54, %v13270_v11 }
 0x453   : > { %v5872_v34 = vxor.u32 2147483648, %v9903_v18  ;;  %v2415_v29 = vsub.s32 32, %v2414_v52  ;;  %v2419_v19 = vsub.s32 4294967266, %v2414_v52  ;;  %v2416_v35 = vshll.u32 %v13261_v25, %v2414_v52 }
 0x454   : > { %v5876_v41 = vsel %vm5874_vm3, %v5875_v37, %v9903_v18  ;;  %v2665_v10 = vadd.s32 1, %v9153_v43  ;;  %v5731_v56 = vadd.s32 %v5730_v59, %v5726_v58  ;;  %vm5867_vm11 = vweird.f32 %v12924_v33 }
 0x455   : > { %v5873_v36 = vsel %vm5871_vm5, %v9901_v40, %v5872_v34  ;;  %v2417_v31 = vshrl.u32 %v2399_v60, %v2415_v29  ;;  %v2420_v26 = vadd.s32 127, %v2419_v19  ;;  %v2436_v9 = vadd.s32 3, %v2432_v16 }
 0x456   : > { %v5877_v48 = vsel %vm5870_vm13, %v5873_v36, %v5876_v41  ;;  %vm2666_vm8 = vcmp.gt.s32.totalorder %v2665_v10, 0  ;;  %v5732_v25 = vadd.s32 536870912, %v5731_v56  ;;  %v2663_v50 = vor.u32 8388608, %v2662_v42 }
 0x457   : > { %v5878_v8 = vsel %vm5867_vm11, nan, %v5877_v48  ;;  %v2418_v27 = vor.u32 %v2417_v31, %v2416_v35  ;;  %v2421_v30 = vshll.u32 %v2420_v26, 23  ;;  %v2667_v38 = vsel %vm2666_vm8, %v2665_v10, 0 }
 0x458   : > { %v7384_v13 = vsel %vm18_vm0, %v12924_v33, %v5878_v8  ;;  %v5733_v12 = vshrl.u32 %v5732_v25, 30  ;;  %v5986_v11 = vand.u32 2139095040, %v13302_v45  ;;  %v2669_v62 = vand.u32 31, %v2667_v38 }
 0x459   : > { %7450 = vst.msk [vmem:[%s10548_s19 + $0x188] sm:$0xff] %vm7400_vm7, %v7384_v13  ;;  %v2422_v39 = vor.u32 4788187, %v2421_v30  ;;  %v2425_v46 = vcvt.s32.f32 %v2418_v27  ;;  %v13319_v5 = vand.u32 3, %v2436_v9  ;;  %v5727_v63 = vadd.s32 %v13269_v15, %v13278_v24 }
 0x45a   : > { %v5734_v22 = vshll.u32 %v5733_v12, 30  ;;  %v2670_v17 = vsub.s32 32, %v2669_v62  ;;  %v5983_v33 = vand.u32 2147483647, %v13302_v45  ;;  %v13325_v40 = vshll.u32 %v2663_v50, 8 }
 0x45b   : > { %v2423_v20 = vand.u32 2147483647, %v2422_v39  ;;  %v5987_v60 = vshrl.u32 %v5986_v11, 23  ;;  %v13327_v16 = vshrl.u32 %v2667_v38, 5  ;;  %v2672_v58 = vshll.u32 %v10032_v47, %v2669_v62 }
 0x45c   : > { %v13323_v43 = vsub.s32 %v5731_v56, %v5734_v22  ;;  %v2673_v18 = vshrl.u32 %v10033_v51, %v2670_v17  ;;  %v2676_v37 = vshrl.u32 %v10034_v53, %v2670_v17  ;;  %vm5673_vm12 = vcmp.lt.s32.totalorder %v13089_v7, 0 }
 0x45d   : > { %v2426_v54 = vmul.f32 %v2425_v46, %v2423_v20  ;;  %v2675_v24 = vshll.u32 %v10033_v51, %v2669_v62  ;;  %v2679_v42 = vshrl.u32 %v10035_v55, %v2670_v17  ;;  %v2678_v29 = vshll.u32 %v10034_v53, %v2669_v62 }
 0x45e   : > { %v5737_v15 = vsub.s32 0, %v13323_v43  ;;  %v2674_v34 = vor.u32 %v2673_v18, %v2672_v58  ;;  %v2681_v19 = vshll.u32 %v10035_v55, %v2669_v62  ;;  %v2682_v41 = vshrl.u32 %v10036_v57, %v2670_v17 }
 0x45f   : > { %v2427_v52 = vxor.u32 2147483648, %v2426_v54  ;;  %v2677_v10 = vor.u32 %v2676_v37, %v2675_v24  ;;  %v2684_v36 = vshll.u32 %v10036_v57, %v2669_v62  ;;  %v2680_v26 = vor.u32 %v2679_v42, %v2678_v29 }
 0x460   : > { %v9270_v59 = vmin.u32 %v5737_v15, %v13323_v43  ;;  %v2683_v56 = vor.u32 %v2682_v41, %v2681_v19  ;;  %v2685_v48 = vshrl.u32 %v10037_v2, %v2670_v17  ;;  %v5757_v27 = vsub.s32 4, %v5733_v12 }
 0x461   : > { %v2428_v35 = vsel %vm2345_vm15, %v2427_v52, %v2426_v54  ;;  %v9281_v30 = vadd.s32 4294967169, %v5987_v60  ;;  %v2671_v25 = vshrl.u32 %v10032_v47, %v2670_v17  ;;  %vm2687_vm14 = vcmp.lt.s32.totalorder %v13327_v16, 1  ;;  %v13372_v60 = vpop.f32.mrb[21].mxu1 }
 0x462   : > { %v2431_v31 = vsel %vm13285_vm4, %v13034_v61, %v2428_v35  ;;  %v5739_v8 = vclz %v9270_v59  ;;  %v2686_v13 = vor.u32 %v2685_v48, %v2684_v36  ;;  %vm13351_vm2 = vcmp.le.f32.partialorder %v5671_v4, 0.7853982 }
 0x463   : > { %9904 = vcosq.f32 %v2431_v31  ;;  %vm2689_vm1 = vcmp.lt.s32.totalorder %v13327_v16, 3  ;;  %vm2690_vm9 = vcmp.lt.s32.totalorder %v13327_v16, 4  ;;  %v2695_v38 = vsel %vm2687_vm14, %v2674_v34, %v2677_v10 }
 0x464   : > { %9906 = vsinq.f32 %v2431_v31  ;;  %v9271_v23 = vadd.s32 4294967294, %v5739_v8  ;;  %v2692_v39 = vsel %vm2690_vm9, %v2680_v26, 2102212464  ;;  %v2696_v50 = vsel %vm2690_vm9, %v2683_v56, 920167782 }
 0x465   : > { %v2699_v11 = vsel %vm2687_vm14, %v2677_v10, %v2680_v26  ;;  %v2700_v62 = vsel %vm2690_vm9, %v2686_v13, 1326507024  ;;  %vm2688_vm13 = vcmp.lt.s32.totalorder %v13327_v16, 2  ;;  %v2697_v4 = vsel %vm2689_vm1, %v2680_v26, %v2696_v50 }
 0x466   : > { %vm9272_vm15 = vcmp.lt.s32.totalorder %v9271_v23, 0  ;;  %v2701_v20 = vsel %vm2689_vm1, %v2683_v56, %v2700_v62  ;;  %v5758_v22 = vsel %vm5673_vm12, %v5757_v27, %v5733_v12  ;;  %v2698_v17 = vsel %vm2688_vm13, %v2695_v38, %v2697_v4 }
 0x467   : > { %v5742_v46 = vsel %vm9272_vm15, 0, %v9271_v23  ;;  %v2702_v54 = vsel %vm2688_vm13, %v2699_v11, %v2701_v20  ;;  %v2691_v37 = vsel %vm2687_vm14, %v2671_v25, %v2674_v34  ;;  %v2693_v52 = vsel %vm2689_vm1, %v2677_v10, %v2692_v39 }
 0x468   : > { %v5743_v58 = vsub.s32 32, %v5742_v46  ;;  %v5747_v18 = vsub.s32 4294967266, %v5742_v46  ;;  %vm2435_vm4 = vweird.f32 %v13034_v61  ;;  %v5744_v29 = vshll.u32 %v13323_v43, %v5742_v46 }
 0x469   : > { %v13380_v12 = vmul.u32.u64.low %v13325_v40, %v2702_v54  ;;  %v13381_v15 = vmul.u32.u64.high %v13325_v40, %v2702_v54, %v13380_v12  ;;  %v13384_v24 = vmul.u32.u64.low %v13325_v40, %v2698_v17  ;;  %v13385_v42 = vmul.u32.u64.high %v13325_v40, %v2698_v17, %v13384_v24 }
 0x46a   : > { %v5745_v19 = vshrl.u32 %v5727_v63, %v5743_v58  ;;  %v5748_v41 = vadd.s32 127, %v5747_v18  ;;  %v5993_v35 = vadd.s32 1, %v9281_v30  ;;  %vm2438_vm5 = vcmp.lt.s32.totalorder %v13319_v5, 2 }
 0x46b   : > { %vm2439_vm3 = vcmp.eq.s32.totalorder %v13319_v5, 0  ;;  %vm2442_vm6 = vcmp.eq.s32.totalorder %v13319_v5, 2  ;;  %v2694_v34 = vsel %vm2688_vm13, %v2691_v37, %v2693_v52  ;;  %v5990_v31 = vand.u32 8388607, %v5983_v33 }
 0x46c   : > { %v5746_v10 = vor.u32 %v5745_v19, %v5744_v29  ;;  %v5749_v36 = vshll.u32 %v5748_v41, 23  ;;  %vm5994_vm10 = vcmp.gt.s32.totalorder %v5993_v35, 0  ;;  %v5760_v26 = vsel %vm13351_vm2, 0, %v5758_v22 }
 0x46d   : > { %v9905_v59 = vpop.eup %9904  ;;  %vm2712_vm11 = vc.u32 %v13381_v15, %v13384_v24  ;;  %v2713_v56 = vadd.s32 1, %v13385_v42  ;;  %v2710_v8 = vmul.u32 %v13325_v40, %v2694_v34  ;;  %v5995_v27 = vsel %vm5994_vm10, %v5993_v35, 0 }
 0x46e   : > { %v9907_v43 = vpop.eup %9906  ;;  %v2443_v63 = vxor.u32 2147483648, %v9905_v59  ;;  %v5750_v16 = vor.u32 4788187, %v5749_v36  ;;  %v5997_v13 = vand.u32 31, %v5995_v27  ;;  %v13407_v23 = vadd.f32 %v10066_v1, %v12931_v49 }
 0x46f   : > { %v2440_v48 = vxor.u32 2147483648, %v9907_v43  ;;  %v2714_v25 = vsel %vm2712_vm11, %v2713_v56, %v13385_v42  ;;  %v5753_v50 = vcvt.s32.f32 %v5746_v10  ;;  %v5764_v62 = vadd.s32 3, %v5760_v26 }
 0x470   : > { %v2444_v30 = vsel %vm2442_vm6, %v2443_v63, %v9907_v43  ;;  %v5751_v39 = vand.u32 2147483647, %v5750_v16  ;;  %v2715_v11 = vadd.s32 %v2714_v25, %v2710_v8  ;;  %v5991_v4 = vor.u32 8388608, %v5990_v31 }
 0x471   : > { %v2441_v38 = vsel %vm2439_vm3, %v9905_v59, %v2440_v48  ;;  %v5998_v20 = vsub.s32 32, %v5997_v13  ;;  %v5996_v49 = vshrl.u32 %v5995_v27, 5  ;;  %v6000_v58 = vshll.u32 %v10032_v47, %v5997_v13 }
 0x472   : > { %v2445_v40 = vsel %vm2438_vm5, %v2441_v38, %v2444_v30  ;;  %v5754_v22 = vmul.f32 %v5753_v50, %v5751_v39  ;;  %v2716_v17 = vadd.s32 536870912, %v2715_v11  ;;  %v6003_v12 = vshll.u32 %v10033_v51, %v5997_v13 }
 0x473   : > { %v2446_v46 = vsel %vm2435_vm4, nan, %v2445_v40  ;;  %v6001_v18 = vshrl.u32 %v10033_v51, %v5998_v20  ;;  %v6004_v5 = vshrl.u32 %v10034_v53, %v5998_v20  ;;  %v6007_v42 = vshrl.u32 %v10035_v55, %v5998_v20 }
 0x474   : > { %v7351_v54 = vsel %vm18_vm0, %v13034_v61, %v2446_v46  ;;  %v5755_v37 = vxor.u32 2147483648, %v5754_v22  ;;  %v13423_v52 = vshrl.u32 %v2716_v17, 30  ;;  %v6006_v19 = vshll.u32 %v10034_v53, %v5997_v13 }
 0x475   : > { %7417 = vst.msk [vmem:[%s10548_s19 + $0x80] sm:$0xff] %vm7400_vm7, %v7351_v54  ;;  %v6002_v29 = vor.u32 %v6001_v18, %v6000_v58  ;;  %v6009_v61 = vshll.u32 %v10035_v55, %v5997_v13  ;;  %v6010_v41 = vshrl.u32 %v10036_v57, %v5998_v20  ;;  %v6005_v59 = vor.u32 %v6004_v5, %v6003_v12 }
 0x476   : > { %v5756_v35 = vsel %vm5673_vm12, %v5755_v37, %v5754_v22  ;;  %v2718_v34 = vshll.u32 %v13423_v52, 30  ;;  %v6012_v10 = vshll.u32 %v10036_v57, %v5997_v13  ;;  %v6008_v31 = vor.u32 %v6007_v42, %v6006_v19 }
 0x477   : > { %v5759_v36 = vsel %vm13351_vm2, %v13089_v7, %v5756_v35  ;;  %v6011_v43 = vor.u32 %v6010_v41, %v6009_v61  ;;  %v6013_v63 = vshrl.u32 %v10037_v2, %v5998_v20  ;;  %v13442_v56 = vadd.f32 %v10066_v1, %v13010_v32 }
 0x478   : > { %9908 = vcosq.f32 %v5759_v36  ;;  %v13438_v26 = vsub.s32 %v2715_v11, %v2718_v34  ;;  %v5765_v48 = vand.u32 3, %v5764_v62  ;;  %v2554_v8 = vand.u32 2139095040, %v13407_v23  ;;  %v13470_v34 = vpop.f32.mrb[22].mxu0 }
 0x479   : > { %9910 = vsinq.f32 %v5759_v36  ;;  %v6014_v16 = vor.u32 %v6013_v63, %v6012_v10  ;;  %vm2657_vm8 = vcmp.lt.s32.totalorder %v13225_v6, 0  ;;  %vm6015_vm12 = vcmp.lt.s32.totalorder %v5996_v49, 1 }
 0x47a   : > { %v2721_v9 = vsub.s32 0, %v13438_v26  ;;  %vm6018_vm14 = vcmp.lt.s32.totalorder %v5996_v49, 4  ;;  %v6031_v27 = vshll.u32 %v5991_v4, 8  ;;  %vm6017_vm2 = vcmp.lt.s32.totalorder %v5996_v49, 3 }
 0x47b   : > { %v6020_v30 = vsel %vm6018_vm14, %v6008_v31, 2102212464  ;;  %v6023_v25 = vsel %vm6015_vm12, %v6002_v29, %v6005_v59  ;;  %v6024_v13 = vsel %vm6018_vm14, %v6011_v43, 920167782  ;;  %v5999_v38 = vshrl.u32 %v10032_v47, %v5998_v20 }
 0x47c   : > { %v9154_v32 = vmin.u32 %v2721_v9, %v13438_v26  ;;  %vm6016_vm1 = vcmp.lt.s32.totalorder %v5996_v49, 2  ;;  %v6025_v39 = vsel %vm6017_vm2, %v6008_v31, %v6024_v13  ;;  %v6027_v11 = vsel %vm6015_vm12, %v6005_v59, %v6008_v31 }
 0x47d   : > { %v6026_v50 = vsel %vm6016_vm1, %v6023_v25, %v6025_v39  ;;  %v6028_v40 = vsel %vm6018_vm14, %v6014_v16, 1326507024  ;;  %v2555_v62 = vshrl.u32 %v2554_v8, 23  ;;  %vm5766_vm9 = vcmp.lt.s32.totalorder %v5765_v48, 2 }
 0x47e   : > { %v2723_v4 = vclz %v9154_v32  ;;  %v6019_v46 = vsel %vm6015_vm12, %v5999_v38, %v6002_v29  ;;  %v6021_v22 = vsel %vm6017_vm2, %v6005_v59, %v6020_v30  ;;  %vm5763_vm15 = vweird.f32 %v13089_v7 }
 0x47f   : > { %v2741_v17 = vsub.s32 4, %v13423_v52  ;;  %v6029_v20 = vsel %vm6017_vm2, %v6011_v43, %v6028_v40  ;;  %v13458_v54 = vmul.u32.u64.low %v6031_v27, %v6026_v50  ;;  %v13459_v58 = vmul.u32.u64.high %v6031_v27, %v6026_v50, %v13458_v54 }
 0x480   : > { %vm5767_vm13 = vcmp.eq.s32.totalorder %v5765_v48, 0  ;;  %v9155_v18 = vadd.s32 4294967294, %v2723_v4  ;;  %v6030_v5 = vsel %vm6016_vm1, %v6027_v11, %v6029_v20  ;;  %v9149_v37 = vadd.s32 4294967169, %v2555_v62 }
 0x481   : > { %vm5770_vm4 = vcmp.eq.s32.totalorder %v5765_v48, 2  ;;  %v6022_v12 = vsel %vm6016_vm1, %v6019_v46, %v6021_v22  ;;  %v13464_v42 = vmul.u32.u64.low %v6031_v27, %v6030_v5  ;;  %v13465_v29 = vmul.u32.u64.high %v6031_v27, %v6030_v5, %v13464_v42 }
 0x482   : > { %v9909_v19 = vpop.eup %9908  ;;  %v2711_v61 = vadd.s32 %v13384_v24, %v13381_v15  ;;  %vm9156_vm5 = vcmp.lt.s32.totalorder %v9155_v18, 0  ;;  %v2551_v41 = vand.u32 2147483647, %v13407_v23  ;;  %v2561_v35 = vadd.s32 1, %v9149_v37 }
 0x483   : > { %v9911_v59 = vpop.eup %9910  ;;  %v5771_v10 = vxor.u32 2147483648, %v9909_v19  ;;  %v2726_v36 = vsel %vm9156_vm5, 0, %v9155_v18  ;;  %v2742_v49 = vsel %vm2657_vm8, %v2741_v17, %v13423_v52  ;;  %v6041_v31 = vadd.s32 1, %v13459_v58 }
 0x484   : > { %v5768_v43 = vxor.u32 2147483648, %v9911_v59  ;;  %v2727_v63 = vsub.s32 32, %v2726_v36  ;;  %v2731_v16 = vsub.s32 4294967266, %v2726_v36  ;;  %v6038_v8 = vmul.u32 %v6031_v27, %v6022_v12 }
 0x485   : > { %v5772_v15 = vsel %vm5770_vm4, %v5771_v10, %v9911_v59  ;;  %v2728_v24 = vshll.u32 %v13438_v26, %v2726_v36  ;;  %vm6040_vm3 = vc.u32 %v13465_v29, %v13458_v54  ;;  %vm2562_vm6 = vcmp.gt.s32.totalorder %v2561_v35, 0 }
 0x486   : > { %v5769_v9 = vsel %vm5767_vm13, %v9909_v19, %v5768_v43  ;;  %v2729_v30 = vshrl.u32 %v2711_v61, %v2727_v63  ;;  %v2732_v25 = vadd.s32 127, %v2731_v16  ;;  %v6042_v52 = vsel %vm6040_vm3, %v6041_v31, %v13459_v58 }
 0x487   : > { %v5773_v13 = vsel %vm5766_vm9, %v5769_v9, %v5772_v15  ;;  %v6043_v32 = vadd.s32 %v6042_v52, %v6038_v8  ;;  %v2558_v27 = vand.u32 8388607, %v2551_v41  ;;  %v2563_v38 = vsel %vm2562_vm6, %v2561_v35, 0 }
 0x488   : > { %v5774_v26 = vsel %vm5763_vm15, nan, %v5773_v13  ;;  %v2730_v39 = vor.u32 %v2729_v30, %v2728_v24  ;;  %v2733_v50 = vshll.u32 %v2732_v25, 23  ;;  %vm13492_vm10 = vcmp.le.f32.partialorder %v2655_v44, 0.7853982 }
 0x489   : > { %v7383_v11 = vsel %vm18_vm0, %v13089_v7, %v5774_v26  ;;  %v6044_v48 = vadd.s32 536870912, %v6043_v32  ;;  %v2565_v62 = vand.u32 31, %v2563_v38  ;;  %v2744_v46 = vsel %vm13492_vm10, 0, %v2742_v49 }
 0x48a   : > { %7449 = vst.msk [vmem:[%s10548_s19 + $0x180] sm:$0xff] %vm7400_vm7, %v7383_v11  ;;  %v2734_v4 = vor.u32 4788187, %v2733_v50  ;;  %v5879_v22 = vand.u32 2147483647, %v13442_v56  ;;  %v13503_v17 = vadd.f32 %v13115_v21, %v10066_v1  ;;  %v2559_v44 = vor.u32 8388608, %v2558_v27 }
 0x48b   : > { %v13505_v7 = vshrl.u32 %v6044_v48, 30  ;;  %v2566_v20 = vsub.s32 32, %v2565_v62  ;;  %v5882_v58 = vand.u32 2139095040, %v13442_v56  ;;  %v2737_v5 = vcvt.s32.f32 %v2730_v39 }
 0x48c   : > { %v2735_v18 = vand.u32 2147483647, %v2734_v4  ;;  %v13508_v37 = vshrl.u32 %v2563_v38, 5  ;;  %v2568_v12 = vshll.u32 %v10032_v47, %v2565_v62  ;;  %v2571_v61 = vshll.u32 %v10033_v51, %v2565_v62 }
 0x48d   : > { %v6046_v42 = vshll.u32 %v13505_v7, 30  ;;  %v2569_v19 = vshrl.u32 %v10033_v51, %v2566_v20  ;;  %v2574_v21 = vshll.u32 %v10034_v53, %v2565_v62  ;;  %v2572_v59 = vshrl.u32 %v10034_v53, %v2566_v20 }
 0x48e   : > { %v2738_v35 = vmul.f32 %v2737_v5, %v2735_v18  ;;  %v2575_v10 = vshrl.u32 %v10035_v55, %v2566_v20  ;;  %v2578_v36 = vshrl.u32 %v10036_v57, %v2566_v20  ;;  %v2748_v49 = vadd.s32 3, %v2744_v46 }
 0x48f   : > { %v13518_v31 = vsub.s32 %v6043_v32, %v6046_v42  ;;  %v2577_v43 = vshll.u32 %v10035_v55, %v2565_v62  ;;  %v2581_v63 = vshrl.u32 %v10037_v2, %v2566_v20  ;;  %v2570_v8 = vor.u32 %v2569_v19, %v2568_v12 }
 0x490   : > { %v2739_v16 = vxor.u32 2147483648, %v2738_v35  ;;  %v2573_v15 = vor.u32 %v2572_v59, %v2571_v61  ;;  %v2576_v24 = vor.u32 %v2575_v10, %v2574_v21  ;;  %v2580_v25 = vshll.u32 %v10036_v57, %v2565_v62 }
 0x491   : > { %v6049_v9 = vsub.s32 0, %v13518_v31  ;;  %v2579_v30 = vor.u32 %v2578_v36, %v2577_v43  ;;  %v13524_v52 = vshll.u32 %v2559_v44, 8  ;;  %vm5985_vm11 = vcmp.lt.s32.totalorder %v13302_v45, 0 }
 0x492   : > { %v2740_v13 = vsel %vm2657_vm8, %v2739_v16, %v2738_v35  ;;  %v2567_v32 = vshrl.u32 %v10032_v47, %v2566_v20  ;;  %vm2583_vm12 = vcmp.lt.s32.totalorder %v13508_v37, 1  ;;  %v5883_v27 = vshrl.u32 %v5882_v58, 23 }
 0x493   : > { %v2743_v38 = vsel %vm13492_vm10, %v13225_v6, %v2740_v13  ;;  %v9282_v26 = vmin.u32 %v6049_v9, %v13518_v31  ;;  %v2582_v39 = vor.u32 %v2581_v63, %v2580_v25  ;;  %vm2586_vm14 = vcmp.lt.s32.totalorder %v13508_v37, 4  ;;  %v13581_v9 = vpop.f32.mrb[22].mxu1 }
 0x494   : > { %9912 = vcosq.f32 %v2743_v38  ;;  %v2588_v50 = vsel %vm2586_vm14, %v2576_v24, 2102212464  ;;  %v2591_v11 = vsel %vm2583_vm12, %v2570_v8, %v2573_v15  ;;  %v2592_v48 = vsel %vm2586_vm14, %v2579_v30, 920167782 }
 0x495   : > { %9914 = vsinq.f32 %v2743_v38  ;;  %v6051_v62 = vclz %v9282_v26  ;;  %vm2584_vm8 = vcmp.lt.s32.totalorder %v13508_v37, 2  ;;  %vm2585_vm2 = vcmp.lt.s32.totalorder %v13508_v37, 3 }
 0x496   : > { %v6069_v40 = vsub.s32 4, %v13505_v7  ;;  %v2587_v4 = vsel %vm2583_vm12, %v2567_v32, %v2570_v8  ;;  %v2593_v46 = vsel %vm2585_vm2, %v2576_v24, %v2592_v48  ;;  %v2595_v44 = vsel %vm2583_vm12, %v2573_v15, %v2576_v24 }
 0x497   : > { %v9283_v20 = vadd.s32 4294967294, %v6051_v62  ;;  %v2589_v58 = vsel %vm2585_vm2, %v2573_v15, %v2588_v50  ;;  %v2594_v18 = vsel %vm2584_vm8, %v2591_v11, %v2593_v46  ;;  %v2596_v5 = vsel %vm2586_vm14, %v2582_v39, 1326507024 }
 0x498   : > { %v2597_v12 = vsel %vm2585_vm2, %v2579_v30, %v2596_v5  ;;  %v13554_v42 = vmul.u32.u64.low %v13524_v52, %v2594_v18  ;;  %v13555_v19 = vmul.u32.u64.high %v13524_v52, %v2594_v18, %v13554_v42  ;;  %v9277_v61 = vadd.s32 4294967169, %v5883_v27 }
 0x499   : > { %vm13560_vm1 = vcmp.le.f32.partialorder %v5983_v33, 0.7853982  ;;  %v6039_v35 = vadd.s32 %v13458_v54, %v13465_v29  ;;  %vm9284_vm9 = vcmp.lt.s32.totalorder %v9283_v20, 0  ;;  %v2598_v59 = vsel %vm2584_vm8, %v2595_v44, %v2597_v12 }
 0x49a   : > { %v6054_v10 = vsel %vm9284_vm9, 0, %v9283_v20  ;;  %v13569_v36 = vmul.u32.u64.low %v13524_v52, %v2598_v59  ;;  %v13570_v43 = vmul.u32.u64.high %v13524_v52, %v2598_v59, %v13569_v36  ;;  %v5889_v63 = vadd.s32 1, %v9277_v61 }
 0x49b   : > { %vm2747_vm15 = vweird.f32 %v13225_v6  ;;  %v6055_v16 = vsub.s32 32, %v6054_v10  ;;  %v6059_v33 = vsub.s32 4294967266, %v6054_v10  ;;  %v6070_v8 = vsel %vm5985_vm11, %v6069_v40, %v13505_v7 }
 0x49c   : > { %v2590_v54 = vsel %vm2584_vm8, %v2587_v4, %v2589_v58  ;;  %v2749_v29 = vand.u32 3, %v2748_v49  ;;  %v2609_v15 = vadd.s32 1, %v13555_v19  ;;  %v5886_v24 = vand.u32 8388607, %v5879_v22 }
 0x49d   : > { %vm5890_vm13 = vcmp.gt.s32.totalorder %v5889_v63, 0  ;;  %v6056_v30 = vshll.u32 %v13518_v31, %v6054_v10  ;;  %v6057_v25 = vshrl.u32 %v6039_v35, %v6055_v16  ;;  %v6060_v13 = vadd.s32 127, %v6059_v33 }
 0x49e   : > { %v5891_v32 = vsel %vm5890_vm13, %v5889_v63, 0  ;;  %v9913_v27 = vpop.eup %9912  ;;  %v6072_v7 = vsel %vm13560_vm1, 0, %v6070_v8  ;;  %v2606_v37 = vmul.u32 %v13524_v52, %v2590_v54  ;;  %vm2608_vm4 = vc.u32 %v13570_v43, %v13554_v42 }
 0x49f   : > { %v5893_v49 = vand.u32 31, %v5891_v32  ;;  %v9915_v38 = vpop.eup %9914  ;;  %v2755_v26 = vxor.u32 2147483648, %v9913_v27  ;;  %v6058_v39 = vor.u32 %v6057_v25, %v6056_v30  ;;  %v6061_v50 = vshll.u32 %v6060_v13, 23 }
 0x4a0   : > { %v2610_v11 = vsel %vm2608_vm4, %v2609_v15, %v13555_v19  ;;  %v2752_v31 = vxor.u32 2147483648, %v9915_v38  ;;  %vm2754_vm5 = vcmp.eq.s32.totalorder %v2749_v29, 2  ;;  %vm2750_vm3 = vcmp.lt.s32.totalorder %v2749_v29, 2 }
 0x4a1   : > { %v2611_v48 = vadd.s32 %v2610_v11, %v2606_v37  ;;  %v5894_v62 = vsub.s32 32, %v5893_v49  ;;  %vm2751_vm6 = vcmp.eq.s32.totalorder %v2749_v29, 0  ;;  %v2756_v40 = vsel %vm2754_vm5, %v2755_v26, %v9915_v38 }
 0x4a2   : > { %v6062_v4 = vor.u32 4788187, %v6061_v50  ;;  %v2753_v46 = vsel %vm2751_vm6, %v9913_v27, %v2752_v31  ;;  %v6076_v52 = vadd.s32 3, %v6072_v7  ;;  %v5887_v20 = vor.u32 8388608, %v5886_v24 }
 0x4a3   : > { %v2612_v44 = vadd.s32 536870912, %v2611_v48  ;;  %v2757_v58 = vsel %vm2750_vm3, %v2753_v46, %v2756_v40  ;;  %v6065_v5 = vcvt.s32.f32 %v6058_v39  ;;  %v5892_v12 = vshrl.u32 %v5891_v32, 5 }
 0x4a4   : > { %v6063_v18 = vand.u32 2147483647, %v6062_v4  ;;  %v2758_v19 = vsel %vm2747_vm15, nan, %v2757_v58  ;;  %v5897_v35 = vshrl.u32 %v10033_v51, %v5894_v62  ;;  %v5903_v59 = vshrl.u32 %v10035_v55, %v5894_v62 }
 0x4a5   : > { %v13592_v61 = vshrl.u32 %v2612_v44, 30  ;;  %v7354_v10 = vsel %vm18_vm0, %v13225_v6, %v2758_v19  ;;  %v5896_v63 = vshll.u32 %v10032_v47, %v5893_v49  ;;  %v5900_v16 = vshrl.u32 %v10034_v53, %v5894_v62 }
 0x4a6   : > { %v6066_v36 = vmul.f32 %v6065_v5, %v6063_v18  ;;  %7420 = vst.msk [vmem:[%s10548_s19 + $0x98] sm:$0xff] %vm7400_vm7, %v7354_v10  ;;  %v5899_v8 = vshll.u32 %v10033_v51, %v5893_v49  ;;  %v5902_v54 = vshll.u32 %v10034_v53, %v5893_v49  ;;  %v5906_v29 = vshrl.u32 %v10036_v57, %v5894_v62 }
 0x4a7   : > { %v2614_v33 = vshll.u32 %v13592_v61, 30  ;;  %v5905_v24 = vshll.u32 %v10035_v55, %v5893_v49  ;;  %v5908_v6 = vshll.u32 %v10036_v57, %v5893_v49  ;;  %v5909_v30 = vshrl.u32 %v10037_v2, %v5894_v62 }
 0x4a8   : > { %v6067_v15 = vxor.u32 2147483648, %v6066_v36  ;;  %v5898_v13 = vor.u32 %v5897_v35, %v5896_v63  ;;  %v5904_v32 = vor.u32 %v5903_v59, %v5902_v54  ;;  %v5901_v7 = vor.u32 %v5900_v16, %v5899_v8  ;;  %v13633_v8 = vpop.f32.mrb[23].mxu0 }
 0x4a9   : > { %v13610_v25 = vsub.s32 %v2611_v48, %v2614_v33  ;;  %v5907_v37 = vor.u32 %v5906_v29, %v5905_v24  ;;  %v5910_v38 = vor.u32 %v5909_v30, %v5908_v6  ;;  %v13617_v39 = vand.u32 3, %v6076_v52 }
 0x4aa   : > { %v6068_v27 = vsel %vm5985_vm11, %v6067_v15, %v6066_v36  ;;  %v5927_v50 = vshll.u32 %v5887_v20, 8  ;;  %v5895_v11 = vshrl.u32 %v10032_v47, %v5894_v62  ;;  %vm5914_vm10 = vcmp.lt.s32.totalorder %v5892_v12, 4 }
 0x4ab   : > { %v6071_v26 = vsel %vm13560_vm1, %v13302_v45, %v6068_v27  ;;  %v2617_v49 = vsub.s32 0, %v13610_v25  ;;  %v2866_v31 = vand.u32 2139095040, %v13503_v17  ;;  %vm5911_vm11 = vcmp.lt.s32.totalorder %v5892_v12, 1 }
 0x4ac   : > { %9916 = vcosq.f32 %v6071_v26  ;;  %v5916_v40 = vsel %vm5914_vm10, %v5904_v32, 2102212464  ;;  %v5919_v4 = vsel %vm5911_vm11, %v5898_v13, %v5901_v7  ;;  %v5920_v46 = vsel %vm5914_vm10, %v5907_v37, 920167782 }
 0x4ad   : > { %9918 = vsinq.f32 %v6071_v26  ;;  %v9150_v48 = vmin.u32 %v2617_v49, %v13610_v25  ;;  %v5923_v21 = vsel %vm5911_vm11, %v5901_v7, %v5904_v32  ;;  %v5924_v44 = vsel %vm5914_vm10, %v5910_v38, 1326507024 }
 0x4ae   : > { %v2637_v58 = vsub.s32 4, %v13592_v61  ;;  %vm5912_vm12 = vcmp.lt.s32.totalorder %v5892_v12, 2  ;;  %vm5913_vm14 = vcmp.lt.s32.totalorder %v5892_v12, 3  ;;  %v5915_v20 = vsel %vm5911_vm11, %v5895_v11, %v5898_v13 }
 0x4af   : > { %v2619_v52 = vclz %v9150_v48  ;;  %v5917_v18 = vsel %vm5913_vm14, %v5901_v7, %v5916_v40  ;;  %v5921_v62 = vsel %vm5913_vm14, %v5904_v32, %v5920_v46  ;;  %v5925_v5 = vsel %vm5913_vm14, %v5907_v37, %v5924_v44 }
 0x4b0   : > { %v5922_v35 = vsel %vm5912_vm12, %v5919_v4, %v5921_v62  ;;  %v5926_v59 = vsel %vm5912_vm12, %v5923_v21, %v5925_v5  ;;  %v2867_v10 = vshrl.u32 %v2866_v31, 23  ;;  %vm6075_vm8 = vweird.f32 %v13302_v45 }
 0x4b1   : > { %v9151_v19 = vadd.s32 4294967294, %v2619_v52  ;;  %v13626_v36 = vmul.u32.u64.low %v5927_v50, %v5926_v59  ;;  %v13627_v63 = vmul.u32.u64.high %v5927_v50, %v5926_v59, %v13626_v36  ;;  %vm2553_vm2 = vcmp.lt.s32.totalorder %v13407_v23, 0 }
 0x4b2   : > { %v13629_v16 = vmul.u32.u64.low %v5927_v50, %v5922_v35  ;;  %v13630_v33 = vmul.u32.u64.high %v5927_v50, %v5922_v35, %v13629_v16  ;;  %v5918_v54 = vsel %vm5912_vm12, %v5915_v20, %v5917_v18  ;;  %v9161_v29 = vadd.s32 4294967169, %v2867_v10 }
 0x4b3   : > { %vm9152_vm1 = vcmp.lt.s32.totalorder %v9151_v19, 0  ;;  %vm6079_vm9 = vcmp.eq.s32.totalorder %v13617_v39, 0  ;;  %vm13641_vm15 = vcmp.le.f32.partialorder %v2551_v41, 0.7853982  ;;  %v2863_v6 = vand.u32 2147483647, %v13503_v17 }
 0x4b4   : > { %v2622_v24 = vsel %vm9152_vm1, 0, %v9151_v19  ;;  %v2607_v30 = vadd.s32 %v13554_v42, %v13570_v43  ;;  %v2638_v12 = vsel %vm2553_vm2, %v2637_v58, %v13592_v61  ;;  %v5934_v7 = vmul.u32 %v5927_v50, %v5918_v54 }
 0x4b5   : > { %v2623_v13 = vsub.s32 32, %v2622_v24  ;;  %v2627_v32 = vsub.s32 4294967266, %v2622_v24  ;;  %vm5936_vm13 = vc.u32 %v13627_v63, %v13629_v16  ;;  %v5937_v41 = vadd.s32 1, %v13630_v33 }
 0x4b6   : > { %v9917_v27 = vpop.eup %9916  ;;  %v2873_v37 = vadd.s32 1, %v9161_v29  ;;  %v2624_v49 = vshll.u32 %v13610_v25, %v2622_v24  ;;  %vm6082_vm4 = vcmp.eq.s32.totalorder %v13617_v39, 2  ;;  %vm6078_vm3 = vcmp.lt.s32.totalorder %v13617_v39, 2 }
 0x4b7   : > { %v9919_v38 = vpop.eup %9918  ;;  %v6083_v26 = vxor.u32 2147483648, %v9917_v27  ;;  %v2625_v11 = vshrl.u32 %v2607_v30, %v2623_v13  ;;  %v2628_v42 = vadd.s32 127, %v2627_v32  ;;  %v5938_v31 = vsel %vm5936_vm13, %v5937_v41, %v13630_v33 }
 0x4b8   : > { %v6080_v43 = vxor.u32 2147483648, %v9919_v38  ;;  %vm2874_vm5 = vcmp.gt.s32.totalorder %v2873_v37, 0  ;;  %v5939_v40 = vadd.s32 %v5938_v31, %v5934_v7  ;;  %v2640_v25 = vsel %vm13641_vm15, 0, %v2638_v12 }
 0x4b9   : > { %v6084_v61 = vsel %vm6082_vm4, %v6083_v26, %v9919_v38  ;;  %v2626_v50 = vor.u32 %v2625_v11, %v2624_v49  ;;  %v2629_v48 = vshll.u32 %v2628_v42, 23  ;;  %v2875_v46 = vsel %vm2874_vm5, %v2873_v37, 0 }
 0x4ba   : > { %v6081_v4 = vsel %vm6079_vm9, %v9917_v27, %v6080_v43  ;;  %v5940_v52 = vadd.s32 536870912, %v5939_v40  ;;  %v2870_v58 = vand.u32 8388607, %v2863_v6  ;;  %v2877_v18 = vand.u32 31, %v2875_v46 }
 0x4bb   : > { %v6085_v21 = vsel %vm6078_vm3, %v6081_v4, %v6084_v61  ;;  %v2630_v44 = vor.u32 4788187, %v2629_v48  ;;  %v2633_v5 = vcvt.s32.f32 %v2626_v50  ;;  %v2644_v35 = vadd.s32 3, %v2640_v25 }
 0x4bc   : > { %v6086_v20 = vsel %vm6075_vm8, nan, %v6085_v21  ;;  %v13669_v19 = vshrl.u32 %v5940_v52, 30  ;;  %v2878_v59 = vsub.s32 32, %v2877_v18  ;;  %v13675_v10 = vadd.f32 %v13197_v28, %v10066_v1 }
 0x4bd   : > { %v7386_v62 = vsel %vm18_vm0, %v13302_v45, %v6086_v20  ;;  %v2631_v39 = vand.u32 2147483647, %v2630_v44  ;;  %v2871_v54 = vor.u32 8388608, %v2870_v58  ;;  %v2880_v29 = vshll.u32 %v10032_v47, %v2877_v18 }
 0x4be   : > { %7452 = vst.msk [vmem:[%s10548_s19 + $0x198] sm:$0xff] %vm7400_vm7, %v7386_v62  ;;  %v5942_v33 = vshll.u32 %v13669_v19, 30  ;;  %v2881_v45 = vshrl.u32 %v10033_v51, %v2878_v59  ;;  %v2883_v24 = vshll.u32 %v10033_v51, %v2877_v18  ;;  %v2884_v30 = vshrl.u32 %v10034_v53, %v2878_v59 }
 0x4bf   : > { %v2634_v36 = vmul.f32 %v2633_v5, %v2631_v39  ;;  %v2887_v13 = vshrl.u32 %v10035_v55, %v2878_v59  ;;  %v2886_v28 = vshll.u32 %v10034_v53, %v2877_v18  ;;  %v2890_v27 = vshrl.u32 %v10036_v57, %v2878_v59 }
 0x4c0   : > { %v13683_v12 = vsub.s32 %v5939_v40, %v5942_v33  ;;  %v13687_v7 = vand.u32 3, %v2644_v35  ;;  %v2876_v41 = vshrl.u32 %v2875_v46, 5  ;;  %v2882_v37 = vor.u32 %v2881_v45, %v2880_v29 }
 0x4c1   : > { %v2635_v32 = vxor.u32 2147483648, %v2634_v36  ;;  %v2889_v38 = vshll.u32 %v10035_v55, %v2877_v18  ;;  %v2885_v11 = vor.u32 %v2884_v30, %v2883_v24  ;;  %v2888_v42 = vor.u32 %v2887_v13, %v2886_v28 }
 0x4c2   : > { %v5945_v49 = vsub.s32 0, %v13683_v12  ;;  %vm5881_vm6 = vcmp.lt.s32.totalorder %v13442_v56, 0  ;;  %v2892_v61 = vshll.u32 %v10036_v57, %v2877_v18  ;;  %v2893_v50 = vshrl.u32 %v10037_v2, %v2878_v59 }
 0x4c3   : > { %v2636_v26 = vsel %vm2553_vm2, %v2635_v32, %v2634_v36  ;;  %v2891_v31 = vor.u32 %v2890_v27, %v2889_v38  ;;  %v13700_v40 = vshll.u32 %v2871_v54, 8  ;;  %v6194_v4 = vand.u32 2139095040, %v13675_v10  ;;  %v13720_v32 = vpop.f32.mrb[23].mxu1 }
 0x4c4   : > { %v2639_v43 = vsel %vm13641_vm15, %v13407_v23, %v2636_v26  ;;  %v9278_v48 = vmin.u32 %v5945_v49, %v13683_v12  ;;  %v5965_v25 = vsub.s32 4, %v13669_v19  ;;  %v2879_v15 = vshrl.u32 %v10032_v47, %v2878_v59 }
 0x4c5   : > { %9920 = vcosq.f32 %v2639_v43  ;;  %v2894_v46 = vor.u32 %v2893_v50, %v2892_v61  ;;  %vm2895_vm10 = vcmp.lt.s32.totalorder %v2876_v41, 1  ;;  %vm2896_vm11 = vcmp.lt.s32.totalorder %v2876_v41, 2 }
 0x4c6   : > { %9922 = vsinq.f32 %v2639_v43  ;;  %v5947_v21 = vclz %v9278_v48  ;;  %vm2898_vm12 = vcmp.lt.s32.totalorder %v2876_v41, 4  ;;  %vm2897_vm14 = vcmp.lt.s32.totalorder %v2876_v41, 3 }
 0x4c7   : > { %v2900_v44 = vsel %vm2898_vm12, %v2888_v42, 2102212464  ;;  %v2903_v52 = vsel %vm2895_vm10, %v2882_v37, %v2885_v11  ;;  %v2904_v58 = vsel %vm2898_vm12, %v2891_v31, 920167782  ;;  %vm13707_vm8 = vcmp.le.f32.partialorder %v5879_v22, 0.7853982 }
 0x4c8   : > { %v9279_v18 = vadd.s32 4294967294, %v5947_v21  ;;  %v2899_v62 = vsel %vm2895_vm10, %v2879_v15, %v2882_v37  ;;  %v2905_v39 = vsel %vm2897_vm14, %v2888_v42, %v2904_v58  ;;  %v2907_v5 = vsel %vm2895_vm10, %v2885_v11, %v2888_v42 }
 0x4c9   : > { %vm2647_vm2 = vcmp.eq.s32.totalorder %v13687_v7, 0  ;;  %v2901_v35 = vsel %vm2897_vm14, %v2885_v11, %v2900_v44  ;;  %v2906_v59 = vsel %vm2896_vm11, %v2903_v52, %v2905_v39  ;;  %v2908_v36 = vsel %vm2898_vm12, %v2894_v46, 1326507024 }
 0x4ca   : > { %v6195_v33 = vshrl.u32 %v6194_v4, 23  ;;  %vm9280_vm1 = vcmp.lt.s32.totalorder %v9279_v18, 0  ;;  %v2909_v54 = vsel %vm2897_vm14, %v2891_v31, %v2908_v36  ;;  %v6191_v30 = vand.u32 2147483647, %v13675_v10 }
 0x4cb   : > { %v13714_v29 = vmul.u32.u64.low %v13700_v40, %v2906_v59  ;;  %v13715_v45 = vmul.u32.u64.high %v13700_v40, %v2906_v59, %v13714_v29  ;;  %v5950_v22 = vsel %vm9280_vm1, 0, %v9279_v18  ;;  %v2910_v24 = vsel %vm2896_vm11, %v2907_v5, %v2909_v54 }
 0x4cc   : > { %v9289_v13 = vadd.s32 4294967169, %v6195_v33  ;;  %v5935_v28 = vadd.s32 %v13629_v16, %v13627_v63  ;;  %v5951_v27 = vsub.s32 32, %v5950_v22  ;;  %v5955_v37 = vsub.s32 4294967266, %v5950_v22 }
 0x4cd   : > { %v5966_v38 = vsel %vm5881_vm6, %v5965_v25, %v13669_v19  ;;  %v2902_v26 = vsel %vm2896_vm11, %v2899_v62, %v2901_v35  ;;  %v13729_v49 = vmul.u32.u64.low %v13700_v40, %v2910_v24  ;;  %v13730_v11 = vmul.u32.u64.high %v13700_v40, %v2910_v24, %v13729_v49 }
 0x4ce   : > { %v6201_v42 = vadd.s32 1, %v9289_v13  ;;  %v5952_v31 = vshll.u32 %v13683_v12, %v5950_v22  ;;  %v5953_v61 = vshrl.u32 %v5935_v28, %v5951_v27  ;;  %v5956_v50 = vadd.s32 127, %v5955_v37 }
 0x4cf   : > { %v9921_v43 = vpop.eup %9920  ;;  %v2921_v63 = vadd.s32 1, %v13715_v45  ;;  %vm2650_vm9 = vcmp.eq.s32.totalorder %v13687_v7, 2  ;;  %v6198_v19 = vand.u32 8388607, %v6191_v30  ;;  %v5968_v12 = vsel %vm13707_vm8, 0, %v5966_v38 }
 0x4d0   : > { %v9923_v16 = vpop.eup %9922  ;;  %v2651_v48 = vxor.u32 2147483648, %v9921_v43  ;;  %vm6202_vm15 = vcmp.gt.s32.totalorder %v6201_v42, 0  ;;  %v5954_v4 = vor.u32 %v5953_v61, %v5952_v31  ;;  %v5957_v25 = vshll.u32 %v5956_v50, 23 }
 0x4d1   : > { %v2648_v41 = vxor.u32 2147483648, %v9923_v16  ;;  %v6203_v15 = vsel %vm6202_vm15, %v6201_v42, 0  ;;  %v2918_v21 = vmul.u32 %v13700_v40, %v2902_v26  ;;  %vm2920_vm13 = vc.u32 %v13730_v11, %v13714_v29 }
 0x4d2   : > { %v2652_v46 = vsel %vm2650_vm9, %v2651_v48, %v9923_v16  ;;  %vm2646_vm4 = vcmp.lt.s32.totalorder %v13687_v7, 2  ;;  %v5958_v52 = vor.u32 4788187, %v5957_v25  ;;  %v2922_v58 = vsel %vm2920_vm13, %v2921_v63, %v13715_v45 }
 0x4d3   : > { %v2649_v44 = vsel %vm2647_vm2, %v9921_v43, %v2648_v41  ;;  %vm2643_vm5 = vweird.f32 %v13407_v23  ;;  %v2923_v62 = vadd.s32 %v2922_v58, %v2918_v21  ;;  %v6205_v39 = vand.u32 31, %v6203_v15 }
 0x4d4   : > { %v2653_v18 = vsel %vm2646_vm4, %v2649_v44, %v2652_v46  ;;  %v5959_v35 = vand.u32 2147483647, %v5958_v52  ;;  %v5961_v40 = vcvt.s32.f32 %v5954_v4  ;;  %v5972_v59 = vadd.s32 3, %v5968_v12 }
 0x4d5   : > { %v2654_v5 = vsel %vm2643_vm5, nan, %v2653_v18  ;;  %v2924_v33 = vadd.s32 536870912, %v2923_v62  ;;  %v6199_v7 = vor.u32 8388608, %v6198_v19  ;;  %v6206_v54 = vsub.s32 32, %v6205_v39 }
 0x4d6   : > { %v7353_v36 = vsel %vm18_vm0, %v13407_v23, %v2654_v5  ;;  %v5962_v22 = vmul.f32 %v5961_v40, %v5959_v35  ;;  %v6204_v45 = vshrl.u32 %v6203_v15, 5  ;;  %v6208_v24 = vshll.u32 %v10032_v47, %v6205_v39 }
 0x4d7   : > { %7419 = vst.msk [vmem:[%s10548_s19 + $0x90] sm:$0xff] %vm7400_vm7, %v7353_v36  ;;  %v6211_v13 = vshll.u32 %v10033_v51, %v6205_v39  ;;  %vm2865_vm3 = vcmp.lt.s32.totalorder %v13503_v17, 0  ;;  %v2925_v28 = vshrl.u32 %v2924_v33, 30  ;;  %v6209_v27 = vshrl.u32 %v10033_v51, %v6206_v54 }
 0x4d8   : > { %v6212_v37 = vshrl.u32 %v10034_v53, %v6206_v54  ;;  %v6214_v23 = vshll.u32 %v10034_v53, %v6205_v39  ;;  %v5963_v38 = vxor.u32 2147483648, %v5962_v22  ;;  %v6215_v26 = vshrl.u32 %v10035_v55, %v6206_v54 }
 0x4d9   : > { %v6217_v49 = vshll.u32 %v10035_v55, %v6205_v39  ;;  %v6218_v42 = vshrl.u32 %v10036_v57, %v6206_v54  ;;  %v2926_v43 = vshll.u32 %v2925_v28, 30  ;;  %v6210_v31 = vor.u32 %v6209_v27, %v6208_v24 }
 0x4da   : > { %v6213_v61 = vor.u32 %v6212_v37, %v6211_v13  ;;  %v6220_v50 = vshll.u32 %v10036_v57, %v6205_v39  ;;  %v5964_v63 = vsel %vm5881_vm6, %v5963_v38, %v5962_v22  ;;  %v6216_v16 = vor.u32 %v6215_v26, %v6214_v23 }
 0x4db   : > { %v6219_v48 = vor.u32 %v6218_v42, %v6217_v49  ;;  %v6221_v19 = vshrl.u32 %v10037_v2, %v6206_v54  ;;  %v5967_v41 = vsel %vm13707_vm8, %v13442_v56, %v5964_v63  ;;  %v13768_v4 = vand.u32 3, %v5972_v59 }
 0x4dc   : > { %v13770_v25 = vsub.s32 %v2923_v62, %v2926_v43  ;;  %v13774_v15 = vadd.f32 %v10066_v1, %v13280_v14  ;;  %9924 = vcosq.f32 %v5967_v41  ;;  %v2949_v46 = vsub.s32 4, %v2925_v28 }
 0x4dd   : > { %v6222_v12 = vor.u32 %v6221_v19, %v6220_v50  ;;  %v6239_v21 = vshll.u32 %v6199_v7, 8  ;;  %9926 = vsinq.f32 %v5967_v41  ;;  %vm6223_vm6 = vcmp.lt.s32.totalorder %v6204_v45, 1 }
 0x4de   : > { %v2929_v44 = vsub.s32 0, %v13770_v25  ;;  %vm6226_vm10 = vcmp.lt.s32.totalorder %v6204_v45, 4  ;;  %vm6225_vm11 = vcmp.lt.s32.totalorder %v6204_v45, 3  ;;  %v6231_v52 = vsel %vm6223_vm6, %v6210_v31, %v6213_v61 }
 0x4df   : > { %v6228_v20 = vsel %vm6226_vm10, %v6216_v16, 2102212464  ;;  %v6232_v58 = vsel %vm6226_vm10, %v6219_v48, 920167782  ;;  %v6207_v62 = vshrl.u32 %v10032_v47, %v6206_v54  ;;  %vm6224_vm12 = vcmp.lt.s32.totalorder %v6204_v45, 2 }
 0x4e0   : > { %v9162_v18 = vmin.u32 %v2929_v44, %v13770_v25  ;;  %v6233_v14 = vsel %vm6225_vm11, %v6216_v16, %v6232_v58  ;;  %v2950_v39 = vsel %vm2865_vm3, %v2949_v46, %v2925_v28  ;;  %v6235_v35 = vsel %vm6223_vm6, %v6213_v61, %v6216_v16 }
 0x4e1   : > { %v6234_v5 = vsel %vm6224_vm12, %v6231_v52, %v6233_v14  ;;  %v6236_v40 = vsel %vm6226_vm10, %v6222_v12, 1326507024  ;;  %vm13787_vm14 = vcmp.le.f32.partialorder %v2863_v6, 0.7853982  ;;  %v6227_v33 = vsel %vm6223_vm6, %v6207_v62, %v6210_v31 }
 0x4e2   : > { %v2931_v36 = vclz %v9162_v18  ;;  %v6229_v7 = vsel %vm6225_vm11, %v6213_v61, %v6228_v20  ;;  %vm5974_vm8 = vcmp.lt.s32.totalorder %v13768_v4, 2  ;;  %v6237_v54 = vsel %vm6225_vm11, %v6219_v48, %v6236_v40 }
 0x4e3   : > { %v13795_v22 = vmul.u32.u64.low %v6239_v21, %v6234_v5  ;;  %v13796_v24 = vmul.u32.u64.high %v6239_v21, %v6234_v5, %v13795_v22  ;;  %v2762_v13 = vand.u32 2139095040, %v13774_v15  ;;  %vm5971_vm2 = vweird.f32 %v13442_v56 }
 0x4e4   : > { %vm5975_vm1 = vcmp.eq.s32.totalorder %v13768_v4, 0  ;;  %v9163_v6 = vadd.s32 4294967294, %v2931_v36  ;;  %v2952_v28 = vsel %vm13787_vm14, 0, %v2950_v39  ;;  %v6238_v27 = vsel %vm6224_vm12, %v6235_v35, %v6237_v54 }
 0x4e5   : > { %v6230_v37 = vsel %vm6224_vm12, %v6227_v33, %v6229_v7  ;;  %v13806_v23 = vmul.u32.u64.low %v6239_v21, %v6238_v27  ;;  %v13807_v38 = vmul.u32.u64.high %v6239_v21, %v6238_v27, %v13806_v23  ;;  %v2763_v26 = vshrl.u32 %v2762_v13, 23 }
 0x4e6   : > { %vm5978_vm9 = vcmp.eq.s32.totalorder %v13768_v4, 2  ;;  %v2919_v49 = vadd.s32 %v13714_v29, %v13730_v11  ;;  %vm9164_vm15 = vcmp.lt.s32.totalorder %v9163_v6, 0  ;;  %v2759_v42 = vand.u32 2147483647, %v13774_v15  ;;  %v9925_v43 = vpop.eup %9924 }
 0x4e7   : > { %v2934_v31 = vsel %vm9164_vm15, 0, %v9163_v6  ;;  %v2956_v61 = vadd.s32 3, %v2952_v28  ;;  %v6249_v50 = vadd.s32 1, %v13796_v24  ;;  %v9157_v63 = vadd.s32 4294967169, %v2763_v26  ;;  %v9927_v45 = vpop.eup %9926 }
 0x4e8   : > { %v5979_v16 = vxor.u32 2147483648, %v9925_v43  ;;  %v2935_v48 = vsub.s32 32, %v2934_v31  ;;  %v2939_v19 = vsub.s32 4294967266, %v2934_v31  ;;  %v6246_v41 = vmul.u32 %v6239_v21, %v6230_v37 }
 0x4e9   : > { %v5976_v46 = vxor.u32 2147483648, %v9927_v45  ;;  %v2936_v12 = vshll.u32 %v13770_v25, %v2934_v31  ;;  %vm6248_vm13 = vc.u32 %v13807_v38, %v13795_v22  ;;  %v2769_v29 = vadd.s32 1, %v9157_v63  ;;  %v13824_v25 = vpop.f32.mrb[24].mxu0 }
 0x4ea   : > { %v5980_v11 = vsel %vm5978_vm9, %v5979_v16, %v9927_v45  ;;  %v2937_v44 = vshrl.u32 %v2919_v49, %v2935_v48  ;;  %v2940_v20 = vadd.s32 127, %v2939_v19  ;;  %v6250_v52 = vsel %vm6248_vm13, %v6249_v50, %v13796_v24 }
 0x4eb   : > { %v5977_v58 = vsel %vm5975_vm1, %v9925_v43, %v5976_v46  ;;  %v6251_v18 = vadd.s32 %v6250_v52, %v6246_v41  ;;  %v2766_v21 = vand.u32 8388607, %v2759_v42  ;;  %vm2770_vm4 = vcmp.gt.s32.totalorder %v2769_v29, 0 }
 0x4ec   : > { %v5981_v62 = vsel %vm5974_vm8, %v5977_v58, %v5980_v11  ;;  %v2938_v14 = vor.u32 %v2937_v44, %v2936_v12  ;;  %v2941_v39 = vshll.u32 %v2940_v20, 23  ;;  %v2771_v5 = vsel %vm2770_vm4, %v2769_v29, 0 }
 0x4ed   : > { %v5982_v35 = vsel %vm5971_vm2, nan, %v5981_v62  ;;  %v6252_v40 = vadd.s32 536870912, %v6251_v18  ;;  %v2773_v36 = vand.u32 31, %v2771_v5  ;;  %v13832_v33 = vadd.f32 %v10066_v1, %v13372_v60 }
 0x4ee   : > { %v7385_v7 = vsel %vm18_vm0, %v13442_v56, %v5982_v35  ;;  %v2942_v54 = vor.u32 4788187, %v2941_v39  ;;  %v2945_v6 = vcvt.s32.f32 %v2938_v14  ;;  %v13841_v28 = vand.u32 3, %v2956_v61 }
 0x4ef   : > { %7451 = vst.msk [vmem:[%s10548_s19 + $0x190] sm:$0xff] %vm7400_vm7, %v7385_v7  ;;  %v13839_v4 = vshrl.u32 %v6252_v40, 30  ;;  %v2774_v24 = vsub.s32 32, %v2773_v36  ;;  %v2767_v27 = vor.u32 8388608, %v2766_v21  ;;  %v2776_v60 = vshll.u32 %v10032_v47, %v2773_v36 }
 0x4f0   : > { %v2943_v13 = vand.u32 2147483647, %v2942_v54  ;;  %v6090_v26 = vand.u32 2139095040, %v13832_v33  ;;  %v2779_v61 = vshll.u32 %v10033_v51, %v2773_v36  ;;  %v2782_v63 = vshll.u32 %v10034_v53, %v2773_v36 }
 0x4f1   : > { %v6254_v37 = vshll.u32 %v13839_v4, 30  ;;  %v2777_v23 = vshrl.u32 %v10033_v51, %v2774_v24  ;;  %v2780_v49 = vshrl.u32 %v10034_v53, %v2774_v24  ;;  %v2783_v43 = vshrl.u32 %v10035_v55, %v2774_v24 }
 0x4f2   : > { %v2946_v56 = vmul.f32 %v2945_v6, %v2943_v13  ;;  %v2786_v31 = vshrl.u32 %v10036_v57, %v2774_v24  ;;  %v2789_v45 = vshrl.u32 %v10037_v2, %v2774_v24  ;;  %v2772_v48 = vshrl.u32 %v2771_v5, 5 }
 0x4f3   : > { %v13850_v50 = vsub.s32 %v6251_v18, %v6254_v37  ;;  %v2785_v19 = vshll.u32 %v10035_v55, %v2773_v36  ;;  %v2788_v41 = vshll.u32 %v10036_v57, %v2773_v36  ;;  %v2778_v12 = vor.u32 %v2777_v23, %v2776_v60 }
 0x4f4   : > { %v2947_v16 = vxor.u32 2147483648, %v2946_v56  ;;  %v2781_v29 = vor.u32 %v2780_v49, %v2779_v61  ;;  %v2784_v11 = vor.u32 %v2783_v43, %v2782_v63  ;;  %v6247_v20 = vadd.s32 %v13795_v22, %v13807_v38 }
 0x4f5   : > { %v6257_v46 = vsub.s32 0, %v13850_v50  ;;  %v2787_v52 = vor.u32 %v2786_v31, %v2785_v19  ;;  %v2807_v58 = vshll.u32 %v2767_v27, 8  ;;  %v2790_v62 = vor.u32 %v2789_v45, %v2788_v41 }
 0x4f6   : > { %v2948_v44 = vsel %vm2865_vm3, %v2947_v16, %v2946_v56  ;;  %v6091_v14 = vshrl.u32 %v6090_v26, 23  ;;  %v2775_v39 = vshrl.u32 %v10032_v47, %v2774_v24  ;;  %vm2791_vm5 = vcmp.lt.s32.totalorder %v2772_v48, 1  ;;  %v13868_v24 = vpop.f32.mrb[24].mxu1 }
 0x4f7   : > { %v2951_v18 = vsel %vm13787_vm14, %v13503_v17, %v2948_v44  ;;  %v9290_v21 = vmin.u32 %v6257_v46, %v13850_v50  ;;  %vm2794_vm6 = vcmp.lt.s32.totalorder %v2772_v48, 4  ;;  %v2799_v40 = vsel %vm2791_vm5, %v2778_v12, %v2781_v29 }
 0x4f8   : > { %9928 = vcosq.f32 %v2951_v18  ;;  %v2796_v35 = vsel %vm2794_vm6, %v2784_v11, 2102212464  ;;  %vm2792_vm3 = vcmp.lt.s32.totalorder %v2772_v48, 2  ;;  %vm2793_vm10 = vcmp.lt.s32.totalorder %v2772_v48, 3 }
 0x4f9   : > { %9930 = vsinq.f32 %v2951_v18  ;;  %v6259_v5 = vclz %v9290_v21  ;;  %v2800_v22 = vsel %vm2794_vm6, %v2787_v52, 920167782  ;;  %v2803_v38 = vsel %vm2791_vm5, %v2781_v29, %v2784_v11 }
 0x4fa   : > { %v2795_v59 = vsel %vm2791_vm5, %v2775_v39, %v2778_v12  ;;  %v2801_v7 = vsel %vm2793_vm10, %v2784_v11, %v2800_v22  ;;  %v2804_v54 = vsel %vm2794_vm6, %v2790_v62, 1326507024  ;;  %v2797_v13 = vsel %vm2793_vm10, %v2781_v29, %v2796_v35 }
 0x4fb   : > { %v9291_v36 = vadd.s32 4294967294, %v6259_v5  ;;  %v2802_v6 = vsel %vm2792_vm3, %v2799_v40, %v2801_v7  ;;  %v2805_v27 = vsel %vm2793_vm10, %v2787_v52, %v2804_v54  ;;  %v9285_v37 = vadd.s32 4294967169, %v6091_v14 }
 0x4fc   : > { %v2806_v60 = vsel %vm2792_vm3, %v2803_v38, %v2805_v27  ;;  %v13871_v23 = vmul.u32.u64.low %v2807_v58, %v2802_v6  ;;  %v13872_v26 = vmul.u32.u64.high %v2807_v58, %v2802_v6, %v13871_v23  ;;  %v6277_v49 = vsub.s32 4, %v13839_v4 }
 0x4fd   : > { %vm9292_vm11 = vcmp.lt.s32.totalorder %v9291_v36, 0  ;;  %v13876_v43 = vmul.u32.u64.low %v2807_v58, %v2806_v60  ;;  %v13877_v31 = vmul.u32.u64.high %v2807_v58, %v2806_v60, %v13876_v43  ;;  %v2798_v45 = vsel %vm2792_vm3, %v2795_v59, %v2797_v13 }
 0x4fe   : > { %v6262_v56 = vsel %vm9292_vm11, 0, %v9291_v36  ;;  %v6097_v16 = vadd.s32 1, %v9285_v37  ;;  %vm2959_vm12 = vcmp.eq.s32.totalorder %v13841_v28, 0  ;;  %vm13883_vm14 = vcmp.le.f32.partialorder %v6191_v30, 0.7853982 }
 0x4ff   : > { %v6263_v61 = vsub.s32 32, %v6262_v56  ;;  %v6267_v63 = vsub.s32 4294967266, %v6262_v56  ;;  %vm6193_vm8 = vcmp.lt.s32.totalorder %v13675_v10, 0  ;;  %v6264_v41 = vshll.u32 %v13850_v50, %v6262_v56 }
 0x500   : > { %v2817_v29 = vadd.s32 1, %v13872_v26  ;;  %vm6098_vm2 = vcmp.gt.s32.totalorder %v6097_v16, 0  ;;  %v6278_v11 = vsel %vm6193_vm8, %v6277_v49, %v13839_v4  ;;  %v2814_v44 = vmul.u32 %v2807_v58, %v2798_v45 }
 0x501   : > { %v6265_v46 = vshrl.u32 %v6247_v20, %v6263_v61  ;;  %v6268_v12 = vadd.s32 127, %v6267_v63  ;;  %vm2816_vm1 = vc.u32 %v13877_v31, %v13871_v23  ;;  %v6099_v30 = vsel %vm6098_vm2, %v6097_v16, 0 }
 0x502   : > { %v9929_v48 = vpop.eup %9928  ;;  %v2818_v50 = vsel %vm2816_vm1, %v2817_v29, %v13872_v26  ;;  %vm2962_vm9 = vcmp.eq.s32.totalorder %v13841_v28, 2  ;;  %v6101_v39 = vand.u32 31, %v6099_v30  ;;  %v6280_v4 = vsel %vm13883_vm14, 0, %v6278_v11 }
 0x503   : > { %v9931_v52 = vpop.eup %9930  ;;  %v2963_v18 = vxor.u32 2147483648, %v9929_v48  ;;  %v6266_v21 = vor.u32 %v6265_v46, %v6264_v41  ;;  %v6269_v62 = vshll.u32 %v6268_v12, 23  ;;  %v2819_v14 = vadd.s32 %v2818_v50, %v2814_v44 }
 0x504   : > { %v2960_v20 = vxor.u32 2147483648, %v9931_v52  ;;  %v6087_v58 = vand.u32 2147483647, %v13832_v33  ;;  %vm2958_vm15 = vcmp.lt.s32.totalorder %v13841_v28, 2  ;;  %v6102_v38 = vsub.s32 32, %v6101_v39 }
 0x505   : > { %v2964_v5 = vsel %vm2962_vm9, %v2963_v18, %v9931_v52  ;;  %v6270_v35 = vor.u32 4788187, %v6269_v62  ;;  %v2820_v22 = vadd.s32 536870912, %v2819_v14  ;;  %vm2955_vm13 = vweird.f32 %v13503_v17 }
 0x506   : > { %v2961_v40 = vsel %vm2959_vm12, %v9929_v48, %v2960_v20  ;;  %v6273_v7 = vcvt.s32.f32 %v6266_v21  ;;  %v6284_v13 = vadd.s32 3, %v6280_v4  ;;  %v6105_v27 = vshrl.u32 %v10033_v51, %v6102_v38 }
 0x507   : > { %v2965_v36 = vsel %vm2958_vm15, %v2961_v40, %v2964_v5  ;;  %v6271_v59 = vand.u32 2147483647, %v6270_v35  ;;  %v2821_v6 = vshrl.u32 %v2820_v22, 30  ;;  %v6094_v28 = vand.u32 8388607, %v6087_v58 }
 0x508   : > { %v2966_v54 = vsel %vm2955_vm13, nan, %v2965_v36  ;;  %v6108_v26 = vshrl.u32 %v10034_v53, %v6102_v38  ;;  %v6100_v49 = vshrl.u32 %v6099_v30, 5  ;;  %v6104_v43 = vshll.u32 %v10032_v47, %v6101_v39 }
 0x509   : > { %v7356_v37 = vsel %vm18_vm0, %v13503_v17, %v2966_v54  ;;  %v6274_v60 = vmul.f32 %v6273_v7, %v6271_v59  ;;  %v2822_v56 = vshll.u32 %v2821_v6, 30  ;;  %v6111_v61 = vshrl.u32 %v10035_v55, %v6102_v38 }
 0x50a   : > { %7422 = vst.msk [vmem:[%s10548_s19 + $0xa8] sm:$0xff] %vm7400_vm7, %v7356_v37  ;;  %v6107_v45 = vshll.u32 %v10033_v51, %v6101_v39  ;;  %v6113_v16 = vshll.u32 %v10035_v55, %v6101_v39  ;;  %v6114_v17 = vshrl.u32 %v10036_v57, %v6102_v38  ;;  %v6106_v46 = vor.u32 %v6105_v27, %v6104_v43 }
 0x50b   : > { %v6275_v63 = vxor.u32 2147483648, %v6274_v60  ;;  %v13918_v41 = vsub.s32 %v2819_v14, %v2822_v56  ;;  %v6110_v12 = vshll.u32 %v10034_v53, %v6101_v39  ;;  %v6117_v29 = vshrl.u32 %v10037_v2, %v6102_v38 }
 0x50c   : > { %vm2761_vm4 = vcmp.lt.s32.totalorder %v13774_v15, 0  ;;  %v6109_v11 = vor.u32 %v6108_v26, %v6107_v45  ;;  %v6115_v44 = vor.u32 %v6114_v17, %v6113_v16  ;;  %v6116_v30 = vshll.u32 %v10036_v57, %v6101_v39 }
 0x50d   : > { %v6276_v48 = vsel %vm6193_vm8, %v6275_v63, %v6274_v60  ;;  %v13929_v18 = vand.u32 3, %v6284_v13  ;;  %v2825_v21 = vsub.s32 0, %v13918_v41  ;;  %v6112_v62 = vor.u32 %v6111_v61, %v6110_v12 }
 0x50e   : > { %v6279_v52 = vsel %vm13883_vm14, %v13675_v10, %v6276_v48  ;;  %v6095_v50 = vor.u32 8388608, %v6094_v28  ;;  %v6118_v20 = vor.u32 %v6117_v29, %v6116_v30  ;;  %v13934_v14 = vadd.f32 %v13470_v34, %v10066_v1 }
 0x50f   : > { %9932 = vcosq.f32 %v6279_v52  ;;  %vm13938_vm5 = vcmp.le.f32.partialorder %v2759_v42, 0.7853982  ;;  %v9158_v19 = vmin.u32 %v2825_v21, %v13918_v41  ;;  %vm6119_vm6 = vcmp.lt.s32.totalorder %v6100_v49, 1 }
 0x510   : > { %9934 = vsinq.f32 %v6279_v52  ;;  %vm6122_vm3 = vcmp.lt.s32.totalorder %v6100_v49, 4  ;;  %v2845_v5 = vsub.s32 4, %v2821_v6  ;;  %v6103_v35 = vshrl.u32 %v10032_v47, %v6102_v38 }
 0x511   : > { %v6127_v4 = vsel %vm6119_vm6, %v6106_v46, %v6109_v11  ;;  %v6128_v40 = vsel %vm6122_vm3, %v6115_v44, 920167782  ;;  %v2827_v22 = vclz %v9158_v19  ;;  %vm6121_vm10 = vcmp.lt.s32.totalorder %v6100_v49, 3 }
 0x512   : > { %v6124_v34 = vsel %vm6122_vm3, %v6112_v62, 2102212464  ;;  %v6131_v36 = vsel %vm6119_vm6, %v6109_v11, %v6112_v62  ;;  %vm6120_vm11 = vcmp.lt.s32.totalorder %v6100_v49, 2  ;;  %v6129_v59 = vsel %vm6121_vm10, %v6112_v62, %v6128_v40 }
 0x513   : > { %v6132_v7 = vsel %vm6122_vm3, %v6118_v20, 1326507024  ;;  %v6135_v42 = vshll.u32 %v6095_v50, 8  ;;  %v9159_v54 = vadd.s32 4294967294, %v2827_v22  ;;  %v6123_v13 = vsel %vm6119_vm6, %v6103_v35, %v6106_v46  ;;  %v13969_v20 = vpop.f32.mrb[25].mxu0 }
 0x514   : > { %v6130_v27 = vsel %vm6120_vm11, %v6127_v4, %v6129_v59  ;;  %v6133_v37 = vsel %vm6121_vm10, %v6115_v44, %v6132_v7  ;;  %vm6286_vm12 = vcmp.lt.s32.totalorder %v13929_v18, 2  ;;  %v6125_v60 = vsel %vm6121_vm10, %v6109_v11, %v6124_v34 }
 0x515   : > { %v6134_v38 = vsel %vm6120_vm11, %v6131_v36, %v6133_v37  ;;  %v13947_v28 = vmul.u32.u64.low %v6135_v42, %v6130_v27  ;;  %v13948_v26 = vmul.u32.u64.high %v6135_v42, %v6130_v27, %v13947_v28  ;;  %vm9160_vm14 = vcmp.lt.s32.totalorder %v9159_v54, 0 }
 0x516   : > { %v2846_v56 = vsel %vm2761_vm4, %v2845_v5, %v2821_v6  ;;  %v13953_v43 = vmul.u32.u64.low %v6135_v42, %v6134_v38  ;;  %v13954_v61 = vmul.u32.u64.high %v6135_v42, %v6134_v38, %v13953_v43  ;;  %vm6287_vm8 = vcmp.eq.s32.totalorder %v13929_v18, 0 }
 0x517   : > { %vm6290_vm2 = vcmp.eq.s32.totalorder %v13929_v18, 2  ;;  %v2830_v63 = vsel %vm9160_vm14, 0, %v9159_v54  ;;  %v3074_v45 = vand.u32 2139095040, %v13934_v14  ;;  %v2815_v16 = vadd.s32 %v13871_v23, %v13877_v31 }
 0x518   : > { %v2831_v17 = vsub.s32 32, %v2830_v63  ;;  %v2835_v46 = vsub.s32 4294967266, %v2830_v63  ;;  %v6126_v12 = vsel %vm6120_vm11, %v6123_v13, %v6125_v60  ;;  %v2848_v6 = vsel %vm13938_vm5, 0, %v2846_v56 }
 0x519   : > { %v9933_v29 = vpop.eup %9932  ;;  %v6145_v48 = vadd.s32 1, %v13948_v26  ;;  %v3071_v11 = vand.u32 2147483647, %v13934_v14  ;;  %v3075_v44 = vshrl.u32 %v3074_v45, 23  ;;  %v2832_v21 = vshll.u32 %v13918_v41, %v2830_v63 }
 0x51a   : > { %v9935_v30 = vpop.eup %9934  ;;  %v6291_v52 = vxor.u32 2147483648, %v9933_v29  ;;  %v2833_v62 = vshrl.u32 %v2815_v16, %v2831_v17  ;;  %v2836_v50 = vadd.s32 127, %v2835_v46  ;;  %v6142_v31 = vmul.u32 %v6135_v42, %v6126_v12 }
 0x51b   : > { %v6288_v23 = vxor.u32 2147483648, %v9935_v30  ;;  %vm6144_vm1 = vc.u32 %v13954_v61, %v13947_v28  ;;  %v9169_v49 = vadd.s32 4294967169, %v3075_v44  ;;  %v13978_v34 = vadd.f32 %v13581_v9, %v10066_v1 }
 0x51c   : > { %v6292_v19 = vsel %vm6290_vm2, %v6291_v52, %v9935_v30  ;;  %v2834_v5 = vor.u32 %v2833_v62, %v2832_v21  ;;  %v2837_v35 = vshll.u32 %v2836_v50, 23  ;;  %v6146_v4 = vsel %vm6144_vm1, %v6145_v48, %v13948_v26 }
 0x51d   : > { %v6289_v41 = vsel %vm6287_vm8, %v9933_v29, %v6288_v23  ;;  %v6147_v40 = vadd.s32 %v6146_v4, %v6142_v31  ;;  %v3081_v22 = vadd.s32 1, %v9169_v49  ;;  %vm6283_vm9 = vweird.f32 %v13675_v10 }
 0x51e   : > { %v6293_v36 = vsel %vm6286_vm12, %v6289_v41, %v6292_v19  ;;  %v2838_v59 = vor.u32 4788187, %v2837_v35  ;;  %v2852_v7 = vadd.s32 3, %v2848_v6  ;;  %v3078_v13 = vand.u32 8388607, %v3071_v11 }
 0x51f   : > { %v6294_v42 = vsel %vm6283_vm9, nan, %v6293_v36  ;;  %v6148_v54 = vadd.s32 536870912, %v6147_v40  ;;  %vm3082_vm15 = vcmp.gt.s32.totalorder %v3081_v22, 0  ;;  %v2841_v9 = vcvt.s32.f32 %v2834_v5 }
 0x520   : > { %v7388_v27 = vsel %vm18_vm0, %v13675_v10, %v6294_v42  ;;  %v2839_v37 = vand.u32 2147483647, %v2838_v59  ;;  %v3083_v60 = vsel %vm3082_vm15, %v3081_v22, 0  ;;  %v6402_v26 = vand.u32 2139095040, %v13978_v34 }
 0x521   : > { %7454 = vst.msk [vmem:[%s10548_s19 + $0x1a8] sm:$0xff] %vm7400_vm7, %v7388_v27  ;;  %v13990_v38 = vshrl.u32 %v6148_v54, 30  ;;  %v3085_v18 = vand.u32 31, %v3083_v60  ;;  %v13994_v16 = vand.u32 3, %v2852_v7  ;;  %v3079_v17 = vor.u32 8388608, %v3078_v13 }
 0x522   : > { %v2842_v56 = vmul.f32 %v2841_v9, %v2839_v37  ;;  %v6399_v10 = vand.u32 2147483647, %v13978_v34  ;;  %v3084_v12 = vshrl.u32 %v3083_v60, 5  ;;  %v6403_v6 = vshrl.u32 %v6402_v26, 23 }
 0x523   : > { %v6150_v43 = vshll.u32 %v13990_v38, 30  ;;  %v3086_v63 = vsub.s32 32, %v3085_v18  ;;  %v3088_v44 = vshll.u32 %v10032_v47, %v3085_v18  ;;  %v3091_v50 = vshll.u32 %v10033_v51, %v3085_v18 }
 0x524   : > { %v2843_v45 = vxor.u32 2147483648, %v2842_v56  ;;  %v3094_v23 = vshll.u32 %v10034_v53, %v3085_v18  ;;  %v3097_v49 = vshll.u32 %v10035_v55, %v3085_v18  ;;  %v3100_v39 = vshll.u32 %v10036_v57, %v3085_v18 }
 0x525   : > { %v13997_v46 = vsub.s32 %v6147_v40, %v6150_v43  ;;  %v3089_v29 = vshrl.u32 %v10033_v51, %v3086_v63  ;;  %v3092_v30 = vshrl.u32 %v10034_v53, %v3086_v63  ;;  %v3095_v52 = vshrl.u32 %v10035_v55, %v3086_v63 }
 0x526   : > { %v2844_v48 = vsel %vm2761_vm4, %v2843_v45, %v2842_v56  ;;  %v3098_v19 = vshrl.u32 %v10036_v57, %v3086_v63  ;;  %v3101_v40 = vshrl.u32 %v10037_v2, %v3086_v63  ;;  %v14016_v22 = vshll.u32 %v3079_v17, 8  ;;  %v14023_v56 = vpop.f32.mrb[25].mxu1 }
 0x527   : > { %v2847_v21 = vsel %vm13938_vm5, %v13774_v15, %v2844_v48  ;;  %v6153_v62 = vsub.s32 0, %v13997_v46  ;;  %v3090_v31 = vor.u32 %v3089_v29, %v3088_v44  ;;  %v3093_v35 = vor.u32 %v3092_v30, %v3091_v50 }
 0x528   : > { %9936 = vcosq.f32 %v2847_v21  ;;  %v3096_v4 = vor.u32 %v3095_v52, %v3094_v23  ;;  %v3099_v41 = vor.u32 %v3098_v19, %v3097_v49  ;;  %v3087_v59 = vshrl.u32 %v10032_v47, %v3086_v63 }
 0x529   : > { %9938 = vsinq.f32 %v2847_v21  ;;  %v9286_v5 = vmin.u32 %v6153_v62, %v13997_v46  ;;  %vm3103_vm13 = vcmp.lt.s32.totalorder %v3084_v12, 1  ;;  %v9297_v7 = vadd.s32 4294967169, %v6403_v6 }
 0x52a   : > { %vm2858_vm4 = vcmp.eq.s32.totalorder %v13994_v16, 2  ;;  %v3102_v42 = vor.u32 %v3101_v40, %v3100_v39  ;;  %vm3104_vm5 = vcmp.lt.s32.totalorder %v3084_v12, 2  ;;  %vm3105_vm6 = vcmp.lt.s32.totalorder %v3084_v12, 3 }
 0x52b   : > { %v6155_v36 = vclz %v9286_v5  ;;  %vm3106_vm3 = vcmp.lt.s32.totalorder %v3084_v12, 4  ;;  %vm2855_vm10 = vcmp.eq.s32.totalorder %v13994_v16, 0  ;;  %v3111_v27 = vsel %vm3103_vm13, %v3090_v31, %v3093_v35 }
 0x52c   : > { %v3108_v13 = vsel %vm3106_vm3, %v3096_v4, 2102212464  ;;  %v3112_v37 = vsel %vm3106_vm3, %v3099_v41, 920167782  ;;  %vm6089_vm11 = vcmp.lt.s32.totalorder %v13832_v33, 0  ;;  %v3107_v9 = vsel %vm3103_vm13, %v3087_v59, %v3090_v31 }
 0x52d   : > { %v9287_v54 = vadd.s32 4294967294, %v6155_v36  ;;  %v3113_v60 = vsel %vm3105_vm6, %v3096_v4, %v3112_v37  ;;  %v3115_v18 = vsel %vm3103_vm13, %v3093_v35, %v3096_v4  ;;  %v3116_v26 = vsel %vm3106_vm3, %v3102_v42, 1326507024 }
 0x52e   : > { %vm2851_vm12 = vweird.f32 %v13774_v15  ;;  %v3109_v43 = vsel %vm3105_vm6, %v3093_v35, %v3108_v13  ;;  %v3114_v63 = vsel %vm3104_vm5, %v3111_v27, %v3113_v60  ;;  %v3117_v45 = vsel %vm3105_vm6, %v3099_v41, %v3116_v26 }
 0x52f   : > { %vm9288_vm14 = vcmp.lt.s32.totalorder %v9287_v54, 0  ;;  %v3118_v29 = vsel %vm3104_vm5, %v3115_v18, %v3117_v45  ;;  %v14031_v6 = vmul.u32.u64.low %v14016_v22, %v3114_v63  ;;  %v14032_v48 = vmul.u32.u64.high %v14016_v22, %v3114_v63, %v14031_v6 }
 0x530   : > { %v6158_v17 = vsel %vm9288_vm14, 0, %v9287_v54  ;;  %v6143_v44 = vadd.s32 %v13947_v28, %v13954_v61  ;;  %v6173_v21 = vsub.s32 4, %v13990_v38  ;;  %v3110_v50 = vsel %vm3104_vm5, %v3107_v9, %v3109_v43 }
 0x531   : > { %v6159_v30 = vsub.s32 32, %v6158_v17  ;;  %v6163_v52 = vsub.s32 4294967266, %v6158_v17  ;;  %v14040_v23 = vmul.u32.u64.low %v14016_v22, %v3118_v29  ;;  %v14041_v31 = vmul.u32.u64.high %v14016_v22, %v3118_v29, %v14040_v23 }
 0x532   : > { %v9937_v62 = vpop.eup %9936  ;;  %v6409_v49 = vadd.s32 1, %v9297_v7  ;;  %v6160_v35 = vshll.u32 %v13997_v46, %v6158_v17  ;;  %v3129_v28 = vadd.s32 1, %v14032_v48  ;;  %v14047_v61 = vand.u32 8388607, %v6399_v10 }
 0x533   : > { %v9939_v19 = vpop.eup %9938  ;;  %v2859_v5 = vxor.u32 2147483648, %v9937_v62  ;;  %v6161_v4 = vshrl.u32 %v6143_v44, %v6159_v30  ;;  %v6164_v41 = vadd.s32 127, %v6163_v52  ;;  %vm2854_vm2 = vcmp.lt.s32.totalorder %v13994_v16, 2 }
 0x534   : > { %v2856_v39 = vxor.u32 2147483648, %v9939_v19  ;;  %vm6410_vm8 = vcmp.gt.s32.totalorder %v6409_v49, 0  ;;  %v3126_v7 = vmul.u32 %v14016_v22, %v3110_v50  ;;  %vm3128_vm1 = vc.u32 %v14041_v31, %v14031_v6 }
 0x535   : > { %v2860_v12 = vsel %vm2858_vm4, %v2859_v5, %v9939_v19  ;;  %v6162_v40 = vor.u32 %v6161_v4, %v6160_v35  ;;  %v6165_v36 = vshll.u32 %v6164_v41, 23  ;;  %v6411_v59 = vsel %vm6410_vm8, %v6409_v49, 0 }
 0x536   : > { %v2857_v46 = vsel %vm2855_vm10, %v9937_v62, %v2856_v39  ;;  %v6174_v13 = vsel %vm6089_vm11, %v6173_v21, %v13990_v38  ;;  %v3130_v27 = vsel %vm3128_vm1, %v3129_v28, %v14032_v48  ;;  %vm14065_vm9 = vcmp.le.f32.partialorder %v6087_v58, 0.7853982 }
 0x537   : > { %v2861_v42 = vsel %vm2854_vm2, %v2857_v46, %v2860_v12  ;;  %v6166_v54 = vor.u32 4788187, %v6165_v36  ;;  %v3131_v22 = vadd.s32 %v3130_v27, %v3126_v7  ;;  %v6413_v9 = vand.u32 31, %v6411_v59 }
 0x538   : > { %v2862_v37 = vsel %vm2851_vm12, nan, %v2861_v42  ;;  %v6169_v26 = vcvt.s32.f32 %v6162_v40  ;;  %v6407_v38 = vor.u32 8388608, %v14047_v61  ;;  %v6176_v43 = vsel %vm14065_vm9, 0, %v6174_v13 }
 0x539   : > { %v7355_v60 = vsel %vm18_vm0, %v13774_v15, %v2862_v37  ;;  %v6167_v18 = vand.u32 2147483647, %v6166_v54  ;;  %v3132_v63 = vadd.s32 536870912, %v3131_v22  ;;  %v6412_v58 = vshrl.u32 %v6411_v59, 5 }
 0x53a   : > { %7421 = vst.msk [vmem:[%s10548_s19 + $0xa0] sm:$0xff] %vm7400_vm7, %v7355_v60  ;;  %v6414_v45 = vsub.s32 32, %v6413_v9  ;;  %v6416_v29 = vshll.u32 %v10032_v47, %v6413_v9  ;;  %v6419_v48 = vshll.u32 %v10033_v51, %v6413_v9  ;;  %v6422_v44 = vshll.u32 %v10034_v53, %v6413_v9 }
 0x53b   : > { %v6170_v17 = vmul.f32 %v6169_v26, %v6167_v18  ;;  %v3133_v15 = vshrl.u32 %v3132_v63, 30  ;;  %v6425_v21 = vshll.u32 %v10035_v55, %v6413_v9  ;;  %v6428_v35 = vshll.u32 %v10036_v57, %v6413_v9 }
 0x53c   : > { %v6417_v30 = vshrl.u32 %v10033_v51, %v6414_v45  ;;  %v6420_v52 = vshrl.u32 %v10034_v53, %v6414_v45  ;;  %v6423_v50 = vshrl.u32 %v10035_v55, %v6414_v45  ;;  %v6426_v23 = vshrl.u32 %v10036_v57, %v6414_v45 }
 0x53d   : > { %v6171_v62 = vxor.u32 2147483648, %v6170_v17  ;;  %v6429_v49 = vshrl.u32 %v10037_v2, %v6414_v45  ;;  %v3134_v19 = vshll.u32 %v3133_v15, 30  ;;  %v14089_v4 = vadd.f32 %v10066_v1, %v13633_v8 }
 0x53e   : > { %v6418_v5 = vor.u32 %v6417_v30, %v6416_v29  ;;  %v6421_v39 = vor.u32 %v6420_v52, %v6419_v48  ;;  %v6424_v28 = vor.u32 %v6423_v50, %v6422_v44  ;;  %v6427_v61 = vor.u32 %v6426_v23, %v6425_v21 }
 0x53f   : > { %v6172_v41 = vsel %vm6089_vm11, %v6171_v62, %v6170_v17  ;;  %v6180_v40 = vadd.s32 3, %v6176_v43  ;;  %v14096_v36 = vsub.s32 %v3131_v22, %v3134_v19  ;;  %v6430_v59 = vor.u32 %v6429_v49, %v6428_v35 }
 0x540   : > { %v6175_v12 = vsel %vm14065_vm9, %v13832_v33, %v6172_v41  ;;  %vm6431_vm15 = vcmp.lt.s32.totalorder %v6412_v58, 1  ;;  %vm6432_vm13 = vcmp.lt.s32.totalorder %v6412_v58, 2  ;;  %vm6433_vm4 = vcmp.lt.s32.totalorder %v6412_v58, 3 }
 0x541   : > { %9940 = vcosq.f32 %v6175_v12  ;;  %vm14100_vm5 = vcmp.le.f32.partialorder %v3071_v11, 0.7853982  ;;  %v3137_v46 = vsub.s32 0, %v14096_v36  ;;  %v6415_v7 = vshrl.u32 %v10032_v47, %v6414_v45 }
 0x542   : > { %9942 = vsinq.f32 %v6175_v12  ;;  %vm6434_vm6 = vcmp.lt.s32.totalorder %v6412_v58, 4  ;;  %v3157_v42 = vsub.s32 4, %v3133_v15  ;;  %v6439_v13 = vsel %vm6431_vm15, %v6418_v5, %v6421_v39 }
 0x543   : > { %v6436_v54 = vsel %vm6434_vm6, %v6424_v28, 2102212464  ;;  %v6440_v27 = vsel %vm6434_vm6, %v6427_v61, 920167782  ;;  %v9170_v37 = vmin.u32 %v3137_v46, %v14096_v36  ;;  %v6443_v22 = vsel %vm6431_vm15, %v6421_v39, %v6424_v28 }
 0x544   : > { %v6441_v16 = vsel %vm6433_vm4, %v6424_v28, %v6440_v27  ;;  %v6444_v11 = vsel %vm6434_vm6, %v6430_v59, 1326507024  ;;  %v6181_v9 = vand.u32 3, %v6180_v40  ;;  %v6447_v26 = vshll.u32 %v6407_v38, 8 }
 0x545   : > { %v6442_v60 = vsel %vm6432_vm13, %v6439_v13, %v6441_v16  ;;  %v6445_v18 = vsel %vm6433_vm4, %v6427_v61, %v6444_v11  ;;  %vm3073_vm3 = vcmp.lt.s32.totalorder %v13934_v14, 0  ;;  %v3139_v43 = vclz %v9170_v37  ;;  %v14141_v11 = vpop.f32.mrb[26].mxu0 }
 0x546   : > { %v6435_v63 = vsel %vm6431_vm15, %v6415_v7, %v6418_v5  ;;  %v6437_v45 = vsel %vm6433_vm4, %v6421_v39, %v6436_v54  ;;  %v6446_v17 = vsel %vm6432_vm13, %v6443_v22, %v6445_v18  ;;  %v2970_v44 = vand.u32 2139095040, %v14089_v4 }
 0x547   : > { %v14116_v29 = vmul.u32.u64.low %v6447_v26, %v6442_v60  ;;  %v14117_v48 = vmul.u32.u64.high %v6447_v26, %v6442_v60, %v14116_v29  ;;  %vm6179_vm10 = vweird.f32 %v13832_v33  ;;  %v9171_v30 = vadd.s32 4294967294, %v3139_v43 }
 0x548   : > { %v3158_v38 = vsel %vm3073_vm3, %v3157_v42, %v3133_v15  ;;  %v14124_v52 = vmul.u32.u64.low %v6447_v26, %v6446_v17  ;;  %v14125_v21 = vmul.u32.u64.high %v6447_v26, %v6446_v17, %v14124_v52  ;;  %vm6182_vm11 = vcmp.lt.s32.totalorder %v6181_v9, 2 }
 0x549   : > { %vm6183_vm12 = vcmp.eq.s32.totalorder %v6181_v9, 0  ;;  %v6438_v62 = vsel %vm6432_vm13, %v6435_v63, %v6437_v45  ;;  %v2971_v50 = vshrl.u32 %v2970_v44, 23  ;;  %vm6186_vm14 = vcmp.eq.s32.totalorder %v6181_v9, 2 }
 0x54a   : > { %v3127_v23 = vadd.s32 %v14031_v6, %v14041_v31  ;;  %vm9172_vm8 = vcmp.lt.s32.totalorder %v9171_v30, 0  ;;  %v2967_v49 = vand.u32 2147483647, %v14089_v4  ;;  %v3160_v15 = vsel %vm14100_vm5, 0, %v3158_v38 }
 0x54b   : > { %v9941_v19 = vpop.eup %9940  ;;  %v3142_v5 = vsel %vm9172_vm8, 0, %v9171_v30  ;;  %v6457_v35 = vadd.s32 1, %v14117_v48  ;;  %v9165_v41 = vadd.s32 4294967169, %v2971_v50  ;;  %v6454_v12 = vmul.u32 %v6447_v26, %v6438_v62 }
 0x54c   : > { %v9943_v39 = vpop.eup %9942  ;;  %v6187_v28 = vxor.u32 2147483648, %v9941_v19  ;;  %v3143_v58 = vsub.s32 32, %v3142_v5  ;;  %v3147_v61 = vsub.s32 4294967266, %v3142_v5  ;;  %v3144_v59 = vshll.u32 %v14096_v36, %v3142_v5 }
 0x54d   : > { %v6184_v40 = vxor.u32 2147483648, %v9943_v39  ;;  %vm6456_vm2 = vc.u32 %v14125_v21, %v14116_v29  ;;  %v2977_v6 = vadd.s32 1, %v9165_v41  ;;  %v3164_v13 = vadd.s32 3, %v3160_v15 }
 0x54e   : > { %v6188_v31 = vsel %vm6186_vm14, %v6187_v28, %v9943_v39  ;;  %v3145_v46 = vshrl.u32 %v3127_v23, %v3143_v58  ;;  %v3148_v7 = vadd.s32 127, %v3147_v61  ;;  %v6458_v42 = vsel %vm6456_vm2, %v6457_v35, %v14117_v48 }
 0x54f   : > { %v6185_v54 = vsel %vm6183_vm12, %v9941_v19, %v6184_v40  ;;  %v6459_v27 = vadd.s32 %v6458_v42, %v6454_v12  ;;  %vm2978_vm1 = vcmp.gt.s32.totalorder %v2977_v6, 0  ;;  %v2974_v26 = vand.u32 8388607, %v2967_v49 }
 0x550   : > { %v6189_v37 = vsel %vm6182_vm11, %v6185_v54, %v6188_v31  ;;  %v3146_v16 = vor.u32 %v3145_v46, %v3144_v59  ;;  %v3149_v36 = vshll.u32 %v3148_v7, 23  ;;  %v2979_v22 = vsel %vm2978_vm1, %v2977_v6, 0 }
 0x551   : > { %v6190_v60 = vsel %vm6179_vm10, nan, %v6189_v37  ;;  %v6460_v18 = vadd.s32 536870912, %v6459_v27  ;;  %v2981_v43 = vand.u32 31, %v2979_v22  ;;  %v14152_v30 = vand.u32 3, %v3164_v13 }
 0x552   : > { %v7387_v63 = vsel %vm18_vm0, %v13832_v33, %v6190_v60  ;;  %v3150_v45 = vor.u32 4788187, %v3149_v36  ;;  %v3153_v44 = vcvt.s32.f32 %v3146_v16  ;;  %v14156_v38 = vadd.f32 %v10066_v1, %v13720_v32 }
 0x553   : > { %7453 = vst.msk [vmem:[%s10548_s19 + $0x1a0] sm:$0xff] %vm7400_vm7, %v7387_v63  ;;  %v6461_v9 = vshrl.u32 %v6460_v18, 30  ;;  %v2982_v17 = vsub.s32 32, %v2981_v43  ;;  %vm6401_vm9 = vcmp.lt.s32.totalorder %v13978_v34, 0  ;;  %v2975_v62 = vor.u32 8388608, %v2974_v26 }
 0x554   : > { %v3151_v48 = vand.u32 2147483647, %v3150_v45  ;;  %v2984_v50 = vshll.u32 %v10032_v47, %v2981_v43  ;;  %v2987_v32 = vshll.u32 %v10033_v51, %v2981_v43  ;;  %v2990_v41 = vshll.u32 %v10034_v53, %v2981_v43 }
 0x555   : > { %v6462_v52 = vshll.u32 %v6461_v9, 30  ;;  %v2985_v33 = vshrl.u32 %v10033_v51, %v2982_v17  ;;  %v2988_v19 = vshrl.u32 %v10034_v53, %v2982_v17  ;;  %v2991_v5 = vshrl.u32 %v10035_v55, %v2982_v17 }
 0x556   : > { %v3154_v23 = vmul.f32 %v3153_v44, %v3151_v48  ;;  %v2994_v15 = vshrl.u32 %v10036_v57, %v2982_v17  ;;  %v2997_v39 = vshrl.u32 %v10037_v2, %v2982_v17  ;;  %v2980_v58 = vshrl.u32 %v2979_v22, 5 }
 0x557   : > { %v14164_v35 = vsub.s32 %v6459_v27, %v6462_v52  ;;  %v2993_v61 = vshll.u32 %v10035_v55, %v2981_v43  ;;  %v2996_v12 = vshll.u32 %v10036_v57, %v2981_v43  ;;  %v2986_v59 = vor.u32 %v2985_v33, %v2984_v50  ;;  %v14189_v50 = vpop.f32.mrb[26].mxu1 }
 0x558   : > { %v3155_v28 = vxor.u32 2147483648, %v3154_v23  ;;  %v2989_v6 = vor.u32 %v2988_v19, %v2987_v32  ;;  %v2992_v31 = vor.u32 %v2991_v5, %v2990_v41  ;;  %v6485_v7 = vsub.s32 4, %v6461_v9 }
 0x559   : > { %v6465_v40 = vsub.s32 0, %v14164_v35  ;;  %v2995_v42 = vor.u32 %v2994_v15, %v2993_v61  ;;  %v6295_v54 = vand.u32 2147483647, %v14156_v38  ;;  %vm14180_vm15 = vcmp.le.f32.partialorder %v6399_v10, 0.7853982 }
 0x55a   : > { %v3156_v46 = vsel %vm3073_vm3, %v3155_v28, %v3154_v23  ;;  %v2998_v16 = vor.u32 %v2997_v39, %v2996_v12  ;;  %v3015_v36 = vshll.u32 %v2975_v62, 8  ;;  %v2983_v22 = vshrl.u32 %v10032_v47, %v2982_v17 }
 0x55b   : > { %v3159_v13 = vsel %vm14100_vm5, %v13934_v14, %v3156_v46  ;;  %v9298_v37 = vmin.u32 %v6465_v40, %v14164_v35  ;;  %vm2999_vm13 = vcmp.lt.s32.totalorder %v2980_v58, 1  ;;  %vm3002_vm4 = vcmp.lt.s32.totalorder %v2980_v58, 4 }
 0x55c   : > { %9944 = vcosq.f32 %v3159_v13  ;;  %v3004_v18 = vsel %vm3002_vm4, %v2992_v31, 2102212464  ;;  %v3007_v8 = vsel %vm2999_vm13, %v2986_v59, %v2989_v6  ;;  %v6486_v26 = vsel %vm6401_vm9, %v6485_v7, %v6461_v9 }
 0x55d   : > { %9946 = vsinq.f32 %v3159_v13  ;;  %v6467_v60 = vclz %v9298_v37  ;;  %vm3001_vm5 = vcmp.lt.s32.totalorder %v2980_v58, 3  ;;  %v3008_v10 = vsel %vm3002_vm4, %v2995_v42, 920167782 }
 0x55e   : > { %v3011_v43 = vsel %vm2999_vm13, %v2989_v6, %v2992_v31  ;;  %vm3000_vm6 = vcmp.lt.s32.totalorder %v2980_v58, 2  ;;  %v3009_v45 = vsel %vm3001_vm5, %v2992_v31, %v3008_v10  ;;  %v3012_v48 = vsel %vm3002_vm4, %v2998_v16, 1326507024 }
 0x55f   : > { %v9299_v63 = vadd.s32 4294967294, %v6467_v60  ;;  %v3003_v44 = vsel %vm2999_vm13, %v2983_v22, %v2986_v59  ;;  %v3005_v52 = vsel %vm3001_vm5, %v2989_v6, %v3004_v18  ;;  %v3010_v17 = vsel %vm3000_vm6, %v3007_v8, %v3009_v45 }
 0x560   : > { %v3013_v62 = vsel %vm3001_vm5, %v2995_v42, %v3012_v48  ;;  %v14192_v23 = vmul.u32.u64.low %v3015_v36, %v3010_v17  ;;  %v14193_v19 = vmul.u32.u64.high %v3015_v36, %v3010_v17, %v14192_v23  ;;  %v6298_v32 = vand.u32 2139095040, %v14156_v38 }
 0x561   : > { %vm9300_vm3 = vcmp.lt.s32.totalorder %v9299_v63, 0  ;;  %v3014_v33 = vsel %vm3000_vm6, %v3011_v43, %v3013_v62  ;;  %vm3163_vm10 = vweird.f32 %v13934_v14  ;;  %v6455_v41 = vadd.s32 %v14116_v29, %v14125_v21 }
 0x562   : > { %v6470_v9 = vsel %vm9300_vm3, 0, %v9299_v63  ;;  %v14196_v5 = vmul.u32.u64.low %v3015_v36, %v3014_v33  ;;  %v14197_v15 = vmul.u32.u64.high %v3015_v36, %v3014_v33, %v14196_v5  ;;  %v3006_v61 = vsel %vm3000_vm6, %v3003_v44, %v3005_v52 }
 0x563   : > { %v6471_v39 = vsub.s32 32, %v6470_v9  ;;  %v6475_v28 = vsub.s32 4294967266, %v6470_v9  ;;  %vm3166_vm11 = vcmp.lt.s32.totalorder %v14152_v30, 2  ;;  %vm3170_vm12 = vcmp.eq.s32.totalorder %v14152_v30, 2 }
 0x564   : > { %v6488_v12 = vsel %vm14180_vm15, 0, %v6486_v26  ;;  %v6299_v40 = vshrl.u32 %v6298_v32, 23  ;;  %v6472_v59 = vshll.u32 %v14164_v35, %v6470_v9  ;;  %v3025_v46 = vadd.s32 1, %v14193_v19 }
 0x565   : > { %v6473_v6 = vshrl.u32 %v6455_v41, %v6471_v39  ;;  %v6476_v31 = vadd.s32 127, %v6475_v28  ;;  %v3022_v29 = vmul.u32 %v3015_v36, %v3006_v61  ;;  %vm3024_vm14 = vc.u32 %v14197_v15, %v14192_v23 }
 0x566   : > { %v9945_v7 = vpop.eup %9944  ;;  %v9293_v21 = vadd.s32 4294967169, %v6299_v40  ;;  %v6302_v58 = vand.u32 8388607, %v6295_v54  ;;  %v3026_v22 = vsel %vm3024_vm14, %v3025_v46, %v14193_v19  ;;  %v14217_v8 = vadd.f32 %v13824_v25, %v10066_v1 }
 0x567   : > { %v9947_v42 = vpop.eup %9946  ;;  %v3171_v13 = vxor.u32 2147483648, %v9945_v7  ;;  %v6474_v37 = vor.u32 %v6473_v6, %v6472_v59  ;;  %v6477_v16 = vshll.u32 %v6476_v31, 23  ;;  %v3027_v60 = vadd.s32 %v3026_v22, %v3022_v29 }
 0x568   : > { %v3168_v35 = vxor.u32 2147483648, %v9947_v42  ;;  %v6305_v18 = vadd.s32 1, %v9293_v21  ;;  %vm3167_vm8 = vcmp.eq.s32.totalorder %v14152_v30, 0  ;;  %v6492_v10 = vadd.s32 3, %v6488_v12 }
 0x569   : > { %v3172_v36 = vsel %vm3170_vm12, %v3171_v13, %v9947_v42  ;;  %v6478_v26 = vor.u32 4788187, %v6477_v16  ;;  %v3028_v63 = vadd.s32 536870912, %v3027_v60  ;;  %v6303_v45 = vor.u32 8388608, %v6302_v58 }
 0x56a   : > { %v3169_v43 = vsel %vm3167_vm8, %v9945_v7, %v3168_v35  ;;  %vm6306_vm2 = vcmp.gt.s32.totalorder %v6305_v18, 0  ;;  %v6481_v52 = vcvt.s32.f32 %v6474_v37  ;;  %v3282_v19 = vand.u32 2139095040, %v14217_v8 }
 0x56b   : > { %v3173_v48 = vsel %vm3166_vm11, %v3169_v43, %v3172_v36  ;;  %v6479_v44 = vand.u32 2147483647, %v6478_v26  ;;  %v6307_v17 = vsel %vm6306_vm2, %v6305_v18, 0  ;;  %v14226_v62 = vshrl.u32 %v3028_v63, 30 }
 0x56c   : > { %v3174_v25 = vsel %vm3163_vm10, nan, %v3173_v48  ;;  %v6309_v33 = vand.u32 31, %v6307_v17  ;;  %v14235_v39 = vand.u32 3, %v6492_v10  ;;  %v14237_v28 = vshll.u32 %v6303_v45, 8 }
 0x56d   : > { %v7358_v9 = vsel %vm18_vm0, %v13934_v14, %v3174_v25  ;;  %v6482_v5 = vmul.f32 %v6481_v52, %v6479_v44  ;;  %v3030_v30 = vshll.u32 %v14226_v62, 30  ;;  %v3279_v61 = vand.u32 2147483647, %v14217_v8 }
 0x56e   : > { %7424 = vst.msk [vmem:[%s10548_s19 + $0xb8] sm:$0xff] %vm7400_vm7, %v7358_v9  ;;  %v6310_v32 = vsub.s32 32, %v6309_v33  ;;  %v6308_v40 = vshrl.u32 %v6307_v17, 5  ;;  %v3283_v6 = vshrl.u32 %v3282_v19, 23  ;;  %v6312_v31 = vshll.u32 %v10032_v47, %v6309_v33 }
 0x56f   : > { %v6483_v41 = vxor.u32 2147483648, %v6482_v5  ;;  %v14240_v12 = vsub.s32 %v3027_v60, %v3030_v30  ;;  %v6315_v58 = vshll.u32 %v10033_v51, %v6309_v33  ;;  %v6318_v42 = vshll.u32 %v10034_v53, %v6309_v33 }
 0x570   : > { %v6313_v59 = vshrl.u32 %v10033_v51, %v6310_v32  ;;  %v6316_v46 = vshrl.u32 %v10034_v53, %v6310_v32  ;;  %v6319_v7 = vshrl.u32 %v10035_v55, %v6310_v32  ;;  %v6321_v37 = vshll.u32 %v10035_v55, %v6309_v33 }
 0x571   : > { %v6484_v14 = vsel %vm6401_vm9, %v6483_v41, %v6482_v5  ;;  %v3033_v21 = vsub.s32 0, %v14240_v12  ;;  %v6322_v16 = vshrl.u32 %v10036_v57, %v6310_v32  ;;  %v6324_v27 = vshll.u32 %v10036_v57, %v6309_v33 }
 0x572   : > { %v6487_v29 = vsel %vm14180_vm15, %v13978_v34, %v6484_v14  ;;  %v6314_v13 = vor.u32 %v6313_v59, %v6312_v31  ;;  %v6317_v35 = vor.u32 %v6316_v46, %v6315_v58  ;;  %v6320_v60 = vor.u32 %v6319_v7, %v6318_v42 }
 0x573   : > { %9948 = vcosq.f32 %v6487_v29  ;;  %v9166_v22 = vmin.u32 %v3033_v21, %v14240_v12  ;;  %v6323_v18 = vor.u32 %v6322_v16, %v6321_v37  ;;  %v6325_v36 = vshrl.u32 %v10037_v2, %v6310_v32 }
 0x574   : > { %9950 = vsinq.f32 %v6487_v29  ;;  %v9177_v26 = vadd.s32 4294967169, %v3283_v6  ;;  %vm2969_vm1 = vcmp.lt.s32.totalorder %v14089_v4, 0  ;;  %v3053_v43 = vsub.s32 4, %v14226_v62 }
 0x575   : > { %v3035_v10 = vclz %v9166_v22  ;;  %v6311_v63 = vshrl.u32 %v10032_v47, %v6310_v32  ;;  %vm6327_vm9 = vcmp.lt.s32.totalorder %v6308_v40, 1  ;;  %vm6498_vm15 = vcmp.eq.s32.totalorder %v14235_v39, 2 }
 0x576   : > { %v6326_v45 = vor.u32 %v6325_v36, %v6324_v27  ;;  %vm6328_vm13 = vcmp.lt.s32.totalorder %v6308_v40, 2  ;;  %vm6329_vm4 = vcmp.lt.s32.totalorder %v6308_v40, 3  ;;  %vm6330_vm5 = vcmp.lt.s32.totalorder %v6308_v40, 4 }
 0x577   : > { %vm6495_vm6 = vcmp.eq.s32.totalorder %v14235_v39, 0  ;;  %v9167_v48 = vadd.s32 4294967294, %v3035_v10  ;;  %v6332_v44 = vsel %vm6330_vm5, %v6320_v60, 2102212464  ;;  %v6335_v52 = vsel %vm6327_vm9, %v6314_v13, %v6317_v35 }
 0x578   : > { %v6336_v17 = vsel %vm6330_vm5, %v6323_v18, 920167782  ;;  %vm14266_vm3 = vcmp.le.f32.partialorder %v2967_v49, 0.7853982  ;;  %v6331_v33 = vsel %vm6327_vm9, %v6311_v63, %v6314_v13  ;;  %v6339_v9 = vsel %vm6327_vm9, %v6317_v35, %v6320_v60  ;;  %v14299_v63 = vpop.f32.mrb[27].mxu0 }
 0x579   : > { %v6337_v19 = vsel %vm6329_vm4, %v6320_v60, %v6336_v17  ;;  %v6340_v5 = vsel %vm6330_vm5, %v6326_v45, 1326507024  ;;  %vm6491_vm10 = vweird.f32 %v13978_v34  ;;  %vm9168_vm11 = vcmp.lt.s32.totalorder %v9167_v48, 0 }
 0x57a   : > { %v6333_v30 = vsel %vm6329_vm4, %v6317_v35, %v6332_v44  ;;  %v6338_v32 = vsel %vm6328_vm13, %v6335_v52, %v6337_v19  ;;  %v6341_v41 = vsel %vm6329_vm4, %v6323_v18, %v6340_v5  ;;  %v3038_v59 = vsel %vm9168_vm11, 0, %v9167_v48 }
 0x57b   : > { %v6342_v49 = vsel %vm6328_vm13, %v6339_v9, %v6341_v41  ;;  %v14277_v6 = vmul.u32.u64.low %v14237_v28, %v6338_v32  ;;  %v14278_v14 = vmul.u32.u64.high %v14237_v28, %v6338_v32, %v14277_v6  ;;  %v3023_v31 = vadd.s32 %v14192_v23, %v14197_v15 }
 0x57c   : > { %v3039_v46 = vsub.s32 32, %v3038_v59  ;;  %v3043_v7 = vsub.s32 4294967266, %v3038_v59  ;;  %v14285_v29 = vand.u32 8388607, %v3279_v61  ;;  %v6334_v58 = vsel %vm6328_vm13, %v6331_v33, %v6333_v30 }
 0x57d   : > { %v9949_v21 = vpop.eup %9948  ;;  %v14289_v42 = vmul.u32.u64.low %v14237_v28, %v6342_v49  ;;  %v14290_v13 = vmul.u32.u64.high %v14237_v28, %v6342_v49, %v14289_v42  ;;  %v3289_v37 = vadd.s32 1, %v9177_v26  ;;  %v3040_v35 = vshll.u32 %v14240_v12, %v3038_v59 }
 0x57e   : > { %v9951_v16 = vpop.eup %9950  ;;  %v6499_v22 = vxor.u32 2147483648, %v9949_v21  ;;  %v3041_v60 = vshrl.u32 %v3023_v31, %v3039_v46  ;;  %v3044_v23 = vadd.s32 127, %v3043_v7  ;;  %v3054_v18 = vsel %vm2969_vm1, %v3053_v43, %v14226_v62 }
 0x57f   : > { %v6496_v15 = vxor.u32 2147483648, %v9951_v16  ;;  %v6353_v27 = vadd.s32 1, %v14278_v14  ;;  %vm3290_vm12 = vcmp.gt.s32.totalorder %v3289_v37, 0  ;;  %vm6494_vm14 = vcmp.lt.s32.totalorder %v14235_v39, 2 }
 0x580   : > { %v6500_v40 = vsel %vm6498_vm15, %v6499_v22, %v9951_v16  ;;  %v3042_v36 = vor.u32 %v3041_v60, %v3040_v35  ;;  %v3045_v10 = vshll.u32 %v3044_v23, 23  ;;  %v3291_v26 = vsel %vm3290_vm12, %v3289_v37, 0 }
 0x581   : > { %v6497_v12 = vsel %vm6495_vm6, %v9949_v21, %v6496_v15  ;;  %v6350_v45 = vmul.u32 %v14237_v28, %v6334_v58  ;;  %vm6352_vm8 = vc.u32 %v14290_v13, %v14277_v6  ;;  %v3056_v48 = vsel %vm14266_vm3, 0, %v3054_v18 }
 0x582   : > { %v6501_v62 = vsel %vm6494_vm14, %v6497_v12, %v6500_v40  ;;  %v3046_v43 = vor.u32 4788187, %v3045_v10  ;;  %v6354_v44 = vsel %vm6352_vm8, %v6353_v27, %v14278_v14  ;;  %v3293_v33 = vand.u32 31, %v3291_v26 }
 0x583   : > { %v6502_v52 = vsel %vm6491_vm10, nan, %v6501_v62  ;;  %v6355_v17 = vadd.s32 %v6354_v44, %v6350_v45  ;;  %v14314_v39 = vadd.f32 %v13868_v24, %v10066_v1  ;;  %v3049_v9 = vcvt.s32.f32 %v3042_v36 }
 0x584   : > { %v7390_v28 = vsel %vm18_vm0, %v13978_v34, %v6502_v52  ;;  %v3047_v19 = vand.u32 2147483647, %v3046_v43  ;;  %v3287_v5 = vor.u32 8388608, %v14285_v29  ;;  %v3060_v30 = vadd.s32 3, %v3056_v48 }
 0x585   : > { %7456 = vst.msk [vmem:[%s10548_s19 + $0x1b8] sm:$0xff] %vm7400_vm7, %v7390_v28  ;;  %v6356_v32 = vadd.s32 536870912, %v6355_v17  ;;  %v3292_v41 = vshrl.u32 %v3291_v26, 5  ;;  %v3294_v59 = vsub.s32 32, %v3293_v33  ;;  %v3296_v14 = vshll.u32 %v10032_v47, %v3293_v33 }
 0x586   : > { %v3050_v49 = vmul.f32 %v3049_v9, %v3047_v19  ;;  %v3299_v24 = vshll.u32 %v10033_v51, %v3293_v33  ;;  %v3302_v31 = vshll.u32 %v10034_v53, %v3293_v33  ;;  %v3305_v29 = vshll.u32 %v10035_v55, %v3293_v33 }
 0x587   : > { %v6357_v46 = vshrl.u32 %v6356_v32, 30  ;;  %v3297_v34 = vshrl.u32 %v10033_v51, %v3294_v59  ;;  %v3300_v7 = vshrl.u32 %v10034_v53, %v3294_v59  ;;  %vm6297_vm2 = vcmp.lt.s32.totalorder %v14156_v38, 0 }
 0x588   : > { %v3051_v21 = vxor.u32 2147483648, %v3050_v49  ;;  %v3303_v58 = vshrl.u32 %v10035_v55, %v3294_v59  ;;  %v3306_v42 = vshrl.u32 %v10036_v57, %v3294_v59  ;;  %v3309_v37 = vshrl.u32 %v10037_v2, %v3294_v59 }
 0x589   : > { %v6358_v16 = vshll.u32 %v6357_v46, 30  ;;  %v3298_v22 = vor.u32 %v3297_v34, %v3296_v14  ;;  %v3308_v35 = vshll.u32 %v10036_v57, %v3293_v33  ;;  %vm3311_vm9 = vcmp.lt.s32.totalorder %v3292_v41, 1 }
 0x58a   : > { %v3052_v60 = vsel %vm2969_vm1, %v3051_v21, %v3050_v49  ;;  %v3301_v23 = vor.u32 %v3300_v7, %v3299_v24  ;;  %v3304_v15 = vor.u32 %v3303_v58, %v3302_v31  ;;  %v3307_v18 = vor.u32 %v3306_v42, %v3305_v29 }
 0x58b   : > { %v3055_v27 = vsel %vm14266_vm3, %v14089_v4, %v3052_v60  ;;  %v14338_v40 = vsub.s32 %v6355_v17, %v6358_v16  ;;  %v3310_v36 = vor.u32 %v3309_v37, %v3308_v35  ;;  %vm3314_vm15 = vcmp.lt.s32.totalorder %v3292_v41, 4  ;;  %v14374_v37 = vpop.f32.mrb[27].mxu1 }
 0x58c   : > { %9952 = vcosq.f32 %v3055_v27  ;;  %v3295_v10 = vshrl.u32 %v10032_v47, %v3294_v59  ;;  %vm3312_vm13 = vcmp.lt.s32.totalorder %v3292_v41, 2  ;;  %v3316_v26 = vsel %vm3314_vm15, %v3304_v15, 2102212464 }
 0x58d   : > { %9954 = vsinq.f32 %v3055_v27  ;;  %v6361_v12 = vsub.s32 0, %v14338_v40  ;;  %v6381_v45 = vsub.s32 4, %v6357_v46  ;;  %vm3313_vm1 = vcmp.lt.s32.totalorder %v3292_v41, 3 }
 0x58e   : > { %v3315_v62 = vsel %vm3311_vm9, %v3295_v10, %v3298_v22  ;;  %v3317_v43 = vsel %vm3313_vm1, %v3301_v23, %v3316_v26  ;;  %v3319_v25 = vsel %vm3311_vm9, %v3298_v22, %v3301_v23  ;;  %v3320_v48 = vsel %vm3314_vm15, %v3307_v18, 920167782 }
 0x58f   : > { %v9294_v44 = vmin.u32 %v6361_v12, %v14338_v40  ;;  %v3321_v52 = vsel %vm3313_vm1, %v3304_v15, %v3320_v48  ;;  %v3323_v17 = vsel %vm3311_vm9, %v3301_v23, %v3304_v15  ;;  %v3324_v33 = vsel %vm3314_vm15, %v3310_v36, 1326507024 }
 0x590   : > { %v3061_v28 = vand.u32 3, %v3060_v30  ;;  %v3322_v19 = vsel %vm3312_vm13, %v3319_v25, %v3321_v52  ;;  %v3325_v9 = vsel %vm3313_vm1, %v3307_v18, %v3324_v33  ;;  %v3327_v32 = vshll.u32 %v3287_v5, 8 }
 0x591   : > { %v6363_v59 = vclz %v9294_v44  ;;  %v6382_v49 = vsel %vm6297_vm2, %v6381_v45, %v6357_v46  ;;  %v6607_v14 = vand.u32 2147483647, %v14314_v39  ;;  %v3318_v24 = vsel %vm3312_vm13, %v3315_v62, %v3317_v43 }
 0x592   : > { %v3326_v31 = vsel %vm3312_vm13, %v3323_v17, %v3325_v9  ;;  %v14355_v34 = vmul.u32.u64.low %v3327_v32, %v3322_v19  ;;  %v14356_v7 = vmul.u32.u64.high %v3327_v32, %v3322_v19, %v14355_v34  ;;  %v6610_v58 = vand.u32 2139095040, %v14314_v39 }
 0x593   : > { %v9295_v29 = vadd.s32 4294967294, %v6363_v59  ;;  %v14358_v21 = vmul.u32.u64.low %v3327_v32, %v3326_v31  ;;  %v14359_v30 = vmul.u32.u64.high %v3327_v32, %v3326_v31, %v14358_v21  ;;  %vm3063_vm4 = vcmp.eq.s32.totalorder %v3061_v28, 0 }
 0x594   : > { %vm14364_vm5 = vcmp.le.f32.partialorder %v6295_v54, 0.7853982  ;;  %v14370_v41 = vadd.f32 %v10066_v1, %v13969_v20  ;;  %vm3066_vm6 = vcmp.eq.s32.totalorder %v3061_v28, 2  ;;  %v6351_v46 = vadd.s32 %v14277_v6, %v14290_v13 }
 0x595   : > { %vm9296_vm3 = vcmp.lt.s32.totalorder %v9295_v29, 0  ;;  %v6611_v42 = vshrl.u32 %v6610_v58, 23  ;;  %v6384_v54 = vsel %vm14364_vm5, 0, %v6382_v49  ;;  %v3334_v35 = vmul.u32 %v3327_v32, %v3318_v24 }
 0x596   : > { %v9953_v16 = vpop.eup %9952  ;;  %v6366_v22 = vsel %vm9296_vm3, 0, %v9295_v29  ;;  %v3337_v60 = vadd.s32 1, %v14356_v7  ;;  %v6614_v27 = vand.u32 8388607, %v6607_v14  ;;  %vm3336_vm10 = vc.u32 %v14359_v30, %v14355_v34 }
 0x597   : > { %v9955_v23 = vpop.eup %9954  ;;  %v3067_v15 = vxor.u32 2147483648, %v9953_v16  ;;  %v6367_v20 = vsub.s32 32, %v6366_v22  ;;  %v6371_v18 = vsub.s32 4294967266, %v6366_v22  ;;  %v6368_v13 = vshll.u32 %v14338_v40, %v6366_v22 }
 0x598   : > { %v3064_v6 = vxor.u32 2147483648, %v9955_v23  ;;  %v9305_v36 = vadd.s32 4294967169, %v6611_v42  ;;  %v3338_v45 = vsel %vm3336_vm10, %v3337_v60, %v14356_v7  ;;  %vm3062_vm11 = vcmp.lt.s32.totalorder %v3061_v28, 2 }
 0x599   : > { %v3068_v10 = vsel %vm3066_vm6, %v3067_v15, %v9955_v23  ;;  %v6369_v26 = vshrl.u32 %v6351_v46, %v6367_v20  ;;  %v6372_v12 = vadd.s32 127, %v6371_v18  ;;  %v3339_v43 = vadd.s32 %v3338_v45, %v3334_v35 }
 0x59a   : > { %v3065_v62 = vsel %vm3063_vm4, %v9953_v16, %v3064_v6  ;;  %v6617_v25 = vadd.s32 1, %v9305_v36  ;;  %vm3059_vm12 = vweird.f32 %v14089_v4  ;;  %v6388_v17 = vadd.s32 3, %v6384_v54 }
 0x59b   : > { %v3069_v48 = vsel %vm3062_vm11, %v3065_v62, %v3068_v10  ;;  %v6370_v44 = vor.u32 %v6369_v26, %v6368_v13  ;;  %v6373_v40 = vshll.u32 %v6372_v12, 23  ;;  %v3340_v33 = vadd.s32 536870912, %v3339_v43 }
 0x59c   : > { %v3070_v52 = vsel %vm3059_vm12, nan, %v3069_v48  ;;  %vm6618_vm14 = vcmp.gt.s32.totalorder %v6617_v25, 0  ;;  %v6615_v32 = vor.u32 8388608, %v6614_v27  ;;  %v3178_v24 = vand.u32 2139095040, %v14370_v41 }
 0x59d   : > { %v7357_v19 = vsel %vm18_vm0, %v14089_v4, %v3070_v52  ;;  %v6374_v9 = vor.u32 4788187, %v6373_v40  ;;  %v6619_v28 = vsel %vm6618_vm14, %v6617_v25, 0  ;;  %v3341_v59 = vshrl.u32 %v3340_v33, 30 }
 0x59e   : > { %7423 = vst.msk [vmem:[%s10548_s19 + $0xb0] sm:$0xff] %vm7400_vm7, %v7357_v19  ;;  %v6621_v49 = vand.u32 31, %v6619_v28  ;;  %v6377_v7 = vcvt.s32.f32 %v6370_v44  ;;  %vm3281_vm8 = vcmp.lt.s32.totalorder %v14217_v8, 0  ;;  %v14394_v29 = vand.u32 3, %v6388_v17 }
 0x59f   : > { %v6375_v31 = vand.u32 2147483647, %v6374_v9  ;;  %vm14398_vm9 = vcmp.le.f32.partialorder %v3279_v61, 0.7853982  ;;  %v3342_v4 = vshll.u32 %v3341_v59, 30  ;;  %v3335_v16 = vadd.s32 %v14355_v34, %v14359_v30 }
 0x5a0   : > { %v6622_v58 = vsub.s32 32, %v6621_v49  ;;  %v3175_v46 = vand.u32 2147483647, %v14370_v41  ;;  %v3365_v22 = vsub.s32 4, %v3341_v59  ;;  %v14404_v54 = vshll.u32 %v6615_v32, 8 }
 0x5a1   : > { %v6378_v42 = vmul.f32 %v6377_v7, %v6375_v31  ;;  %v14406_v35 = vsub.s32 %v3339_v43, %v3342_v4  ;;  %v14408_v60 = vshrl.u32 %v6619_v28, 5  ;;  %v3179_v61 = vshrl.u32 %v3178_v24, 23 }
 0x5a2   : > { %v6625_v23 = vshrl.u32 %v10033_v51, %v6622_v58  ;;  %v6624_v20 = vshll.u32 %v10032_v47, %v6621_v49  ;;  %v6628_v18 = vshrl.u32 %v10034_v53, %v6622_v58  ;;  %v6631_v27 = vshrl.u32 %v10035_v55, %v6622_v58 }
 0x5a3   : > { %v6379_v15 = vxor.u32 2147483648, %v6378_v42  ;;  %v3345_v6 = vsub.s32 0, %v14406_v35  ;;  %v6627_v34 = vshll.u32 %v10033_v51, %v6621_v49  ;;  %v6630_v30 = vshll.u32 %v10034_v53, %v6621_v49 }
 0x5a4   : > { %v6634_v13 = vshrl.u32 %v10036_v57, %v6622_v58  ;;  %v3366_v10 = vsel %vm3281_vm8, %v3365_v22, %v3341_v59  ;;  %v6626_v26 = vor.u32 %v6625_v23, %v6624_v20  ;;  %v6633_v12 = vshll.u32 %v10035_v55, %v6621_v49 }
 0x5a5   : > { %v6380_v36 = vsel %vm6297_vm2, %v6379_v15, %v6378_v42  ;;  %v9178_v62 = vmin.u32 %v3345_v6, %v14406_v35  ;;  %v6629_v43 = vor.u32 %v6628_v18, %v6627_v34  ;;  %v6632_v25 = vor.u32 %v6631_v27, %v6630_v30 }
 0x5a6   : > { %v6383_v45 = vsel %vm14364_vm5, %v14156_v38, %v6380_v36  ;;  %v6635_v48 = vor.u32 %v6634_v13, %v6633_v12  ;;  %v6636_v44 = vshll.u32 %v10036_v57, %v6621_v49  ;;  %v6637_v40 = vshrl.u32 %v10037_v2, %v6622_v58 }
 0x5a7   : > { %9956 = vcosq.f32 %v6383_v45  ;;  %v3347_v52 = vclz %v9178_v62  ;;  %v9173_v17 = vadd.s32 4294967169, %v3179_v61  ;;  %v14431_v33 = vand.u32 8388607, %v3175_v46 }
 0x5a8   : > { %9958 = vsinq.f32 %v6383_v45  ;;  %v3368_v5 = vsel %vm14398_vm9, 0, %v3366_v10  ;;  %v6623_v19 = vshrl.u32 %v10032_v47, %v6622_v58  ;;  %v6638_v9 = vor.u32 %v6637_v40, %v6636_v44 }
 0x5a9   : > { %vm6639_vm2 = vcmp.lt.s32.totalorder %v14408_v60, 1  ;;  %v9179_v32 = vadd.s32 4294967294, %v3347_v52  ;;  %vm6641_vm15 = vcmp.lt.s32.totalorder %v14408_v60, 3  ;;  %vm6642_vm13 = vcmp.lt.s32.totalorder %v14408_v60, 4 }
 0x5aa   : > { %v6647_v28 = vsel %vm6639_vm2, %v6626_v26, %v6629_v43  ;;  %v6644_v59 = vsel %vm6642_vm13, %v6632_v25, 2102212464  ;;  %v6648_v49 = vsel %vm6642_vm13, %v6635_v48, 920167782  ;;  %v6651_v24 = vsel %vm6639_vm2, %v6629_v43, %v6632_v25 }
 0x5ab   : > { %v6652_v31 = vsel %vm6642_vm13, %v6638_v9, 1326507024  ;;  %vm6391_vm1 = vcmp.eq.s32.totalorder %v14394_v29, 0  ;;  %vm9180_vm4 = vcmp.lt.s32.totalorder %v9179_v32, 0  ;;  %vm6640_vm5 = vcmp.lt.s32.totalorder %v14408_v60, 2 }
 0x5ac   : > { %v6649_v7 = vsel %vm6641_vm15, %v6632_v25, %v6648_v49  ;;  %v6653_v4 = vsel %vm6641_vm15, %v6635_v48, %v6652_v31  ;;  %vm6390_vm6 = vcmp.lt.s32.totalorder %v14394_v29, 2  ;;  %v3350_v58 = vsel %vm9180_vm4, 0, %v9179_v32 }
 0x5ad   : > { %v6643_v42 = vsel %vm6639_vm2, %v6623_v19, %v6626_v26  ;;  %v6650_v22 = vsel %vm6640_vm5, %v6647_v28, %v6649_v7  ;;  %v6654_v23 = vsel %vm6640_vm5, %v6651_v24, %v6653_v4  ;;  %vm6387_vm3 = vweird.f32 %v14156_v38  ;;  %v14469_v26 = vpop.f32.mrb[28].mxu0 }
 0x5ae   : > { %v3351_v61 = vsub.s32 32, %v3350_v58  ;;  %v3355_v15 = vsub.s32 4294967266, %v3350_v58  ;;  %v6645_v20 = vsel %vm6641_vm15, %v6629_v43, %v6644_v59  ;;  %v3185_v18 = vadd.s32 1, %v9173_v17 }
 0x5af   : > { %v14460_v27 = vmul.u32.u64.low %v14404_v54, %v6654_v23  ;;  %v14461_v6 = vmul.u32.u64.high %v14404_v54, %v6654_v23, %v14460_v27  ;;  %v14464_v34 = vmul.u32.u64.low %v14404_v54, %v6650_v22  ;;  %v14465_v30 = vmul.u32.u64.high %v14404_v54, %v6650_v22, %v14464_v34 }
 0x5b0   : > { %v3352_v13 = vshll.u32 %v14406_v35, %v3350_v58  ;;  %v3353_v36 = vshrl.u32 %v3335_v16, %v3351_v61  ;;  %v3356_v10 = vadd.s32 127, %v3355_v15  ;;  %vm3186_vm10 = vcmp.gt.s32.totalorder %v3185_v18, 0 }
 0x5b1   : > { %v9957_v12 = vpop.eup %9956  ;;  %vm6394_vm11 = vcmp.eq.s32.totalorder %v14394_v29, 2  ;;  %v3372_v45 = vadd.s32 3, %v3368_v5  ;;  %v6646_v62 = vsel %vm6640_vm5, %v6643_v42, %v6645_v20  ;;  %v3187_v43 = vsel %vm3186_vm10, %v3185_v18, 0 }
 0x5b2   : > { %v9959_v25 = vpop.eup %9958  ;;  %v6395_v48 = vxor.u32 2147483648, %v9957_v12  ;;  %v3354_v44 = vor.u32 %v3353_v36, %v3352_v13  ;;  %v3357_v40 = vshll.u32 %v3356_v10, 23  ;;  %v3183_v52 = vor.u32 8388608, %v14431_v33 }
 0x5b3   : > { %v6392_v35 = vxor.u32 2147483648, %v9959_v25  ;;  %vm6664_vm12 = vc.u32 %v14461_v6, %v14464_v34  ;;  %v6665_v16 = vadd.s32 1, %v14465_v30  ;;  %v14480_v17 = vadd.f32 %v10066_v1, %v14023_v56 }
 0x5b4   : > { %v6396_v5 = vsel %vm6394_vm11, %v6395_v48, %v9959_v25  ;;  %v3358_v60 = vor.u32 4788187, %v3357_v40  ;;  %v6662_v19 = vmul.u32 %v14404_v54, %v6646_v62  ;;  %v3189_v9 = vand.u32 31, %v3187_v43 }
 0x5b5   : > { %v6393_v32 = vsel %vm6391_vm1, %v9957_v12, %v6392_v35  ;;  %v3361_v33 = vcvt.s32.f32 %v3354_v44  ;;  %v14485_v28 = vand.u32 3, %v3372_v45  ;;  %v6666_v59 = vsel %vm6664_vm12, %v6665_v16, %v14465_v30 }
 0x5b6   : > { %v6397_v49 = vsel %vm6390_vm6, %v6393_v32, %v6396_v5  ;;  %v3359_v24 = vand.u32 2147483647, %v3358_v60  ;;  %v6667_v56 = vadd.s32 %v6666_v59, %v6662_v19  ;;  %v3190_v31 = vsub.s32 32, %v3189_v9 }
 0x5b7   : > { %v6398_v7 = vsel %vm6387_vm3, nan, %v6397_v49  ;;  %v3188_v54 = vshrl.u32 %v3187_v43, 5  ;;  %v3192_v4 = vshll.u32 %v10032_v47, %v3189_v9  ;;  %v3195_v58 = vshll.u32 %v10033_v51, %v3189_v9 }
 0x5b8   : > { %v7389_v42 = vsel %vm18_vm0, %v14156_v38, %v6398_v7  ;;  %v3362_v22 = vmul.f32 %v3361_v33, %v3359_v24  ;;  %v6668_v23 = vadd.s32 536870912, %v6667_v56  ;;  %v3198_v29 = vshll.u32 %v10034_v53, %v3189_v9 }
 0x5b9   : > { %7455 = vst.msk [vmem:[%s10548_s19 + $0x1b0] sm:$0xff] %vm7400_vm7, %v7389_v42  ;;  %v3193_v61 = vshrl.u32 %v10033_v51, %v3190_v31  ;;  %v3196_v15 = vshrl.u32 %v10034_v53, %v3190_v31  ;;  %v3199_v20 = vshrl.u32 %v10035_v55, %v3190_v31  ;;  %v3201_v18 = vshll.u32 %v10035_v55, %v3189_v9 }
 0x5ba   : > { %v3363_v27 = vxor.u32 2147483648, %v3362_v22  ;;  %v6669_v30 = vshrl.u32 %v6668_v23, 30  ;;  %v3202_v13 = vshrl.u32 %v10036_v57, %v3190_v31  ;;  %v3204_v38 = vshll.u32 %v10036_v57, %v3189_v9 }
 0x5bb   : > { %v3194_v36 = vor.u32 %v3193_v61, %v3192_v4  ;;  %v3197_v10 = vor.u32 %v3196_v15, %v3195_v58  ;;  %v3200_v12 = vor.u32 %v3199_v20, %v3198_v29  ;;  %v3205_v45 = vshrl.u32 %v10037_v2, %v3190_v31 }
 0x5bc   : > { %v3364_v62 = vsel %vm3281_vm8, %v3363_v27, %v3362_v22  ;;  %v6670_v43 = vshll.u32 %v6669_v30, 30  ;;  %v3203_v25 = vor.u32 %v3202_v13, %v3201_v18  ;;  %v14509_v48 = vshll.u32 %v3183_v52, 8  ;;  %v14542_v13 = vpop.f32.mrb[28].mxu1 }
 0x5bd   : > { %v3367_v44 = vsel %vm14398_vm9, %v14217_v8, %v3364_v62  ;;  %v3206_v40 = vor.u32 %v3205_v45, %v3204_v38  ;;  %vm3207_vm14 = vcmp.lt.s32.totalorder %v3188_v54, 1  ;;  %v6506_v35 = vand.u32 2139095040, %v14480_v17 }
 0x5be   : > { %9960 = vcosq.f32 %v3367_v44  ;;  %v14515_v16 = vsub.s32 %v6667_v56, %v6670_v43  ;;  %vm3208_vm2 = vcmp.lt.s32.totalorder %v3188_v54, 2  ;;  %vm3210_vm15 = vcmp.lt.s32.totalorder %v3188_v54, 4 }
 0x5bf   : > { %9962 = vsinq.f32 %v3367_v44  ;;  %v3191_v5 = vshrl.u32 %v10032_v47, %v3190_v31  ;;  %v3212_v60 = vsel %vm3210_vm15, %v3200_v12, 2102212464  ;;  %v3215_v52 = vsel %vm3207_vm14, %v3194_v36, %v3197_v10 }
 0x5c0   : > { %v6673_v19 = vsub.s32 0, %v14515_v16  ;;  %v6693_v9 = vsub.s32 4, %v6669_v30  ;;  %vm3209_vm8 = vcmp.lt.s32.totalorder %v3188_v54, 3  ;;  %v3216_v21 = vsel %vm3210_vm15, %v3203_v25, 920167782 }
 0x5c1   : > { %v3211_v32 = vsel %vm3207_vm14, %v3191_v5, %v3194_v36  ;;  %v3217_v33 = vsel %vm3209_vm8, %v3200_v12, %v3216_v21  ;;  %v3219_v59 = vsel %vm3207_vm14, %v3197_v10, %v3200_v12  ;;  %v3220_v49 = vsel %vm3210_vm15, %v3206_v40, 1326507024 }
 0x5c2   : > { %v9306_v24 = vmin.u32 %v6673_v19, %v14515_v16  ;;  %v3213_v56 = vsel %vm3209_vm8, %v3197_v10, %v3212_v60  ;;  %v3218_v7 = vsel %vm3208_vm2, %v3215_v52, %v3217_v33  ;;  %v3221_v31 = vsel %vm3209_vm8, %v3203_v25, %v3220_v49 }
 0x5c3   : > { %vm6609_vm9 = vcmp.lt.s32.totalorder %v14314_v39, 0  ;;  %v3222_v4 = vsel %vm3208_vm2, %v3219_v59, %v3221_v31  ;;  %v14527_v58 = vmul.u32.u64.low %v14509_v48, %v3218_v7  ;;  %v14528_v42 = vmul.u32.u64.high %v14509_v48, %v3218_v7, %v14527_v58 }
 0x5c4   : > { %v6675_v22 = vclz %v9306_v24  ;;  %v6694_v23 = vsel %vm6609_vm9, %v6693_v9, %v6669_v30  ;;  %v6503_v29 = vand.u32 2147483647, %v14480_v17  ;;  %v14535_v61 = vadd.f32 %v14141_v11, %v10066_v1 }
 0x5c5   : > { %v3214_v15 = vsel %vm3208_vm2, %v3211_v32, %v3213_v56  ;;  %v14539_v20 = vmul.u32.u64.low %v14509_v48, %v3222_v4  ;;  %v14540_v18 = vmul.u32.u64.high %v14509_v48, %v3222_v4, %v14539_v20  ;;  %v6507_v27 = vshrl.u32 %v6506_v35, 23 }
 0x5c6   : > { %vm3374_vm13 = vcmp.lt.s32.totalorder %v14485_v28, 2  ;;  %vm3375_vm1 = vcmp.eq.s32.totalorder %v14485_v28, 0  ;;  %vm14548_vm4 = vcmp.le.f32.partialorder %v6607_v14, 0.7853982  ;;  %v9307_v11 = vadd.s32 4294967294, %v6675_v22 }
 0x5c7   : > { %vm3378_vm5 = vcmp.eq.s32.totalorder %v14485_v28, 2  ;;  %v6663_v54 = vadd.s32 %v14464_v34, %v14461_v6  ;;  %v3233_v38 = vadd.s32 1, %v14528_v42  ;;  %v9301_v36 = vadd.s32 4294967169, %v6507_v27 }
 0x5c8   : > { %v9961_v10 = vpop.eup %9960  ;;  %vm9308_vm6 = vcmp.lt.s32.totalorder %v9307_v11, 0  ;;  %v6696_v12 = vsel %vm14548_vm4, 0, %v6694_v23  ;;  %v3230_v45 = vmul.u32 %v14509_v48, %v3214_v15  ;;  %v6510_v14 = vand.u32 8388607, %v6503_v29 }
 0x5c9   : > { %v9963_v62 = vpop.eup %9962  ;;  %v3379_v43 = vxor.u32 2147483648, %v9961_v10  ;;  %v6678_v25 = vsel %vm9308_vm6, 0, %v9307_v11  ;;  %vm3232_vm3 = vc.u32 %v14540_v18, %v14527_v58  ;;  %v3487_v6 = vand.u32 2147483647, %v14535_v61 }
 0x5ca   : > { %v3376_v34 = vxor.u32 2147483648, %v9963_v62  ;;  %v6679_v44 = vsub.s32 32, %v6678_v25  ;;  %v6683_v40 = vsub.s32 4294967266, %v6678_v25  ;;  %v3490_v35 = vand.u32 2139095040, %v14535_v61 }
 0x5cb   : > { %v3380_v5 = vsel %vm3378_vm5, %v3379_v43, %v9963_v62  ;;  %v6680_v48 = vshll.u32 %v14515_v16, %v6678_v25  ;;  %v3234_v60 = vsel %vm3232_vm3, %v3233_v38, %v14528_v42  ;;  %v6513_v52 = vadd.s32 1, %v9301_v36 }
 0x5cc   : > { %v3377_v19 = vsel %vm3375_vm1, %v9961_v10, %v3376_v34  ;;  %v6681_v9 = vshrl.u32 %v6663_v54, %v6679_v44  ;;  %v6684_v21 = vadd.s32 127, %v6683_v40  ;;  %v3235_v32 = vadd.s32 %v3234_v60, %v3230_v45 }
 0x5cd   : > { %vm3371_vm10 = vweird.f32 %v14217_v8  ;;  %v3381_v33 = vsel %vm3374_vm13, %v3377_v19, %v3380_v5  ;;  %vm6514_vm11 = vcmp.gt.s32.totalorder %v6513_v52, 0  ;;  %v6700_v7 = vadd.s32 3, %v6696_v12 }
 0x5ce   : > { %v3382_v59 = vsel %vm3371_vm10, nan, %v3381_v33  ;;  %v6682_v49 = vor.u32 %v6681_v9, %v6680_v48  ;;  %v6685_v24 = vshll.u32 %v6684_v21, 23  ;;  %v3236_v16 = vadd.s32 536870912, %v3235_v32 }
 0x5cf   : > { %v7360_v56 = vsel %vm18_vm0, %v14217_v8, %v3382_v59  ;;  %v6511_v31 = vor.u32 8388608, %v6510_v14  ;;  %v6515_v4 = vsel %vm6514_vm11, %v6513_v52, 0  ;;  %v3491_v23 = vshrl.u32 %v3490_v35, 23 }
 0x5d0   : > { %7426 = vst.msk [vmem:[%s10548_s19 + $0xc8] sm:$0xff] %vm7400_vm7, %v7360_v56  ;;  %v6686_v42 = vor.u32 4788187, %v6685_v24  ;;  %v3237_v22 = vshrl.u32 %v3236_v16, 30  ;;  %v14580_v28 = vand.u32 8388607, %v3487_v6  ;;  %v6689_v27 = vcvt.s32.f32 %v6682_v49 }
 0x5d1   : > { %v6517_v15 = vand.u32 31, %v6515_v4  ;;  %v14582_v54 = vand.u32 3, %v6700_v7  ;;  %v14585_v8 = vadd.s32 %v14527_v58, %v14540_v18  ;;  %v14587_v36 = vshll.u32 %v6511_v31, 8 }
 0x5d2   : > { %v6687_v20 = vand.u32 2147483647, %v6686_v42  ;;  %v3238_v11 = vshll.u32 %v3237_v22, 30  ;;  %v9185_v45 = vadd.s32 4294967169, %v3491_v23  ;;  %v3495_v14 = vor.u32 8388608, %v14580_v28 }
 0x5d3   : > { %v6518_v38 = vsub.s32 32, %v6517_v15  ;;  %v14592_v62 = vshrl.u32 %v6515_v4, 5  ;;  %v6520_v43 = vshll.u32 %v10032_v47, %v6517_v15  ;;  %vm3177_vm12 = vcmp.lt.s32.totalorder %v14370_v41, 0 }
 0x5d4   : > { %v6690_v10 = vmul.f32 %v6689_v27, %v6687_v20  ;;  %v14589_v12 = vsub.s32 %v3235_v32, %v3238_v11  ;;  %v6523_v18 = vshll.u32 %v10033_v51, %v6517_v15  ;;  %v6526_v5 = vshll.u32 %v10034_v53, %v6517_v15 }
 0x5d5   : > { %v6521_v25 = vshrl.u32 %v10033_v51, %v6518_v38  ;;  %v6524_v34 = vshrl.u32 %v10034_v53, %v6518_v38  ;;  %v6527_v40 = vshrl.u32 %v10035_v55, %v6518_v38  ;;  %v6529_v48 = vshll.u32 %v10035_v55, %v6517_v15 }
 0x5d6   : > { %v6691_v44 = vxor.u32 2147483648, %v6690_v10  ;;  %v3241_v58 = vsub.s32 0, %v14589_v12  ;;  %v6530_v60 = vshrl.u32 %v10036_v57, %v6518_v38  ;;  %v6532_v21 = vshll.u32 %v10036_v57, %v6517_v15 }
 0x5d7   : > { %v6522_v35 = vor.u32 %v6521_v25, %v6520_v43  ;;  %v6525_v9 = vor.u32 %v6524_v34, %v6523_v18  ;;  %v6528_v33 = vor.u32 %v6527_v40, %v6526_v5  ;;  %v6533_v49 = vshrl.u32 %v10037_v2, %v6518_v38 }
 0x5d8   : > { %v6692_v52 = vsel %vm6609_vm9, %v6691_v44, %v6690_v10  ;;  %v9174_v19 = vmin.u32 %v3241_v58, %v14589_v12  ;;  %v6531_v59 = vor.u32 %v6530_v60, %v6529_v48  ;;  %v3261_v16 = vsub.s32 4, %v3237_v22  ;;  %v14653_v48 = vpop.f32.mrb[29].mxu0 }
 0x5d9   : > { %v6695_v32 = vsel %vm14548_vm4, %v14314_v39, %v6692_v52  ;;  %v3497_v56 = vadd.s32 1, %v9185_v45  ;;  %vm14614_vm14 = vcmp.le.f32.partialorder %v3175_v46, 0.7853982  ;;  %v6519_v31 = vshrl.u32 %v10032_v47, %v6518_v38 }
 0x5da   : > { %9964 = vcosq.f32 %v6695_v32  ;;  %v3243_v24 = vclz %v9174_v19  ;;  %v6534_v4 = vor.u32 %v6533_v49, %v6532_v21  ;;  %vm6535_vm2 = vcmp.lt.s32.totalorder %v14592_v62, 1 }
 0x5db   : > { %9966 = vsinq.f32 %v6695_v32  ;;  %vm6537_vm15 = vcmp.lt.s32.totalorder %v14592_v62, 3  ;;  %vm6538_vm8 = vcmp.lt.s32.totalorder %v14592_v62, 4  ;;  %v6543_v42 = vsel %vm6535_vm2, %v6522_v35, %v6525_v9 }
 0x5dc   : > { %v9175_v30 = vadd.s32 4294967294, %v3243_v24  ;;  %v6540_v23 = vsel %vm6538_vm8, %v6528_v33, 2102212464  ;;  %v6544_v15 = vsel %vm6538_vm8, %v6531_v59, 920167782  ;;  %v6547_v46 = vsel %vm6535_vm2, %v6525_v9, %v6528_v33 }
 0x5dd   : > { %v6548_v20 = vsel %vm6538_vm8, %v6534_v4, 1326507024  ;;  %vm6536_vm13 = vcmp.lt.s32.totalorder %v14592_v62, 2  ;;  %v6545_v27 = vsel %vm6537_vm15, %v6528_v33, %v6544_v15  ;;  %vm6703_vm1 = vcmp.eq.s32.totalorder %v14582_v54, 0 }
 0x5de   : > { %vm9176_vm9 = vcmp.lt.s32.totalorder %v9175_v30, 0  ;;  %v6549_v11 = vsel %vm6537_vm15, %v6531_v59, %v6548_v20  ;;  %v3262_v10 = vsel %vm3177_vm12, %v3261_v16, %v3237_v22  ;;  %v6546_v45 = vsel %vm6536_vm13, %v6543_v42, %v6545_v27 }
 0x5df   : > { %v3246_v38 = vsel %vm9176_vm9, 0, %v9175_v30  ;;  %v6550_v43 = vsel %vm6536_vm13, %v6547_v46, %v6549_v11  ;;  %vm6702_vm4 = vcmp.lt.s32.totalorder %v14582_v54, 2  ;;  %v6539_v44 = vsel %vm6535_vm2, %v6519_v31, %v6522_v35 }
 0x5e0   : > { %v3247_v25 = vsub.s32 32, %v3246_v38  ;;  %v3251_v34 = vsub.s32 4294967266, %v3246_v38  ;;  %v6541_v58 = vsel %vm6537_vm15, %v6525_v9, %v6540_v23  ;;  %vm6699_vm5 = vweird.f32 %v14314_v39 }
 0x5e1   : > { %v14645_v22 = vmul.u32.u64.low %v14587_v36, %v6550_v43  ;;  %v14646_v18 = vmul.u32.u64.high %v14587_v36, %v6550_v43, %v14645_v22  ;;  %v14649_v40 = vmul.u32.u64.low %v14587_v36, %v6546_v45  ;;  %v14650_v5 = vmul.u32.u64.high %v14587_v36, %v6546_v45, %v14649_v40 }
 0x5e2   : > { %v3248_v60 = vshll.u32 %v14589_v12, %v3246_v38  ;;  %v3249_v35 = vshrl.u32 %v14585_v8, %v3247_v25  ;;  %v3252_v52 = vadd.s32 127, %v3251_v34  ;;  %vm3498_vm6 = vcmp.gt.s32.totalorder %v3497_v56, 0 }
 0x5e3   : > { %vm6706_vm3 = vcmp.eq.s32.totalorder %v14582_v54, 2  ;;  %v6542_v19 = vsel %vm6536_vm13, %v6539_v44, %v6541_v58  ;;  %v3499_v9 = vsel %vm3498_vm6, %v3497_v56, 0  ;;  %v14662_v21 = vshll.u32 %v3495_v14, 8 }
 0x5e4   : > { %v9965_v32 = vpop.eup %9964  ;;  %v3250_v33 = vor.u32 %v3249_v35, %v3248_v60  ;;  %v3253_v59 = vshll.u32 %v3252_v52, 23  ;;  %v3264_v12 = vsel %vm14614_vm14, 0, %v3262_v10  ;;  %v3501_v49 = vand.u32 31, %v3499_v9 }
 0x5e5   : > { %v9967_v8 = vpop.eup %9966  ;;  %v6707_v24 = vxor.u32 2147483648, %v9965_v32  ;;  %vm6560_vm10 = vc.u32 %v14646_v18, %v14649_v40  ;;  %v6561_v62 = vadd.s32 1, %v14650_v5  ;;  %v14671_v16 = vadd.f32 %v14189_v50, %v10066_v1 }
 0x5e6   : > { %v6704_v28 = vxor.u32 2147483648, %v9967_v8  ;;  %v3254_v14 = vor.u32 4788187, %v3253_v59  ;;  %v6558_v56 = vmul.u32 %v14587_v36, %v6542_v19  ;;  %v3502_v31 = vsub.s32 32, %v3501_v49 }
 0x5e7   : > { %v6708_v4 = vsel %vm6706_vm3, %v6707_v24, %v9967_v8  ;;  %v3268_v30 = vadd.s32 3, %v3264_v12  ;;  %v6562_v42 = vsel %vm6560_vm10, %v6561_v62, %v14650_v5  ;;  %v14677_v23 = vshrl.u32 %v3499_v9, 5 }
 0x5e8   : > { %v6705_v15 = vsel %vm6703_vm1, %v9965_v32, %v6704_v28  ;;  %v3255_v46 = vand.u32 2147483647, %v3254_v14  ;;  %v3257_v50 = vcvt.s32.f32 %v3250_v33  ;;  %v6563_v20 = vadd.s32 %v6562_v42, %v6558_v56 }
 0x5e9   : > { %v6709_v27 = vsel %vm6702_vm4, %v6705_v15, %v6708_v4  ;;  %v3504_v36 = vshll.u32 %v10032_v47, %v3501_v49  ;;  %v3505_v11 = vshrl.u32 %v10033_v51, %v3502_v31  ;;  %v3508_v38 = vshrl.u32 %v10034_v53, %v3502_v31 }
 0x5ea   : > { %v6710_v10 = vsel %vm6699_vm5, nan, %v6709_v27  ;;  %v3258_v45 = vmul.f32 %v3257_v50, %v3255_v46  ;;  %v6564_v43 = vadd.s32 536870912, %v6563_v20  ;;  %v3511_v25 = vshrl.u32 %v10035_v55, %v3502_v31 }
 0x5eb   : > { %v7392_v34 = vsel %vm18_vm0, %v14314_v39, %v6710_v10  ;;  %v3506_v44 = vor.u32 %v3505_v11, %v3504_v36  ;;  %v3507_v54 = vshll.u32 %v10033_v51, %v3501_v49  ;;  %v3510_v58 = vshll.u32 %v10034_v53, %v3501_v49 }
 0x5ec   : > { %7458 = vst.msk [vmem:[%s10548_s19 + $0x1c8] sm:$0xff] %vm7400_vm7, %v7392_v34  ;;  %v3259_v22 = vxor.u32 2147483648, %v3258_v45  ;;  %v6565_v5 = vshrl.u32 %v6564_v43, 30  ;;  %v3513_v60 = vshll.u32 %v10035_v55, %v3501_v49  ;;  %v3514_v35 = vshrl.u32 %v10036_v57, %v3502_v31  ;;  %v14729_v34 = vpop.f32.mrb[29].mxu1 }
 0x5ed   : > { %v3509_v52 = vor.u32 %v3508_v38, %v3507_v54  ;;  %v3512_v19 = vor.u32 %v3511_v25, %v3510_v58  ;;  %v3516_v9 = vshll.u32 %v10036_v57, %v3501_v49  ;;  %v3517_v32 = vshrl.u32 %v10037_v2, %v3502_v31 }
 0x5ee   : > { %v3260_v39 = vsel %vm3177_vm12, %v3259_v22, %v3258_v45  ;;  %v14702_v33 = vand.u32 3, %v3268_v30  ;;  %v6566_v59 = vshll.u32 %v6565_v5, 30  ;;  %v3515_v12 = vor.u32 %v3514_v35, %v3513_v60 }
 0x5ef   : > { %v3263_v8 = vsel %vm14614_vm14, %v14370_v41, %v3260_v39  ;;  %v3503_v24 = vshrl.u32 %v10032_v47, %v3502_v31  ;;  %v3518_v62 = vor.u32 %v3517_v32, %v3516_v9  ;;  %v6818_v28 = vand.u32 2139095040, %v14671_v16 }
 0x5f0   : > { %9968 = vcosq.f32 %v3263_v8  ;;  %v14709_v49 = vsub.s32 %v6563_v20, %v6566_v59  ;;  %vm3519_vm11 = vcmp.lt.s32.totalorder %v14677_v23, 1  ;;  %vm3522_vm12 = vcmp.lt.s32.totalorder %v14677_v23, 4 }
 0x5f1   : > { %9970 = vsinq.f32 %v3263_v8  ;;  %vm3520_vm2 = vcmp.lt.s32.totalorder %v14677_v23, 2  ;;  %v3524_v14 = vsel %vm3522_vm12, %v3512_v19, 2102212464  ;;  %v3527_v56 = vsel %vm3519_vm11, %v3506_v44, %v3509_v52 }
 0x5f2   : > { %v6569_v7 = vsub.s32 0, %v14709_v49  ;;  %v6589_v4 = vsub.s32 4, %v6565_v5  ;;  %vm3521_vm14 = vcmp.lt.s32.totalorder %v14677_v23, 3  ;;  %v3528_v31 = vsel %vm3522_vm12, %v3515_v12, 920167782 }
 0x5f3   : > { %v3523_v30 = vsel %vm3519_vm11, %v3503_v24, %v3506_v44  ;;  %v3529_v42 = vsel %vm3521_vm14, %v3512_v19, %v3528_v31  ;;  %v3531_v15 = vsel %vm3519_vm11, %v3509_v52, %v3512_v19  ;;  %v3532_v46 = vsel %vm3522_vm12, %v3518_v62, 1326507024 }
 0x5f4   : > { %v9302_v50 = vmin.u32 %v6569_v7, %v14709_v49  ;;  %v3525_v20 = vsel %vm3521_vm14, %v3509_v52, %v3524_v14  ;;  %v3530_v27 = vsel %vm3520_vm2, %v3527_v56, %v3529_v42  ;;  %v3533_v36 = vsel %vm3521_vm14, %v3515_v12, %v3532_v46 }
 0x5f5   : > { %vm6505_vm15 = vcmp.lt.s32.totalorder %v14480_v17, 0  ;;  %v3534_v11 = vsel %vm3520_vm2, %v3531_v15, %v3533_v36  ;;  %v14723_v38 = vmul.u32.u64.low %v14662_v21, %v3530_v27  ;;  %v14724_v10 = vmul.u32.u64.high %v14662_v21, %v3530_v27, %v14723_v38 }
 0x5f6   : > { %v6571_v45 = vclz %v9302_v50  ;;  %v6590_v43 = vsel %vm6505_vm15, %v6589_v4, %v6565_v5  ;;  %v6815_v25 = vand.u32 2147483647, %v14671_v16  ;;  %v3526_v44 = vsel %vm3520_vm2, %v3523_v30, %v3525_v20 }
 0x5f7   : > { %v14734_v54 = vmul.u32.u64.low %v14662_v21, %v3534_v11  ;;  %v14735_v58 = vmul.u32.u64.high %v14662_v21, %v3534_v11, %v14734_v54  ;;  %v6819_v22 = vshrl.u32 %v6818_v28, 23  ;;  %vm3270_vm8 = vcmp.lt.s32.totalorder %v14702_v33, 2 }
 0x5f8   : > { %vm14740_vm9 = vcmp.le.f32.partialorder %v6503_v29, 0.7853982  ;;  %v9303_v5 = vadd.s32 4294967294, %v6571_v45  ;;  %vm3271_vm13 = vcmp.eq.s32.totalorder %v14702_v33, 0  ;;  %vm3274_vm1 = vcmp.eq.s32.totalorder %v14702_v33, 2 }
 0x5f9   : > { %v3545_v23 = vadd.s32 1, %v14724_v10  ;;  %v9313_v35 = vadd.s32 4294967169, %v6819_v22  ;;  %v6559_v19 = vadd.s32 %v14649_v40, %v14646_v18  ;;  %v6592_v9 = vsel %vm14740_vm9, 0, %v6590_v43 }
 0x5fa   : > { %v9969_v52 = vpop.eup %9968  ;;  %vm9304_vm4 = vcmp.lt.s32.totalorder %v9303_v5, 0  ;;  %v3542_v29 = vmul.u32 %v14662_v21, %v3526_v44  ;;  %vm3544_vm5 = vc.u32 %v14735_v58, %v14723_v38  ;;  %v6822_v12 = vand.u32 8388607, %v6815_v25 }
 0x5fb   : > { %v9971_v32 = vpop.eup %9970  ;;  %v3275_v39 = vxor.u32 2147483648, %v9969_v52  ;;  %v6574_v59 = vsel %vm9304_vm4, 0, %v9303_v5  ;;  %v14757_v18 = vadd.f32 %v10066_v1, %v14299_v63  ;;  %v3546_v28 = vsel %vm3544_vm5, %v3545_v23, %v14724_v10 }
 0x5fc   : > { %v3272_v8 = vxor.u32 2147483648, %v9971_v32  ;;  %v6575_v24 = vsub.s32 32, %v6574_v59  ;;  %v6579_v62 = vsub.s32 4294967266, %v6574_v59  ;;  %v6576_v21 = vshll.u32 %v14709_v49, %v6574_v59 }
 0x5fd   : > { %v3276_v40 = vsel %vm3274_vm1, %v3275_v39, %v9971_v32  ;;  %v6825_v14 = vadd.s32 1, %v9313_v35  ;;  %v3547_v31 = vadd.s32 %v3546_v28, %v3542_v29  ;;  %vm3267_vm6 = vweird.f32 %v14370_v41 }
 0x5fe   : > { %v3273_v56 = vsel %vm3271_vm13, %v9969_v52, %v3272_v8  ;;  %v6577_v7 = vshrl.u32 %v6559_v19, %v6575_v24  ;;  %v6580_v4 = vadd.s32 127, %v6579_v62  ;;  %v6596_v50 = vadd.s32 3, %v6592_v9 }
 0x5ff   : > { %v3277_v63 = vsel %vm3270_vm8, %v3273_v56, %v3276_v40  ;;  %vm6826_vm3 = vcmp.gt.s32.totalorder %v6825_v14, 0  ;;  %v3548_v49 = vadd.s32 536870912, %v3547_v31  ;;  %v6823_v11 = vor.u32 8388608, %v6822_v12 }
 0x600   : > { %v3278_v30 = vsel %vm3267_vm6, nan, %v3277_v63  ;;  %v6578_v42 = vor.u32 %v6577_v7, %v6576_v21  ;;  %v6581_v15 = vshll.u32 %v6580_v4, 23  ;;  %v6827_v20 = vsel %vm6826_vm3, %v6825_v14, 0 }
 0x601   : > { %v7359_v46 = vsel %vm18_vm0, %v14370_v41, %v3278_v30  ;;  %v3549_v36 = vshrl.u32 %v3548_v49, 30  ;;  %v3386_v10 = vand.u32 2139095040, %v14757_v18  ;;  %v6829_v33 = vand.u32 31, %v6827_v20 }
 0x602   : > { %7425 = vst.msk [vmem:[%s10548_s19 + $0xc0] sm:$0xff] %vm7400_vm7, %v7359_v46  ;;  %v6582_v27 = vor.u32 4788187, %v6581_v15  ;;  %v6585_v43 = vcvt.s32.f32 %v6578_v42  ;;  %v14774_v54 = vand.u32 3, %v6596_v50  ;;  %v3543_v22 = vadd.s32 %v14723_v38, %v14735_v58 }
 0x603   : > { %v3550_v44 = vshll.u32 %v3549_v36, 30  ;;  %v6830_v5 = vsub.s32 32, %v6829_v33  ;;  %v3383_v41 = vand.u32 2147483647, %v14757_v18  ;;  %v14780_v52 = vshll.u32 %v6823_v11, 8 }
 0x604   : > { %v6583_v45 = vand.u32 2147483647, %v6582_v27  ;;  %v3387_v19 = vshrl.u32 %v3386_v10, 23  ;;  %v14782_v9 = vshrl.u32 %v6827_v20, 5  ;;  %v6832_v29 = vshll.u32 %v10032_v47, %v6829_v33 }
 0x605   : > { %v14778_v35 = vsub.s32 %v3547_v31, %v3550_v44  ;;  %v6833_v32 = vshrl.u32 %v10033_v51, %v6830_v5  ;;  %v6836_v39 = vshrl.u32 %v10034_v53, %v6830_v5  ;;  %vm3489_vm10 = vcmp.lt.s32.totalorder %v14535_v61, 0 }
 0x606   : > { %v6586_v23 = vmul.f32 %v6585_v43, %v6583_v45  ;;  %v6835_v58 = vshll.u32 %v10033_v51, %v6829_v33  ;;  %v6839_v12 = vshrl.u32 %v10035_v55, %v6830_v5  ;;  %v6838_v24 = vshll.u32 %v10034_v53, %v6829_v33 }
 0x607   : > { %v3553_v38 = vsub.s32 0, %v14778_v35  ;;  %v6834_v8 = vor.u32 %v6833_v32, %v6832_v29  ;;  %v6841_v62 = vshll.u32 %v10035_v55, %v6829_v33  ;;  %v6842_v40 = vshrl.u32 %v10036_v57, %v6830_v5 }
 0x608   : > { %v6587_v59 = vxor.u32 2147483648, %v6586_v23  ;;  %v6837_v14 = vor.u32 %v6836_v39, %v6835_v58  ;;  %v6844_v56 = vshll.u32 %v10036_v57, %v6829_v33  ;;  %v6840_v4 = vor.u32 %v6839_v12, %v6838_v24 }
 0x609   : > { %v9186_v28 = vmin.u32 %v3553_v38, %v14778_v35  ;;  %v6843_v31 = vor.u32 %v6842_v40, %v6841_v62  ;;  %v6845_v63 = vshrl.u32 %v10037_v2, %v6830_v5  ;;  %v3573_v42 = vsub.s32 4, %v3549_v36 }
 0x60a   : > { %v6588_v21 = vsel %vm6505_vm15, %v6587_v59, %v6586_v23  ;;  %v9181_v15 = vadd.s32 4294967169, %v3387_v19  ;;  %v6831_v49 = vshrl.u32 %v10032_v47, %v6830_v5  ;;  %vm6847_vm11 = vcmp.lt.s32.totalorder %v14782_v9, 1 }
 0x60b   : > { %v6591_v7 = vsel %vm14740_vm9, %v14480_v17, %v6588_v21  ;;  %v3555_v30 = vclz %v9186_v28  ;;  %v6846_v46 = vor.u32 %v6845_v63, %v6844_v56  ;;  %vm14806_vm12 = vcmp.le.f32.partialorder %v3487_v6, 0.7853982 }
 0x60c   : > { %9972 = vcosq.f32 %v6591_v7  ;;  %vm6849_vm2 = vcmp.lt.s32.totalorder %v14782_v9, 3  ;;  %vm6850_vm14 = vcmp.lt.s32.totalorder %v14782_v9, 4  ;;  %v6855_v20 = vsel %vm6847_vm11, %v6834_v8, %v6837_v14 }
 0x60d   : > { %9974 = vsinq.f32 %v6591_v7  ;;  %v9187_v60 = vadd.s32 4294967294, %v3555_v30  ;;  %v6852_v27 = vsel %vm6850_vm14, %v6840_v4, 2102212464  ;;  %v6856_v11 = vsel %vm6850_vm14, %v6843_v31, 920167782 }
 0x60e   : > { %v6859_v10 = vsel %vm6847_vm11, %v6837_v14, %v6840_v4  ;;  %v6860_v33 = vsel %vm6850_vm14, %v6846_v46, 1326507024  ;;  %vm6848_vm8 = vcmp.lt.s32.totalorder %v14782_v9, 2  ;;  %v6857_v6 = vsel %vm6849_vm2, %v6840_v4, %v6856_v11 }
 0x60f   : > { %vm9188_vm15 = vcmp.lt.s32.totalorder %v9187_v60, 0  ;;  %v6861_v45 = vsel %vm6849_vm2, %v6843_v31, %v6860_v33  ;;  %v3574_v44 = vsel %vm3489_vm10, %v3573_v42, %v3549_v36  ;;  %v6858_v5 = vsel %vm6848_vm8, %v6855_v20, %v6857_v6 }
 0x610   : > { %v3558_v43 = vsel %vm9188_vm15, 0, %v9187_v60  ;;  %v6862_v23 = vsel %vm6848_vm8, %v6859_v10, %v6861_v45  ;;  %v6851_v32 = vsel %vm6847_vm11, %v6831_v49, %v6834_v8  ;;  %v6853_v39 = vsel %vm6849_vm2, %v6837_v14, %v6852_v27  ;;  %v14842_v8 = vpop.f32.mrb[30].mxu0 }
 0x611   : > { %v3559_v19 = vsub.s32 32, %v3558_v43  ;;  %v3563_v29 = vsub.s32 4294967266, %v3558_v43  ;;  %vm6595_vm9 = vweird.f32 %v14480_v17  ;;  %v3560_v12 = vshll.u32 %v14778_v35, %v3558_v43 }
 0x612   : > { %v14833_v59 = vmul.u32.u64.low %v14780_v52, %v6862_v23  ;;  %v14834_v38 = vmul.u32.u64.high %v14780_v52, %v6862_v23, %v14833_v59  ;;  %v14837_v36 = vmul.u32.u64.low %v14780_v52, %v6858_v5  ;;  %v14838_v58 = vmul.u32.u64.high %v14780_v52, %v6858_v5, %v14837_v36 }
 0x613   : > { %v3561_v24 = vshrl.u32 %v3543_v22, %v3559_v19  ;;  %v3564_v62 = vadd.s32 127, %v3563_v29  ;;  %v3393_v40 = vadd.s32 1, %v9181_v15  ;;  %vm6598_vm13 = vcmp.lt.s32.totalorder %v14774_v54, 2 }
 0x614   : > { %vm6599_vm1 = vcmp.eq.s32.totalorder %v14774_v54, 0  ;;  %vm6602_vm4 = vcmp.eq.s32.totalorder %v14774_v54, 2  ;;  %v6854_v21 = vsel %vm6848_vm8, %v6851_v32, %v6853_v39  ;;  %v3390_v35 = vand.u32 8388607, %v3383_v41 }
 0x615   : > { %v3562_v14 = vor.u32 %v3561_v24, %v3560_v12  ;;  %v3565_v56 = vshll.u32 %v3564_v62, 23  ;;  %vm3394_vm5 = vcmp.gt.s32.totalorder %v3393_v40, 0  ;;  %v3576_v4 = vsel %vm14806_vm12, 0, %v3574_v44 }
 0x616   : > { %v9973_v28 = vpop.eup %9972  ;;  %vm6872_vm6 = vc.u32 %v14834_v38, %v14837_v36  ;;  %v6873_v31 = vadd.s32 1, %v14838_v58  ;;  %v6870_v30 = vmul.u32 %v14780_v52, %v6854_v21  ;;  %v3395_v42 = vsel %vm3394_vm5, %v3393_v40, 0 }
 0x617   : > { %v9975_v22 = vpop.eup %9974  ;;  %v6603_v7 = vxor.u32 2147483648, %v9973_v28  ;;  %v3566_v9 = vor.u32 4788187, %v3565_v56  ;;  %v3397_v46 = vand.u32 31, %v3395_v42  ;;  %v14862_v60 = vadd.f32 %v10066_v1, %v14374_v37 }
 0x618   : > { %v6600_v63 = vxor.u32 2147483648, %v9975_v22  ;;  %v6874_v49 = vsel %vm6872_vm6, %v6873_v31, %v14838_v58  ;;  %v3569_v11 = vcvt.s32.f32 %v3562_v14  ;;  %v3580_v33 = vadd.s32 3, %v3576_v4 }
 0x619   : > { %v6604_v15 = vsel %vm6602_vm4, %v6603_v7, %v9975_v22  ;;  %v3567_v27 = vand.u32 2147483647, %v3566_v9  ;;  %v6875_v10 = vadd.s32 %v6874_v49, %v6870_v30  ;;  %v3391_v6 = vor.u32 8388608, %v3390_v35 }
 0x61a   : > { %v6601_v20 = vsel %vm6599_vm1, %v9973_v28, %v6600_v63  ;;  %v3398_v45 = vsub.s32 32, %v3397_v46  ;;  %v3396_v37 = vshrl.u32 %v3395_v42, 5  ;;  %v3400_v19 = vshll.u32 %v10032_v47, %v3397_v46 }
 0x61b   : > { %v6605_v52 = vsel %vm6598_vm13, %v6601_v20, %v6604_v15  ;;  %v3570_v44 = vmul.f32 %v3569_v11, %v3567_v27  ;;  %v6876_v5 = vadd.s32 536870912, %v6875_v10  ;;  %v3403_v59 = vshll.u32 %v10033_v51, %v3397_v46 }
 0x61c   : > { %v6606_v43 = vsel %vm6595_vm9, nan, %v6605_v52  ;;  %v3401_v29 = vshrl.u32 %v10033_v51, %v3398_v45  ;;  %v3404_v54 = vshrl.u32 %v10034_v53, %v3398_v45  ;;  %v3407_v58 = vshrl.u32 %v10035_v55, %v3398_v45 }
 0x61d   : > { %v7391_v23 = vsel %vm18_vm0, %v14480_v17, %v6606_v43  ;;  %v3571_v32 = vxor.u32 2147483648, %v3570_v44  ;;  %v14878_v39 = vshrl.u32 %v6876_v5, 30  ;;  %v3406_v24 = vshll.u32 %v10034_v53, %v3397_v46 }
 0x61e   : > { %7457 = vst.msk [vmem:[%s10548_s19 + $0x1c0] sm:$0xff] %vm7400_vm7, %v7391_v23  ;;  %v3402_v12 = vor.u32 %v3401_v29, %v3400_v19  ;;  %v3409_v17 = vshll.u32 %v10035_v55, %v3397_v46  ;;  %v3410_v62 = vshrl.u32 %v10036_v57, %v3398_v45  ;;  %v3405_v28 = vor.u32 %v3404_v54, %v3403_v59  ;;  %v14917_v29 = vpop.f32.mrb[30].mxu1 }
 0x61f   : > { %v3572_v40 = vsel %vm3489_vm10, %v3571_v32, %v3570_v44  ;;  %v6878_v21 = vshll.u32 %v14878_v39, 30  ;;  %v3412_v14 = vshll.u32 %v10036_v57, %v3397_v46  ;;  %v3408_v35 = vor.u32 %v3407_v58, %v3406_v24 }
 0x620   : > { %v3575_v56 = vsel %vm14806_vm12, %v14535_v61, %v3572_v40  ;;  %v3411_v22 = vor.u32 %v3410_v62, %v3409_v17  ;;  %v3413_v7 = vshrl.u32 %v10037_v2, %v3398_v45  ;;  %v14897_v31 = vadd.f32 %v14469_v26, %v10066_v1 }
 0x621   : > { %9976 = vcosq.f32 %v3575_v56  ;;  %v14893_v4 = vsub.s32 %v6875_v10, %v6878_v21  ;;  %v3581_v63 = vand.u32 3, %v3580_v33  ;;  %v6714_v30 = vand.u32 2139095040, %v14862_v60 }
 0x622   : > { %9978 = vsinq.f32 %v3575_v56  ;;  %v3414_v9 = vor.u32 %v3413_v7, %v3412_v14  ;;  %vm6817_vm3 = vcmp.lt.s32.totalorder %v14671_v16, 0  ;;  %vm3415_vm10 = vcmp.lt.s32.totalorder %v3396_v37, 1 }
 0x623   : > { %v6881_v50 = vsub.s32 0, %v14893_v4  ;;  %vm3418_vm11 = vcmp.lt.s32.totalorder %v3396_v37, 4  ;;  %v3431_v42 = vshll.u32 %v3391_v6, 8  ;;  %vm3417_vm12 = vcmp.lt.s32.totalorder %v3396_v37, 3 }
 0x624   : > { %v3420_v15 = vsel %vm3418_vm11, %v3408_v35, 2102212464  ;;  %v3423_v49 = vsel %vm3415_vm10, %v3402_v12, %v3405_v28  ;;  %v3424_v46 = vsel %vm3418_vm11, %v3411_v22, 920167782  ;;  %v3399_v20 = vshrl.u32 %v10032_v47, %v3398_v45 }
 0x625   : > { %v9314_v26 = vmin.u32 %v6881_v50, %v14893_v4  ;;  %vm3416_vm2 = vcmp.lt.s32.totalorder %v3396_v37, 2  ;;  %v3425_v27 = vsel %vm3417_vm12, %v3408_v35, %v3424_v46  ;;  %v3427_v10 = vsel %vm3415_vm10, %v3405_v28, %v3408_v35 }
 0x626   : > { %v3426_v11 = vsel %vm3416_vm2, %v3423_v49, %v3425_v27  ;;  %v3428_v52 = vsel %vm3418_vm11, %v3414_v9, 1326507024  ;;  %v6715_v33 = vshrl.u32 %v6714_v30, 23  ;;  %vm3582_vm14 = vcmp.lt.s32.totalorder %v3581_v63, 2 }
 0x627   : > { %v6883_v6 = vclz %v9314_v26  ;;  %v3419_v43 = vsel %vm3415_vm10, %v3399_v20, %v3402_v12  ;;  %v3421_v44 = vsel %vm3417_vm12, %v3405_v28, %v3420_v15  ;;  %vm3579_vm15 = vweird.f32 %v14535_v61 }
 0x628   : > { %v6901_v5 = vsub.s32 4, %v14878_v39  ;;  %v3429_v45 = vsel %vm3417_vm12, %v3411_v22, %v3428_v52  ;;  %v14913_v23 = vmul.u32.u64.low %v3431_v42, %v3426_v11  ;;  %v14914_v19 = vmul.u32.u64.high %v3431_v42, %v3426_v11, %v14913_v23 }
 0x629   : > { %vm3583_vm8 = vcmp.eq.s32.totalorder %v3581_v63, 0  ;;  %v9315_v54 = vadd.s32 4294967294, %v6883_v6  ;;  %v3430_v32 = vsel %vm3416_vm2, %v3427_v10, %v3429_v45  ;;  %v9309_v59 = vadd.s32 4294967169, %v6715_v33 }
 0x62a   : > { %vm3586_vm9 = vcmp.eq.s32.totalorder %v3581_v63, 2  ;;  %v3422_v58 = vsel %vm3416_vm2, %v3419_v43, %v3421_v44  ;;  %v14921_v12 = vmul.u32.u64.low %v3431_v42, %v3430_v32  ;;  %v14922_v24 = vmul.u32.u64.high %v3431_v42, %v3430_v32, %v14921_v12 }
 0x62b   : > { %v9977_v17 = vpop.eup %9976  ;;  %v6871_v62 = vadd.s32 %v14837_v36, %v14834_v38  ;;  %vm9316_vm13 = vcmp.lt.s32.totalorder %v9315_v54, 0  ;;  %v6711_v40 = vand.u32 2147483647, %v14862_v60  ;;  %v6721_v21 = vadd.s32 1, %v9309_v59 }
 0x62c   : > { %v9979_v28 = vpop.eup %9978  ;;  %v3587_v14 = vxor.u32 2147483648, %v9977_v17  ;;  %v6886_v56 = vsel %vm9316_vm13, 0, %v9315_v54  ;;  %v6902_v35 = vsel %vm6817_vm3, %v6901_v5, %v14878_v39  ;;  %v3441_v37 = vadd.s32 1, %v14914_v19 }
 0x62d   : > { %v3584_v22 = vxor.u32 2147483648, %v9979_v28  ;;  %v6887_v7 = vsub.s32 32, %v6886_v56  ;;  %v6891_v9 = vsub.s32 4294967266, %v6886_v56  ;;  %v3438_v30 = vmul.u32 %v3431_v42, %v3422_v58 }
 0x62e   : > { %v3588_v50 = vsel %vm3586_vm9, %v3587_v14, %v9979_v28  ;;  %v6888_v38 = vshll.u32 %v14893_v4, %v6886_v56  ;;  %vm3440_vm1 = vc.u32 %v14922_v24, %v14913_v23  ;;  %vm6722_vm4 = vcmp.gt.s32.totalorder %v6721_v21, 0 }
 0x62f   : > { %v3585_v36 = vsel %vm3583_vm8, %v9977_v17, %v3584_v22  ;;  %v6889_v15 = vshrl.u32 %v6871_v62, %v6887_v7  ;;  %v6892_v49 = vadd.s32 127, %v6891_v9  ;;  %v3442_v39 = vsel %vm3440_vm1, %v3441_v37, %v14914_v19 }
 0x630   : > { %v3589_v46 = vsel %vm3582_vm14, %v3585_v36, %v3588_v50  ;;  %v3443_v26 = vadd.s32 %v3442_v39, %v3438_v30  ;;  %v6718_v42 = vand.u32 8388607, %v6711_v40  ;;  %v6723_v20 = vsel %vm6722_vm4, %v6721_v21, 0 }
 0x631   : > { %v3590_v4 = vsel %vm3579_vm15, nan, %v3589_v46  ;;  %v6890_v27 = vor.u32 %v6889_v15, %v6888_v38  ;;  %v6893_v11 = vshll.u32 %v6892_v49, 23  ;;  %vm14947_vm5 = vcmp.le.f32.partialorder %v6815_v25, 0.7853982 }
 0x632   : > { %v7362_v10 = vsel %vm18_vm0, %v14535_v61, %v3590_v4  ;;  %v3444_v63 = vadd.s32 536870912, %v3443_v26  ;;  %v6725_v33 = vand.u32 31, %v6723_v20  ;;  %v6904_v43 = vsel %vm14947_vm5, 0, %v6902_v35 }
 0x633   : > { %7428 = vst.msk [vmem:[%s10548_s19 + $0xd8] sm:$0xff] %vm7400_vm7, %v7362_v10  ;;  %v6894_v6 = vor.u32 4788187, %v6893_v11  ;;  %v3695_v44 = vand.u32 2147483647, %v14897_v31  ;;  %v14958_v5 = vadd.f32 %v14542_v13, %v10066_v1  ;;  %v6719_v25 = vor.u32 8388608, %v6718_v42 }
 0x634   : > { %v14960_v61 = vshrl.u32 %v3444_v63, 30  ;;  %v6726_v45 = vsub.s32 32, %v6725_v33  ;;  %v3698_v19 = vand.u32 2139095040, %v14897_v31  ;;  %v6897_v32 = vcvt.s32.f32 %v6890_v27 }
 0x635   : > { %v6895_v54 = vand.u32 2147483647, %v6894_v6  ;;  %v14963_v59 = vshrl.u32 %v6723_v20, 5  ;;  %v6728_v58 = vshll.u32 %v10032_v47, %v6725_v33  ;;  %v6731_v62 = vshll.u32 %v10033_v51, %v6725_v33 }
 0x636   : > { %v3446_v12 = vshll.u32 %v14960_v61, 30  ;;  %v6729_v17 = vshrl.u32 %v10033_v51, %v6726_v45  ;;  %v6734_v13 = vshll.u32 %v10034_v53, %v6725_v33  ;;  %v6732_v28 = vshrl.u32 %v10034_v53, %v6726_v45 }
 0x637   : > { %v6898_v21 = vmul.f32 %v6897_v32, %v6895_v54  ;;  %v6735_v14 = vshrl.u32 %v10035_v55, %v6726_v45  ;;  %v6738_v56 = vshrl.u32 %v10036_v57, %v6726_v45  ;;  %v6908_v35 = vadd.s32 3, %v6904_v43 }
 0x638   : > { %v14973_v37 = vsub.s32 %v3443_v26, %v3446_v12  ;;  %v6737_v22 = vshll.u32 %v10035_v55, %v6725_v33  ;;  %v6741_v7 = vshrl.u32 %v10037_v2, %v6726_v45  ;;  %v6730_v30 = vor.u32 %v6729_v17, %v6728_v58 }
 0x639   : > { %v6899_v9 = vxor.u32 2147483648, %v6898_v21  ;;  %v6733_v50 = vor.u32 %v6732_v28, %v6731_v62  ;;  %v6736_v38 = vor.u32 %v6735_v14, %v6734_v13  ;;  %v6740_v49 = vshll.u32 %v10036_v57, %v6725_v33 }
 0x63a   : > { %v3449_v36 = vsub.s32 0, %v14973_v37  ;;  %v6739_v15 = vor.u32 %v6738_v56, %v6737_v22  ;;  %v14979_v39 = vshll.u32 %v6719_v25, 8  ;;  %vm3385_vm6 = vcmp.lt.s32.totalorder %v14757_v18, 0 }
 0x63b   : > { %v6900_v46 = vsel %vm6817_vm3, %v6899_v9, %v6898_v21  ;;  %v6727_v26 = vshrl.u32 %v10032_v47, %v6726_v45  ;;  %vm6743_vm10 = vcmp.lt.s32.totalorder %v14963_v59, 1  ;;  %v3699_v42 = vshrl.u32 %v3698_v19, 23 }
 0x63c   : > { %v6903_v20 = vsel %vm14947_vm5, %v14671_v16, %v6900_v46  ;;  %v9182_v4 = vmin.u32 %v3449_v36, %v14973_v37  ;;  %v6742_v27 = vor.u32 %v6741_v7, %v6740_v49  ;;  %vm6746_vm11 = vcmp.lt.s32.totalorder %v14963_v59, 4 }
 0x63d   : > { %9980 = vcosq.f32 %v6903_v20  ;;  %v6748_v11 = vsel %vm6746_vm11, %v6736_v38, 2102212464  ;;  %v6751_v10 = vsel %vm6743_vm10, %v6730_v30, %v6733_v50  ;;  %v6752_v63 = vsel %vm6746_vm11, %v6739_v15, 920167782 }
 0x63e   : > { %9982 = vsinq.f32 %v6903_v20  ;;  %v3451_v33 = vclz %v9182_v4  ;;  %vm6744_vm3 = vcmp.lt.s32.totalorder %v14963_v59, 2  ;;  %vm6745_vm12 = vcmp.lt.s32.totalorder %v14963_v59, 3 }
 0x63f   : > { %v3469_v52 = vsub.s32 4, %v14960_v61  ;;  %v6747_v6 = vsel %vm6743_vm10, %v6727_v26, %v6730_v30  ;;  %v6753_v43 = vsel %vm6745_vm12, %v6736_v38, %v6752_v63  ;;  %v6755_v25 = vsel %vm6743_vm10, %v6733_v50, %v6736_v38  ;;  %v15037_v26 = vpop.f32.mrb[31].mxu0 }
 0x640   : > { %v9183_v45 = vadd.s32 4294967294, %v3451_v33  ;;  %v6749_v19 = vsel %vm6745_vm12, %v6733_v50, %v6748_v11  ;;  %v6754_v54 = vsel %vm6744_vm3, %v6751_v10, %v6753_v43  ;;  %v6756_v32 = vsel %vm6746_vm11, %v6742_v27, 1326507024 }
 0x641   : > { %v6757_v58 = vsel %vm6745_vm12, %v6739_v15, %v6756_v32  ;;  %v15009_v12 = vmul.u32.u64.low %v14979_v39, %v6754_v54  ;;  %v15010_v17 = vmul.u32.u64.high %v14979_v39, %v6754_v54, %v15009_v12  ;;  %v9193_v62 = vadd.s32 4294967169, %v3699_v42 }
 0x642   : > { %vm15015_vm2 = vcmp.le.f32.partialorder %v3383_v41, 0.7853982  ;;  %v3439_v21 = vadd.s32 %v14913_v23, %v14922_v24  ;;  %vm9184_vm14 = vcmp.lt.s32.totalorder %v9183_v45, 0  ;;  %v6758_v28 = vsel %vm6744_vm3, %v6755_v25, %v6757_v58 }
 0x643   : > { %v3454_v14 = vsel %vm9184_vm14, 0, %v9183_v45  ;;  %v15024_v56 = vmul.u32.u64.low %v14979_v39, %v6758_v28  ;;  %v15025_v22 = vmul.u32.u64.high %v14979_v39, %v6758_v28, %v15024_v56  ;;  %v3705_v7 = vadd.s32 1, %v9193_v62 }
 0x644   : > { %vm6907_vm15 = vweird.f32 %v14671_v16  ;;  %v3455_v9 = vsub.s32 32, %v3454_v14  ;;  %v3459_v41 = vsub.s32 4294967266, %v3454_v14  ;;  %v3470_v30 = vsel %vm3385_vm6, %v3469_v52, %v14960_v61 }
 0x645   : > { %v6750_v23 = vsel %vm6744_vm3, %v6747_v6, %v6749_v19  ;;  %v6909_v24 = vand.u32 3, %v6908_v35  ;;  %v6769_v50 = vadd.s32 1, %v15010_v17  ;;  %v3702_v38 = vand.u32 8388607, %v3695_v44 }
 0x646   : > { %vm3706_vm8 = vcmp.gt.s32.totalorder %v3705_v7, 0  ;;  %v3456_v36 = vshll.u32 %v14973_v37, %v3454_v14  ;;  %v3457_v15 = vshrl.u32 %v3439_v21, %v3455_v9  ;;  %v3460_v49 = vadd.s32 127, %v3459_v41 }
 0x647   : > { %v3707_v46 = vsel %vm3706_vm8, %v3705_v7, 0  ;;  %v9981_v42 = vpop.eup %9980  ;;  %v3472_v61 = vsel %vm15015_vm2, 0, %v3470_v30  ;;  %v6766_v59 = vmul.u32 %v14979_v39, %v6750_v23  ;;  %vm6768_vm9 = vc.u32 %v15025_v22, %v15009_v12 }
 0x648   : > { %v3709_v35 = vand.u32 31, %v3707_v46  ;;  %v9983_v20 = vpop.eup %9982  ;;  %v6915_v4 = vxor.u32 2147483648, %v9981_v42  ;;  %v3458_v27 = vor.u32 %v3457_v15, %v3456_v36  ;;  %v3461_v11 = vshll.u32 %v3460_v49, 23 }
 0x649   : > { %v6770_v37 = vsel %vm6768_vm9, %v6769_v50, %v15010_v17  ;;  %v6912_v10 = vxor.u32 2147483648, %v9983_v20  ;;  %vm6914_vm13 = vcmp.eq.s32.totalorder %v6909_v24, 2  ;;  %vm6910_vm1 = vcmp.lt.s32.totalorder %v6909_v24, 2 }
 0x64a   : > { %v6771_v63 = vadd.s32 %v6770_v37, %v6766_v59  ;;  %v3710_v33 = vsub.s32 32, %v3709_v35  ;;  %vm6911_vm4 = vcmp.eq.s32.totalorder %v6909_v24, 0  ;;  %v6916_v52 = vsel %vm6914_vm13, %v6915_v4, %v9983_v20 }
 0x64b   : > { %v3462_v6 = vor.u32 4788187, %v3461_v11  ;;  %v6913_v43 = vsel %vm6911_vm4, %v9981_v42, %v6912_v10  ;;  %v3476_v39 = vadd.s32 3, %v3472_v61  ;;  %v3703_v45 = vor.u32 8388608, %v3702_v38 }
 0x64c   : > { %v6772_v25 = vadd.s32 536870912, %v6771_v63  ;;  %v6917_v19 = vsel %vm6910_vm1, %v6913_v43, %v6916_v52  ;;  %v3465_v32 = vcvt.s32.f32 %v3458_v27  ;;  %v3708_v58 = vshrl.u32 %v3707_v46, 5 }
 0x64d   : > { %v3463_v54 = vand.u32 2147483647, %v3462_v6  ;;  %v6918_v17 = vsel %vm6907_vm15, nan, %v6917_v19  ;;  %v3713_v21 = vshrl.u32 %v10033_v51, %v3710_v33  ;;  %v3719_v28 = vshrl.u32 %v10035_v55, %v3710_v33 }
 0x64e   : > { %v15047_v62 = vshrl.u32 %v6772_v25, 30  ;;  %v7394_v14 = vsel %vm18_vm0, %v14671_v16, %v6918_v17  ;;  %v3712_v7 = vshll.u32 %v10032_v47, %v3709_v35  ;;  %v3716_v9 = vshrl.u32 %v10034_v53, %v3710_v33 }
 0x64f   : > { %v3466_v56 = vmul.f32 %v3465_v32, %v3463_v54  ;;  %7460 = vst.msk [vmem:[%s10548_s19 + $0x1d8] sm:$0xff] %vm7400_vm7, %v7394_v14  ;;  %v3715_v30 = vshll.u32 %v10033_v51, %v3709_v35  ;;  %v3718_v23 = vshll.u32 %v10034_v53, %v3709_v35  ;;  %v3722_v24 = vshrl.u32 %v10036_v57, %v3710_v33 }
 0x650   : > { %v6774_v41 = vshll.u32 %v15047_v62, 30  ;;  %v3721_v38 = vshll.u32 %v10035_v55, %v3709_v35  ;;  %v3724_v16 = vshll.u32 %v10036_v57, %v3709_v35  ;;  %v3725_v36 = vshrl.u32 %v10037_v2, %v3710_v33 }
 0x651   : > { %v3467_v50 = vxor.u32 2147483648, %v3466_v56  ;;  %v3714_v49 = vor.u32 %v3713_v21, %v3712_v7  ;;  %v3720_v46 = vor.u32 %v3719_v28, %v3718_v23  ;;  %v3717_v61 = vor.u32 %v3716_v9, %v3715_v30 }
 0x652   : > { %v15065_v15 = vsub.s32 %v6771_v63, %v6774_v41  ;;  %v3723_v59 = vor.u32 %v3722_v24, %v3721_v38  ;;  %v3726_v20 = vor.u32 %v3725_v36, %v3724_v16  ;;  %v15072_v27 = vand.u32 3, %v3476_v39 }
 0x653   : > { %v3468_v42 = vsel %vm3385_vm6, %v3467_v50, %v3466_v56  ;;  %v3743_v11 = vshll.u32 %v3703_v45, 8  ;;  %v3711_v37 = vshrl.u32 %v10032_v47, %v3710_v33  ;;  %vm3730_vm5 = vcmp.lt.s32.totalorder %v3708_v58, 4  ;;  %v15081_v56 = vpop.f32.mrb[31].mxu1 }
 0x654   : > { %v3471_v4 = vsel %vm15015_vm2, %v14757_v18, %v3468_v42  ;;  %v6777_v35 = vsub.s32 0, %v15065_v15  ;;  %v7026_v10 = vand.u32 2139095040, %v14958_v5  ;;  %vm3727_vm6 = vcmp.lt.s32.totalorder %v3708_v58, 1 }
 0x655   : > { %9984 = vcosq.f32 %v3471_v4  ;;  %v3732_v52 = vsel %vm3730_vm5, %v3720_v46, 2102212464  ;;  %v3735_v6 = vsel %vm3727_vm6, %v3714_v49, %v3717_v61  ;;  %v3736_v43 = vsel %vm3730_vm5, %v3723_v59, 920167782 }
 0x656   : > { %9986 = vsinq.f32 %v3471_v4  ;;  %v9310_v63 = vmin.u32 %v6777_v35, %v15065_v15  ;;  %v3739_v13 = vsel %vm3727_vm6, %v3717_v61, %v3720_v46  ;;  %v3740_v25 = vsel %vm3730_vm5, %v3726_v20, 1326507024 }
 0x657   : > { %v6797_v19 = vsub.s32 4, %v15047_v62  ;;  %vm3728_vm10 = vcmp.lt.s32.totalorder %v3708_v58, 2  ;;  %vm3729_vm11 = vcmp.lt.s32.totalorder %v3708_v58, 3  ;;  %v3731_v45 = vsel %vm3727_vm6, %v3711_v37, %v3714_v49 }
 0x658   : > { %v6779_v39 = vclz %v9310_v63  ;;  %v3733_v54 = vsel %vm3729_vm11, %v3717_v61, %v3732_v52  ;;  %v3737_v33 = vsel %vm3729_vm11, %v3720_v46, %v3736_v43  ;;  %v3741_v32 = vsel %vm3729_vm11, %v3723_v59, %v3740_v25 }
 0x659   : > { %v3738_v21 = vsel %vm3728_vm10, %v3735_v6, %v3737_v33  ;;  %v3742_v28 = vsel %vm3728_vm10, %v3739_v13, %v3741_v32  ;;  %v7027_v14 = vshrl.u32 %v7026_v10, 23  ;;  %vm3475_vm3 = vweird.f32 %v14757_v18 }
 0x65a   : > { %v9311_v17 = vadd.s32 4294967294, %v6779_v39  ;;  %v15083_v7 = vmul.u32.u64.low %v3743_v11, %v3742_v28  ;;  %v15084_v9 = vmul.u32.u64.high %v3743_v11, %v3742_v28, %v15083_v7  ;;  %vm6713_vm12 = vcmp.lt.s32.totalorder %v14862_v60, 0 }
 0x65b   : > { %v15086_v41 = vmul.u32.u64.low %v3743_v11, %v3738_v21  ;;  %v15087_v30 = vmul.u32.u64.high %v3743_v11, %v3738_v21, %v15086_v41  ;;  %v3734_v23 = vsel %vm3728_vm10, %v3731_v45, %v3733_v54  ;;  %v9321_v24 = vadd.s32 4294967169, %v7027_v14 }
 0x65c   : > { %vm9312_vm2 = vcmp.lt.s32.totalorder %v9311_v17, 0  ;;  %vm3479_vm14 = vcmp.eq.s32.totalorder %v15072_v27, 0  ;;  %vm15096_vm15 = vcmp.le.f32.partialorder %v6711_v40, 0.7853982  ;;  %v7023_v16 = vand.u32 2147483647, %v14958_v5 }
 0x65d   : > { %v6782_v38 = vsel %vm9312_vm2, 0, %v9311_v17  ;;  %v6767_v36 = vadd.s32 %v15009_v12, %v15025_v22  ;;  %v6798_v58 = vsel %vm6713_vm12, %v6797_v19, %v15047_v62  ;;  %v3750_v61 = vmul.u32 %v3743_v11, %v3734_v23 }
 0x65e   : > { %v6783_v49 = vsub.s32 32, %v6782_v38  ;;  %v6787_v46 = vsub.s32 4294967266, %v6782_v38  ;;  %vm3752_vm8 = vc.u32 %v15084_v9, %v15086_v41  ;;  %v3753_v40 = vadd.s32 1, %v15087_v30 }
 0x65f   : > { %v9985_v42 = vpop.eup %9984  ;;  %v7033_v59 = vadd.s32 1, %v9321_v24  ;;  %v6784_v35 = vshll.u32 %v15065_v15, %v6782_v38  ;;  %vm3482_vm9 = vcmp.eq.s32.totalorder %v15072_v27, 2  ;;  %vm3478_vm1 = vcmp.lt.s32.totalorder %v15072_v27, 2 }
 0x660   : > { %v9987_v20 = vpop.eup %9986  ;;  %v3483_v4 = vxor.u32 2147483648, %v9985_v42  ;;  %v6785_v37 = vshrl.u32 %v6767_v36, %v6783_v49  ;;  %v6788_v12 = vadd.s32 127, %v6787_v46  ;;  %v3754_v10 = vsel %vm3752_vm8, %v3753_v40, %v15087_v30 }
 0x661   : > { %v3480_v22 = vxor.u32 2147483648, %v9987_v20  ;;  %vm7034_vm13 = vcmp.gt.s32.totalorder %v7033_v59, 0  ;;  %v3755_v52 = vadd.s32 %v3754_v10, %v3750_v61  ;;  %v6800_v15 = vsel %vm15096_vm15, 0, %v6798_v58 }
 0x662   : > { %v3484_v62 = vsel %vm3482_vm9, %v3483_v4, %v9987_v20  ;;  %v6786_v11 = vor.u32 %v6785_v37, %v6784_v35  ;;  %v6789_v63 = vshll.u32 %v6788_v12, 23  ;;  %v7035_v43 = vsel %vm7034_vm13, %v7033_v59, 0 }
 0x663   : > { %v3481_v6 = vsel %vm3479_vm14, %v9985_v42, %v3480_v22  ;;  %v3756_v39 = vadd.s32 536870912, %v3755_v52  ;;  %v7030_v19 = vand.u32 8388607, %v7023_v16  ;;  %v7037_v54 = vand.u32 31, %v7035_v43 }
 0x664   : > { %v3485_v13 = vsel %vm3478_vm1, %v3481_v6, %v3484_v62  ;;  %v6790_v25 = vor.u32 4788187, %v6789_v63  ;;  %v6793_v32 = vcvt.s32.f32 %v6786_v11  ;;  %v6804_v21 = vadd.s32 3, %v6800_v15 }
 0x665   : > { %v3486_v45 = vsel %vm3475_vm3, nan, %v3485_v13  ;;  %v15124_v17 = vshrl.u32 %v3756_v39, 30  ;;  %v7038_v28 = vsub.s32 32, %v7037_v54  ;;  %v15130_v14 = vadd.f32 %v10066_v1, %v14653_v48 }
 0x666   : > { %v7361_v33 = vsel %vm18_vm0, %v14757_v18, %v3486_v45  ;;  %v6791_v27 = vand.u32 2147483647, %v6790_v25  ;;  %v7031_v23 = vor.u32 8388608, %v7030_v19  ;;  %v7040_v24 = vshll.u32 %v10032_v47, %v7037_v54 }
 0x667   : > { %7427 = vst.msk [vmem:[%s10548_s19 + $0xd0] sm:$0xff] %vm7400_vm7, %v7361_v33  ;;  %v3758_v30 = vshll.u32 %v15124_v17, 30  ;;  %v7041_v18 = vshrl.u32 %v10033_v51, %v7038_v28  ;;  %v7043_v38 = vshll.u32 %v10033_v51, %v7037_v54  ;;  %v7044_v36 = vshrl.u32 %v10034_v53, %v7038_v28 }
 0x668   : > { %v6794_v7 = vmul.f32 %v6793_v32, %v6791_v27  ;;  %v7047_v49 = vshrl.u32 %v10035_v55, %v7038_v28  ;;  %v7046_v48 = vshll.u32 %v10034_v53, %v7037_v54  ;;  %v7050_v42 = vshrl.u32 %v10036_v57, %v7038_v28 }
 0x669   : > { %v15138_v58 = vsub.s32 %v3755_v52, %v3758_v30  ;;  %v15142_v61 = vand.u32 3, %v6804_v21  ;;  %v7036_v40 = vshrl.u32 %v7035_v43, 5  ;;  %v7042_v59 = vor.u32 %v7041_v18, %v7040_v24 }
 0x66a   : > { %v6795_v46 = vxor.u32 2147483648, %v6794_v7  ;;  %v7049_v20 = vshll.u32 %v10035_v55, %v7037_v54  ;;  %v7045_v37 = vor.u32 %v7044_v36, %v7043_v38  ;;  %v7048_v12 = vor.u32 %v7047_v49, %v7046_v48 }
 0x66b   : > { %v3761_v35 = vsub.s32 0, %v15138_v58  ;;  %vm3697_vm4 = vcmp.lt.s32.totalorder %v14897_v31, 0  ;;  %v7052_v62 = vshll.u32 %v10036_v57, %v7037_v54  ;;  %v7053_v11 = vshrl.u32 %v10037_v2, %v7038_v28 }
 0x66c   : > { %v6796_v4 = vsel %vm6713_vm12, %v6795_v46, %v6794_v7  ;;  %v7051_v10 = vor.u32 %v7050_v42, %v7049_v20  ;;  %v15155_v52 = vshll.u32 %v7031_v23, 8  ;;  %v3594_v6 = vand.u32 2139095040, %v15130_v14 }
 0x66d   : > { %v6799_v22 = vsel %vm15096_vm15, %v14862_v60, %v6796_v4  ;;  %v9194_v63 = vmin.u32 %v3761_v35, %v15138_v58  ;;  %v3781_v15 = vsub.s32 4, %v15124_v17  ;;  %v7039_v50 = vshrl.u32 %v10032_v47, %v7038_v28 }
 0x66e   : > { %9988 = vcosq.f32 %v6799_v22  ;;  %v7054_v43 = vor.u32 %v7053_v11, %v7052_v62  ;;  %vm7055_vm5 = vcmp.lt.s32.totalorder %v7036_v40, 1  ;;  %vm7056_vm6 = vcmp.lt.s32.totalorder %v7036_v40, 2 }
 0x66f   : > { %9990 = vsinq.f32 %v6799_v22  ;;  %v3763_v13 = vclz %v9194_v63  ;;  %vm7058_vm10 = vcmp.lt.s32.totalorder %v7036_v40, 4  ;;  %vm7057_vm11 = vcmp.lt.s32.totalorder %v7036_v40, 3 }
 0x670   : > { %v7060_v25 = vsel %vm7058_vm10, %v7048_v12, 2102212464  ;;  %v7063_v39 = vsel %vm7055_vm5, %v7042_v59, %v7045_v37  ;;  %v7064_v19 = vsel %vm7058_vm10, %v7051_v10, 920167782  ;;  %vm15162_vm3 = vcmp.le.f32.partialorder %v3695_v44, 0.7853982 }
 0x671   : > { %v9195_v54 = vadd.s32 4294967294, %v3763_v13  ;;  %v7059_v33 = vsel %vm7055_vm5, %v7039_v50, %v7042_v59  ;;  %v7065_v27 = vsel %vm7057_vm11, %v7048_v12, %v7064_v19  ;;  %v7067_v32 = vsel %vm7055_vm5, %v7045_v37, %v7048_v12 }
 0x672   : > { %vm6807_vm12 = vcmp.eq.s32.totalorder %v15142_v61, 0  ;;  %v7061_v21 = vsel %vm7057_vm11, %v7045_v37, %v7060_v25  ;;  %v7066_v28 = vsel %vm7056_vm6, %v7063_v39, %v7065_v27  ;;  %v7068_v7 = vsel %vm7058_vm10, %v7054_v43, 1326507024 }
 0x673   : > { %v3595_v30 = vshrl.u32 %v3594_v6, 23  ;;  %vm9196_vm2 = vcmp.lt.s32.totalorder %v9195_v54, 0  ;;  %v7069_v23 = vsel %vm7057_vm11, %v7051_v10, %v7068_v7  ;;  %v3591_v36 = vand.u32 2147483647, %v15130_v14 }
 0x674   : > { %v15169_v24 = vmul.u32.u64.low %v15155_v52, %v7066_v28  ;;  %v15170_v18 = vmul.u32.u64.high %v15155_v52, %v7066_v28, %v15169_v24  ;;  %v3766_v44 = vsel %vm9196_vm2, 0, %v9195_v54  ;;  %v7070_v38 = vsel %vm7056_vm6, %v7067_v32, %v7069_v23 }
 0x675   : > { %v9189_v49 = vadd.s32 4294967169, %v3595_v30  ;;  %v3751_v46 = vadd.s32 %v15086_v41, %v15084_v9  ;;  %v3767_v48 = vsub.s32 32, %v3766_v44  ;;  %v3771_v42 = vsub.s32 4294967266, %v3766_v44 }
 0x676   : > { %v3782_v59 = vsel %vm3697_vm4, %v3781_v15, %v15124_v17  ;;  %v7062_v20 = vsel %vm7056_vm6, %v7059_v33, %v7061_v21  ;;  %v15182_v4 = vmul.u32.u64.low %v15155_v52, %v7070_v38  ;;  %v15183_v35 = vmul.u32.u64.high %v15155_v52, %v7070_v38, %v15182_v4 }
 0x677   : > { %v3601_v37 = vadd.s32 1, %v9189_v49  ;;  %v3768_v22 = vshll.u32 %v15138_v58, %v3766_v44  ;;  %v3769_v10 = vshrl.u32 %v3751_v46, %v3767_v48  ;;  %v3772_v62 = vadd.s32 127, %v3771_v42 }
 0x678   : > { %v9989_v12 = vpop.eup %9988  ;;  %v7081_v9 = vadd.s32 1, %v15170_v18  ;;  %vm6810_vm14 = vcmp.eq.s32.totalorder %v15142_v61, 2  ;;  %v3598_v17 = vand.u32 8388607, %v3591_v36  ;;  %v3784_v58 = vsel %vm15162_vm3, 0, %v3782_v59 }
 0x679   : > { %v9991_v41 = vpop.eup %9990  ;;  %v6811_v11 = vxor.u32 2147483648, %v9989_v12  ;;  %vm3602_vm15 = vcmp.gt.s32.totalorder %v3601_v37, 0  ;;  %v3770_v63 = vor.u32 %v3769_v10, %v3768_v22  ;;  %v3773_v6 = vshll.u32 %v3772_v62, 23 }
 0x67a   : > { %v6808_v40 = vxor.u32 2147483648, %v9991_v41  ;;  %v3603_v15 = vsel %vm3602_vm15, %v3601_v37, 0  ;;  %v7078_v43 = vmul.u32 %v15155_v52, %v7062_v20  ;;  %vm7080_vm8 = vc.u32 %v15183_v35, %v15169_v24 }
 0x67b   : > { %v6812_v50 = vsel %vm6810_vm14, %v6811_v11, %v9991_v41  ;;  %vm6806_vm9 = vcmp.lt.s32.totalorder %v15142_v61, 2  ;;  %v3774_v25 = vor.u32 4788187, %v3773_v6  ;;  %v7082_v39 = vsel %vm7080_vm8, %v7081_v9, %v15170_v18 }
 0x67c   : > { %v6809_v13 = vsel %vm6807_vm12, %v9989_v12, %v6808_v40  ;;  %vm6803_vm13 = vweird.f32 %v14862_v60  ;;  %v7083_v54 = vadd.s32 %v7082_v39, %v7078_v43  ;;  %v3605_v33 = vand.u32 31, %v3603_v15 }
 0x67d   : > { %v6813_v19 = vsel %vm6806_vm9, %v6809_v13, %v6812_v50  ;;  %v3775_v32 = vand.u32 2147483647, %v3774_v25  ;;  %v3777_v52 = vcvt.s32.f32 %v3770_v63  ;;  %v3788_v21 = vadd.s32 3, %v3784_v58 }
 0x67e   : > { %v6814_v27 = vsel %vm6803_vm13, nan, %v6813_v19  ;;  %v7084_v7 = vadd.s32 536870912, %v7083_v54  ;;  %v3599_v61 = vor.u32 8388608, %v3598_v17  ;;  %v3606_v30 = vsub.s32 32, %v3605_v33 }
 0x67f   : > { %v7393_v28 = vsel %vm18_vm0, %v14862_v60, %v6814_v27  ;;  %v3778_v23 = vmul.f32 %v3777_v52, %v3775_v32  ;;  %v3604_v18 = vshrl.u32 %v3603_v15, 5  ;;  %v3608_v44 = vshll.u32 %v10032_v47, %v3605_v33 }
 0x680   : > { %7459 = vst.msk [vmem:[%s10548_s19 + $0x1d0] sm:$0xff] %vm7400_vm7, %v7393_v28  ;;  %v3611_v38 = vshll.u32 %v10033_v51, %v3605_v33  ;;  %vm7025_vm1 = vcmp.lt.s32.totalorder %v14958_v5, 0  ;;  %v7085_v49 = vshrl.u32 %v7084_v7, 30  ;;  %v3609_v46 = vshrl.u32 %v10033_v51, %v3606_v30 }
 0x681   : > { %v3612_v48 = vshrl.u32 %v10034_v53, %v3606_v30  ;;  %v3614_v60 = vshll.u32 %v10034_v53, %v3605_v33  ;;  %v3779_v42 = vxor.u32 2147483648, %v3778_v23  ;;  %v3615_v59 = vshrl.u32 %v10035_v55, %v3606_v30 }
 0x682   : > { %v3617_v20 = vshll.u32 %v10035_v55, %v3605_v33  ;;  %v3618_v4 = vshrl.u32 %v10036_v57, %v3606_v30  ;;  %v7086_v37 = vshll.u32 %v7085_v49, 30  ;;  %v3610_v12 = vor.u32 %v3609_v46, %v3608_v44 }
 0x683   : > { %v3613_v22 = vor.u32 %v3612_v48, %v3611_v38  ;;  %v3620_v10 = vshll.u32 %v10036_v57, %v3605_v33  ;;  %v3780_v62 = vsel %vm3697_vm4, %v3779_v42, %v3778_v23  ;;  %v3616_v9 = vor.u32 %v3615_v59, %v3614_v60 }
 0x684   : > { %v3619_v41 = vor.u32 %v3618_v4, %v3617_v20  ;;  %v3621_v11 = vshrl.u32 %v10037_v2, %v3606_v30  ;;  %v3783_v17 = vsel %vm15162_vm3, %v14897_v31, %v3780_v62  ;;  %v15221_v40 = vand.u32 3, %v3788_v21 }
 0x685   : > { %v15223_v63 = vsub.s32 %v7083_v54, %v7086_v37  ;;  %v15227_v6 = vadd.f32 %v10066_v1, %v14729_v34  ;;  %9992 = vcosq.f32 %v3783_v17  ;;  %v7109_v15 = vsub.s32 4, %v7085_v49 }
 0x686   : > { %v3622_v50 = vor.u32 %v3621_v11, %v3620_v10  ;;  %v3639_v58 = vshll.u32 %v3599_v61, 8  ;;  %9994 = vsinq.f32 %v3783_v17  ;;  %vm3623_vm4 = vcmp.lt.s32.totalorder %v3604_v18, 1 }
 0x687   : > { %v7089_v43 = vsub.s32 0, %v15223_v63  ;;  %vm3626_vm5 = vcmp.lt.s32.totalorder %v3604_v18, 4  ;;  %vm3625_vm6 = vcmp.lt.s32.totalorder %v3604_v18, 3  ;;  %v3631_v13 = vsel %vm3623_vm4, %v3610_v12, %v3613_v22 }
 0x688   : > { %v3628_v45 = vsel %vm3626_vm5, %v3616_v9, 2102212464  ;;  %v3632_v25 = vsel %vm3626_vm5, %v3619_v41, 920167782  ;;  %v3607_v19 = vshrl.u32 %v10032_v47, %v3606_v30  ;;  %vm3624_vm10 = vcmp.lt.s32.totalorder %v3604_v18, 2 }
 0x689   : > { %v9322_v39 = vmin.u32 %v7089_v43, %v15223_v63  ;;  %v3633_v34 = vsel %vm3625_vm6, %v3616_v9, %v3632_v25  ;;  %v7110_v54 = vsel %vm7025_vm1, %v7109_v15, %v7085_v49  ;;  %v3635_v27 = vsel %vm3623_vm4, %v3613_v22, %v3616_v9 }
 0x68a   : > { %v3634_v33 = vsel %vm3624_vm10, %v3631_v13, %v3633_v34  ;;  %v3636_v32 = vsel %vm3626_vm5, %v3622_v50, 1326507024  ;;  %vm15240_vm11 = vcmp.le.f32.partialorder %v7023_v16, 0.7853982  ;;  %v3627_v28 = vsel %vm3623_vm4, %v3607_v19, %v3610_v12 }
 0x68b   : > { %v7091_v21 = vclz %v9322_v39  ;;  %v3629_v7 = vsel %vm3625_vm6, %v3613_v22, %v3628_v45  ;;  %vm3790_vm3 = vcmp.lt.s32.totalorder %v15221_v40, 2  ;;  %v3637_v61 = vsel %vm3625_vm6, %v3619_v41, %v3636_v32 }
 0x68c   : > { %v15248_v30 = vmul.u32.u64.low %v3639_v58, %v3634_v33  ;;  %v15249_v23 = vmul.u32.u64.high %v3639_v58, %v3634_v33, %v15248_v30  ;;  %v6922_v44 = vand.u32 2139095040, %v15227_v6  ;;  %vm3787_vm12 = vweird.f32 %v14897_v31 }
 0x68d   : > { %vm3791_vm2 = vcmp.eq.s32.totalorder %v15221_v40, 0  ;;  %v9323_v16 = vadd.s32 4294967294, %v7091_v21  ;;  %v7112_v38 = vsel %vm15240_vm11, 0, %v7110_v54  ;;  %v3638_v49 = vsel %vm3624_vm10, %v3635_v27, %v3637_v61 }
 0x68e   : > { %v3630_v46 = vsel %vm3624_vm10, %v3627_v28, %v3629_v7  ;;  %v15259_v48 = vmul.u32.u64.low %v3639_v58, %v3638_v49  ;;  %v15260_v60 = vmul.u32.u64.high %v3639_v58, %v3638_v49, %v15259_v48  ;;  %v6923_v42 = vshrl.u32 %v6922_v44, 23 }
 0x68f   : > { %vm3794_vm14 = vcmp.eq.s32.totalorder %v15221_v40, 2  ;;  %v7079_v59 = vadd.s32 %v15169_v24, %v15183_v35  ;;  %vm9324_vm15 = vcmp.lt.s32.totalorder %v9323_v16, 0  ;;  %v6919_v20 = vand.u32 2147483647, %v15227_v6  ;;  %v9993_v4 = vpop.eup %9992 }
 0x690   : > { %v7094_v37 = vsel %vm9324_vm15, 0, %v9323_v16  ;;  %v7116_v12 = vadd.s32 3, %v7112_v38  ;;  %v3649_v22 = vadd.s32 1, %v15249_v23  ;;  %v9317_v10 = vadd.s32 4294967169, %v6923_v42  ;;  %v9995_v18 = vpop.eup %9994 }
 0x691   : > { %v3795_v62 = vxor.u32 2147483648, %v9993_v4  ;;  %v7095_v9 = vsub.s32 32, %v7094_v37  ;;  %v7099_v41 = vsub.s32 4294967266, %v7094_v37  ;;  %v3646_v11 = vmul.u32 %v3639_v58, %v3630_v46 }
 0x692   : > { %v3792_v17 = vxor.u32 2147483648, %v9995_v18  ;;  %v7096_v15 = vshll.u32 %v15223_v63, %v7094_v37  ;;  %vm3648_vm8 = vc.u32 %v15260_v60, %v15248_v30  ;;  %v6929_v24 = vadd.s32 1, %v9317_v10 }
 0x693   : > { %v3796_v35 = vsel %vm3794_vm14, %v3795_v62, %v9995_v18  ;;  %v7097_v50 = vshrl.u32 %v7079_v59, %v7095_v9  ;;  %v7100_v43 = vadd.s32 127, %v7099_v41  ;;  %v3650_v45 = vsel %vm3648_vm8, %v3649_v22, %v15249_v23 }
 0x694   : > { %v3793_v13 = vsel %vm3791_vm2, %v9993_v4, %v3792_v17  ;;  %v3651_v25 = vadd.s32 %v3650_v45, %v3646_v11  ;;  %v6926_v58 = vand.u32 8388607, %v6919_v20  ;;  %vm6930_vm9 = vcmp.gt.s32.totalorder %v6929_v24, 0 }
 0x695   : > { %v3797_v63 = vsel %vm3790_vm3, %v3793_v13, %v3796_v35  ;;  %v7098_v39 = vor.u32 %v7097_v50, %v7096_v15  ;;  %v7101_v19 = vshll.u32 %v7100_v43, 23  ;;  %v6931_v34 = vsel %vm6930_vm9, %v6929_v24, 0 }
 0x696   : > { %v3798_v54 = vsel %vm3787_vm12, nan, %v3797_v63  ;;  %v3652_v33 = vadd.s32 536870912, %v3651_v25  ;;  %v6933_v27 = vand.u32 31, %v6931_v34  ;;  %v15283_v32 = vadd.f32 %v14842_v8, %v10066_v1 }
 0x697   : > { %v7364_v21 = vsel %vm18_vm0, %v14897_v31, %v3798_v54  ;;  %v7102_v28 = vor.u32 4788187, %v7101_v19  ;;  %v7105_v23 = vcvt.s32.f32 %v7098_v39  ;;  %v15292_v44 = vand.u32 3, %v7116_v12 }
 0x698   : > { %7430 = vst.msk [vmem:[%s10548_s19 + $0xe8] sm:$0xff] %vm7400_vm7, %v7364_v21  ;;  %v15290_v40 = vshrl.u32 %v3652_v33, 30  ;;  %v6934_v7 = vsub.s32 32, %v6933_v27  ;;  %v6927_v16 = vor.u32 8388608, %v6926_v58  ;;  %v6936_v8 = vshll.u32 %v10032_v47, %v6933_v27 }
 0x699   : > { %v7103_v61 = vand.u32 2147483647, %v7102_v28  ;;  %v3906_v46 = vand.u32 2139095040, %v15283_v32  ;;  %v6939_v37 = vshll.u32 %v10033_v51, %v6933_v27  ;;  %v6942_v12 = vshll.u32 %v10034_v53, %v6933_v27 }
 0x69a   : > { %v3654_v38 = vshll.u32 %v15290_v40, 30  ;;  %v6937_v49 = vshrl.u32 %v10033_v51, %v6934_v7  ;;  %v6940_v48 = vshrl.u32 %v10034_v53, %v6934_v7  ;;  %v6943_v42 = vshrl.u32 %v10035_v55, %v6934_v7 }
 0x69b   : > { %v7106_v31 = vmul.f32 %v7105_v23, %v7103_v61  ;;  %v6946_v59 = vshrl.u32 %v10036_v57, %v6934_v7  ;;  %v6949_v22 = vshrl.u32 %v10037_v2, %v6934_v7  ;;  %v6932_v18 = vshrl.u32 %v6931_v34, 5 }
 0x69c   : > { %v15301_v4 = vsub.s32 %v3651_v25, %v3654_v38  ;;  %v6945_v62 = vshll.u32 %v10035_v55, %v6933_v27  ;;  %v6948_v9 = vshll.u32 %v10036_v57, %v6933_v27  ;;  %v6938_v11 = vor.u32 %v6937_v49, %v6936_v8 }
 0x69d   : > { %v7107_v10 = vxor.u32 2147483648, %v7106_v31  ;;  %v6941_v17 = vor.u32 %v6940_v48, %v6939_v37  ;;  %v6944_v15 = vor.u32 %v6943_v42, %v6942_v12  ;;  %v3647_v35 = vadd.s32 %v15248_v30, %v15260_v60 }
 0x69e   : > { %v3657_v41 = vsub.s32 0, %v15301_v4  ;;  %v6947_v50 = vor.u32 %v6946_v59, %v6945_v62  ;;  %v6967_v43 = vshll.u32 %v6927_v16, 8  ;;  %v6950_v25 = vor.u32 %v6949_v22, %v6948_v9 }
 0x69f   : > { %v7108_v24 = vsel %vm7025_vm1, %v7107_v10, %v7106_v31  ;;  %v3907_v58 = vshrl.u32 %v3906_v46, 23  ;;  %v6935_v63 = vshrl.u32 %v10032_v47, %v6934_v7  ;;  %vm6951_vm13 = vcmp.lt.s32.totalorder %v6932_v18, 1 }
 0x6a0   : > { %v7111_v45 = vsel %vm15240_vm11, %v14958_v5, %v7108_v24  ;;  %v9190_v13 = vmin.u32 %v3657_v41, %v15301_v4  ;;  %vm6954_vm4 = vcmp.lt.s32.totalorder %v6932_v18, 4  ;;  %v6959_v34 = vsel %vm6951_vm13, %v6938_v11, %v6941_v17 }
 0x6a1   : > { %9996 = vcosq.f32 %v7111_v45  ;;  %v6956_v19 = vsel %vm6954_vm4, %v6944_v15, 2102212464  ;;  %vm6952_vm1 = vcmp.lt.s32.totalorder %v6932_v18, 2  ;;  %vm6953_vm5 = vcmp.lt.s32.totalorder %v6932_v18, 3 }
 0x6a2   : > { %9998 = vsinq.f32 %v7111_v45  ;;  %v3659_v39 = vclz %v9190_v13  ;;  %v6960_v30 = vsel %vm6954_vm4, %v6947_v50, 920167782  ;;  %v6963_v60 = vsel %vm6951_vm13, %v6941_v17, %v6944_v15 }
 0x6a3   : > { %v6955_v52 = vsel %vm6951_vm13, %v6935_v63, %v6938_v11  ;;  %v6961_v33 = vsel %vm6953_vm5, %v6944_v15, %v6960_v30  ;;  %v6964_v27 = vsel %vm6954_vm4, %v6950_v25, 1326507024  ;;  %v6957_v21 = vsel %vm6953_vm5, %v6941_v17, %v6956_v19 }
 0x6a4   : > { %v9191_v54 = vadd.s32 4294967294, %v3659_v39  ;;  %v6962_v28 = vsel %vm6952_vm1, %v6959_v34, %v6961_v33  ;;  %v6965_v61 = vsel %vm6953_vm5, %v6947_v50, %v6964_v27  ;;  %v9201_v23 = vadd.s32 4294967169, %v3907_v58 }
 0x6a5   : > { %v6966_v7 = vsel %vm6952_vm1, %v6963_v60, %v6965_v61  ;;  %v15320_v16 = vmul.u32.u64.low %v6967_v43, %v6962_v28  ;;  %v15321_v38 = vmul.u32.u64.high %v6967_v43, %v6962_v28, %v15320_v16  ;;  %v3677_v49 = vsub.s32 4, %v15290_v40 }
 0x6a6   : > { %vm9192_vm6 = vcmp.lt.s32.totalorder %v9191_v54, 0  ;;  %v15325_v46 = vmul.u32.u64.low %v6967_v43, %v6966_v7  ;;  %v15326_v31 = vmul.u32.u64.high %v6967_v43, %v6966_v7, %v15325_v46  ;;  %v6958_v59 = vsel %vm6952_vm1, %v6955_v52, %v6957_v21 }
 0x6a7   : > { %v3662_v8 = vsel %vm9192_vm6, 0, %v9191_v54  ;;  %v3913_v37 = vadd.s32 1, %v9201_v23  ;;  %vm7119_vm10 = vcmp.eq.s32.totalorder %v15292_v44, 0  ;;  %vm15332_vm11 = vcmp.le.f32.partialorder %v3591_v36, 0.7853982 }
 0x6a8   : > { %v3663_v48 = vsub.s32 32, %v3662_v8  ;;  %v3667_v42 = vsub.s32 4294967266, %v3662_v8  ;;  %vm3593_vm3 = vcmp.lt.s32.totalorder %v15130_v14, 0  ;;  %v3664_v22 = vshll.u32 %v15301_v4, %v3662_v8 }
 0x6a9   : > { %v6977_v9 = vadd.s32 1, %v15321_v38  ;;  %vm3914_vm12 = vcmp.gt.s32.totalorder %v3913_v37, 0  ;;  %v3678_v41 = vsel %vm3593_vm3, %v3677_v49, %v15290_v40  ;;  %v6974_v11 = vmul.u32 %v6967_v43, %v6958_v59 }
 0x6aa   : > { %v3665_v10 = vshrl.u32 %v3647_v35, %v3663_v48  ;;  %v3668_v62 = vadd.s32 127, %v3667_v42  ;;  %vm6976_vm2 = vc.u32 %v15326_v31, %v15320_v16  ;;  %v3915_v36 = vsel %vm3914_vm12, %v3913_v37, 0 }
 0x6ab   : > { %v9997_v18 = vpop.eup %9996  ;;  %v6978_v4 = vsel %vm6976_vm2, %v6977_v9, %v15321_v38  ;;  %vm7122_vm14 = vcmp.eq.s32.totalorder %v15292_v44, 2  ;;  %v3917_v13 = vand.u32 31, %v3915_v36  ;;  %v3680_v40 = vsel %vm15332_vm11, 0, %v3678_v41 }
 0x6ac   : > { %v9999_v17 = vpop.eup %9998  ;;  %v7123_v15 = vxor.u32 2147483648, %v9997_v18  ;;  %v3666_v24 = vor.u32 %v3665_v10, %v3664_v22  ;;  %v3669_v50 = vshll.u32 %v3668_v62, 23  ;;  %v6979_v45 = vadd.s32 %v6978_v4, %v6974_v11 }
 0x6ad   : > { %v7120_v35 = vxor.u32 2147483648, %v9999_v17  ;;  %v3903_v43 = vand.u32 2147483647, %v15283_v32  ;;  %vm7118_vm15 = vcmp.lt.s32.totalorder %v15292_v44, 2  ;;  %v3918_v19 = vsub.s32 32, %v3917_v13 }
 0x6ae   : > { %v7124_v25 = vsel %vm7122_vm14, %v7123_v15, %v9999_v17  ;;  %v3670_v58 = vor.u32 4788187, %v3669_v50  ;;  %v6980_v39 = vadd.s32 536870912, %v6979_v45  ;;  %vm7115_vm8 = vweird.f32 %v14958_v5 }
 0x6af   : > { %v7121_v63 = vsel %vm7119_vm10, %v9997_v18, %v7120_v35  ;;  %v3673_v60 = vcvt.s32.f32 %v3666_v24  ;;  %v3684_v52 = vadd.s32 3, %v3680_v40  ;;  %v3921_v27 = vshrl.u32 %v10033_v51, %v3918_v19 }
 0x6b0   : > { %v7125_v34 = vsel %vm7118_vm15, %v7121_v63, %v7124_v25  ;;  %v3671_v30 = vand.u32 2147483647, %v3670_v58  ;;  %v6981_v33 = vshrl.u32 %v6980_v39, 30  ;;  %v3910_v44 = vand.u32 8388607, %v3903_v43 }
 0x6b1   : > { %v7126_v54 = vsel %vm7115_vm8, nan, %v7125_v34  ;;  %v3924_v61 = vshrl.u32 %v10034_v53, %v3918_v19  ;;  %v3916_v7 = vshrl.u32 %v3915_v36, 5  ;;  %v3920_v38 = vshll.u32 %v10032_v47, %v3917_v13 }
 0x6b2   : > { %v7396_v21 = vsel %vm18_vm0, %v14958_v5, %v7126_v54  ;;  %v3674_v28 = vmul.f32 %v3673_v60, %v3671_v30  ;;  %v6982_v23 = vshll.u32 %v6981_v33, 30  ;;  %v3927_v8 = vshrl.u32 %v10035_v55, %v3918_v19 }
 0x6b3   : > { %7462 = vst.msk [vmem:[%s10548_s19 + $0x1e8] sm:$0xff] %vm7400_vm7, %v7396_v21  ;;  %v3923_v46 = vshll.u32 %v10033_v51, %v3917_v13  ;;  %v3929_v48 = vshll.u32 %v10035_v55, %v3917_v13  ;;  %v3930_v5 = vshrl.u32 %v10036_v57, %v3918_v19  ;;  %v3922_v59 = vor.u32 %v3921_v27, %v3920_v38 }
 0x6b4   : > { %v3675_v49 = vxor.u32 2147483648, %v3674_v28  ;;  %v15367_v42 = vsub.s32 %v6979_v45, %v6982_v23  ;;  %v3926_v37 = vshll.u32 %v10034_v53, %v3917_v13  ;;  %v3933_v22 = vshrl.u32 %v10037_v2, %v3918_v19 }
 0x6b5   : > { %vm6921_vm9 = vcmp.lt.s32.totalorder %v15227_v6, 0  ;;  %v3925_v62 = vor.u32 %v3924_v61, %v3923_v46  ;;  %v3931_v9 = vor.u32 %v3930_v5, %v3929_v48  ;;  %v3932_v18 = vshll.u32 %v10036_v57, %v3917_v13 }
 0x6b6   : > { %v3676_v10 = vsel %vm3593_vm3, %v3675_v49, %v3674_v28  ;;  %v15378_v11 = vand.u32 3, %v3684_v52  ;;  %v6985_v36 = vsub.s32 0, %v15367_v42  ;;  %v3928_v17 = vor.u32 %v3927_v8, %v3926_v37 }
 0x6b7   : > { %v3679_v41 = vsel %vm15332_vm11, %v15130_v14, %v3676_v10  ;;  %v3911_v15 = vor.u32 8388608, %v3910_v44  ;;  %v3934_v24 = vor.u32 %v3933_v22, %v3932_v18  ;;  %v15383_v50 = vadd.f32 %v14917_v29, %v10066_v1 }
 0x6b8   : > { %10000 = vcosq.f32 %v3679_v41  ;;  %vm15387_vm13 = vcmp.le.f32.partialorder %v6919_v20, 0.7853982  ;;  %v9318_v12 = vmin.u32 %v6985_v36, %v15367_v42  ;;  %vm3935_vm4 = vcmp.lt.s32.totalorder %v3916_v7, 1 }
 0x6b9   : > { %10002 = vsinq.f32 %v3679_v41  ;;  %vm3938_vm1 = vcmp.lt.s32.totalorder %v3916_v7, 4  ;;  %v7005_v35 = vsub.s32 4, %v6981_v33  ;;  %v3919_v45 = vshrl.u32 %v10032_v47, %v3918_v19 }
 0x6ba   : > { %v3943_v13 = vsel %vm3935_vm4, %v3922_v59, %v3925_v62  ;;  %v3944_v25 = vsel %vm3938_vm1, %v3931_v9, 920167782  ;;  %v6987_v58 = vclz %v9318_v12  ;;  %vm3937_vm5 = vcmp.lt.s32.totalorder %v3916_v7, 3 }
 0x6bb   : > { %v3940_v29 = vsel %vm3938_vm1, %v3928_v17, 2102212464  ;;  %v3947_v40 = vsel %vm3935_vm4, %v3925_v62, %v3928_v17  ;;  %vm3936_vm6 = vcmp.lt.s32.totalorder %v3916_v7, 2  ;;  %v3945_v63 = vsel %vm3937_vm5, %v3928_v17, %v3944_v25 }
 0x6bc   : > { %v3948_v39 = vsel %vm3938_vm1, %v3934_v24, 1326507024  ;;  %v3951_v20 = vshll.u32 %v3911_v15, 8  ;;  %v9319_v34 = vadd.s32 4294967294, %v6987_v58  ;;  %v3939_v30 = vsel %vm3935_vm4, %v3919_v45, %v3922_v59 }
 0x6bd   : > { %v3946_v60 = vsel %vm3936_vm6, %v3943_v13, %v3945_v63  ;;  %v3949_v54 = vsel %vm3937_vm5, %v3931_v9, %v3948_v39  ;;  %vm3686_vm10 = vcmp.lt.s32.totalorder %v15378_v11, 2  ;;  %v3941_v52 = vsel %vm3937_vm5, %v3925_v62, %v3940_v29 }
 0x6be   : > { %v3950_v19 = vsel %vm3936_vm6, %v3947_v40, %v3949_v54  ;;  %v15396_v27 = vmul.u32.u64.low %v3951_v20, %v3946_v60  ;;  %v15397_v21 = vmul.u32.u64.high %v3951_v20, %v3946_v60, %v15396_v27  ;;  %vm9320_vm11 = vcmp.lt.s32.totalorder %v9319_v34, 0 }
 0x6bf   : > { %v7006_v28 = vsel %vm6921_vm9, %v7005_v35, %v6981_v33  ;;  %v15402_v44 = vmul.u32.u64.low %v3951_v20, %v3950_v19  ;;  %v15403_v61 = vmul.u32.u64.high %v3951_v20, %v3950_v19, %v15402_v44  ;;  %vm3687_vm3 = vcmp.eq.s32.totalorder %v15378_v11, 0 }
 0x6c0   : > { %vm3690_vm12 = vcmp.eq.s32.totalorder %v15378_v11, 2  ;;  %v6990_v23 = vsel %vm9320_vm11, 0, %v9319_v34  ;;  %v7234_v38 = vand.u32 2139095040, %v15383_v50  ;;  %v6975_v8 = vadd.s32 %v15320_v16, %v15326_v31 }
 0x6c1   : > { %v6991_v49 = vsub.s32 32, %v6990_v23  ;;  %v6995_v46 = vsub.s32 4294967266, %v6990_v23  ;;  %v3942_v48 = vsel %vm3936_vm6, %v3939_v30, %v3941_v52  ;;  %v7008_v33 = vsel %vm15387_vm13, 0, %v7006_v28 }
 0x6c2   : > { %v10001_v5 = vpop.eup %10000  ;;  %v3961_v59 = vadd.s32 1, %v15397_v21  ;;  %v7231_v37 = vand.u32 2147483647, %v15383_v50  ;;  %v7235_v22 = vshrl.u32 %v7234_v38, 23  ;;  %v6992_v9 = vshll.u32 %v15367_v42, %v6990_v23 }
 0x6c3   : > { %v10003_v10 = vpop.eup %10002  ;;  %v3691_v62 = vxor.u32 2147483648, %v10001_v5  ;;  %v6993_v18 = vshrl.u32 %v6975_v8, %v6991_v49  ;;  %v6996_v41 = vadd.s32 127, %v6995_v46  ;;  %v3958_v31 = vmul.u32 %v3951_v20, %v3942_v48 }
 0x6c4   : > { %v3688_v16 = vxor.u32 2147483648, %v10003_v10  ;;  %vm3960_vm2 = vc.u32 %v15403_v61, %v15396_v27  ;;  %v9329_v7 = vadd.s32 4294967169, %v7235_v22  ;;  %v15425_v45 = vadd.f32 %v10066_v1, %v15037_v26 }
 0x6c5   : > { %v3692_v36 = vsel %vm3690_vm12, %v3691_v62, %v10003_v10  ;;  %v6994_v17 = vor.u32 %v6993_v18, %v6992_v9  ;;  %v6997_v15 = vshll.u32 %v6996_v41, 23  ;;  %v3962_v24 = vsel %vm3960_vm2, %v3961_v59, %v15397_v21 }
 0x6c6   : > { %v3689_v12 = vsel %vm3687_vm3, %v10001_v5, %v3688_v16  ;;  %v3963_v42 = vadd.s32 %v3962_v24, %v3958_v31  ;;  %v7241_v35 = vadd.s32 1, %v9329_v7  ;;  %vm3683_vm14 = vweird.f32 %v15130_v14 }
 0x6c7   : > { %v3693_v13 = vsel %vm3686_vm10, %v3689_v12, %v3692_v36  ;;  %v6998_v25 = vor.u32 4788187, %v6997_v15  ;;  %v7012_v58 = vadd.s32 3, %v7008_v33  ;;  %v7238_v63 = vand.u32 8388607, %v7231_v37 }
 0x6c8   : > { %v3694_v29 = vsel %vm3683_vm14, nan, %v3693_v13  ;;  %v3964_v40 = vadd.s32 536870912, %v3963_v42  ;;  %vm7242_vm15 = vcmp.gt.s32.totalorder %v7241_v35, 0  ;;  %v7001_v26 = vcvt.s32.f32 %v6994_v17 }
 0x6c9   : > { %v7363_v39 = vsel %vm18_vm0, %v15130_v14, %v3694_v29  ;;  %v6999_v20 = vand.u32 2147483647, %v6998_v25  ;;  %v7243_v34 = vsel %vm7242_vm15, %v7241_v35, 0  ;;  %v3802_v60 = vand.u32 2139095040, %v15425_v45 }
 0x6ca   : > { %7429 = vst.msk [vmem:[%s10548_s19 + $0xe0] sm:$0xff] %vm7400_vm7, %v7363_v39  ;;  %v15437_v30 = vshrl.u32 %v3964_v40, 30  ;;  %v7245_v11 = vand.u32 31, %v7243_v34  ;;  %v15441_v28 = vand.u32 3, %v7012_v58  ;;  %v7239_v44 = vor.u32 8388608, %v7238_v63 }
 0x6cb   : > { %v7002_v54 = vmul.f32 %v7001_v26, %v6999_v20  ;;  %v3799_v14 = vand.u32 2147483647, %v15425_v45  ;;  %v7244_v38 = vshrl.u32 %v7243_v34, 5  ;;  %v3803_v49 = vshrl.u32 %v3802_v60, 23 }
 0x6cc   : > { %v3966_v52 = vshll.u32 %v15437_v30, 30  ;;  %v7246_v19 = vsub.s32 32, %v7245_v11  ;;  %v7248_v48 = vshll.u32 %v10032_v47, %v7245_v11  ;;  %v7251_v10 = vshll.u32 %v10033_v51, %v7245_v11 }
 0x6cd   : > { %v7003_v21 = vxor.u32 2147483648, %v7002_v54  ;;  %v7254_v62 = vshll.u32 %v10034_v53, %v7245_v11  ;;  %v7257_v18 = vshll.u32 %v10035_v55, %v7245_v11  ;;  %v7260_v4 = vshll.u32 %v10036_v57, %v7245_v11 }
 0x6ce   : > { %v15444_v23 = vsub.s32 %v3963_v42, %v3966_v52  ;;  %v7249_v8 = vshrl.u32 %v10033_v51, %v7246_v19  ;;  %v7252_v5 = vshrl.u32 %v10034_v53, %v7246_v19  ;;  %v7255_v33 = vshrl.u32 %v10035_v55, %v7246_v19 }
 0x6cf   : > { %v7004_v46 = vsel %vm6921_vm9, %v7003_v21, %v7002_v54  ;;  %v7258_v41 = vshrl.u32 %v10036_v57, %v7246_v19  ;;  %v7261_v17 = vshrl.u32 %v10037_v2, %v7246_v19  ;;  %v7279_v15 = vshll.u32 %v7239_v44, 8 }
 0x6d0   : > { %v7007_v59 = vsel %vm15387_vm13, %v15227_v6, %v7004_v46  ;;  %v3969_v22 = vsub.s32 0, %v15444_v23  ;;  %v7250_v9 = vor.u32 %v7249_v8, %v7248_v48  ;;  %v7253_v31 = vor.u32 %v7252_v5, %v7251_v10 }
 0x6d1   : > { %10004 = vcosq.f32 %v7007_v59  ;;  %v7256_v7 = vor.u32 %v7255_v33, %v7254_v62  ;;  %v7259_v36 = vor.u32 %v7258_v41, %v7257_v18  ;;  %v7247_v12 = vshrl.u32 %v10032_v47, %v7246_v19 }
 0x6d2   : > { %10006 = vsinq.f32 %v7007_v59  ;;  %v9202_v16 = vmin.u32 %v3969_v22, %v15444_v23  ;;  %vm7263_vm8 = vcmp.lt.s32.totalorder %v7244_v38, 1  ;;  %v9197_v42 = vadd.s32 4294967169, %v3803_v49 }
 0x6d3   : > { %v7262_v35 = vor.u32 %v7261_v17, %v7260_v4  ;;  %vm7264_vm9 = vcmp.lt.s32.totalorder %v7244_v38, 2  ;;  %vm7265_vm13 = vcmp.lt.s32.totalorder %v7244_v38, 3  ;;  %vm7266_vm4 = vcmp.lt.s32.totalorder %v7244_v38, 4 }
 0x6d4   : > { %v3971_v24 = vclz %v9202_v16  ;;  %vm7015_vm1 = vcmp.eq.s32.totalorder %v15441_v28, 0  ;;  %v7268_v25 = vsel %vm7266_vm4, %v7256_v7, 2102212464  ;;  %v7271_v58 = vsel %vm7263_vm8, %v7250_v9, %v7253_v31 }
 0x6d5   : > { %v7272_v29 = vsel %vm7266_vm4, %v7259_v36, 920167782  ;;  %vm7014_vm5 = vcmp.lt.s32.totalorder %v15441_v28, 2  ;;  %v7267_v40 = vsel %vm7263_vm8, %v7247_v12, %v7250_v9  ;;  %v7275_v39 = vsel %vm7263_vm8, %v7253_v31, %v7256_v7 }
 0x6d6   : > { %v9203_v13 = vadd.s32 4294967294, %v3971_v24  ;;  %v7273_v63 = vsel %vm7265_vm13, %v7256_v7, %v7272_v29  ;;  %v7276_v20 = vsel %vm7266_vm4, %v7262_v35, 1326507024  ;;  %vm7011_vm6 = vweird.f32 %v15227_v6 }
 0x6d7   : > { %v7269_v26 = vsel %vm7265_vm13, %v7253_v31, %v7268_v25  ;;  %v7274_v34 = vsel %vm7264_vm9, %v7271_v58, %v7273_v63  ;;  %v7277_v11 = vsel %vm7265_vm13, %v7259_v36, %v7276_v20  ;;  %vm7018_vm11 = vcmp.eq.s32.totalorder %v15441_v28, 2 }
 0x6d8   : > { %vm9204_vm10 = vcmp.lt.s32.totalorder %v9203_v13, 0  ;;  %v7278_v54 = vsel %vm7264_vm9, %v7275_v39, %v7277_v11  ;;  %v15472_v52 = vmul.u32.u64.low %v7279_v15, %v7274_v34  ;;  %v15473_v19 = vmul.u32.u64.high %v7279_v15, %v7274_v34, %v15472_v52 }
 0x6d9   : > { %v3974_v60 = vsel %vm9204_vm10, 0, %v9203_v13  ;;  %v3959_v21 = vadd.s32 %v15396_v27, %v15403_v61  ;;  %v7270_v46 = vsel %vm7264_vm9, %v7267_v40, %v7269_v26  ;;  %v3809_v33 = vadd.s32 1, %v9197_v42 }
 0x6da   : > { %v3975_v44 = vsub.s32 32, %v3974_v60  ;;  %v3979_v8 = vsub.s32 4294967266, %v3974_v60  ;;  %v15480_v48 = vmul.u32.u64.low %v7279_v15, %v7278_v54  ;;  %v15481_v5 = vmul.u32.u64.high %v7279_v15, %v7278_v54, %v15480_v48 }
 0x6db   : > { %v10005_v49 = vpop.eup %10004  ;;  %v3976_v10 = vshll.u32 %v15444_v23, %v3974_v60  ;;  %v7289_v41 = vadd.s32 1, %v15473_v19  ;;  %v15487_v27 = vand.u32 8388607, %v3799_v14  ;;  %vm3810_vm3 = vcmp.gt.s32.totalorder %v3809_v33, 0 }
 0x6dc   : > { %v10007_v59 = vpop.eup %10006  ;;  %v7019_v22 = vxor.u32 2147483648, %v10005_v49  ;;  %v3977_v62 = vshrl.u32 %v3959_v21, %v3975_v44  ;;  %v3980_v9 = vadd.s32 127, %v3979_v8  ;;  %v3811_v31 = vsel %vm3810_vm3, %v3809_v33, 0 }
 0x6dd   : > { %v7016_v18 = vxor.u32 2147483648, %v10007_v59  ;;  %v3989_v23 = vsub.s32 4, %v15437_v30  ;;  %v7286_v36 = vmul.u32 %v7279_v15, %v7270_v46  ;;  %vm7288_vm12 = vc.u32 %v15481_v5, %v15472_v52 }
 0x6de   : > { %v7020_v61 = vsel %vm7018_vm11, %v7019_v22, %v10007_v59  ;;  %v3978_v38 = vor.u32 %v3977_v62, %v3976_v10  ;;  %v3981_v16 = vshll.u32 %v3980_v9, 23  ;;  %vm3905_vm2 = vcmp.lt.s32.totalorder %v15283_v32, 0 }
 0x6df   : > { %v7017_v7 = vsel %vm7015_vm1, %v10005_v49, %v7016_v18  ;;  %v7290_v24 = vsel %vm7288_vm12, %v7289_v41, %v15473_v19  ;;  %vm15504_vm14 = vcmp.le.f32.partialorder %v3903_v43, 0.7853982  ;;  %v3813_v35 = vand.u32 31, %v3811_v31 }
 0x6e0   : > { %v7021_v4 = vsel %vm7014_vm5, %v7017_v7, %v7020_v61  ;;  %v3982_v17 = vor.u32 4788187, %v3981_v16  ;;  %v7291_v15 = vadd.s32 %v7290_v24, %v7286_v36  ;;  %v3985_v25 = vcvt.s32.f32 %v3978_v38 }
 0x6e1   : > { %v7022_v12 = vsel %vm7011_vm6, nan, %v7021_v4  ;;  %v3807_v58 = vor.u32 8388608, %v15487_v27  ;;  %v3990_v29 = vsel %vm3905_vm2, %v3989_v23, %v15437_v30  ;;  %v3812_v40 = vshrl.u32 %v3811_v31, 5 }
 0x6e2   : > { %v7395_v28 = vsel %vm18_vm0, %v15227_v6, %v7022_v12  ;;  %v3983_v13 = vand.u32 2147483647, %v3982_v17  ;;  %v7292_v43 = vadd.s32 536870912, %v7291_v15  ;;  %v3814_v63 = vsub.s32 32, %v3813_v35 }
 0x6e3   : > { %7461 = vst.msk [vmem:[%s10548_s19 + $0x1e0] sm:$0xff] %vm7400_vm7, %v7395_v28  ;;  %v3816_v20 = vshll.u32 %v10032_v47, %v3813_v35  ;;  %v3819_v26 = vshll.u32 %v10033_v51, %v3813_v35  ;;  %v3822_v6 = vshll.u32 %v10034_v53, %v3813_v35  ;;  %v3825_v54 = vshll.u32 %v10035_v55, %v3813_v35 }
 0x6e4   : > { %v3986_v39 = vmul.f32 %v3985_v25, %v3983_v13  ;;  %v15520_v34 = vshrl.u32 %v7292_v43, 30  ;;  %v3817_v11 = vshrl.u32 %v10033_v51, %v3814_v63  ;;  %v3820_v60 = vshrl.u32 %v10034_v53, %v3814_v63 }
 0x6e5   : > { %v3823_v30 = vshrl.u32 %v10035_v55, %v3814_v63  ;;  %v3826_v21 = vshrl.u32 %v10036_v57, %v3814_v63  ;;  %v3829_v44 = vshrl.u32 %v10037_v2, %v3814_v63  ;;  %v3992_v8 = vsel %vm15504_vm14, 0, %v3990_v29 }
 0x6e6   : > { %v3987_v19 = vxor.u32 2147483648, %v3986_v39  ;;  %v7294_v49 = vshll.u32 %v15520_v34, 30  ;;  %v3818_v46 = vor.u32 %v3817_v11, %v3816_v20  ;;  %v3828_v48 = vshll.u32 %v10036_v57, %v3813_v35 }
 0x6e7   : > { %v3821_v59 = vor.u32 %v3820_v60, %v3819_v26  ;;  %v3824_v22 = vor.u32 %v3823_v30, %v3822_v6  ;;  %v3827_v10 = vor.u32 %v3826_v21, %v3825_v54  ;;  %v15541_v41 = vadd.f32 %v10066_v1, %v15081_v56 }
 0x6e8   : > { %v3988_v33 = vsel %vm3905_vm2, %v3987_v19, %v3986_v39  ;;  %v15537_v9 = vsub.s32 %v7291_v15, %v7294_v49  ;;  %v3830_v18 = vor.u32 %v3829_v44, %v3828_v48  ;;  %v3996_v27 = vadd.s32 3, %v3992_v8 }
 0x6e9   : > { %v3991_v62 = vsel %vm15504_vm14, %v15283_v32, %v3988_v33  ;;  %vm3831_vm15 = vcmp.lt.s32.totalorder %v3812_v40, 1  ;;  %vm3832_vm8 = vcmp.lt.s32.totalorder %v3812_v40, 2  ;;  %vm3833_vm9 = vcmp.lt.s32.totalorder %v3812_v40, 3 }
 0x6ea   : > { %10008 = vcosq.f32 %v3991_v62  ;;  %v7297_v61 = vsub.s32 0, %v15537_v9  ;;  %vm3834_vm13 = vcmp.lt.s32.totalorder %v3812_v40, 4  ;;  %v3815_v38 = vshrl.u32 %v10032_v47, %v3814_v63 }
 0x6eb   : > { %10010 = vsinq.f32 %v3991_v62  ;;  %v3836_v16 = vsel %vm3834_vm13, %v3824_v22, 2102212464  ;;  %v3839_v31 = vsel %vm3831_vm15, %v3818_v46, %v3821_v59  ;;  %v3840_v7 = vsel %vm3834_vm13, %v3827_v10, 920167782 }
 0x6ec   : > { %v9330_v23 = vmin.u32 %v7297_v61, %v15537_v9  ;;  %v3841_v56 = vsel %vm3833_vm9, %v3824_v22, %v3840_v7  ;;  %v3843_v36 = vsel %vm3831_vm15, %v3821_v59, %v3824_v22  ;;  %v3844_v4 = vsel %vm3834_vm13, %v3830_v18, 1326507024 }
 0x6ed   : > { %v3997_v17 = vand.u32 3, %v3996_v27  ;;  %v3842_v24 = vsel %vm3832_vm8, %v3839_v31, %v3841_v56  ;;  %v3845_v12 = vsel %vm3833_vm9, %v3827_v10, %v3844_v4  ;;  %v3847_v42 = vshll.u32 %v3807_v58, 8 }
 0x6ee   : > { %v7299_v15 = vclz %v9330_v23  ;;  %v3835_v35 = vsel %vm3831_vm15, %v3815_v38, %v3818_v46  ;;  %v3837_v28 = vsel %vm3833_vm9, %v3821_v59, %v3836_v16  ;;  %v3846_v13 = vsel %vm3832_vm8, %v3843_v36, %v3845_v12 }
 0x6ef   : > { %v15554_v25 = vmul.u32.u64.low %v3847_v42, %v3842_v24  ;;  %v15555_v29 = vmul.u32.u64.high %v3847_v42, %v3842_v24, %v15554_v25  ;;  %v7130_v43 = vand.u32 2139095040, %v15541_v41  ;;  %vm3995_vm4 = vweird.f32 %v15283_v32 }
 0x6f0   : > { %vm7233_vm1 = vcmp.lt.s32.totalorder %v15383_v50, 0  ;;  %v9331_v63 = vadd.s32 4294967294, %v7299_v15  ;;  %v15561_v39 = vmul.u32.u64.low %v3847_v42, %v3846_v13  ;;  %v15562_v58 = vmul.u32.u64.high %v3847_v42, %v3846_v13, %v15561_v39 }
 0x6f1   : > { %vm3998_vm5 = vcmp.lt.s32.totalorder %v3997_v17, 2  ;;  %vm3999_vm6 = vcmp.eq.s32.totalorder %v3997_v17, 0  ;;  %v3838_v20 = vsel %vm3832_vm8, %v3835_v35, %v3837_v28  ;;  %v7131_v26 = vshrl.u32 %v7130_v43, 23 }
 0x6f2   : > { %vm4002_vm10 = vcmp.eq.s32.totalorder %v3997_v17, 2  ;;  %v7287_v6 = vadd.s32 %v15472_v52, %v15481_v5  ;;  %vm9332_vm11 = vcmp.lt.s32.totalorder %v9331_v63, 0  ;;  %v7127_v11 = vand.u32 2147483647, %v15541_v41 }
 0x6f3   : > { %v7302_v54 = vsel %vm9332_vm11, 0, %v9331_v63  ;;  %v7317_v19 = vsub.s32 4, %v15520_v34  ;;  %v3857_v30 = vadd.s32 1, %v15555_v29  ;;  %v9325_v21 = vadd.s32 4294967169, %v7131_v26 }
 0x6f4   : > { %v10009_v60 = vpop.eup %10008  ;;  %v7303_v49 = vsub.s32 32, %v7302_v54  ;;  %v7307_v40 = vsub.s32 4294967266, %v7302_v54  ;;  %v3854_v46 = vmul.u32 %v3847_v42, %v3838_v20  ;;  %v7304_v33 = vshll.u32 %v15537_v9, %v7302_v54 }
 0x6f5   : > { %v10011_v44 = vpop.eup %10010  ;;  %v4003_v8 = vxor.u32 2147483648, %v10009_v60  ;;  %vm3856_vm3 = vc.u32 %v15562_v58, %v15554_v25  ;;  %v7137_v52 = vadd.s32 1, %v9325_v21  ;;  %v7318_v18 = vsel %vm7233_vm1, %v7317_v19, %v15520_v34 }
 0x6f6   : > { %v4000_v48 = vxor.u32 2147483648, %v10011_v44  ;;  %v7305_v59 = vshrl.u32 %v7287_v6, %v7303_v49  ;;  %v7308_v22 = vadd.s32 127, %v7307_v40  ;;  %v3858_v10 = vsel %vm3856_vm3, %v3857_v30, %v15555_v29 }
 0x6f7   : > { %v4004_v5 = vsel %vm4002_vm10, %v4003_v8, %v10011_v44  ;;  %v3859_v27 = vadd.s32 %v3858_v10, %v3854_v46  ;;  %vm7138_vm12 = vcmp.gt.s32.totalorder %v7137_v52, 0  ;;  %v7134_v23 = vand.u32 8388607, %v7127_v11 }
 0x6f8   : > { %v4001_v62 = vsel %vm3999_vm6, %v10009_v60, %v4000_v48  ;;  %v7306_v61 = vor.u32 %v7305_v59, %v7304_v33  ;;  %v7309_v38 = vshll.u32 %v7308_v22, 23  ;;  %v7139_v16 = vsel %vm7138_vm12, %v7137_v52, 0 }
 0x6f9   : > { %v4005_v9 = vsel %vm3998_vm5, %v4001_v62, %v4004_v5  ;;  %v3860_v7 = vadd.s32 536870912, %v3859_v27  ;;  %v7141_v56 = vand.u32 31, %v7139_v16  ;;  %vm15591_vm2 = vcmp.le.f32.partialorder %v7231_v37, 0.7853982 }
 0x6fa   : > { %v4006_v31 = vsel %vm3995_vm4, nan, %v4005_v9  ;;  %v7310_v34 = vor.u32 4788187, %v7309_v38  ;;  %v7313_v42 = vcvt.s32.f32 %v7306_v61  ;;  %v7320_v15 = vsel %vm15591_vm2, 0, %v7318_v18 }
 0x6fb   : > { %v7366_v36 = vsel %vm18_vm0, %v15283_v32, %v4006_v31  ;;  %v15595_v17 = vshrl.u32 %v3860_v7, 30  ;;  %v7142_v24 = vsub.s32 32, %v7141_v56  ;;  %v7135_v32 = vor.u32 8388608, %v7134_v23 }
 0x6fc   : > { %7432 = vst.msk [vmem:[%s10548_s19 + $0xf8] sm:$0xff] %vm7400_vm7, %v7366_v36  ;;  %v7311_v12 = vand.u32 2147483647, %v7310_v34  ;;  %v7144_v28 = vshll.u32 %v10032_v47, %v7141_v56  ;;  %v7147_v20 = vshll.u32 %v10033_v51, %v7141_v56  ;;  %v7150_v26 = vshll.u32 %v10034_v53, %v7141_v56 }
 0x6fd   : > { %v3862_v35 = vshll.u32 %v15595_v17, 30  ;;  %v7145_v13 = vshrl.u32 %v10033_v51, %v7142_v24  ;;  %v7148_v37 = vshrl.u32 %v10034_v53, %v7142_v24  ;;  %v7151_v43 = vshrl.u32 %v10035_v55, %v7142_v24 }
 0x6fe   : > { %v7314_v29 = vmul.f32 %v7313_v42, %v7311_v12  ;;  %v7154_v63 = vshrl.u32 %v10036_v57, %v7142_v24  ;;  %v7157_v6 = vshrl.u32 %v10037_v2, %v7142_v24  ;;  %v7140_v54 = vshrl.u32 %v7139_v16, 5 }
 0x6ff   : > { %v3863_v39 = vsub.s32 %v3859_v27, %v3862_v35  ;;  %v7153_v19 = vshll.u32 %v10035_v55, %v7141_v56  ;;  %v7156_v30 = vshll.u32 %v10036_v57, %v7141_v56  ;;  %v7146_v44 = vor.u32 %v7145_v13, %v7144_v28 }
 0x700   : > { %v7315_v60 = vxor.u32 2147483648, %v7314_v29  ;;  %v7149_v8 = vor.u32 %v7148_v37, %v7147_v20  ;;  %v7152_v49 = vor.u32 %v7151_v43, %v7150_v26  ;;  %v7324_v53 = vadd.s32 3, %v7320_v15 }
 0x701   : > { %v3865_v21 = vsub.s32 0, %v3863_v39  ;;  %v7155_v46 = vor.u32 %v7154_v63, %v7153_v19  ;;  %v7158_v48 = vor.u32 %v7157_v6, %v7156_v30  ;;  %vm7159_vm14 = vcmp.lt.s32.totalorder %v7140_v54, 1 }
 0x702   : > { %v7316_v40 = vsel %vm7233_vm1, %v7315_v60, %v7314_v29  ;;  %vm7162_vm15 = vcmp.lt.s32.totalorder %v7140_v54, 4  ;;  %v7175_v55 = vshll.u32 %v7135_v32, 8  ;;  %v7167_v52 = vsel %vm7159_vm14, %v7146_v44, %v7149_v8 }
 0x703   : > { %v7319_v51 = vsel %vm15591_vm2, %v15383_v50, %v7316_v40  ;;  %v9198_v2 = vmin.u32 %v3865_v21, %v3863_v39  ;;  %v7164_v33 = vsel %vm7162_vm15, %v7152_v49, 2102212464  ;;  %v7143_v5 = vshrl.u32 %v10032_v47, %v7142_v24 }
 0x704   : > { %10012 = vcosq.f32 %v7319_v51  ;;  %vm7161_vm8 = vcmp.lt.s32.totalorder %v7140_v54, 3  ;;  %v7168_v59 = vsel %vm7162_vm15, %v7155_v46, 920167782  ;;  %v7171_v22 = vsel %vm7159_vm14, %v7149_v8, %v7152_v49 }
 0x705   : > { %10014 = vsinq.f32 %v7319_v51  ;;  %v3867_v57 = vclz %v9198_v2  ;;  %vm7160_vm9 = vcmp.lt.s32.totalorder %v7140_v54, 2  ;;  %v7169_v62 = vsel %vm7161_vm8, %v7152_v49, %v7168_v59 }
 0x706   : > { %v7172_v18 = vsel %vm7162_vm15, %v7158_v48, 1326507024  ;;  %v7163_v27 = vsel %vm7159_vm14, %v7143_v5, %v7146_v44  ;;  %v7165_v9 = vsel %vm7161_vm8, %v7149_v8, %v7164_v33  ;;  %v7170_v61 = vsel %vm7160_vm9, %v7167_v52, %v7169_v62 }
 0x707   : > { %v9199_v10 = vadd.s32 4294967294, %v3867_v57  ;;  %v7173_v38 = vsel %vm7161_vm8, %v7155_v46, %v7172_v18  ;;  %v15616_v31 = vmul.u32.u64.low %v7175_v55, %v7170_v61  ;;  %v15617_v7 = vmul.u32.u64.high %v7175_v55, %v7170_v61, %v15616_v31 }
 0x708   : > { %v7174_v16 = vsel %vm7160_vm9, %v7171_v22, %v7173_v38  ;;  %v3855_v47 = vadd.s32 %v15554_v25, %v15562_v58  ;;  %v7166_v24 = vsel %vm7160_vm9, %v7163_v27, %v7165_v9  ;;  %v7325_v12 = vand.u32 3, %v7324_v53 }
 0x709   : > { %vm9200_vm13 = vcmp.lt.s32.totalorder %v9199_v10, 0  ;;  %v15619_v56 = vmul.u32.u64.low %v7175_v55, %v7174_v16  ;;  %v15620_v36 = vmul.u32.u64.high %v7175_v55, %v7174_v16, %v15619_v56  ;;  %v7185_v32 = vadd.s32 1, %v15617_v7 }
 0x70a   : > { %v3870_v23 = vsel %vm9200_vm13, 0, %v9199_v10  ;;  %v7182_v13 = vmul.u32 %v7175_v55, %v7166_v24  ;;  %vm7330_vm1 = vcmp.eq.s32.totalorder %v7325_v12, 2  ;;  %vm7327_vm5 = vcmp.eq.s32.totalorder %v7325_v12, 0 }
 0x70b   : > { %v3871_v34 = vsub.s32 32, %v3870_v23  ;;  %v3875_v4 = vsub.s32 4294967266, %v3870_v23  ;;  %v3872_v42 = vshll.u32 %v3863_v39, %v3870_v23  ;;  %vm7184_vm4 = vc.u32 %v15620_v36, %v15616_v31 }
 0x70c   : > { %v7186_v20 = vsel %vm7184_vm4, %v7185_v32, %v15617_v7  ;;  %vm7326_vm6 = vcmp.lt.s32.totalorder %v7325_v12, 2  ;;  %vm7323_vm10 = vweird.f32 %v15383_v50  ;;  %v3885_v40 = vsub.s32 4, %v15595_v17 }
 0x70d   : > { %v3873_v15 = vshrl.u32 %v3855_v47, %v3871_v34  ;;  %v3876_v35 = vadd.s32 127, %v3875_v4  ;;  %v7187_v58 = vadd.s32 %v7186_v20, %v7182_v13  ;;  %vm3801_vm11 = vcmp.lt.s32.totalorder %v15425_v45, 0 }
 0x70e   : > { %v10013_v28 = vpop.eup %10012  ;;  %vm3800_vm3 = vcmp.le.f32.partialorder %v3799_v14, 0.7853982  ;;  %v3886_v48 = vsel %vm3801_vm11, %v3885_v40, %v15595_v17  ;;  %v7183_v62 = vadd.s32 %v15616_v31, %v15620_v36  ;;  %vm3891_vm8 = vweird.f32 %v15425_v45 }
 0x70f   : > { %v10015_v29 = vpop.eup %10014  ;;  %v7331_v37 = vxor.u32 2147483648, %v10013_v28  ;;  %v3874_v43 = vor.u32 %v3873_v15, %v3872_v42  ;;  %v3877_v63 = vshll.u32 %v3876_v35, 23  ;;  %v7188_v60 = vadd.s32 536870912, %v7187_v58 }
 0x710   : > { %v7328_v25 = vxor.u32 2147483648, %v10015_v29  ;;  %vm7129_vm9 = vcmp.lt.s32.totalorder %v15541_v41, 0  ;;  %vm7128_vm13 = vcmp.le.f32.partialorder %v7127_v11, 0.7853982 }
 0x711   : > { %v7332_v39 = vsel %vm7330_vm1, %v7331_v37, %v10015_v29  ;;  %v3878_v26 = vor.u32 4788187, %v3877_v63  ;;  %v3881_v30 = vcvt.s32.f32 %v3874_v43  ;;  %v7189_v44 = vshrl.u32 %v7188_v60, 30 }
 0x712   : > { %v7329_v6 = vsel %vm7327_vm5, %v10013_v28, %v7328_v25 }
 0x713   : > { %v7333_v54 = vsel %vm7326_vm6, %v7329_v6, %v7332_v39  ;;  %v3879_v19 = vand.u32 2147483647, %v3878_v26  ;;  %v7190_v46 = vshll.u32 %v7189_v44, 30  ;;  %v7213_v35 = vsub.s32 4, %v7189_v44 }
 0x714   : > { %v7334_v21 = vsel %vm7323_vm10, nan, %v7333_v54  ;;  %vm7219_vm6 = vweird.f32 %v15541_v41 }
 0x715   : > { %v7398_v8 = vsel %vm18_vm0, %v15383_v50, %v7334_v21  ;;  %v3882_v49 = vmul.f32 %v3881_v30, %v3879_v19  ;;  %v7191_v53 = vsub.s32 %v7187_v58, %v7190_v46  ;;  %v3888_v50 = vsel %vm3800_vm3, 0, %v3886_v48 }
 0x716   : > { %7464 = vst.msk [vmem:[%s10548_s19 + $0x1f8] sm:$0xff] %vm7400_vm7, %v7398_v8  ;;  %v3892_v5 = vadd.s32 3, %v3888_v50  ;;  %v7214_v13 = vsel %vm7129_vm9, %v7213_v35, %v7189_v44 }
 0x717   : > { %v3883_v51 = vxor.u32 2147483648, %v3882_v49  ;;  %v7193_v57 = vsub.s32 0, %v7191_v53  ;;  %v7216_v37 = vsel %vm7128_vm13, 0, %v7214_v13 }
 0x718   : > { %v3893_v22 = vand.u32 3, %v3892_v5 }
 0x719   : > { %v3884_v2 = vsel %vm3801_vm11, %v3883_v51, %v3882_v49  ;;  %v9326_v33 = vmin.u32 %v7193_v57, %v7191_v53 }
 0x71a   : > { %v3887_v55 = vsel %vm3800_vm3, %v15425_v45, %v3884_v2  ;;  %vm3898_vm2 = vcmp.eq.s32.totalorder %v3893_v22, 2  ;;  %vm3895_vm14 = vcmp.eq.s32.totalorder %v3893_v22, 0  ;;  %vm3894_vm15 = vcmp.lt.s32.totalorder %v3893_v22, 2 }
 0x71b   : > { %10016 = vcosq.f32 %v3887_v55  ;;  %v7195_v52 = vclz %v9326_v33 }
 0x71c   : > { %10018 = vsinq.f32 %v3887_v55 }
 0x71d   : > { %v9327_v59 = vadd.s32 4294967294, %v7195_v52 }
 0x71f   : > { %vm9328_vm12 = vcmp.lt.s32.totalorder %v9327_v59, 0 }
 0x720   : > { %v7198_v10 = vsel %vm9328_vm12, 0, %v9327_v59 }
 0x721   : > { %v7199_v18 = vsub.s32 32, %v7198_v10  ;;  %v7203_v14 = vsub.s32 4294967266, %v7198_v10  ;;  %v7200_v61 = vshll.u32 %v7191_v53, %v7198_v10 }
 0x723   : > { %v7201_v38 = vshrl.u32 %v7183_v62, %v7199_v18  ;;  %v7204_v16 = vadd.s32 127, %v7203_v14 }
 0x725   : > { %v10017_v27 = vpop.eup %10016  ;;  %v7202_v56 = vor.u32 %v7201_v38, %v7200_v61  ;;  %v7205_v47 = vshll.u32 %v7204_v16, 23 }
 0x726   : > { %v10019_v9 = vpop.eup %10018  ;;  %v3899_v17 = vxor.u32 2147483648, %v10017_v27 }
 0x727   : > { %v3896_v7 = vxor.u32 2147483648, %v10019_v9  ;;  %v7206_v36 = vor.u32 4788187, %v7205_v47  ;;  %v7209_v42 = vcvt.s32.f32 %v7202_v56 }
 0x728   : > { %v3900_v23 = vsel %vm3898_vm2, %v3899_v17, %v10019_v9 }
 0x729   : > { %v3897_v34 = vsel %vm3895_vm14, %v10017_v27, %v3896_v7  ;;  %v7207_v12 = vand.u32 2147483647, %v7206_v36 }
 0x72a   : > { %v3901_v31 = vsel %vm3894_vm15, %v3897_v34, %v3900_v23 }
 0x72b   : > { %v3902_v4 = vsel %vm3891_vm8, nan, %v3901_v31  ;;  %v7210_v15 = vmul.f32 %v7209_v42, %v7207_v12 }
 0x72c   : > { %v7365_v24 = vsel %vm18_vm0, %v15425_v45, %v3902_v4  ;;  %v7220_v45 = vadd.s32 3, %v7216_v37 }
 0x72d   : > { %7431 = vst.msk [vmem:[%s10548_s19 + $0xf0] sm:$0xff] %vm7400_vm7, %v7365_v24  ;;  %v7211_v32 = vxor.u32 2147483648, %v7210_v15 }
 0x72e   : > { %v7221_v43 = vand.u32 3, %v7220_v45 }
 0x72f   : > { %v7212_v28 = vsel %vm7129_vm9, %v7211_v32, %v7210_v15 }
 0x730   : > { %v7215_v29 = vsel %vm7128_vm13, %v15541_v41, %v7212_v28  ;;  %vm7226_vm4 = vcmp.eq.s32.totalorder %v7221_v43, 2  ;;  %vm7223_vm1 = vcmp.eq.s32.totalorder %v7221_v43, 0  ;;  %vm7222_vm5 = vcmp.lt.s32.totalorder %v7221_v43, 2 }
 0x731   : > { %10020 = vcosq.f32 %v7215_v29 }
 0x732   : > { %10022 = vsinq.f32 %v7215_v29 }
 0x73b   : > { %v10021_v63 = vpop.eup %10020 }
 0x73c   : > { %v10023_v20 = vpop.eup %10022  ;;  %v7227_v25 = vxor.u32 2147483648, %v10021_v63 }
 0x73d   : > { %v7224_v58 = vxor.u32 2147483648, %v10023_v20  ;;  %23 = sbr.rel (!%p21_p0) target bundleno = 5 (0x5), region = 79 }
 0x73e   : > { %v7228_v39 = vsel %vm7226_vm4, %v7227_v25, %v10023_v20 }
 0x73f   : > { %v7225_v26 = vsel %vm7223_vm1, %v10021_v63, %v7224_v58 }
 0x740   : > { %v7229_v11 = vsel %vm7222_vm5, %v7225_v26, %v7228_v39 }
 0x741   : > { %v7230_v6 = vsel %vm7219_vm6, nan, %v7229_v11 }
 0x742   : > { %v7397_v60 = vsel %vm18_vm0, %v15541_v41, %v7230_v6 }
 0x743   : > { %7463 = vst.msk [vmem:[%s10548_s19 + $0x1f0] sm:$0xff] %vm7400_vm7, %v7397_v60 }
 0x74a   :  { %v8242_v54 = vld [vmem:[#allocation2] sm:$0xff]  ;;  %v8244_v19 = vld [vmem:[#allocation2 + $0x8] sm:$0xff]  ;;  %v8246_v30 = vld [vmem:[#allocation2 + $0x10] sm:$0xff] }
 0x74b   :  { %8243 = vst [vmem:[%s16787_s3] sm:$0xff] %v8242_v54  ;;  %8245 = vst [vmem:[%s16787_s3 + $0x8] sm:$0xff] %v8244_v19  ;;  %v8248_v41 = vld [vmem:[#allocation2 + $0x18] sm:$0xff]  ;;  %v8250_v21 = vld [vmem:[#allocation2 + $0x20] sm:$0xff] }
 0x74c   :  { %8247 = vst [vmem:[%s16787_s3 + $0x10] sm:$0xff] %v8246_v30  ;;  %v8252_v44 = vld [vmem:[#allocation2 + $0x28] sm:$0xff]  ;;  %8249 = vst [vmem:[%s16787_s3 + $0x18] sm:$0xff] %v8248_v41  ;;  %v8254_v0 = vld [vmem:[#allocation2 + $0x30] sm:$0xff] }
 0x74d   :  { %8251 = vst [vmem:[%s16787_s3 + $0x20] sm:$0xff] %v8250_v21  ;;  %8253 = vst [vmem:[%s16787_s3 + $0x28] sm:$0xff] %v8252_v44  ;;  %v8256_v1 = vld [vmem:[#allocation2 + $0x38] sm:$0xff]  ;;  %v8258_v3 = vld [vmem:[#allocation2 + $0x40] sm:$0xff] }
 0x74e   :  { %8255 = vst [vmem:[%s16787_s3 + $0x30] sm:$0xff] %v8254_v0  ;;  %8257 = vst [vmem:[%s16787_s3 + $0x38] sm:$0xff] %v8256_v1  ;;  %v8260_v8 = vld [vmem:[#allocation2 + $0x48] sm:$0xff]  ;;  %v8262_v49 = vld [vmem:[#allocation2 + $0x50] sm:$0xff] }
 0x74f   :  { %8259 = vst [vmem:[%s16787_s3 + $0x40] sm:$0xff] %v8258_v3  ;;  %v8264_v40 = vld [vmem:[#allocation2 + $0x58] sm:$0xff]  ;;  %8261 = vst [vmem:[%s16787_s3 + $0x48] sm:$0xff] %v8260_v8  ;;  %v8266_v46 = vld [vmem:[#allocation2 + $0x60] sm:$0xff] }
 0x750   :  { %8263 = vst [vmem:[%s16787_s3 + $0x50] sm:$0xff] %v8262_v49  ;;  %8265 = vst [vmem:[%s16787_s3 + $0x58] sm:$0xff] %v8264_v40  ;;  %v8268_v51 = vld [vmem:[#allocation2 + $0x68] sm:$0xff]  ;;  %v8270_v53 = vld [vmem:[#allocation2 + $0x70] sm:$0xff] }
 0x751   :  { %8267 = vst [vmem:[%s16787_s3 + $0x60] sm:$0xff] %v8266_v46  ;;  %8269 = vst [vmem:[%s16787_s3 + $0x68] sm:$0xff] %v8268_v51  ;;  %v8272_v2 = vld [vmem:[#allocation2 + $0x78] sm:$0xff]  ;;  %v8274_v48 = vld [vmem:[#allocation2 + $0x80] sm:$0xff] }
 0x752   :  { %8271 = vst [vmem:[%s16787_s3 + $0x70] sm:$0xff] %v8270_v53  ;;  %v8276_v55 = vld [vmem:[#allocation2 + $0x88] sm:$0xff]  ;;  %8273 = vst [vmem:[%s16787_s3 + $0x78] sm:$0xff] %v8272_v2  ;;  %v8278_v57 = vld [vmem:[#allocation2 + $0x90] sm:$0xff] }
 0x753   :  { %8275 = vst [vmem:[%s16787_s3 + $0x80] sm:$0xff] %v8274_v48  ;;  %8277 = vst [vmem:[%s16787_s3 + $0x88] sm:$0xff] %v8276_v55  ;;  %v8280_v50 = vld [vmem:[#allocation2 + $0x98] sm:$0xff]  ;;  %v8282_v33 = vld [vmem:[#allocation2 + $0xa0] sm:$0xff] }
 0x754   :  { %8279 = vst [vmem:[%s16787_s3 + $0x90] sm:$0xff] %v8278_v57  ;;  %8281 = vst [vmem:[%s16787_s3 + $0x98] sm:$0xff] %v8280_v50  ;;  %v8284_v52 = vld [vmem:[#allocation2 + $0xa8] sm:$0xff]  ;;  %v8286_v5 = vld [vmem:[#allocation2 + $0xb0] sm:$0xff] }
 0x755   :  { %8283 = vst [vmem:[%s16787_s3 + $0xa0] sm:$0xff] %v8282_v33  ;;  %v8288_v59 = vld [vmem:[#allocation2 + $0xb8] sm:$0xff]  ;;  %8285 = vst [vmem:[%s16787_s3 + $0xa8] sm:$0xff] %v8284_v52  ;;  %v8290_v22 = vld [vmem:[#allocation2 + $0xc0] sm:$0xff] }
 0x756   :  { %8287 = vst [vmem:[%s16787_s3 + $0xb0] sm:$0xff] %v8286_v5  ;;  %8289 = vst [vmem:[%s16787_s3 + $0xb8] sm:$0xff] %v8288_v59  ;;  %v8292_v10 = vld [vmem:[#allocation2 + $0xc8] sm:$0xff]  ;;  %v8294_v62 = vld [vmem:[#allocation2 + $0xd0] sm:$0xff] }
 0x757   :  { %8291 = vst [vmem:[%s16787_s3 + $0xc0] sm:$0xff] %v8290_v22  ;;  %8293 = vst [vmem:[%s16787_s3 + $0xc8] sm:$0xff] %v8292_v10  ;;  %v8296_v18 = vld [vmem:[#allocation2 + $0xd8] sm:$0xff]  ;;  %v8298_v14 = vld [vmem:[#allocation2 + $0xe0] sm:$0xff] }
 0x758   :  { %8295 = vst [vmem:[%s16787_s3 + $0xd0] sm:$0xff] %v8294_v62  ;;  %v8300_v27 = vld [vmem:[#allocation2 + $0xe8] sm:$0xff]  ;;  %8297 = vst [vmem:[%s16787_s3 + $0xd8] sm:$0xff] %v8296_v18  ;;  %v8302_v9 = vld [vmem:[#allocation2 + $0xf0] sm:$0xff] }
 0x759   :  { %8299 = vst [vmem:[%s16787_s3 + $0xe0] sm:$0xff] %v8298_v14  ;;  %8301 = vst [vmem:[%s16787_s3 + $0xe8] sm:$0xff] %v8300_v27  ;;  %v8304_v17 = vld [vmem:[#allocation2 + $0xf8] sm:$0xff]  ;;  %v8306_v61 = vld [vmem:[#allocation2 + $0x100] sm:$0xff] }
 0x75a   :  { %8303 = vst [vmem:[%s16787_s3 + $0xf0] sm:$0xff] %v8302_v9  ;;  %8305 = vst [vmem:[%s16787_s3 + $0xf8] sm:$0xff] %v8304_v17  ;;  %v8308_v38 = vld [vmem:[#allocation2 + $0x108] sm:$0xff]  ;;  %v8310_v16 = vld [vmem:[#allocation2 + $0x110] sm:$0xff] }
 0x75b   :  { %8307 = vst [vmem:[%s16787_s3 + $0x100] sm:$0xff] %v8306_v61  ;;  %v8312_v7 = vld [vmem:[#allocation2 + $0x118] sm:$0xff]  ;;  %8309 = vst [vmem:[%s16787_s3 + $0x108] sm:$0xff] %v8308_v38  ;;  %v8314_v23 = vld [vmem:[#allocation2 + $0x120] sm:$0xff] }
 0x75c   :  { %8311 = vst [vmem:[%s16787_s3 + $0x110] sm:$0xff] %v8310_v16  ;;  %8313 = vst [vmem:[%s16787_s3 + $0x118] sm:$0xff] %v8312_v7  ;;  %v8316_v56 = vld [vmem:[#allocation2 + $0x128] sm:$0xff]  ;;  %v8318_v47 = vld [vmem:[#allocation2 + $0x130] sm:$0xff] }
 0x75d   :  { %8315 = vst [vmem:[%s16787_s3 + $0x120] sm:$0xff] %v8314_v23  ;;  %8317 = vst [vmem:[%s16787_s3 + $0x128] sm:$0xff] %v8316_v56  ;;  %v8320_v34 = vld [vmem:[#allocation2 + $0x138] sm:$0xff]  ;;  %v8322_v31 = vld [vmem:[#allocation2 + $0x140] sm:$0xff] }
 0x75e   :  { %8319 = vst [vmem:[%s16787_s3 + $0x130] sm:$0xff] %v8318_v47  ;;  %v8324_v36 = vld [vmem:[#allocation2 + $0x148] sm:$0xff]  ;;  %8321 = vst [vmem:[%s16787_s3 + $0x138] sm:$0xff] %v8320_v34  ;;  %v8326_v4 = vld [vmem:[#allocation2 + $0x150] sm:$0xff] }
 0x75f   :  { %8323 = vst [vmem:[%s16787_s3 + $0x140] sm:$0xff] %v8322_v31  ;;  %8325 = vst [vmem:[%s16787_s3 + $0x148] sm:$0xff] %v8324_v36  ;;  %v8328_v24 = vld [vmem:[#allocation2 + $0x158] sm:$0xff]  ;;  %v8330_v12 = vld [vmem:[#allocation2 + $0x160] sm:$0xff] }
 0x760   :  { %8327 = vst [vmem:[%s16787_s3 + $0x150] sm:$0xff] %v8326_v4  ;;  %8329 = vst [vmem:[%s16787_s3 + $0x158] sm:$0xff] %v8328_v24  ;;  %v8332_v42 = vld [vmem:[#allocation2 + $0x168] sm:$0xff]  ;;  %v8334_v15 = vld [vmem:[#allocation2 + $0x170] sm:$0xff] }
 0x761   :  { %8331 = vst [vmem:[%s16787_s3 + $0x160] sm:$0xff] %v8330_v12  ;;  %v8336_v35 = vld [vmem:[#allocation2 + $0x178] sm:$0xff]  ;;  %8333 = vst [vmem:[%s16787_s3 + $0x168] sm:$0xff] %v8332_v42  ;;  %v8338_v32 = vld [vmem:[#allocation2 + $0x180] sm:$0xff] }
 0x762   :  { %8335 = vst [vmem:[%s16787_s3 + $0x170] sm:$0xff] %v8334_v15  ;;  %8337 = vst [vmem:[%s16787_s3 + $0x178] sm:$0xff] %v8336_v35  ;;  %v8340_v28 = vld [vmem:[#allocation2 + $0x188] sm:$0xff]  ;;  %v8342_v13 = vld [vmem:[#allocation2 + $0x190] sm:$0xff] }
 0x763   :  { %8339 = vst [vmem:[%s16787_s3 + $0x180] sm:$0xff] %v8338_v32  ;;  %8341 = vst [vmem:[%s16787_s3 + $0x188] sm:$0xff] %v8340_v28  ;;  %v8344_v29 = vld [vmem:[#allocation2 + $0x198] sm:$0xff]  ;;  %v8346_v37 = vld [vmem:[#allocation2 + $0x1a0] sm:$0xff] }
 0x764   :  { %8343 = vst [vmem:[%s16787_s3 + $0x190] sm:$0xff] %v8342_v13  ;;  %v8348_v45 = vld [vmem:[#allocation2 + $0x1a8] sm:$0xff]  ;;  %8345 = vst [vmem:[%s16787_s3 + $0x198] sm:$0xff] %v8344_v29  ;;  %v8350_v43 = vld [vmem:[#allocation2 + $0x1b0] sm:$0xff] }
 0x765   :  { %8347 = vst [vmem:[%s16787_s3 + $0x1a0] sm:$0xff] %v8346_v37  ;;  %8349 = vst [vmem:[%s16787_s3 + $0x1a8] sm:$0xff] %v8348_v45  ;;  %v8352_v63 = vld [vmem:[#allocation2 + $0x1b8] sm:$0xff]  ;;  %v8354_v20 = vld [vmem:[#allocation2 + $0x1c0] sm:$0xff] }
 0x766   :  { %8351 = vst [vmem:[%s16787_s3 + $0x1b0] sm:$0xff] %v8350_v43  ;;  %8353 = vst [vmem:[%s16787_s3 + $0x1b8] sm:$0xff] %v8352_v63  ;;  %v8356_v25 = vld [vmem:[#allocation2 + $0x1c8] sm:$0xff]  ;;  %v8358_v58 = vld [vmem:[#allocation2 + $0x1d0] sm:$0xff] }
 0x767   :  { %8355 = vst [vmem:[%s16787_s3 + $0x1c0] sm:$0xff] %v8354_v20  ;;  %v8360_v39 = vld [vmem:[#allocation2 + $0x1d8] sm:$0xff]  ;;  %8357 = vst [vmem:[%s16787_s3 + $0x1c8] sm:$0xff] %v8356_v25  ;;  %v8362_v26 = vld [vmem:[#allocation2 + $0x1e0] sm:$0xff] }
 0x768   :  { %8359 = vst [vmem:[%s16787_s3 + $0x1d0] sm:$0xff] %v8358_v58  ;;  %8361 = vst [vmem:[%s16787_s3 + $0x1d8] sm:$0xff] %v8360_v39  ;;  %v8364_v11 = vld [vmem:[#allocation2 + $0x1e8] sm:$0xff]  ;;  %v8366_v6 = vld [vmem:[#allocation2 + $0x1f0] sm:$0xff] }
 0x769   :  { %8363 = vst [vmem:[%s16787_s3 + $0x1e0] sm:$0xff] %v8362_v26  ;;  %8365 = vst [vmem:[%s16787_s3 + $0x1e8] sm:$0xff] %v8364_v11  ;;  %v8368_v60 = vld [vmem:[#allocation2 + $0x1f8] sm:$0xff]  ;;  %v8370_v54 = vld [vmem:[#allocation2 + $0x200] sm:$0xff] }
 0x76a   :  { %8367 = vst [vmem:[%s16787_s3 + $0x1f0] sm:$0xff] %v8366_v6  ;;  %v8372_v19 = vld [vmem:[#allocation2 + $0x208] sm:$0xff]  ;;  %8369 = vst [vmem:[%s16787_s3 + $0x1f8] sm:$0xff] %v8368_v60  ;;  %v8374_v30 = vld [vmem:[#allocation2 + $0x210] sm:$0xff] }
 0x76b   :  { %8371 = vst [vmem:[%s16787_s3 + $0x200] sm:$0xff] %v8370_v54  ;;  %8373 = vst [vmem:[%s16787_s3 + $0x208] sm:$0xff] %v8372_v19  ;;  %v8376_v41 = vld [vmem:[#allocation2 + $0x218] sm:$0xff]  ;;  %v8378_v21 = vld [vmem:[#allocation2 + $0x220] sm:$0xff] }
 0x76c   :  { %8375 = vst [vmem:[%s16787_s3 + $0x210] sm:$0xff] %v8374_v30  ;;  %8377 = vst [vmem:[%s16787_s3 + $0x218] sm:$0xff] %v8376_v41  ;;  %v8380_v44 = vld [vmem:[#allocation2 + $0x228] sm:$0xff]  ;;  %v8382_v0 = vld [vmem:[#allocation2 + $0x230] sm:$0xff] }
 0x76d   :  { %8379 = vst [vmem:[%s16787_s3 + $0x220] sm:$0xff] %v8378_v21  ;;  %v8384_v1 = vld [vmem:[#allocation2 + $0x238] sm:$0xff]  ;;  %8381 = vst [vmem:[%s16787_s3 + $0x228] sm:$0xff] %v8380_v44  ;;  %v8386_v3 = vld [vmem:[#allocation2 + $0x240] sm:$0xff] }
 0x76e   :  { %8383 = vst [vmem:[%s16787_s3 + $0x230] sm:$0xff] %v8382_v0  ;;  %8385 = vst [vmem:[%s16787_s3 + $0x238] sm:$0xff] %v8384_v1  ;;  %v8388_v8 = vld [vmem:[#allocation2 + $0x248] sm:$0xff]  ;;  %v8390_v49 = vld [vmem:[#allocation2 + $0x250] sm:$0xff] }
 0x76f   :  { %8387 = vst [vmem:[%s16787_s3 + $0x240] sm:$0xff] %v8386_v3  ;;  %8389 = vst [vmem:[%s16787_s3 + $0x248] sm:$0xff] %v8388_v8  ;;  %v8392_v40 = vld [vmem:[#allocation2 + $0x258] sm:$0xff]  ;;  %v8394_v46 = vld [vmem:[#allocation2 + $0x260] sm:$0xff] }
 0x770   :  { %8391 = vst [vmem:[%s16787_s3 + $0x250] sm:$0xff] %v8390_v49  ;;  %v8396_v51 = vld [vmem:[#allocation2 + $0x268] sm:$0xff]  ;;  %8393 = vst [vmem:[%s16787_s3 + $0x258] sm:$0xff] %v8392_v40  ;;  %v8398_v53 = vld [vmem:[#allocation2 + $0x270] sm:$0xff] }
 0x771   :  { %8395 = vst [vmem:[%s16787_s3 + $0x260] sm:$0xff] %v8394_v46  ;;  %8397 = vst [vmem:[%s16787_s3 + $0x268] sm:$0xff] %v8396_v51  ;;  %v8400_v2 = vld [vmem:[#allocation2 + $0x278] sm:$0xff]  ;;  %v8402_v48 = vld [vmem:[#allocation2 + $0x280] sm:$0xff] }
 0x772   :  { %8399 = vst [vmem:[%s16787_s3 + $0x270] sm:$0xff] %v8398_v53  ;;  %8401 = vst [vmem:[%s16787_s3 + $0x278] sm:$0xff] %v8400_v2  ;;  %v8404_v55 = vld [vmem:[#allocation2 + $0x288] sm:$0xff]  ;;  %v8406_v57 = vld [vmem:[#allocation2 + $0x290] sm:$0xff] }
 0x773   :  { %8403 = vst [vmem:[%s16787_s3 + $0x280] sm:$0xff] %v8402_v48  ;;  %v8408_v50 = vld [vmem:[#allocation2 + $0x298] sm:$0xff]  ;;  %8405 = vst [vmem:[%s16787_s3 + $0x288] sm:$0xff] %v8404_v55  ;;  %v8410_v33 = vld [vmem:[#allocation2 + $0x2a0] sm:$0xff] }
 0x774   :  { %8407 = vst [vmem:[%s16787_s3 + $0x290] sm:$0xff] %v8406_v57  ;;  %8409 = vst [vmem:[%s16787_s3 + $0x298] sm:$0xff] %v8408_v50  ;;  %v8412_v52 = vld [vmem:[#allocation2 + $0x2a8] sm:$0xff]  ;;  %v8414_v5 = vld [vmem:[#allocation2 + $0x2b0] sm:$0xff] }
 0x775   :  { %8411 = vst [vmem:[%s16787_s3 + $0x2a0] sm:$0xff] %v8410_v33  ;;  %8413 = vst [vmem:[%s16787_s3 + $0x2a8] sm:$0xff] %v8412_v52  ;;  %v8416_v59 = vld [vmem:[#allocation2 + $0x2b8] sm:$0xff]  ;;  %v8418_v22 = vld [vmem:[#allocation2 + $0x2c0] sm:$0xff] }
 0x776   :  { %8415 = vst [vmem:[%s16787_s3 + $0x2b0] sm:$0xff] %v8414_v5  ;;  %v8420_v10 = vld [vmem:[#allocation2 + $0x2c8] sm:$0xff]  ;;  %8417 = vst [vmem:[%s16787_s3 + $0x2b8] sm:$0xff] %v8416_v59  ;;  %v8422_v62 = vld [vmem:[#allocation2 + $0x2d0] sm:$0xff] }
 0x777   :  { %8419 = vst [vmem:[%s16787_s3 + $0x2c0] sm:$0xff] %v8418_v22  ;;  %8421 = vst [vmem:[%s16787_s3 + $0x2c8] sm:$0xff] %v8420_v10  ;;  %v8424_v18 = vld [vmem:[#allocation2 + $0x2d8] sm:$0xff]  ;;  %v8426_v14 = vld [vmem:[#allocation2 + $0x2e0] sm:$0xff] }
 0x778   :  { %8423 = vst [vmem:[%s16787_s3 + $0x2d0] sm:$0xff] %v8422_v62  ;;  %8425 = vst [vmem:[%s16787_s3 + $0x2d8] sm:$0xff] %v8424_v18  ;;  %v8428_v27 = vld [vmem:[#allocation2 + $0x2e8] sm:$0xff]  ;;  %v8430_v9 = vld [vmem:[#allocation2 + $0x2f0] sm:$0xff] }
 0x779   :  { %8427 = vst [vmem:[%s16787_s3 + $0x2e0] sm:$0xff] %v8426_v14  ;;  %v8432_v17 = vld [vmem:[#allocation2 + $0x2f8] sm:$0xff]  ;;  %8429 = vst [vmem:[%s16787_s3 + $0x2e8] sm:$0xff] %v8428_v27  ;;  %v8434_v61 = vld [vmem:[#allocation2 + $0x300] sm:$0xff] }
 0x77a   :  { %8431 = vst [vmem:[%s16787_s3 + $0x2f0] sm:$0xff] %v8430_v9  ;;  %8433 = vst [vmem:[%s16787_s3 + $0x2f8] sm:$0xff] %v8432_v17  ;;  %v8436_v38 = vld [vmem:[#allocation2 + $0x308] sm:$0xff]  ;;  %v8438_v16 = vld [vmem:[#allocation2 + $0x310] sm:$0xff] }
 0x77b   :  { %8435 = vst [vmem:[%s16787_s3 + $0x300] sm:$0xff] %v8434_v61  ;;  %8437 = vst [vmem:[%s16787_s3 + $0x308] sm:$0xff] %v8436_v38  ;;  %v8440_v7 = vld [vmem:[#allocation2 + $0x318] sm:$0xff]  ;;  %v8442_v23 = vld [vmem:[#allocation2 + $0x320] sm:$0xff] }
 0x77c   :  { %8439 = vst [vmem:[%s16787_s3 + $0x310] sm:$0xff] %v8438_v16  ;;  %v8444_v56 = vld [vmem:[#allocation2 + $0x328] sm:$0xff]  ;;  %8441 = vst [vmem:[%s16787_s3 + $0x318] sm:$0xff] %v8440_v7  ;;  %v8446_v47 = vld [vmem:[#allocation2 + $0x330] sm:$0xff] }
 0x77d   :  { %8443 = vst [vmem:[%s16787_s3 + $0x320] sm:$0xff] %v8442_v23  ;;  %8445 = vst [vmem:[%s16787_s3 + $0x328] sm:$0xff] %v8444_v56  ;;  %v8448_v34 = vld [vmem:[#allocation2 + $0x338] sm:$0xff]  ;;  %v8450_v31 = vld [vmem:[#allocation2 + $0x340] sm:$0xff] }
 0x77e   :  { %8447 = vst [vmem:[%s16787_s3 + $0x330] sm:$0xff] %v8446_v47  ;;  %8449 = vst [vmem:[%s16787_s3 + $0x338] sm:$0xff] %v8448_v34  ;;  %v8452_v36 = vld [vmem:[#allocation2 + $0x348] sm:$0xff]  ;;  %v8454_v4 = vld [vmem:[#allocation2 + $0x350] sm:$0xff] }
 0x77f   :  { %8451 = vst [vmem:[%s16787_s3 + $0x340] sm:$0xff] %v8450_v31  ;;  %v8456_v24 = vld [vmem:[#allocation2 + $0x358] sm:$0xff]  ;;  %8453 = vst [vmem:[%s16787_s3 + $0x348] sm:$0xff] %v8452_v36  ;;  %v8458_v12 = vld [vmem:[#allocation2 + $0x360] sm:$0xff] }
 0x780   :  { %8455 = vst [vmem:[%s16787_s3 + $0x350] sm:$0xff] %v8454_v4  ;;  %8457 = vst [vmem:[%s16787_s3 + $0x358] sm:$0xff] %v8456_v24  ;;  %v8460_v42 = vld [vmem:[#allocation2 + $0x368] sm:$0xff]  ;;  %v8462_v15 = vld [vmem:[#allocation2 + $0x370] sm:$0xff] }
 0x781   :  { %8459 = vst [vmem:[%s16787_s3 + $0x360] sm:$0xff] %v8458_v12  ;;  %8461 = vst [vmem:[%s16787_s3 + $0x368] sm:$0xff] %v8460_v42  ;;  %v8464_v35 = vld [vmem:[#allocation2 + $0x378] sm:$0xff]  ;;  %v8466_v32 = vld [vmem:[#allocation2 + $0x380] sm:$0xff] }
 0x782   :  { %8463 = vst [vmem:[%s16787_s3 + $0x370] sm:$0xff] %v8462_v15  ;;  %v8468_v28 = vld [vmem:[#allocation2 + $0x388] sm:$0xff]  ;;  %8465 = vst [vmem:[%s16787_s3 + $0x378] sm:$0xff] %v8464_v35  ;;  %v8470_v13 = vld [vmem:[#allocation2 + $0x390] sm:$0xff] }
 0x783   :  { %8467 = vst [vmem:[%s16787_s3 + $0x380] sm:$0xff] %v8466_v32  ;;  %8469 = vst [vmem:[%s16787_s3 + $0x388] sm:$0xff] %v8468_v28  ;;  %v8472_v29 = vld [vmem:[#allocation2 + $0x398] sm:$0xff]  ;;  %v8474_v37 = vld [vmem:[#allocation2 + $0x3a0] sm:$0xff] }
 0x784   :  { %8471 = vst [vmem:[%s16787_s3 + $0x390] sm:$0xff] %v8470_v13  ;;  %8473 = vst [vmem:[%s16787_s3 + $0x398] sm:$0xff] %v8472_v29  ;;  %v8476_v45 = vld [vmem:[#allocation2 + $0x3a8] sm:$0xff]  ;;  %v8478_v43 = vld [vmem:[#allocation2 + $0x3b0] sm:$0xff] }
 0x785   :  { %8475 = vst [vmem:[%s16787_s3 + $0x3a0] sm:$0xff] %v8474_v37  ;;  %v8480_v63 = vld [vmem:[#allocation2 + $0x3b8] sm:$0xff]  ;;  %8477 = vst [vmem:[%s16787_s3 + $0x3a8] sm:$0xff] %v8476_v45  ;;  %v8482_v20 = vld [vmem:[#allocation2 + $0x3c0] sm:$0xff] }
 0x786   :  { %8479 = vst [vmem:[%s16787_s3 + $0x3b0] sm:$0xff] %v8478_v43  ;;  %8481 = vst [vmem:[%s16787_s3 + $0x3b8] sm:$0xff] %v8480_v63  ;;  %v8484_v25 = vld [vmem:[#allocation2 + $0x3c8] sm:$0xff]  ;;  %v8486_v58 = vld [vmem:[#allocation2 + $0x3d0] sm:$0xff] }
 0x787   :  { %8483 = vst [vmem:[%s16787_s3 + $0x3c0] sm:$0xff] %v8482_v20  ;;  %8485 = vst [vmem:[%s16787_s3 + $0x3c8] sm:$0xff] %v8484_v25  ;;  %v8488_v39 = vld [vmem:[#allocation2 + $0x3d8] sm:$0xff]  ;;  %v8490_v26 = vld [vmem:[#allocation2 + $0x3e0] sm:$0xff] }
 0x788   :  { %8487 = vst [vmem:[%s16787_s3 + $0x3d0] sm:$0xff] %v8486_v58  ;;  %v8492_v11 = vld [vmem:[#allocation2 + $0x3e8] sm:$0xff]  ;;  %8489 = vst [vmem:[%s16787_s3 + $0x3d8] sm:$0xff] %v8488_v39  ;;  %v8494_v6 = vld [vmem:[#allocation2 + $0x3f0] sm:$0xff] }
 0x789   :  { %8491 = vst [vmem:[%s16787_s3 + $0x3e0] sm:$0xff] %v8490_v26  ;;  %8493 = vst [vmem:[%s16787_s3 + $0x3e8] sm:$0xff] %v8492_v11  ;;  %v8496_v60 = vld [vmem:[#allocation2 + $0x3f8] sm:$0xff]  ;;  %v8498_v54 = vld [vmem:[#allocation2 + $0x400] sm:$0xff] }
 0x78a   :  { %8495 = vst [vmem:[%s16787_s3 + $0x3f0] sm:$0xff] %v8494_v6  ;;  %8497 = vst [vmem:[%s16787_s3 + $0x3f8] sm:$0xff] %v8496_v60  ;;  %v8500_v19 = vld [vmem:[#allocation2 + $0x408] sm:$0xff]  ;;  %v8502_v30 = vld [vmem:[#allocation2 + $0x410] sm:$0xff] }
 0x78b   :  { %8499 = vst [vmem:[%s16787_s3 + $0x400] sm:$0xff] %v8498_v54  ;;  %v8504_v41 = vld [vmem:[#allocation2 + $0x418] sm:$0xff]  ;;  %8501 = vst [vmem:[%s16787_s3 + $0x408] sm:$0xff] %v8500_v19  ;;  %v8506_v21 = vld [vmem:[#allocation2 + $0x420] sm:$0xff] }
 0x78c   :  { %8503 = vst [vmem:[%s16787_s3 + $0x410] sm:$0xff] %v8502_v30  ;;  %8505 = vst [vmem:[%s16787_s3 + $0x418] sm:$0xff] %v8504_v41  ;;  %v8508_v44 = vld [vmem:[#allocation2 + $0x428] sm:$0xff]  ;;  %v8510_v0 = vld [vmem:[#allocation2 + $0x430] sm:$0xff] }
 0x78d   :  { %8507 = vst [vmem:[%s16787_s3 + $0x420] sm:$0xff] %v8506_v21  ;;  %8509 = vst [vmem:[%s16787_s3 + $0x428] sm:$0xff] %v8508_v44  ;;  %v8512_v1 = vld [vmem:[#allocation2 + $0x438] sm:$0xff]  ;;  %v8514_v3 = vld [vmem:[#allocation2 + $0x440] sm:$0xff] }
 0x78e   :  { %8511 = vst [vmem:[%s16787_s3 + $0x430] sm:$0xff] %v8510_v0  ;;  %v8516_v8 = vld [vmem:[#allocation2 + $0x448] sm:$0xff]  ;;  %8513 = vst [vmem:[%s16787_s3 + $0x438] sm:$0xff] %v8512_v1  ;;  %v8518_v49 = vld [vmem:[#allocation2 + $0x450] sm:$0xff] }
 0x78f   :  { %8515 = vst [vmem:[%s16787_s3 + $0x440] sm:$0xff] %v8514_v3  ;;  %8517 = vst [vmem:[%s16787_s3 + $0x448] sm:$0xff] %v8516_v8  ;;  %v8520_v40 = vld [vmem:[#allocation2 + $0x458] sm:$0xff]  ;;  %v8522_v46 = vld [vmem:[#allocation2 + $0x460] sm:$0xff] }
 0x790   :  { %8519 = vst [vmem:[%s16787_s3 + $0x450] sm:$0xff] %v8518_v49  ;;  %8521 = vst [vmem:[%s16787_s3 + $0x458] sm:$0xff] %v8520_v40  ;;  %v8524_v51 = vld [vmem:[#allocation2 + $0x468] sm:$0xff]  ;;  %v8526_v53 = vld [vmem:[#allocation2 + $0x470] sm:$0xff] }
 0x791   :  { %8523 = vst [vmem:[%s16787_s3 + $0x460] sm:$0xff] %v8522_v46  ;;  %v8528_v2 = vld [vmem:[#allocation2 + $0x478] sm:$0xff]  ;;  %8525 = vst [vmem:[%s16787_s3 + $0x468] sm:$0xff] %v8524_v51  ;;  %v8530_v48 = vld [vmem:[#allocation2 + $0x480] sm:$0xff] }
 0x792   :  { %8527 = vst [vmem:[%s16787_s3 + $0x470] sm:$0xff] %v8526_v53  ;;  %8529 = vst [vmem:[%s16787_s3 + $0x478] sm:$0xff] %v8528_v2  ;;  %v8532_v55 = vld [vmem:[#allocation2 + $0x488] sm:$0xff]  ;;  %v8534_v57 = vld [vmem:[#allocation2 + $0x490] sm:$0xff] }
 0x793   :  { %8531 = vst [vmem:[%s16787_s3 + $0x480] sm:$0xff] %v8530_v48  ;;  %8533 = vst [vmem:[%s16787_s3 + $0x488] sm:$0xff] %v8532_v55  ;;  %v8536_v50 = vld [vmem:[#allocation2 + $0x498] sm:$0xff]  ;;  %v8538_v33 = vld [vmem:[#allocation2 + $0x4a0] sm:$0xff] }
 0x794   :  { %8535 = vst [vmem:[%s16787_s3 + $0x490] sm:$0xff] %v8534_v57  ;;  %v8540_v52 = vld [vmem:[#allocation2 + $0x4a8] sm:$0xff]  ;;  %8537 = vst [vmem:[%s16787_s3 + $0x498] sm:$0xff] %v8536_v50  ;;  %v8542_v5 = vld [vmem:[#allocation2 + $0x4b0] sm:$0xff] }
 0x795   :  { %8539 = vst [vmem:[%s16787_s3 + $0x4a0] sm:$0xff] %v8538_v33  ;;  %8541 = vst [vmem:[%s16787_s3 + $0x4a8] sm:$0xff] %v8540_v52  ;;  %v8544_v59 = vld [vmem:[#allocation2 + $0x4b8] sm:$0xff]  ;;  %v8546_v22 = vld [vmem:[#allocation2 + $0x4c0] sm:$0xff] }
 0x796   :  { %8543 = vst [vmem:[%s16787_s3 + $0x4b0] sm:$0xff] %v8542_v5  ;;  %8545 = vst [vmem:[%s16787_s3 + $0x4b8] sm:$0xff] %v8544_v59  ;;  %v8548_v10 = vld [vmem:[#allocation2 + $0x4c8] sm:$0xff]  ;;  %v8550_v62 = vld [vmem:[#allocation2 + $0x4d0] sm:$0xff] }
 0x797   :  { %8547 = vst [vmem:[%s16787_s3 + $0x4c0] sm:$0xff] %v8546_v22  ;;  %v8552_v18 = vld [vmem:[#allocation2 + $0x4d8] sm:$0xff]  ;;  %8549 = vst [vmem:[%s16787_s3 + $0x4c8] sm:$0xff] %v8548_v10  ;;  %v8554_v14 = vld [vmem:[#allocation2 + $0x4e0] sm:$0xff] }
 0x798   :  { %8551 = vst [vmem:[%s16787_s3 + $0x4d0] sm:$0xff] %v8550_v62  ;;  %8553 = vst [vmem:[%s16787_s3 + $0x4d8] sm:$0xff] %v8552_v18  ;;  %v8556_v27 = vld [vmem:[#allocation2 + $0x4e8] sm:$0xff]  ;;  %v8558_v9 = vld [vmem:[#allocation2 + $0x4f0] sm:$0xff] }
 0x799   :  { %8555 = vst [vmem:[%s16787_s3 + $0x4e0] sm:$0xff] %v8554_v14  ;;  %8557 = vst [vmem:[%s16787_s3 + $0x4e8] sm:$0xff] %v8556_v27  ;;  %v8560_v17 = vld [vmem:[#allocation2 + $0x4f8] sm:$0xff]  ;;  %v8562_v61 = vld [vmem:[#allocation2 + $0x500] sm:$0xff] }
 0x79a   :  { %8559 = vst [vmem:[%s16787_s3 + $0x4f0] sm:$0xff] %v8558_v9  ;;  %v8564_v38 = vld [vmem:[#allocation2 + $0x508] sm:$0xff]  ;;  %8561 = vst [vmem:[%s16787_s3 + $0x4f8] sm:$0xff] %v8560_v17  ;;  %v8566_v16 = vld [vmem:[#allocation2 + $0x510] sm:$0xff] }
 0x79b   :  { %8563 = vst [vmem:[%s16787_s3 + $0x500] sm:$0xff] %v8562_v61  ;;  %8565 = vst [vmem:[%s16787_s3 + $0x508] sm:$0xff] %v8564_v38  ;;  %v8568_v7 = vld [vmem:[#allocation2 + $0x518] sm:$0xff]  ;;  %v8570_v23 = vld [vmem:[#allocation2 + $0x520] sm:$0xff] }
 0x79c   :  { %8567 = vst [vmem:[%s16787_s3 + $0x510] sm:$0xff] %v8566_v16  ;;  %8569 = vst [vmem:[%s16787_s3 + $0x518] sm:$0xff] %v8568_v7  ;;  %v8572_v56 = vld [vmem:[#allocation2 + $0x528] sm:$0xff]  ;;  %v8574_v47 = vld [vmem:[#allocation2 + $0x530] sm:$0xff] }
 0x79d   :  { %8571 = vst [vmem:[%s16787_s3 + $0x520] sm:$0xff] %v8570_v23  ;;  %v8576_v34 = vld [vmem:[#allocation2 + $0x538] sm:$0xff]  ;;  %8573 = vst [vmem:[%s16787_s3 + $0x528] sm:$0xff] %v8572_v56  ;;  %v8578_v31 = vld [vmem:[#allocation2 + $0x540] sm:$0xff] }
 0x79e   :  { %8575 = vst [vmem:[%s16787_s3 + $0x530] sm:$0xff] %v8574_v47  ;;  %8577 = vst [vmem:[%s16787_s3 + $0x538] sm:$0xff] %v8576_v34  ;;  %v8580_v36 = vld [vmem:[#allocation2 + $0x548] sm:$0xff]  ;;  %v8582_v4 = vld [vmem:[#allocation2 + $0x550] sm:$0xff] }
 0x79f   :  { %8579 = vst [vmem:[%s16787_s3 + $0x540] sm:$0xff] %v8578_v31  ;;  %8581 = vst [vmem:[%s16787_s3 + $0x548] sm:$0xff] %v8580_v36  ;;  %v8584_v24 = vld [vmem:[#allocation2 + $0x558] sm:$0xff]  ;;  %v8586_v12 = vld [vmem:[#allocation2 + $0x560] sm:$0xff] }
 0x7a0   :  { %8583 = vst [vmem:[%s16787_s3 + $0x550] sm:$0xff] %v8582_v4  ;;  %v8588_v42 = vld [vmem:[#allocation2 + $0x568] sm:$0xff]  ;;  %8585 = vst [vmem:[%s16787_s3 + $0x558] sm:$0xff] %v8584_v24  ;;  %v8590_v15 = vld [vmem:[#allocation2 + $0x570] sm:$0xff] }
 0x7a1   :  { %8587 = vst [vmem:[%s16787_s3 + $0x560] sm:$0xff] %v8586_v12  ;;  %8589 = vst [vmem:[%s16787_s3 + $0x568] sm:$0xff] %v8588_v42  ;;  %v8592_v35 = vld [vmem:[#allocation2 + $0x578] sm:$0xff]  ;;  %v8594_v32 = vld [vmem:[#allocation2 + $0x580] sm:$0xff] }
 0x7a2   :  { %8591 = vst [vmem:[%s16787_s3 + $0x570] sm:$0xff] %v8590_v15  ;;  %8593 = vst [vmem:[%s16787_s3 + $0x578] sm:$0xff] %v8592_v35  ;;  %v8596_v28 = vld [vmem:[#allocation2 + $0x588] sm:$0xff]  ;;  %v8598_v13 = vld [vmem:[#allocation2 + $0x590] sm:$0xff] }
 0x7a3   :  { %8595 = vst [vmem:[%s16787_s3 + $0x580] sm:$0xff] %v8594_v32  ;;  %v8600_v29 = vld [vmem:[#allocation2 + $0x598] sm:$0xff]  ;;  %8597 = vst [vmem:[%s16787_s3 + $0x588] sm:$0xff] %v8596_v28  ;;  %v8602_v37 = vld [vmem:[#allocation2 + $0x5a0] sm:$0xff] }
 0x7a4   :  { %8599 = vst [vmem:[%s16787_s3 + $0x590] sm:$0xff] %v8598_v13  ;;  %8601 = vst [vmem:[%s16787_s3 + $0x598] sm:$0xff] %v8600_v29  ;;  %v8604_v45 = vld [vmem:[#allocation2 + $0x5a8] sm:$0xff]  ;;  %v8606_v43 = vld [vmem:[#allocation2 + $0x5b0] sm:$0xff] }
 0x7a5   :  { %8603 = vst [vmem:[%s16787_s3 + $0x5a0] sm:$0xff] %v8602_v37  ;;  %8605 = vst [vmem:[%s16787_s3 + $0x5a8] sm:$0xff] %v8604_v45  ;;  %v8608_v63 = vld [vmem:[#allocation2 + $0x5b8] sm:$0xff]  ;;  %v8610_v20 = vld [vmem:[#allocation2 + $0x5c0] sm:$0xff] }
 0x7a6   :  { %8607 = vst [vmem:[%s16787_s3 + $0x5b0] sm:$0xff] %v8606_v43  ;;  %v8612_v25 = vld [vmem:[#allocation2 + $0x5c8] sm:$0xff]  ;;  %8609 = vst [vmem:[%s16787_s3 + $0x5b8] sm:$0xff] %v8608_v63  ;;  %v8614_v58 = vld [vmem:[#allocation2 + $0x5d0] sm:$0xff] }
 0x7a7   :  { %8611 = vst [vmem:[%s16787_s3 + $0x5c0] sm:$0xff] %v8610_v20  ;;  %8613 = vst [vmem:[%s16787_s3 + $0x5c8] sm:$0xff] %v8612_v25  ;;  %v8616_v39 = vld [vmem:[#allocation2 + $0x5d8] sm:$0xff]  ;;  %v8618_v26 = vld [vmem:[#allocation2 + $0x5e0] sm:$0xff] }
 0x7a8   :  { %8615 = vst [vmem:[%s16787_s3 + $0x5d0] sm:$0xff] %v8614_v58  ;;  %8617 = vst [vmem:[%s16787_s3 + $0x5d8] sm:$0xff] %v8616_v39  ;;  %v8620_v11 = vld [vmem:[#allocation2 + $0x5e8] sm:$0xff]  ;;  %v8622_v6 = vld [vmem:[#allocation2 + $0x5f0] sm:$0xff] }
 0x7a9   :  { %8619 = vst [vmem:[%s16787_s3 + $0x5e0] sm:$0xff] %v8618_v26  ;;  %v8624_v60 = vld [vmem:[#allocation2 + $0x5f8] sm:$0xff]  ;;  %8621 = vst [vmem:[%s16787_s3 + $0x5e8] sm:$0xff] %v8620_v11  ;;  %v8626_v54 = vld [vmem:[#allocation2 + $0x600] sm:$0xff] }
 0x7aa   :  { %8623 = vst [vmem:[%s16787_s3 + $0x5f0] sm:$0xff] %v8622_v6  ;;  %8625 = vst [vmem:[%s16787_s3 + $0x5f8] sm:$0xff] %v8624_v60  ;;  %v8628_v19 = vld [vmem:[#allocation2 + $0x608] sm:$0xff]  ;;  %v8630_v30 = vld [vmem:[#allocation2 + $0x610] sm:$0xff] }
 0x7ab   :  { %8627 = vst [vmem:[%s16787_s3 + $0x600] sm:$0xff] %v8626_v54  ;;  %8629 = vst [vmem:[%s16787_s3 + $0x608] sm:$0xff] %v8628_v19  ;;  %v8632_v41 = vld [vmem:[#allocation2 + $0x618] sm:$0xff]  ;;  %v8634_v21 = vld [vmem:[#allocation2 + $0x620] sm:$0xff] }
 0x7ac   :  { %8631 = vst [vmem:[%s16787_s3 + $0x610] sm:$0xff] %v8630_v30  ;;  %v8636_v44 = vld [vmem:[#allocation2 + $0x628] sm:$0xff]  ;;  %8633 = vst [vmem:[%s16787_s3 + $0x618] sm:$0xff] %v8632_v41  ;;  %v8638_v0 = vld [vmem:[#allocation2 + $0x630] sm:$0xff] }
 0x7ad   :  { %8635 = vst [vmem:[%s16787_s3 + $0x620] sm:$0xff] %v8634_v21  ;;  %8637 = vst [vmem:[%s16787_s3 + $0x628] sm:$0xff] %v8636_v44  ;;  %v8640_v1 = vld [vmem:[#allocation2 + $0x638] sm:$0xff]  ;;  %v8642_v3 = vld [vmem:[#allocation2 + $0x640] sm:$0xff] }
 0x7ae   :  { %8639 = vst [vmem:[%s16787_s3 + $0x630] sm:$0xff] %v8638_v0  ;;  %8641 = vst [vmem:[%s16787_s3 + $0x638] sm:$0xff] %v8640_v1  ;;  %v8644_v8 = vld [vmem:[#allocation2 + $0x648] sm:$0xff]  ;;  %v8646_v49 = vld [vmem:[#allocation2 + $0x650] sm:$0xff] }
 0x7af   :  { %8643 = vst [vmem:[%s16787_s3 + $0x640] sm:$0xff] %v8642_v3  ;;  %v8648_v40 = vld [vmem:[#allocation2 + $0x658] sm:$0xff]  ;;  %8645 = vst [vmem:[%s16787_s3 + $0x648] sm:$0xff] %v8644_v8  ;;  %v8650_v46 = vld [vmem:[#allocation2 + $0x660] sm:$0xff] }
 0x7b0   :  { %8647 = vst [vmem:[%s16787_s3 + $0x650] sm:$0xff] %v8646_v49  ;;  %8649 = vst [vmem:[%s16787_s3 + $0x658] sm:$0xff] %v8648_v40  ;;  %v8652_v51 = vld [vmem:[#allocation2 + $0x668] sm:$0xff]  ;;  %v8654_v53 = vld [vmem:[#allocation2 + $0x670] sm:$0xff] }
 0x7b1   :  { %8651 = vst [vmem:[%s16787_s3 + $0x660] sm:$0xff] %v8650_v46  ;;  %8653 = vst [vmem:[%s16787_s3 + $0x668] sm:$0xff] %v8652_v51  ;;  %v8656_v2 = vld [vmem:[#allocation2 + $0x678] sm:$0xff]  ;;  %v8658_v48 = vld [vmem:[#allocation2 + $0x680] sm:$0xff] }
 0x7b2   :  { %8655 = vst [vmem:[%s16787_s3 + $0x670] sm:$0xff] %v8654_v53  ;;  %v8660_v55 = vld [vmem:[#allocation2 + $0x688] sm:$0xff]  ;;  %8657 = vst [vmem:[%s16787_s3 + $0x678] sm:$0xff] %v8656_v2  ;;  %v8662_v57 = vld [vmem:[#allocation2 + $0x690] sm:$0xff] }
 0x7b3   :  { %8659 = vst [vmem:[%s16787_s3 + $0x680] sm:$0xff] %v8658_v48  ;;  %8661 = vst [vmem:[%s16787_s3 + $0x688] sm:$0xff] %v8660_v55  ;;  %v8664_v50 = vld [vmem:[#allocation2 + $0x698] sm:$0xff]  ;;  %v8666_v33 = vld [vmem:[#allocation2 + $0x6a0] sm:$0xff] }
 0x7b4   :  { %8663 = vst [vmem:[%s16787_s3 + $0x690] sm:$0xff] %v8662_v57  ;;  %8665 = vst [vmem:[%s16787_s3 + $0x698] sm:$0xff] %v8664_v50  ;;  %v8668_v52 = vld [vmem:[#allocation2 + $0x6a8] sm:$0xff]  ;;  %v8670_v5 = vld [vmem:[#allocation2 + $0x6b0] sm:$0xff] }
 0x7b5   :  { %8667 = vst [vmem:[%s16787_s3 + $0x6a0] sm:$0xff] %v8666_v33  ;;  %v8672_v59 = vld [vmem:[#allocation2 + $0x6b8] sm:$0xff]  ;;  %8669 = vst [vmem:[%s16787_s3 + $0x6a8] sm:$0xff] %v8668_v52  ;;  %v8674_v22 = vld [vmem:[#allocation2 + $0x6c0] sm:$0xff] }
 0x7b6   :  { %8671 = vst [vmem:[%s16787_s3 + $0x6b0] sm:$0xff] %v8670_v5  ;;  %8673 = vst [vmem:[%s16787_s3 + $0x6b8] sm:$0xff] %v8672_v59  ;;  %v8676_v10 = vld [vmem:[#allocation2 + $0x6c8] sm:$0xff]  ;;  %v8678_v62 = vld [vmem:[#allocation2 + $0x6d0] sm:$0xff] }
 0x7b7   :  { %8675 = vst [vmem:[%s16787_s3 + $0x6c0] sm:$0xff] %v8674_v22  ;;  %8677 = vst [vmem:[%s16787_s3 + $0x6c8] sm:$0xff] %v8676_v10  ;;  %v8680_v18 = vld [vmem:[#allocation2 + $0x6d8] sm:$0xff]  ;;  %v8682_v14 = vld [vmem:[#allocation2 + $0x6e0] sm:$0xff] }
 0x7b8   :  { %8679 = vst [vmem:[%s16787_s3 + $0x6d0] sm:$0xff] %v8678_v62  ;;  %v8684_v27 = vld [vmem:[#allocation2 + $0x6e8] sm:$0xff]  ;;  %8681 = vst [vmem:[%s16787_s3 + $0x6d8] sm:$0xff] %v8680_v18  ;;  %v8686_v9 = vld [vmem:[#allocation2 + $0x6f0] sm:$0xff] }
 0x7b9   :  { %8683 = vst [vmem:[%s16787_s3 + $0x6e0] sm:$0xff] %v8682_v14  ;;  %8685 = vst [vmem:[%s16787_s3 + $0x6e8] sm:$0xff] %v8684_v27  ;;  %v8688_v17 = vld [vmem:[#allocation2 + $0x6f8] sm:$0xff]  ;;  %v8690_v61 = vld [vmem:[#allocation2 + $0x700] sm:$0xff] }
 0x7ba   :  { %8687 = vst [vmem:[%s16787_s3 + $0x6f0] sm:$0xff] %v8686_v9  ;;  %8689 = vst [vmem:[%s16787_s3 + $0x6f8] sm:$0xff] %v8688_v17  ;;  %v8692_v38 = vld [vmem:[#allocation2 + $0x708] sm:$0xff]  ;;  %v8694_v16 = vld [vmem:[#allocation2 + $0x710] sm:$0xff] }
 0x7bb   :  { %8691 = vst [vmem:[%s16787_s3 + $0x700] sm:$0xff] %v8690_v61  ;;  %v8696_v7 = vld [vmem:[#allocation2 + $0x718] sm:$0xff]  ;;  %8693 = vst [vmem:[%s16787_s3 + $0x708] sm:$0xff] %v8692_v38  ;;  %v8698_v23 = vld [vmem:[#allocation2 + $0x720] sm:$0xff] }
 0x7bc   :  { %8695 = vst [vmem:[%s16787_s3 + $0x710] sm:$0xff] %v8694_v16  ;;  %8697 = vst [vmem:[%s16787_s3 + $0x718] sm:$0xff] %v8696_v7  ;;  %v8700_v56 = vld [vmem:[#allocation2 + $0x728] sm:$0xff]  ;;  %v8702_v47 = vld [vmem:[#allocation2 + $0x730] sm:$0xff] }
 0x7bd   :  { %8699 = vst [vmem:[%s16787_s3 + $0x720] sm:$0xff] %v8698_v23  ;;  %8701 = vst [vmem:[%s16787_s3 + $0x728] sm:$0xff] %v8700_v56  ;;  %v8704_v34 = vld [vmem:[#allocation2 + $0x738] sm:$0xff]  ;;  %v8706_v31 = vld [vmem:[#allocation2 + $0x740] sm:$0xff] }
 0x7be   :  { %8703 = vst [vmem:[%s16787_s3 + $0x730] sm:$0xff] %v8702_v47  ;;  %v8708_v36 = vld [vmem:[#allocation2 + $0x748] sm:$0xff]  ;;  %8705 = vst [vmem:[%s16787_s3 + $0x738] sm:$0xff] %v8704_v34  ;;  %v8710_v4 = vld [vmem:[#allocation2 + $0x750] sm:$0xff] }
 0x7bf   :  { %8707 = vst [vmem:[%s16787_s3 + $0x740] sm:$0xff] %v8706_v31  ;;  %8709 = vst [vmem:[%s16787_s3 + $0x748] sm:$0xff] %v8708_v36  ;;  %v8712_v24 = vld [vmem:[#allocation2 + $0x758] sm:$0xff]  ;;  %v8714_v12 = vld [vmem:[#allocation2 + $0x760] sm:$0xff] }
 0x7c0   :  { %8711 = vst [vmem:[%s16787_s3 + $0x750] sm:$0xff] %v8710_v4  ;;  %8713 = vst [vmem:[%s16787_s3 + $0x758] sm:$0xff] %v8712_v24  ;;  %v8716_v42 = vld [vmem:[#allocation2 + $0x768] sm:$0xff]  ;;  %v8718_v15 = vld [vmem:[#allocation2 + $0x770] sm:$0xff] }
 0x7c1   :  { %8715 = vst [vmem:[%s16787_s3 + $0x760] sm:$0xff] %v8714_v12  ;;  %v8720_v35 = vld [vmem:[#allocation2 + $0x778] sm:$0xff]  ;;  %8717 = vst [vmem:[%s16787_s3 + $0x768] sm:$0xff] %v8716_v42  ;;  %v8722_v32 = vld [vmem:[#allocation2 + $0x780] sm:$0xff] }
 0x7c2   :  { %8719 = vst [vmem:[%s16787_s3 + $0x770] sm:$0xff] %v8718_v15  ;;  %8721 = vst [vmem:[%s16787_s3 + $0x778] sm:$0xff] %v8720_v35  ;;  %v8724_v28 = vld [vmem:[#allocation2 + $0x788] sm:$0xff]  ;;  %v8726_v13 = vld [vmem:[#allocation2 + $0x790] sm:$0xff] }
 0x7c3   :  { %8723 = vst [vmem:[%s16787_s3 + $0x780] sm:$0xff] %v8722_v32  ;;  %8725 = vst [vmem:[%s16787_s3 + $0x788] sm:$0xff] %v8724_v28  ;;  %v8728_v29 = vld [vmem:[#allocation2 + $0x798] sm:$0xff]  ;;  %v8730_v37 = vld [vmem:[#allocation2 + $0x7a0] sm:$0xff] }
 0x7c4   :  { %8727 = vst [vmem:[%s16787_s3 + $0x790] sm:$0xff] %v8726_v13  ;;  %v8732_v45 = vld [vmem:[#allocation2 + $0x7a8] sm:$0xff]  ;;  %8729 = vst [vmem:[%s16787_s3 + $0x798] sm:$0xff] %v8728_v29  ;;  %v8734_v43 = vld [vmem:[#allocation2 + $0x7b0] sm:$0xff] }
 0x7c5   :  { %8731 = vst [vmem:[%s16787_s3 + $0x7a0] sm:$0xff] %v8730_v37  ;;  %8733 = vst [vmem:[%s16787_s3 + $0x7a8] sm:$0xff] %v8732_v45  ;;  %v8736_v63 = vld [vmem:[#allocation2 + $0x7b8] sm:$0xff]  ;;  %v8738_v20 = vld [vmem:[#allocation2 + $0x7c0] sm:$0xff] }
 0x7c6   :  { %8735 = vst [vmem:[%s16787_s3 + $0x7b0] sm:$0xff] %v8734_v43  ;;  %8737 = vst [vmem:[%s16787_s3 + $0x7b8] sm:$0xff] %v8736_v63  ;;  %v8740_v25 = vld [vmem:[#allocation2 + $0x7c8] sm:$0xff]  ;;  %v8742_v58 = vld [vmem:[#allocation2 + $0x7d0] sm:$0xff] }
 0x7c7   :  { %8739 = vst [vmem:[%s16787_s3 + $0x7c0] sm:$0xff] %v8738_v20  ;;  %v8744_v39 = vld [vmem:[#allocation2 + $0x7d8] sm:$0xff]  ;;  %8741 = vst [vmem:[%s16787_s3 + $0x7c8] sm:$0xff] %v8740_v25  ;;  %v8746_v26 = vld [vmem:[#allocation2 + $0x7e0] sm:$0xff] }
 0x7c8   :  { %8743 = vst [vmem:[%s16787_s3 + $0x7d0] sm:$0xff] %v8742_v58  ;;  %8745 = vst [vmem:[%s16787_s3 + $0x7d8] sm:$0xff] %v8744_v39  ;;  %v8748_v11 = vld [vmem:[#allocation2 + $0x7e8] sm:$0xff]  ;;  %v8750_v6 = vld [vmem:[#allocation2 + $0x7f0] sm:$0xff] }
 0x7c9   :  { %8747 = vst [vmem:[%s16787_s3 + $0x7e0] sm:$0xff] %v8746_v26  ;;  %8749 = vst [vmem:[%s16787_s3 + $0x7e8] sm:$0xff] %v8748_v11  ;;  %v8752_v60 = vld [vmem:[#allocation2 + $0x7f8] sm:$0xff]  ;;  %v8754_v54 = vld [vmem:[#allocation2 + $0x800] sm:$0xff] }
 0x7ca   :  { %8751 = vst [vmem:[%s16787_s3 + $0x7f0] sm:$0xff] %v8750_v6  ;;  %v8756_v19 = vld [vmem:[#allocation2 + $0x808] sm:$0xff]  ;;  %8753 = vst [vmem:[%s16787_s3 + $0x7f8] sm:$0xff] %v8752_v60  ;;  %v8758_v30 = vld [vmem:[#allocation2 + $0x810] sm:$0xff] }
 0x7cb   :  { %8755 = vst [vmem:[%s16787_s3 + $0x800] sm:$0xff] %v8754_v54  ;;  %8757 = vst [vmem:[%s16787_s3 + $0x808] sm:$0xff] %v8756_v19  ;;  %v8760_v41 = vld [vmem:[#allocation2 + $0x818] sm:$0xff]  ;;  %v8762_v21 = vld [vmem:[#allocation2 + $0x820] sm:$0xff] }
 0x7cc   :  { %8759 = vst [vmem:[%s16787_s3 + $0x810] sm:$0xff] %v8758_v30  ;;  %8761 = vst [vmem:[%s16787_s3 + $0x818] sm:$0xff] %v8760_v41  ;;  %v8764_v44 = vld [vmem:[#allocation2 + $0x828] sm:$0xff]  ;;  %v8766_v0 = vld [vmem:[#allocation2 + $0x830] sm:$0xff] }
 0x7cd   :  { %8763 = vst [vmem:[%s16787_s3 + $0x820] sm:$0xff] %v8762_v21  ;;  %v8768_v1 = vld [vmem:[#allocation2 + $0x838] sm:$0xff]  ;;  %8765 = vst [vmem:[%s16787_s3 + $0x828] sm:$0xff] %v8764_v44  ;;  %v8770_v3 = vld [vmem:[#allocation2 + $0x840] sm:$0xff] }
 0x7ce   :  { %8767 = vst [vmem:[%s16787_s3 + $0x830] sm:$0xff] %v8766_v0  ;;  %8769 = vst [vmem:[%s16787_s3 + $0x838] sm:$0xff] %v8768_v1  ;;  %v8772_v8 = vld [vmem:[#allocation2 + $0x848] sm:$0xff]  ;;  %v8774_v49 = vld [vmem:[#allocation2 + $0x850] sm:$0xff] }
 0x7cf   :  { %8771 = vst [vmem:[%s16787_s3 + $0x840] sm:$0xff] %v8770_v3  ;;  %8773 = vst [vmem:[%s16787_s3 + $0x848] sm:$0xff] %v8772_v8  ;;  %v8776_v40 = vld [vmem:[#allocation2 + $0x858] sm:$0xff]  ;;  %v8778_v46 = vld [vmem:[#allocation2 + $0x860] sm:$0xff] }
 0x7d0   :  { %8775 = vst [vmem:[%s16787_s3 + $0x850] sm:$0xff] %v8774_v49  ;;  %v8780_v51 = vld [vmem:[#allocation2 + $0x868] sm:$0xff]  ;;  %8777 = vst [vmem:[%s16787_s3 + $0x858] sm:$0xff] %v8776_v40  ;;  %v8782_v53 = vld [vmem:[#allocation2 + $0x870] sm:$0xff] }
 0x7d1   :  { %8779 = vst [vmem:[%s16787_s3 + $0x860] sm:$0xff] %v8778_v46  ;;  %8781 = vst [vmem:[%s16787_s3 + $0x868] sm:$0xff] %v8780_v51  ;;  %v8784_v2 = vld [vmem:[#allocation2 + $0x878] sm:$0xff]  ;;  %v8786_v48 = vld [vmem:[#allocation2 + $0x880] sm:$0xff] }
 0x7d2   :  { %8783 = vst [vmem:[%s16787_s3 + $0x870] sm:$0xff] %v8782_v53  ;;  %8785 = vst [vmem:[%s16787_s3 + $0x878] sm:$0xff] %v8784_v2  ;;  %v8788_v55 = vld [vmem:[#allocation2 + $0x888] sm:$0xff]  ;;  %v8790_v57 = vld [vmem:[#allocation2 + $0x890] sm:$0xff] }
 0x7d3   :  { %8787 = vst [vmem:[%s16787_s3 + $0x880] sm:$0xff] %v8786_v48  ;;  %v8792_v50 = vld [vmem:[#allocation2 + $0x898] sm:$0xff]  ;;  %8789 = vst [vmem:[%s16787_s3 + $0x888] sm:$0xff] %v8788_v55  ;;  %v8794_v33 = vld [vmem:[#allocation2 + $0x8a0] sm:$0xff] }
 0x7d4   :  { %8791 = vst [vmem:[%s16787_s3 + $0x890] sm:$0xff] %v8790_v57  ;;  %8793 = vst [vmem:[%s16787_s3 + $0x898] sm:$0xff] %v8792_v50  ;;  %v8796_v52 = vld [vmem:[#allocation2 + $0x8a8] sm:$0xff]  ;;  %v8798_v5 = vld [vmem:[#allocation2 + $0x8b0] sm:$0xff] }
 0x7d5   :  { %8795 = vst [vmem:[%s16787_s3 + $0x8a0] sm:$0xff] %v8794_v33  ;;  %8797 = vst [vmem:[%s16787_s3 + $0x8a8] sm:$0xff] %v8796_v52  ;;  %v8800_v59 = vld [vmem:[#allocation2 + $0x8b8] sm:$0xff]  ;;  %v8802_v22 = vld [vmem:[#allocation2 + $0x8c0] sm:$0xff] }
 0x7d6   :  { %8799 = vst [vmem:[%s16787_s3 + $0x8b0] sm:$0xff] %v8798_v5  ;;  %v8804_v10 = vld [vmem:[#allocation2 + $0x8c8] sm:$0xff]  ;;  %8801 = vst [vmem:[%s16787_s3 + $0x8b8] sm:$0xff] %v8800_v59  ;;  %v8806_v62 = vld [vmem:[#allocation2 + $0x8d0] sm:$0xff] }
 0x7d7   :  { %8803 = vst [vmem:[%s16787_s3 + $0x8c0] sm:$0xff] %v8802_v22  ;;  %8805 = vst [vmem:[%s16787_s3 + $0x8c8] sm:$0xff] %v8804_v10  ;;  %v8808_v18 = vld [vmem:[#allocation2 + $0x8d8] sm:$0xff]  ;;  %v8810_v14 = vld [vmem:[#allocation2 + $0x8e0] sm:$0xff] }
 0x7d8   :  { %8807 = vst [vmem:[%s16787_s3 + $0x8d0] sm:$0xff] %v8806_v62  ;;  %8809 = vst [vmem:[%s16787_s3 + $0x8d8] sm:$0xff] %v8808_v18  ;;  %v8812_v27 = vld [vmem:[#allocation2 + $0x8e8] sm:$0xff]  ;;  %v8814_v9 = vld [vmem:[#allocation2 + $0x8f0] sm:$0xff] }
 0x7d9   :  { %8811 = vst [vmem:[%s16787_s3 + $0x8e0] sm:$0xff] %v8810_v14  ;;  %v8816_v17 = vld [vmem:[#allocation2 + $0x8f8] sm:$0xff]  ;;  %8813 = vst [vmem:[%s16787_s3 + $0x8e8] sm:$0xff] %v8812_v27  ;;  %v8818_v61 = vld [vmem:[#allocation2 + $0x900] sm:$0xff] }
 0x7da   :  { %8815 = vst [vmem:[%s16787_s3 + $0x8f0] sm:$0xff] %v8814_v9  ;;  %8817 = vst [vmem:[%s16787_s3 + $0x8f8] sm:$0xff] %v8816_v17  ;;  %v8820_v38 = vld [vmem:[#allocation2 + $0x908] sm:$0xff]  ;;  %v8822_v16 = vld [vmem:[#allocation2 + $0x910] sm:$0xff] }
 0x7db   :  { %8819 = vst [vmem:[%s16787_s3 + $0x900] sm:$0xff] %v8818_v61  ;;  %8821 = vst [vmem:[%s16787_s3 + $0x908] sm:$0xff] %v8820_v38  ;;  %v8824_v7 = vld [vmem:[#allocation2 + $0x918] sm:$0xff]  ;;  %v8826_v23 = vld [vmem:[#allocation2 + $0x920] sm:$0xff] }
 0x7dc   :  { %8823 = vst [vmem:[%s16787_s3 + $0x910] sm:$0xff] %v8822_v16  ;;  %v8828_v56 = vld [vmem:[#allocation2 + $0x928] sm:$0xff]  ;;  %8825 = vst [vmem:[%s16787_s3 + $0x918] sm:$0xff] %v8824_v7  ;;  %v8830_v47 = vld [vmem:[#allocation2 + $0x930] sm:$0xff] }
 0x7dd   :  { %8827 = vst [vmem:[%s16787_s3 + $0x920] sm:$0xff] %v8826_v23  ;;  %8829 = vst [vmem:[%s16787_s3 + $0x928] sm:$0xff] %v8828_v56  ;;  %v8832_v34 = vld [vmem:[#allocation2 + $0x938] sm:$0xff]  ;;  %v8834_v31 = vld [vmem:[#allocation2 + $0x940] sm:$0xff] }
 0x7de   :  { %8831 = vst [vmem:[%s16787_s3 + $0x930] sm:$0xff] %v8830_v47  ;;  %8833 = vst [vmem:[%s16787_s3 + $0x938] sm:$0xff] %v8832_v34  ;;  %v8836_v36 = vld [vmem:[#allocation2 + $0x948] sm:$0xff]  ;;  %v8838_v4 = vld [vmem:[#allocation2 + $0x950] sm:$0xff] }
 0x7df   :  { %8835 = vst [vmem:[%s16787_s3 + $0x940] sm:$0xff] %v8834_v31  ;;  %v8840_v24 = vld [vmem:[#allocation2 + $0x958] sm:$0xff]  ;;  %8837 = vst [vmem:[%s16787_s3 + $0x948] sm:$0xff] %v8836_v36  ;;  %v8842_v12 = vld [vmem:[#allocation2 + $0x960] sm:$0xff] }
 0x7e0   :  { %8839 = vst [vmem:[%s16787_s3 + $0x950] sm:$0xff] %v8838_v4  ;;  %8841 = vst [vmem:[%s16787_s3 + $0x958] sm:$0xff] %v8840_v24  ;;  %v8844_v42 = vld [vmem:[#allocation2 + $0x968] sm:$0xff]  ;;  %v8846_v15 = vld [vmem:[#allocation2 + $0x970] sm:$0xff] }
 0x7e1   :  { %8843 = vst [vmem:[%s16787_s3 + $0x960] sm:$0xff] %v8842_v12  ;;  %8845 = vst [vmem:[%s16787_s3 + $0x968] sm:$0xff] %v8844_v42  ;;  %v8848_v35 = vld [vmem:[#allocation2 + $0x978] sm:$0xff]  ;;  %v8850_v32 = vld [vmem:[#allocation2 + $0x980] sm:$0xff] }
 0x7e2   :  { %8847 = vst [vmem:[%s16787_s3 + $0x970] sm:$0xff] %v8846_v15  ;;  %v8852_v28 = vld [vmem:[#allocation2 + $0x988] sm:$0xff]  ;;  %8849 = vst [vmem:[%s16787_s3 + $0x978] sm:$0xff] %v8848_v35  ;;  %v8854_v13 = vld [vmem:[#allocation2 + $0x990] sm:$0xff] }
 0x7e3   :  { %8851 = vst [vmem:[%s16787_s3 + $0x980] sm:$0xff] %v8850_v32  ;;  %8853 = vst [vmem:[%s16787_s3 + $0x988] sm:$0xff] %v8852_v28  ;;  %v8856_v29 = vld [vmem:[#allocation2 + $0x998] sm:$0xff]  ;;  %v8858_v37 = vld [vmem:[#allocation2 + $0x9a0] sm:$0xff] }
 0x7e4   :  { %8855 = vst [vmem:[%s16787_s3 + $0x990] sm:$0xff] %v8854_v13  ;;  %8857 = vst [vmem:[%s16787_s3 + $0x998] sm:$0xff] %v8856_v29  ;;  %v8860_v45 = vld [vmem:[#allocation2 + $0x9a8] sm:$0xff]  ;;  %v8862_v43 = vld [vmem:[#allocation2 + $0x9b0] sm:$0xff] }
 0x7e5   :  { %8859 = vst [vmem:[%s16787_s3 + $0x9a0] sm:$0xff] %v8858_v37  ;;  %v8864_v63 = vld [vmem:[#allocation2 + $0x9b8] sm:$0xff]  ;;  %8861 = vst [vmem:[%s16787_s3 + $0x9a8] sm:$0xff] %v8860_v45  ;;  %v8866_v20 = vld [vmem:[#allocation2 + $0x9c0] sm:$0xff] }
 0x7e6   :  { %8863 = vst [vmem:[%s16787_s3 + $0x9b0] sm:$0xff] %v8862_v43  ;;  %8865 = vst [vmem:[%s16787_s3 + $0x9b8] sm:$0xff] %v8864_v63  ;;  %v8868_v25 = vld [vmem:[#allocation2 + $0x9c8] sm:$0xff]  ;;  %v8870_v58 = vld [vmem:[#allocation2 + $0x9d0] sm:$0xff] }
 0x7e7   :  { %8867 = vst [vmem:[%s16787_s3 + $0x9c0] sm:$0xff] %v8866_v20  ;;  %8869 = vst [vmem:[%s16787_s3 + $0x9c8] sm:$0xff] %v8868_v25  ;;  %v8872_v39 = vld [vmem:[#allocation2 + $0x9d8] sm:$0xff]  ;;  %v8874_v26 = vld [vmem:[#allocation2 + $0x9e0] sm:$0xff] }
 0x7e8   :  { %8871 = vst [vmem:[%s16787_s3 + $0x9d0] sm:$0xff] %v8870_v58  ;;  %v8876_v11 = vld [vmem:[#allocation2 + $0x9e8] sm:$0xff]  ;;  %8873 = vst [vmem:[%s16787_s3 + $0x9d8] sm:$0xff] %v8872_v39  ;;  %v8878_v6 = vld [vmem:[#allocation2 + $0x9f0] sm:$0xff] }
 0x7e9   :  { %8875 = vst [vmem:[%s16787_s3 + $0x9e0] sm:$0xff] %v8874_v26  ;;  %8877 = vst [vmem:[%s16787_s3 + $0x9e8] sm:$0xff] %v8876_v11  ;;  %v8880_v60 = vld [vmem:[#allocation2 + $0x9f8] sm:$0xff]  ;;  %v8882_v54 = vld [vmem:[#allocation2 + $0xa00] sm:$0xff] }
 0x7ea   :  { %8879 = vst [vmem:[%s16787_s3 + $0x9f0] sm:$0xff] %v8878_v6  ;;  %8881 = vst [vmem:[%s16787_s3 + $0x9f8] sm:$0xff] %v8880_v60  ;;  %v8884_v19 = vld [vmem:[#allocation2 + $0xa08] sm:$0xff]  ;;  %v8886_v30 = vld [vmem:[#allocation2 + $0xa10] sm:$0xff] }
 0x7eb   :  { %8883 = vst [vmem:[%s16787_s3 + $0xa00] sm:$0xff] %v8882_v54  ;;  %v8888_v41 = vld [vmem:[#allocation2 + $0xa18] sm:$0xff]  ;;  %8885 = vst [vmem:[%s16787_s3 + $0xa08] sm:$0xff] %v8884_v19  ;;  %v8890_v21 = vld [vmem:[#allocation2 + $0xa20] sm:$0xff] }
 0x7ec   :  { %8887 = vst [vmem:[%s16787_s3 + $0xa10] sm:$0xff] %v8886_v30  ;;  %8889 = vst [vmem:[%s16787_s3 + $0xa18] sm:$0xff] %v8888_v41  ;;  %v8892_v44 = vld [vmem:[#allocation2 + $0xa28] sm:$0xff]  ;;  %v8894_v0 = vld [vmem:[#allocation2 + $0xa30] sm:$0xff] }
 0x7ed   :  { %8891 = vst [vmem:[%s16787_s3 + $0xa20] sm:$0xff] %v8890_v21  ;;  %8893 = vst [vmem:[%s16787_s3 + $0xa28] sm:$0xff] %v8892_v44  ;;  %v8896_v1 = vld [vmem:[#allocation2 + $0xa38] sm:$0xff]  ;;  %v8898_v3 = vld [vmem:[#allocation2 + $0xa40] sm:$0xff] }
 0x7ee   :  { %8895 = vst [vmem:[%s16787_s3 + $0xa30] sm:$0xff] %v8894_v0  ;;  %v8900_v8 = vld [vmem:[#allocation2 + $0xa48] sm:$0xff]  ;;  %8897 = vst [vmem:[%s16787_s3 + $0xa38] sm:$0xff] %v8896_v1  ;;  %v8902_v49 = vld [vmem:[#allocation2 + $0xa50] sm:$0xff] }
 0x7ef   :  { %8899 = vst [vmem:[%s16787_s3 + $0xa40] sm:$0xff] %v8898_v3  ;;  %8901 = vst [vmem:[%s16787_s3 + $0xa48] sm:$0xff] %v8900_v8  ;;  %v8904_v40 = vld [vmem:[#allocation2 + $0xa58] sm:$0xff]  ;;  %v8906_v46 = vld [vmem:[#allocation2 + $0xa60] sm:$0xff] }
 0x7f0   :  { %8903 = vst [vmem:[%s16787_s3 + $0xa50] sm:$0xff] %v8902_v49  ;;  %8905 = vst [vmem:[%s16787_s3 + $0xa58] sm:$0xff] %v8904_v40  ;;  %v8908_v51 = vld [vmem:[#allocation2 + $0xa68] sm:$0xff]  ;;  %v8910_v53 = vld [vmem:[#allocation2 + $0xa70] sm:$0xff] }
 0x7f1   :  { %8907 = vst [vmem:[%s16787_s3 + $0xa60] sm:$0xff] %v8906_v46  ;;  %v8912_v2 = vld [vmem:[#allocation2 + $0xa78] sm:$0xff]  ;;  %8909 = vst [vmem:[%s16787_s3 + $0xa68] sm:$0xff] %v8908_v51  ;;  %v8914_v48 = vld [vmem:[#allocation2 + $0xa80] sm:$0xff] }
 0x7f2   :  { %8911 = vst [vmem:[%s16787_s3 + $0xa70] sm:$0xff] %v8910_v53  ;;  %8913 = vst [vmem:[%s16787_s3 + $0xa78] sm:$0xff] %v8912_v2  ;;  %v8916_v55 = vld [vmem:[#allocation2 + $0xa88] sm:$0xff]  ;;  %v8918_v57 = vld [vmem:[#allocation2 + $0xa90] sm:$0xff] }
 0x7f3   :  { %8915 = vst [vmem:[%s16787_s3 + $0xa80] sm:$0xff] %v8914_v48  ;;  %8917 = vst [vmem:[%s16787_s3 + $0xa88] sm:$0xff] %v8916_v55  ;;  %v8920_v50 = vld [vmem:[#allocation2 + $0xa98] sm:$0xff]  ;;  %v8922_v33 = vld [vmem:[#allocation2 + $0xaa0] sm:$0xff] }
 0x7f4   :  { %8919 = vst [vmem:[%s16787_s3 + $0xa90] sm:$0xff] %v8918_v57  ;;  %v8924_v52 = vld [vmem:[#allocation2 + $0xaa8] sm:$0xff]  ;;  %8921 = vst [vmem:[%s16787_s3 + $0xa98] sm:$0xff] %v8920_v50  ;;  %v8926_v5 = vld [vmem:[#allocation2 + $0xab0] sm:$0xff] }
 0x7f5   :  { %8923 = vst [vmem:[%s16787_s3 + $0xaa0] sm:$0xff] %v8922_v33  ;;  %8925 = vst [vmem:[%s16787_s3 + $0xaa8] sm:$0xff] %v8924_v52  ;;  %v8928_v59 = vld [vmem:[#allocation2 + $0xab8] sm:$0xff]  ;;  %v8930_v22 = vld [vmem:[#allocation2 + $0xac0] sm:$0xff] }
 0x7f6   :  { %8927 = vst [vmem:[%s16787_s3 + $0xab0] sm:$0xff] %v8926_v5  ;;  %8929 = vst [vmem:[%s16787_s3 + $0xab8] sm:$0xff] %v8928_v59  ;;  %v8932_v10 = vld [vmem:[#allocation2 + $0xac8] sm:$0xff]  ;;  %v8934_v62 = vld [vmem:[#allocation2 + $0xad0] sm:$0xff] }
 0x7f7   :  { %8931 = vst [vmem:[%s16787_s3 + $0xac0] sm:$0xff] %v8930_v22  ;;  %v8936_v18 = vld [vmem:[#allocation2 + $0xad8] sm:$0xff]  ;;  %8933 = vst [vmem:[%s16787_s3 + $0xac8] sm:$0xff] %v8932_v10  ;;  %v8938_v14 = vld [vmem:[#allocation2 + $0xae0] sm:$0xff] }
 0x7f8   :  { %8935 = vst [vmem:[%s16787_s3 + $0xad0] sm:$0xff] %v8934_v62  ;;  %8937 = vst [vmem:[%s16787_s3 + $0xad8] sm:$0xff] %v8936_v18  ;;  %v8940_v27 = vld [vmem:[#allocation2 + $0xae8] sm:$0xff]  ;;  %v8942_v9 = vld [vmem:[#allocation2 + $0xaf0] sm:$0xff] }
 0x7f9   :  { %8939 = vst [vmem:[%s16787_s3 + $0xae0] sm:$0xff] %v8938_v14  ;;  %8941 = vst [vmem:[%s16787_s3 + $0xae8] sm:$0xff] %v8940_v27  ;;  %v8944_v17 = vld [vmem:[#allocation2 + $0xaf8] sm:$0xff]  ;;  %v8946_v61 = vld [vmem:[#allocation2 + $0xb00] sm:$0xff] }
 0x7fa   :  { %8943 = vst [vmem:[%s16787_s3 + $0xaf0] sm:$0xff] %v8942_v9  ;;  %v8948_v38 = vld [vmem:[#allocation2 + $0xb08] sm:$0xff]  ;;  %8945 = vst [vmem:[%s16787_s3 + $0xaf8] sm:$0xff] %v8944_v17  ;;  %v8950_v16 = vld [vmem:[#allocation2 + $0xb10] sm:$0xff] }
 0x7fb   :  { %8947 = vst [vmem:[%s16787_s3 + $0xb00] sm:$0xff] %v8946_v61  ;;  %8949 = vst [vmem:[%s16787_s3 + $0xb08] sm:$0xff] %v8948_v38  ;;  %v8952_v7 = vld [vmem:[#allocation2 + $0xb18] sm:$0xff]  ;;  %v8954_v23 = vld [vmem:[#allocation2 + $0xb20] sm:$0xff] }
 0x7fc   :  { %8951 = vst [vmem:[%s16787_s3 + $0xb10] sm:$0xff] %v8950_v16  ;;  %8953 = vst [vmem:[%s16787_s3 + $0xb18] sm:$0xff] %v8952_v7  ;;  %v8956_v56 = vld [vmem:[#allocation2 + $0xb28] sm:$0xff]  ;;  %v8958_v47 = vld [vmem:[#allocation2 + $0xb30] sm:$0xff] }
 0x7fd   :  { %8955 = vst [vmem:[%s16787_s3 + $0xb20] sm:$0xff] %v8954_v23  ;;  %v8960_v34 = vld [vmem:[#allocation2 + $0xb38] sm:$0xff]  ;;  %8957 = vst [vmem:[%s16787_s3 + $0xb28] sm:$0xff] %v8956_v56  ;;  %v8962_v31 = vld [vmem:[#allocation2 + $0xb40] sm:$0xff] }
 0x7fe   :  { %8959 = vst [vmem:[%s16787_s3 + $0xb30] sm:$0xff] %v8958_v47  ;;  %8961 = vst [vmem:[%s16787_s3 + $0xb38] sm:$0xff] %v8960_v34  ;;  %v8964_v36 = vld [vmem:[#allocation2 + $0xb48] sm:$0xff]  ;;  %v8966_v4 = vld [vmem:[#allocation2 + $0xb50] sm:$0xff] }
 0x7ff   :  { %8963 = vst [vmem:[%s16787_s3 + $0xb40] sm:$0xff] %v8962_v31  ;;  %8965 = vst [vmem:[%s16787_s3 + $0xb48] sm:$0xff] %v8964_v36  ;;  %v8968_v24 = vld [vmem:[#allocation2 + $0xb58] sm:$0xff]  ;;  %v8970_v12 = vld [vmem:[#allocation2 + $0xb60] sm:$0xff] }
 0x800   :  { %8967 = vst [vmem:[%s16787_s3 + $0xb50] sm:$0xff] %v8966_v4  ;;  %v8972_v42 = vld [vmem:[#allocation2 + $0xb68] sm:$0xff]  ;;  %8969 = vst [vmem:[%s16787_s3 + $0xb58] sm:$0xff] %v8968_v24  ;;  %v8974_v15 = vld [vmem:[#allocation2 + $0xb70] sm:$0xff] }
 0x801   :  { %8971 = vst [vmem:[%s16787_s3 + $0xb60] sm:$0xff] %v8970_v12  ;;  %8973 = vst [vmem:[%s16787_s3 + $0xb68] sm:$0xff] %v8972_v42  ;;  %v8976_v35 = vld [vmem:[#allocation2 + $0xb78] sm:$0xff]  ;;  %v8978_v32 = vld [vmem:[#allocation2 + $0xb80] sm:$0xff] }
 0x802   :  { %8975 = vst [vmem:[%s16787_s3 + $0xb70] sm:$0xff] %v8974_v15  ;;  %8977 = vst [vmem:[%s16787_s3 + $0xb78] sm:$0xff] %v8976_v35  ;;  %v8980_v28 = vld [vmem:[#allocation2 + $0xb88] sm:$0xff]  ;;  %v8982_v13 = vld [vmem:[#allocation2 + $0xb90] sm:$0xff] }
 0x803   :  { %8979 = vst [vmem:[%s16787_s3 + $0xb80] sm:$0xff] %v8978_v32  ;;  %v8984_v29 = vld [vmem:[#allocation2 + $0xb98] sm:$0xff]  ;;  %8981 = vst [vmem:[%s16787_s3 + $0xb88] sm:$0xff] %v8980_v28  ;;  %v8986_v37 = vld [vmem:[#allocation2 + $0xba0] sm:$0xff] }
 0x804   :  { %8983 = vst [vmem:[%s16787_s3 + $0xb90] sm:$0xff] %v8982_v13  ;;  %8985 = vst [vmem:[%s16787_s3 + $0xb98] sm:$0xff] %v8984_v29  ;;  %v8988_v45 = vld [vmem:[#allocation2 + $0xba8] sm:$0xff]  ;;  %v8990_v43 = vld [vmem:[#allocation2 + $0xbb0] sm:$0xff] }
 0x805   :  { %8987 = vst [vmem:[%s16787_s3 + $0xba0] sm:$0xff] %v8986_v37  ;;  %8989 = vst [vmem:[%s16787_s3 + $0xba8] sm:$0xff] %v8988_v45 }
 0x806   :  { %8991 = vst [vmem:[%s16787_s3 + $0xbb0] sm:$0xff] %v8990_v43 }

</bundles_post_ra>
